<compile_context>
chip_gen: v6e
topology: v6e:2x2x1
jax: 0.10.0
libtpu: 0.0.40
codegen_flags: <defaults>
</compile_context>

<pallas_src>
import math
from functools import partial

import jax
import jax.numpy as jnp
from jax.experimental import pallas as pl
from jax.experimental.pallas import tpu as pltpu

HIDDEN = 32          # conv channels
CHANNELS = 3         # input image channels (fixed by the module)
CIN_PAD = 8          # input channels zero-padded to a sublane-friendly multiple
KSIZE = 5            # conv kernel (stride 1, pad 2)
LRN_SIZE = 4
LRN_ALPHA = 0.001 / 9.0
LRN_K = 1.0          # beta = 0.75 implemented as rsqrt(base) * sqrt(rsqrt(base))
LEAKY_SLOPE = 0.01   # nn.LeakyReLU default
FC1_OUT = 384
FC2_OUT = 64


def _pool_out(n):
    # nn.MaxPool2d(kernel_size=3, stride=2, padding=1)
    return (n + 2 - 3) // 2 + 1


def _round_up(x, m):
    return (x + m - 1) // m * m


# ------------------- fused conv stack kernel (one image per grid step) -------------------

def _conv_stack_kernel(x_ref, w1_ref, b1_ref, w2_ref, b2_ref, band_ref,
                       out_ref,
                       col1, vp1, hp1, p1pad, col2, vp2, hp2,
                       *, H, W):
    """conv1+ReLU+pool+LRN+conv2+ReLU+LRN+pool for one image, entirely in VMEM.

    x_ref    : (1, H+4, W+4, CIN_PAD)        zero-padded NHWC image tile
    w1_ref   : (25*CIN_PAD, HIDDEN)          K-packed conv1 weights, K order (dh, dw, c)
    w2_ref   : (25*HIDDEN, HIDDEN)           K-packed conv2 weights
    b*_ref   : (1, HIDDEN)
    band_ref : (HIDDEN, HIDDEN)              LRN window matrix with alpha/size folded in
    out_ref  : (1, H2, W2, HIDDEN)           pooled features, one block store per image
    """
    H1, W1 = _pool_out(H), _pool_out(W)
    H2, W2 = _pool_out(H1), _pool_out(W1)

    b1 = b1_ref[...]
    b2 = b2_ref[...]
    band = band_ref[...]

    def lrn(v):
        # v >= 0, shape (M, HIDDEN); base = k + (alpha/size)*window_sum(v^2)
        base = LRN_K + jnp.dot(v * v, band, preferred_element_type=jnp.float32)
        inv = jax.lax.rsqrt(base)                    # base**-0.5   (EUP)
        return v * (inv * jnp.sqrt(inv))             # v * base**-0.75

    def maxpool(m, rows, cols, vp, hp):
        # 3x3 / stride 2 / pad 1 max pool of a non-negative (rows*cols, HIDDEN) map.
        # Inputs are >= 0, so zero padding is equivalent to MaxPool2d's -inf padding.
        r1, c1 = rows // 2, cols // 2
        # vertical 3-max via even/odd row pairs (pair 0 is the zero "row -1" pad)
        vp[0, 1, :, :] = jnp.zeros((cols, HIDDEN), jnp.float32)
        vp[1:r1 + 1, :, :, :] = m.reshape(r1, 2, cols, HIDDEN)
        vm = jnp.maximum(jnp.maximum(vp[1:r1 + 1, 0, :, :],      # row 2i
                                     vp[1:r1 + 1, 1, :, :]),     # row 2i+1
                         vp[0:r1, 1, :, :])                      # row 2i-1 (zero for i=0)
        # horizontal 3-max + stride-2 subsample over the whole map
        hp[:, 0:1, :] = jnp.zeros((r1, 1, HIDDEN), jnp.float32)  # "col -1" zero pad
        hp[:, 1:cols + 1, :] = vm
        t0 = hp[:, pl.ds(0, c1, stride=2), :]
        t1 = hp[:, pl.ds(1, c1, stride=2), :]
        t2 = hp[:, pl.ds(2, c1, stride=2), :]
        return jnp.maximum(jnp.maximum(t0, t1), t2)              # (r1, c1, HIDDEN)

    # ---------------- conv1: im2col slab + single K=200 matmul + ReLU ----------------
    for dh in range(KSIZE):
        for dw in range(KSIZE):
            t = dh * KSIZE + dw
            col1[:, :, t * CIN_PAD:(t + 1) * CIN_PAD] = x_ref[0, dh:dh + H, dw:dw + W, :]
    a1 = col1[...].reshape(H * W, KSIZE * KSIZE * CIN_PAD)
    c1 = jnp.maximum(
        jnp.dot(a1, w1_ref[...], preferred_element_type=jnp.float32) + b1, 0.0)

    # ---------------- maxpool1 + LRN -> zero-padded conv2 input ----------------
    p1 = maxpool(c1, H, W, vp1, hp1)                             # (H1, W1, HIDDEN)
    p1 = lrn(p1.reshape(H1 * W1, HIDDEN)).reshape(H1, W1, HIDDEN)
    # re-zero only the 2-wide border each step (cheap; safe under megacore grid splits)
    p1pad[0:2, :, :] = jnp.zeros((2, W1 + 4, HIDDEN), jnp.float32)
    p1pad[H1 + 2:H1 + 4, :, :] = jnp.zeros((2, W1 + 4, HIDDEN), jnp.float32)
    p1pad[2:H1 + 2, 0:2, :] = jnp.zeros((H1, 2, HIDDEN), jnp.float32)
    p1pad[2:H1 + 2, W1 + 2:W1 + 4, :] = jnp.zeros((H1, 2, HIDDEN), jnp.float32)
    p1pad[2:H1 + 2, 2:W1 + 2, :] = p1

    # ---------------- conv2: im2col slab + single K=800 matmul + ReLU + LRN ----------------
    for dh in range(KSIZE):
        for dw in range(KSIZE):
            t = dh * KSIZE + dw
            col2[:, :, t * HIDDEN:(t + 1) * HIDDEN] = p1pad[dh:dh + H1, dw:dw + W1, :]
    a2 = col2[...].reshape(H1 * W1, KSIZE * KSIZE * HIDDEN)
    c2 = lrn(jnp.maximum(
        jnp.dot(a2, w2_ref[...], preferred_element_type=jnp.float32) + b2, 0.0))

    # ---------------- maxpool2 -> single block store ----------------
    p2 = maxpool(c2, H1, W1, vp2, hp2)                           # (H2, W2, HIDDEN)
    out_ref[0, :, :, :] = p2


def _conv_stack(params, x_padded, H, W):
    B = x_padded.shape[0]
    H1, W1 = _pool_out(H), _pool_out(W)
    H2, W2 = _pool_out(H1), _pool_out(W1)
    kk = KSIZE * KSIZE
    return pl.pallas_call(
        partial(_conv_stack_kernel, H=H, W=W),
        out_shape=jax.ShapeDtypeStruct((B, H2, W2, HIDDEN), jnp.float32),
        grid=(B,),
        in_specs=[
            pl.BlockSpec((1, H + 4, W + 4, CIN_PAD), lambda b: (b, 0, 0, 0)),
            pl.BlockSpec((kk * CIN_PAD, HIDDEN), lambda b: (0, 0)),
            pl.BlockSpec((1, HIDDEN), lambda b: (0, 0)),
            pl.BlockSpec((kk * HIDDEN, HIDDEN), lambda b: (0, 0)),
            pl.BlockSpec((1, HIDDEN), lambda b: (0, 0)),
            pl.BlockSpec((HIDDEN, HIDDEN), lambda b: (0, 0)),
        ],
        out_specs=pl.BlockSpec((1, H2, W2, HIDDEN), lambda b: (b, 0, 0, 0)),
        scratch_shapes=[
            pltpu.VMEM((H, W, kk * CIN_PAD), jnp.float32),        # col1 (im2col slab 1)
            pltpu.VMEM((H1 + 1, 2, W, HIDDEN), jnp.float32),      # vp1  (row-pair pool buf)
            pltpu.VMEM((H1, W + 1, HIDDEN), jnp.float32),         # hp1  (col-padded pool buf)
            pltpu.VMEM((H1 + 4, W1 + 4, HIDDEN), jnp.float32),    # p1pad (conv2 input, pad 2)
            pltpu.VMEM((H1, W1, kk * HIDDEN), jnp.float32),       # col2 (im2col slab 2)
            pltpu.VMEM((H2 + 1, 2, W1, HIDDEN), jnp.float32),     # vp2
            pltpu.VMEM((H2, W1 + 1, HIDDEN), jnp.float32),        # hp2
        ],
        compiler_params=pltpu.CompilerParams(
            dimension_semantics=("parallel",),        # batch grid -> both TCs on v7x (B>=2)
            # sized for <=84x84 images; raise toward 128 MiB on v5e/v6e for larger inputs
            vmem_limit_bytes=48 * 1024 * 1024),
    )(x_padded, params["w1"], params["b1"], params["w2"], params["b2"],
      params["band"])


# ------------------- fused fc1 + LeakyReLU + fc2 + LeakyReLU (single step) -------------------

def _fc_kernel(flat_ref, w1_ref, b1_ref, w2_ref, b2_ref, out_ref):
    h = jnp.dot(flat_ref[...], w1_ref[...], preferred_element_type=jnp.float32) + b1_ref[...]
    h = jnp.maximum(h, LEAKY_SLOPE * h)               # LeakyReLU
    o = jnp.dot(h, w2_ref[...], preferred_element_type=jnp.float32) + b2_ref[...]
    out_ref[...] = jnp.maximum(o, LEAKY_SLOPE * o)


def _fc_stack(params, flat):
    Bp, F = flat.shape
    return pl.pallas_call(
        _fc_kernel,
        out_shape=jax.ShapeDtypeStruct((Bp, FC2_OUT), jnp.float32),
        grid=(1,),
        in_specs=[
            pl.BlockSpec((Bp, F), lambda i: (0, 0)),
            pl.BlockSpec((F, FC1_OUT), lambda i: (0, 0)),
            pl.BlockSpec((1, FC1_OUT), lambda i: (0, 0)),
            pl.BlockSpec((FC1_OUT, FC2_OUT), lambda i: (0, 0)),
            pl.BlockSpec((1, FC2_OUT), lambda i: (0, 0)),
        ],
        out_specs=pl.BlockSpec((Bp, FC2_OUT), lambda i: (0, 0)),
        compiler_params=pltpu.CompilerParams(
            dimension_semantics=("arbitrary",),
            vmem_limit_bytes=48 * 1024 * 1024),
    )(flat, params["fc1_w"], params["fc1_b"], params["fc2_w"], params["fc2_b"])


# ------------------------------ params & forward ------------------------------

def lrn_band_matrix(C):
    # band[j, c] != 0 iff input channel j is inside output channel c's LRN window
    # [c - size//2, c + (size-1)//2] (PyTorch rule); alpha/size folded in.
    j = jnp.arange(C)[:, None]
    c = jnp.arange(C)[None, :]
    mask = (j >= c - LRN_SIZE // 2) & (j <= c + (LRN_SIZE - 1) // 2)
    return mask.astype(jnp.float32) * (LRN_ALPHA / LRN_SIZE)


def init_params(key, image_height, image_width):
    """Deterministic synthetic parameters matching the PyTorch module's shapes/init."""
    ks = jax.random.split(key, 6)

    def tnorm(k, shape, std):
        # approximation of the module's 4-sample truncated-normal init (init-only)
        return jax.random.truncated_normal(k, -2.0, 2.0, shape, jnp.float32) * std

    # conv1: torch (out, in, kh, kw) -> K-packed (kh*kw*cin_pad, out), K order (dh, dw, c)
    w1 = jnp.transpose(tnorm(ks[0], (HIDDEN, CHANNELS, KSIZE, KSIZE), 0.04), (2, 3, 1, 0))
    w1 = jnp.pad(w1, ((0, 0), (0, 0), (0, CIN_PAD - CHANNELS), (0, 0)))
    w1 = w1.reshape(KSIZE * KSIZE * CIN_PAD, HIDDEN)
    b1_bound = 1.0 / math.sqrt(CHANNELS * KSIZE * KSIZE)     # torch conv bias default
    b1 = jax.random.uniform(ks[1], (1, HIDDEN), jnp.float32, -b1_bound, b1_bound)

    w2 = jnp.transpose(tnorm(ks[2], (HIDDEN, HIDDEN, KSIZE, KSIZE), 0.04), (2, 3, 1, 0))
    w2 = w2.reshape(KSIZE * KSIZE * HIDDEN, HIDDEN)
    b2_bound = 1.0 / math.sqrt(HIDDEN * KSIZE * KSIZE)
    b2 = jax.random.uniform(ks[3], (1, HIDDEN), jnp.float32, -b2_bound, b2_bound)

    H1, W1 = _pool_out(image_height), _pool_out(image_width)
    H2, W2 = _pool_out(H1), _pool_out(W1)

    # fc1: torch Linear weight (384, HIDDEN*H2*W2) over an NCHW flatten; permute its
    # input axis once so the kernel consumes the NHWC-flat conv output directly.
    fc1_t = tnorm(ks[4], (FC1_OUT, HIDDEN, H2, W2), 0.04)
    fc1_w = jnp.transpose(fc1_t, (2, 3, 1, 0)).reshape(H2 * W2 * HIDDEN, FC1_OUT)
    fc1_b = jnp.full((1, FC1_OUT), 0.1, jnp.float32)

    fc2_w = jnp.transpose(tnorm(ks[5], (FC2_OUT, FC1_OUT), 0.04), (1, 0))
    fc2_b = jnp.full((1, FC2_OUT), 0.1, jnp.float32)

    return dict(w1=w1, b1=b1, w2=w2, b2=b2,
                fc1_w=fc1_w, fc1_b=fc1_b, fc2_w=fc2_w, fc2_b=fc2_b,
                band=lrn_band_matrix(HIDDEN))


def image_embedding_forward(params, x_nchw):
    """Input: NCHW images (B, 3, H, W); output: (B, 64) embeddings."""
    x = jnp.transpose(x_nchw, (0, 2, 3, 1)).astype(jnp.float32)   # NHWC
    B, H, W, Cin = x.shape
    # both pool stages use the even/odd row-pair trick -> need H, W divisible by 4
    assert H % 4 == 0 and W % 4 == 0, "supported image sizes: multiples of 4 (e.g. 16, 84)"
    H1, W1 = _pool_out(H), _pool_out(W)
    H2, W2 = _pool_out(H1), _pool_out(W1)

    # conv1 zero padding (2 px each side) + channel padding to CIN_PAD, once in JAX.
    xp = jnp.pad(x, ((0, 0), (2, 2), (2, 2), (0, CIN_PAD - Cin)))

    conv_out = _conv_stack(params, xp, H, W)                  # (B, H2, W2, 32)

    # NHWC-major flatten; fc1_w was permuted at init to absorb PyTorch's NCHW order.
    flat = conv_out.reshape(B, H2 * W2 * HIDDEN)
    Bp = _round_up(max(B, 8), 8)
    flat = jnp.pad(flat, ((0, Bp - B), (0, 0)))

    return _fc_stack(params, flat)[:B]


if __name__ == "__main__":
    key = jax.random.PRNGKey(0)
    kx, kp = jax.random.split(key)

    B, H, W = 2, 16, 16                       # module fixes channels = 3
    x = jax.random.uniform(kx, (B, CHANNELS, H, W), jnp.float32)  # NCHW like PyTorch
    params = init_params(kp, H, W)

    fwd = jax.jit(image_embedding_forward)
    out = jax.block_until_ready(fwd(params, x))

    assert out.shape == (B, FC2_OUT), out.shape
    assert bool(jnp.all(jnp.isfinite(out)))
    print("KERNEL_OK")
</pallas_src>

<mosaic_0001>
module attributes {stable_mosaic.version = 11 : i64} {
  func.func @_conv_stack_kernel(%arg0: i32, %arg1: memref<1x20x20x8xf32, #tpu.memory_space<vmem>>, %arg2: memref<200x32xf32, #tpu.memory_space<vmem>>, %arg3: memref<1x32xf32, #tpu.memory_space<vmem>>, %arg4: memref<800x32xf32, #tpu.memory_space<vmem>>, %arg5: memref<1x32xf32, #tpu.memory_space<vmem>>, %arg6: memref<32x32xf32, #tpu.memory_space<vmem>>, %arg7: memref<1x4x4x32xf32, #tpu.memory_space<vmem>>, %arg8: memref<16x16x200xf32, #tpu.memory_space<vmem>>, %arg9: memref<9x2x16x32xf32, #tpu.memory_space<vmem>>, %arg10: memref<8x17x32xf32, #tpu.memory_space<vmem>>, %arg11: memref<12x12x32xf32, #tpu.memory_space<vmem>>, %arg12: memref<8x8x800xf32, #tpu.memory_space<vmem>>, %arg13: memref<5x2x8x32xf32, #tpu.memory_space<vmem>>, %arg14: memref<4x9x32xf32, #tpu.memory_space<vmem>>) attributes {dimension_semantics = [#tpu.dimension_semantics<parallel>], iteration_bounds = array<i64: 2>, scalar_prefetch = 0 : i64, scratch_operands = 7 : i64, tpu.core_type = #tpu.core_type<tc>, window_params = [{transform_indices = @transform_0, window_bounds = array<i64: 1, 20, 20, 8>}, {pipeline_mode = #tpu.pipeline_mode<synchronous>, transform_indices = @transform_1, window_bounds = array<i64: 200, 32>}, {pipeline_mode = #tpu.pipeline_mode<synchronous>, transform_indices = @transform_2, window_bounds = array<i64: 1, 32>}, {pipeline_mode = #tpu.pipeline_mode<synchronous>, transform_indices = @transform_3, window_bounds = array<i64: 800, 32>}, {pipeline_mode = #tpu.pipeline_mode<synchronous>, transform_indices = @transform_4, window_bounds = array<i64: 1, 32>}, {pipeline_mode = #tpu.pipeline_mode<synchronous>, transform_indices = @transform_5, window_bounds = array<i64: 32, 32>}, {transform_indices = @transform_6, window_bounds = array<i64: 1, 4, 4, 32>}]} {
    %c0 = arith.constant 0 : index
    %c0_0 = arith.constant 0 : index
    %0 = vector.load %arg3[%c0, %c0_0] : memref<1x32xf32, #tpu.memory_space<vmem>>, vector<1x32xf32>
    %c0_1 = arith.constant 0 : index
    %c0_2 = arith.constant 0 : index
    %1 = vector.load %arg5[%c0_1, %c0_2] : memref<1x32xf32, #tpu.memory_space<vmem>>, vector<1x32xf32>
    %c0_3 = arith.constant 0 : index
    %c0_4 = arith.constant 0 : index
    %2 = vector.load %arg6[%c0_3, %c0_4] : memref<32x32xf32, #tpu.memory_space<vmem>>, vector<32x32xf32>
    %c0_5 = arith.constant 0 : index
    %c0_6 = arith.constant 0 : index
    %c0_7 = arith.constant 0 : index
    %c0_8 = arith.constant 0 : index
    %3 = vector.load %arg1[%c0_5, %c0_6, %c0_7, %c0_8] : memref<1x20x20x8xf32, #tpu.memory_space<vmem>>, vector<1x16x16x8xf32>
    %4 = vector.shape_cast %3 : vector<1x16x16x8xf32> to vector<16x16x8xf32>
    %c0_9 = arith.constant 0 : index
    %c0_10 = arith.constant 0 : index
    %c0_11 = arith.constant 0 : index
    %5 = vector.load %arg8[%c0_9, %c0_10, %c0_11] : memref<16x16x200xf32, #tpu.memory_space<vmem>>, vector<16x16x8xf32>
    tpu.vector_store %arg8[%c0_9, %c0_10, %c0_11], %4 {strides = array<i32>} : memref<16x16x200xf32, #tpu.memory_space<vmem>>, vector<16x16x8xf32>,
    %c0_12 = arith.constant 0 : index
    %c0_13 = arith.constant 0 : index
    %c1 = arith.constant 1 : index
    %c0_14 = arith.constant 0 : index
    %6 = vector.load %arg1[%c0_12, %c0_13, %c1, %c0_14] : memref<1x20x20x8xf32, #tpu.memory_space<vmem>>, vector<1x16x16x8xf32>
    %7 = vector.shape_cast %6 : vector<1x16x16x8xf32> to vector<16x16x8xf32>
    %c0_15 = arith.constant 0 : index
    %c0_16 = arith.constant 0 : index
    %c8 = arith.constant 8 : index
    %8 = vector.load %arg8[%c0_15, %c0_16, %c8] : memref<16x16x200xf32, #tpu.memory_space<vmem>>, vector<16x16x8xf32>
    tpu.vector_store %arg8[%c0_15, %c0_16, %c8], %7 {strides = array<i32>} : memref<16x16x200xf32, #tpu.memory_space<vmem>>, vector<16x16x8xf32>,
    %c0_17 = arith.constant 0 : index
    %c0_18 = arith.constant 0 : index
    %c2 = arith.constant 2 : index
    %c0_19 = arith.constant 0 : index
    %9 = vector.load %arg1[%c0_17, %c0_18, %c2, %c0_19] : memref<1x20x20x8xf32, #tpu.memory_space<vmem>>, vector<1x16x16x8xf32>
    %10 = vector.shape_cast %9 : vector<1x16x16x8xf32> to vector<16x16x8xf32>
    %c0_20 = arith.constant 0 : index
    %c0_21 = arith.constant 0 : index
    %c16 = arith.constant 16 : index
    %11 = vector.load %arg8[%c0_20, %c0_21, %c16] : memref<16x16x200xf32, #tpu.memory_space<vmem>>, vector<16x16x8xf32>
    tpu.vector_store %arg8[%c0_20, %c0_21, %c16], %10 {strides = array<i32>} : memref<16x16x200xf32, #tpu.memory_space<vmem>>, vector<16x16x8xf32>,
    %c0_22 = arith.constant 0 : index
    %c0_23 = arith.constant 0 : index
    %c3 = arith.constant 3 : index
    %c0_24 = arith.constant 0 : index
    %12 = vector.load %arg1[%c0_22, %c0_23, %c3, %c0_24] : memref<1x20x20x8xf32, #tpu.memory_space<vmem>>, vector<1x16x16x8xf32>
    %13 = vector.shape_cast %12 : vector<1x16x16x8xf32> to vector<16x16x8xf32>
    %c0_25 = arith.constant 0 : index
    %c0_26 = arith.constant 0 : index
    %c24 = arith.constant 24 : index
    %14 = vector.load %arg8[%c0_25, %c0_26, %c24] : memref<16x16x200xf32, #tpu.memory_space<vmem>>, vector<16x16x8xf32>
    tpu.vector_store %arg8[%c0_25, %c0_26, %c24], %13 {strides = array<i32>} : memref<16x16x200xf32, #tpu.memory_space<vmem>>, vector<16x16x8xf32>,
    %c0_27 = arith.constant 0 : index
    %c0_28 = arith.constant 0 : index
    %c4 = arith.constant 4 : index
    %c0_29 = arith.constant 0 : index
    %15 = vector.load %arg1[%c0_27, %c0_28, %c4, %c0_29] : memref<1x20x20x8xf32, #tpu.memory_space<vmem>>, vector<1x16x16x8xf32>
    %16 = vector.shape_cast %15 : vector<1x16x16x8xf32> to vector<16x16x8xf32>
    %c0_30 = arith.constant 0 : index
    %c0_31 = arith.constant 0 : index
    %c32 = arith.constant 32 : index
    %17 = vector.load %arg8[%c0_30, %c0_31, %c32] : memref<16x16x200xf32, #tpu.memory_space<vmem>>, vector<16x16x8xf32>
    tpu.vector_store %arg8[%c0_30, %c0_31, %c32], %16 {strides = array<i32>} : memref<16x16x200xf32, #tpu.memory_space<vmem>>, vector<16x16x8xf32>,
    %c0_32 = arith.constant 0 : index
    %c1_33 = arith.constant 1 : index
    %c0_34 = arith.constant 0 : index
    %c0_35 = arith.constant 0 : index
    %18 = vector.load %arg1[%c0_32, %c1_33, %c0_34, %c0_35] : memref<1x20x20x8xf32, #tpu.memory_space<vmem>>, vector<1x16x16x8xf32>
    %19 = vector.shape_cast %18 : vector<1x16x16x8xf32> to vector<16x16x8xf32>
    %c0_36 = arith.constant 0 : index
    %c0_37 = arith.constant 0 : index
    %c40 = arith.constant 40 : index
    %20 = vector.load %arg8[%c0_36, %c0_37, %c40] : memref<16x16x200xf32, #tpu.memory_space<vmem>>, vector<16x16x8xf32>
    tpu.vector_store %arg8[%c0_36, %c0_37, %c40], %19 {strides = array<i32>} : memref<16x16x200xf32, #tpu.memory_space<vmem>>, vector<16x16x8xf32>,
    %c0_38 = arith.constant 0 : index
    %c1_39 = arith.constant 1 : index
    %c1_40 = arith.constant 1 : index
    %c0_41 = arith.constant 0 : index
    %21 = vector.load %arg1[%c0_38, %c1_39, %c1_40, %c0_41] : memref<1x20x20x8xf32, #tpu.memory_space<vmem>>, vector<1x16x16x8xf32>
    %22 = vector.shape_cast %21 : vector<1x16x16x8xf32> to vector<16x16x8xf32>
    %c0_42 = arith.constant 0 : index
    %c0_43 = arith.constant 0 : index
    %c48 = arith.constant 48 : index
    %23 = vector.load %arg8[%c0_42, %c0_43, %c48] : memref<16x16x200xf32, #tpu.memory_space<vmem>>, vector<16x16x8xf32>
    tpu.vector_store %arg8[%c0_42, %c0_43, %c48], %22 {strides = array<i32>} : memref<16x16x200xf32, #tpu.memory_space<vmem>>, vector<16x16x8xf32>,
    %c0_44 = arith.constant 0 : index
    %c1_45 = arith.constant 1 : index
    %c2_46 = arith.constant 2 : index
    %c0_47 = arith.constant 0 : index
    %24 = vector.load %arg1[%c0_44, %c1_45, %c2_46, %c0_47] : memref<1x20x20x8xf32, #tpu.memory_space<vmem>>, vector<1x16x16x8xf32>
    %25 = vector.shape_cast %24 : vector<1x16x16x8xf32> to vector<16x16x8xf32>
    %c0_48 = arith.constant 0 : index
    %c0_49 = arith.constant 0 : index
    %c56 = arith.constant 56 : index
    %26 = vector.load %arg8[%c0_48, %c0_49, %c56] : memref<16x16x200xf32, #tpu.memory_space<vmem>>, vector<16x16x8xf32>
    tpu.vector_store %arg8[%c0_48, %c0_49, %c56], %25 {strides = array<i32>} : memref<16x16x200xf32, #tpu.memory_space<vmem>>, vector<16x16x8xf32>,
    %c0_50 = arith.constant 0 : index
    %c1_51 = arith.constant 1 : index
    %c3_52 = arith.constant 3 : index
    %c0_53 = arith.constant 0 : index
    %27 = vector.load %arg1[%c0_50, %c1_51, %c3_52, %c0_53] : memref<1x20x20x8xf32, #tpu.memory_space<vmem>>, vector<1x16x16x8xf32>
    %28 = vector.shape_cast %27 : vector<1x16x16x8xf32> to vector<16x16x8xf32>
    %c0_54 = arith.constant 0 : index
    %c0_55 = arith.constant 0 : index
    %c64 = arith.constant 64 : index
    %29 = vector.load %arg8[%c0_54, %c0_55, %c64] : memref<16x16x200xf32, #tpu.memory_space<vmem>>, vector<16x16x8xf32>
    tpu.vector_store %arg8[%c0_54, %c0_55, %c64], %28 {strides = array<i32>} : memref<16x16x200xf32, #tpu.memory_space<vmem>>, vector<16x16x8xf32>,
    %c0_56 = arith.constant 0 : index
    %c1_57 = arith.constant 1 : index
    %c4_58 = arith.constant 4 : index
    %c0_59 = arith.constant 0 : index
    %30 = vector.load %arg1[%c0_56, %c1_57, %c4_58, %c0_59] : memref<1x20x20x8xf32, #tpu.memory_space<vmem>>, vector<1x16x16x8xf32>
    %31 = vector.shape_cast %30 : vector<1x16x16x8xf32> to vector<16x16x8xf32>
    %c0_60 = arith.constant 0 : index
    %c0_61 = arith.constant 0 : index
    %c72 = arith.constant 72 : index
    %32 = vector.load %arg8[%c0_60, %c0_61, %c72] : memref<16x16x200xf32, #tpu.memory_space<vmem>>, vector<16x16x8xf32>
    tpu.vector_store %arg8[%c0_60, %c0_61, %c72], %31 {strides = array<i32>} : memref<16x16x200xf32, #tpu.memory_space<vmem>>, vector<16x16x8xf32>,
    %c0_62 = arith.constant 0 : index
    %c2_63 = arith.constant 2 : index
    %c0_64 = arith.constant 0 : index
    %c0_65 = arith.constant 0 : index
    %33 = vector.load %arg1[%c0_62, %c2_63, %c0_64, %c0_65] : memref<1x20x20x8xf32, #tpu.memory_space<vmem>>, vector<1x16x16x8xf32>
    %34 = vector.shape_cast %33 : vector<1x16x16x8xf32> to vector<16x16x8xf32>
    %c0_66 = arith.constant 0 : index
    %c0_67 = arith.constant 0 : index
    %c80 = arith.constant 80 : index
    %35 = vector.load %arg8[%c0_66, %c0_67, %c80] : memref<16x16x200xf32, #tpu.memory_space<vmem>>, vector<16x16x8xf32>
    tpu.vector_store %arg8[%c0_66, %c0_67, %c80], %34 {strides = array<i32>} : memref<16x16x200xf32, #tpu.memory_space<vmem>>, vector<16x16x8xf32>,
    %c0_68 = arith.constant 0 : index
    %c2_69 = arith.constant 2 : index
    %c1_70 = arith.constant 1 : index
    %c0_71 = arith.constant 0 : index
    %36 = vector.load %arg1[%c0_68, %c2_69, %c1_70, %c0_71] : memref<1x20x20x8xf32, #tpu.memory_space<vmem>>, vector<1x16x16x8xf32>
    %37 = vector.shape_cast %36 : vector<1x16x16x8xf32> to vector<16x16x8xf32>
    %c0_72 = arith.constant 0 : index
    %c0_73 = arith.constant 0 : index
    %c88 = arith.constant 88 : index
    %38 = vector.load %arg8[%c0_72, %c0_73, %c88] : memref<16x16x200xf32, #tpu.memory_space<vmem>>, vector<16x16x8xf32>
    tpu.vector_store %arg8[%c0_72, %c0_73, %c88], %37 {strides = array<i32>} : memref<16x16x200xf32, #tpu.memory_space<vmem>>, vector<16x16x8xf32>,
    %c0_74 = arith.constant 0 : index
    %c2_75 = arith.constant 2 : index
    %c2_76 = arith.constant 2 : index
    %c0_77 = arith.constant 0 : index
    %39 = vector.load %arg1[%c0_74, %c2_75, %c2_76, %c0_77] : memref<1x20x20x8xf32, #tpu.memory_space<vmem>>, vector<1x16x16x8xf32>
    %40 = vector.shape_cast %39 : vector<1x16x16x8xf32> to vector<16x16x8xf32>
    %c0_78 = arith.constant 0 : index
    %c0_79 = arith.constant 0 : index
    %c96 = arith.constant 96 : index
    %41 = vector.load %arg8[%c0_78, %c0_79, %c96] : memref<16x16x200xf32, #tpu.memory_space<vmem>>, vector<16x16x8xf32>
    tpu.vector_store %arg8[%c0_78, %c0_79, %c96], %40 {strides = array<i32>} : memref<16x16x200xf32, #tpu.memory_space<vmem>>, vector<16x16x8xf32>,
    %c0_80 = arith.constant 0 : index
    %c2_81 = arith.constant 2 : index
    %c3_82 = arith.constant 3 : index
    %c0_83 = arith.constant 0 : index
    %42 = vector.load %arg1[%c0_80, %c2_81, %c3_82, %c0_83] : memref<1x20x20x8xf32, #tpu.memory_space<vmem>>, vector<1x16x16x8xf32>
    %43 = vector.shape_cast %42 : vector<1x16x16x8xf32> to vector<16x16x8xf32>
    %c0_84 = arith.constant 0 : index
    %c0_85 = arith.constant 0 : index
    %c104 = arith.constant 104 : index
    %44 = vector.load %arg8[%c0_84, %c0_85, %c104] : memref<16x16x200xf32, #tpu.memory_space<vmem>>, vector<16x16x8xf32>
    tpu.vector_store %arg8[%c0_84, %c0_85, %c104], %43 {strides = array<i32>} : memref<16x16x200xf32, #tpu.memory_space<vmem>>, vector<16x16x8xf32>,
    %c0_86 = arith.constant 0 : index
    %c2_87 = arith.constant 2 : index
    %c4_88 = arith.constant 4 : index
    %c0_89 = arith.constant 0 : index
    %45 = vector.load %arg1[%c0_86, %c2_87, %c4_88, %c0_89] : memref<1x20x20x8xf32, #tpu.memory_space<vmem>>, vector<1x16x16x8xf32>
    %46 = vector.shape_cast %45 : vector<1x16x16x8xf32> to vector<16x16x8xf32>
    %c0_90 = arith.constant 0 : index
    %c0_91 = arith.constant 0 : index
    %c112 = arith.constant 112 : index
    %47 = vector.load %arg8[%c0_90, %c0_91, %c112] : memref<16x16x200xf32, #tpu.memory_space<vmem>>, vector<16x16x8xf32>
    tpu.vector_store %arg8[%c0_90, %c0_91, %c112], %46 {strides = array<i32>} : memref<16x16x200xf32, #tpu.memory_space<vmem>>, vector<16x16x8xf32>,
    %c0_92 = arith.constant 0 : index
    %c3_93 = arith.constant 3 : index
    %c0_94 = arith.constant 0 : index
    %c0_95 = arith.constant 0 : index
    %48 = vector.load %arg1[%c0_92, %c3_93, %c0_94, %c0_95] : memref<1x20x20x8xf32, #tpu.memory_space<vmem>>, vector<1x16x16x8xf32>
    %49 = vector.shape_cast %48 : vector<1x16x16x8xf32> to vector<16x16x8xf32>
    %c0_96 = arith.constant 0 : index
    %c0_97 = arith.constant 0 : index
    %c120 = arith.constant 120 : index
    %50 = vector.load %arg8[%c0_96, %c0_97, %c120] : memref<16x16x200xf32, #tpu.memory_space<vmem>>, vector<16x16x8xf32>
    tpu.vector_store %arg8[%c0_96, %c0_97, %c120], %49 {strides = array<i32>} : memref<16x16x200xf32, #tpu.memory_space<vmem>>, vector<16x16x8xf32>,
    %c0_98 = arith.constant 0 : index
    %c3_99 = arith.constant 3 : index
    %c1_100 = arith.constant 1 : index
    %c0_101 = arith.constant 0 : index
    %51 = vector.load %arg1[%c0_98, %c3_99, %c1_100, %c0_101] : memref<1x20x20x8xf32, #tpu.memory_space<vmem>>, vector<1x16x16x8xf32>
    %52 = vector.shape_cast %51 : vector<1x16x16x8xf32> to vector<16x16x8xf32>
    %c0_102 = arith.constant 0 : index
    %c0_103 = arith.constant 0 : index
    %c128 = arith.constant 128 : index
    %53 = vector.load %arg8[%c0_102, %c0_103, %c128] : memref<16x16x200xf32, #tpu.memory_space<vmem>>, vector<16x16x8xf32>
    tpu.vector_store %arg8[%c0_102, %c0_103, %c128], %52 {strides = array<i32>} : memref<16x16x200xf32, #tpu.memory_space<vmem>>, vector<16x16x8xf32>,
    %c0_104 = arith.constant 0 : index
    %c3_105 = arith.constant 3 : index
    %c2_106 = arith.constant 2 : index
    %c0_107 = arith.constant 0 : index
    %54 = vector.load %arg1[%c0_104, %c3_105, %c2_106, %c0_107] : memref<1x20x20x8xf32, #tpu.memory_space<vmem>>, vector<1x16x16x8xf32>
    %55 = vector.shape_cast %54 : vector<1x16x16x8xf32> to vector<16x16x8xf32>
    %c0_108 = arith.constant 0 : index
    %c0_109 = arith.constant 0 : index
    %c136 = arith.constant 136 : index
    %56 = vector.load %arg8[%c0_108, %c0_109, %c136] : memref<16x16x200xf32, #tpu.memory_space<vmem>>, vector<16x16x8xf32>
    tpu.vector_store %arg8[%c0_108, %c0_109, %c136], %55 {strides = array<i32>} : memref<16x16x200xf32, #tpu.memory_space<vmem>>, vector<16x16x8xf32>,
    %c0_110 = arith.constant 0 : index
    %c3_111 = arith.constant 3 : index
    %c3_112 = arith.constant 3 : index
    %c0_113 = arith.constant 0 : index
    %57 = vector.load %arg1[%c0_110, %c3_111, %c3_112, %c0_113] : memref<1x20x20x8xf32, #tpu.memory_space<vmem>>, vector<1x16x16x8xf32>
    %58 = vector.shape_cast %57 : vector<1x16x16x8xf32> to vector<16x16x8xf32>
    %c0_114 = arith.constant 0 : index
    %c0_115 = arith.constant 0 : index
    %c144 = arith.constant 144 : index
    %59 = vector.load %arg8[%c0_114, %c0_115, %c144] : memref<16x16x200xf32, #tpu.memory_space<vmem>>, vector<16x16x8xf32>
    tpu.vector_store %arg8[%c0_114, %c0_115, %c144], %58 {strides = array<i32>} : memref<16x16x200xf32, #tpu.memory_space<vmem>>, vector<16x16x8xf32>,
    %c0_116 = arith.constant 0 : index
    %c3_117 = arith.constant 3 : index
    %c4_118 = arith.constant 4 : index
    %c0_119 = arith.constant 0 : index
    %60 = vector.load %arg1[%c0_116, %c3_117, %c4_118, %c0_119] : memref<1x20x20x8xf32, #tpu.memory_space<vmem>>, vector<1x16x16x8xf32>
    %61 = vector.shape_cast %60 : vector<1x16x16x8xf32> to vector<16x16x8xf32>
    %c0_120 = arith.constant 0 : index
    %c0_121 = arith.constant 0 : index
    %c152 = arith.constant 152 : index
    %62 = vector.load %arg8[%c0_120, %c0_121, %c152] : memref<16x16x200xf32, #tpu.memory_space<vmem>>, vector<16x16x8xf32>
    tpu.vector_store %arg8[%c0_120, %c0_121, %c152], %61 {strides = array<i32>} : memref<16x16x200xf32, #tpu.memory_space<vmem>>, vector<16x16x8xf32>,
    %c0_122 = arith.constant 0 : index
    %c4_123 = arith.constant 4 : index
    %c0_124 = arith.constant 0 : index
    %c0_125 = arith.constant 0 : index
    %63 = vector.load %arg1[%c0_122, %c4_123, %c0_124, %c0_125] : memref<1x20x20x8xf32, #tpu.memory_space<vmem>>, vector<1x16x16x8xf32>
    %64 = vector.shape_cast %63 : vector<1x16x16x8xf32> to vector<16x16x8xf32>
    %c0_126 = arith.constant 0 : index
    %c0_127 = arith.constant 0 : index
    %c160 = arith.constant 160 : index
    %65 = vector.load %arg8[%c0_126, %c0_127, %c160] : memref<16x16x200xf32, #tpu.memory_space<vmem>>, vector<16x16x8xf32>
    tpu.vector_store %arg8[%c0_126, %c0_127, %c160], %64 {strides = array<i32>} : memref<16x16x200xf32, #tpu.memory_space<vmem>>, vector<16x16x8xf32>,
    %c0_128 = arith.constant 0 : index
    %c4_129 = arith.constant 4 : index
    %c1_130 = arith.constant 1 : index
    %c0_131 = arith.constant 0 : index
    %66 = vector.load %arg1[%c0_128, %c4_129, %c1_130, %c0_131] : memref<1x20x20x8xf32, #tpu.memory_space<vmem>>, vector<1x16x16x8xf32>
    %67 = vector.shape_cast %66 : vector<1x16x16x8xf32> to vector<16x16x8xf32>
    %c0_132 = arith.constant 0 : index
    %c0_133 = arith.constant 0 : index
    %c168 = arith.constant 168 : index
    %68 = vector.load %arg8[%c0_132, %c0_133, %c168] : memref<16x16x200xf32, #tpu.memory_space<vmem>>, vector<16x16x8xf32>
    tpu.vector_store %arg8[%c0_132, %c0_133, %c168], %67 {strides = array<i32>} : memref<16x16x200xf32, #tpu.memory_space<vmem>>, vector<16x16x8xf32>,
    %c0_134 = arith.constant 0 : index
    %c4_135 = arith.constant 4 : index
    %c2_136 = arith.constant 2 : index
    %c0_137 = arith.constant 0 : index
    %69 = vector.load %arg1[%c0_134, %c4_135, %c2_136, %c0_137] : memref<1x20x20x8xf32, #tpu.memory_space<vmem>>, vector<1x16x16x8xf32>
    %70 = vector.shape_cast %69 : vector<1x16x16x8xf32> to vector<16x16x8xf32>
    %c0_138 = arith.constant 0 : index
    %c0_139 = arith.constant 0 : index
    %c176 = arith.constant 176 : index
    %71 = vector.load %arg8[%c0_138, %c0_139, %c176] : memref<16x16x200xf32, #tpu.memory_space<vmem>>, vector<16x16x8xf32>
    tpu.vector_store %arg8[%c0_138, %c0_139, %c176], %70 {strides = array<i32>} : memref<16x16x200xf32, #tpu.memory_space<vmem>>, vector<16x16x8xf32>,
    %c0_140 = arith.constant 0 : index
    %c4_141 = arith.constant 4 : index
    %c3_142 = arith.constant 3 : index
    %c0_143 = arith.constant 0 : index
    %72 = vector.load %arg1[%c0_140, %c4_141, %c3_142, %c0_143] : memref<1x20x20x8xf32, #tpu.memory_space<vmem>>, vector<1x16x16x8xf32>
    %73 = vector.shape_cast %72 : vector<1x16x16x8xf32> to vector<16x16x8xf32>
    %c0_144 = arith.constant 0 : index
    %c0_145 = arith.constant 0 : index
    %c184 = arith.constant 184 : index
    %74 = vector.load %arg8[%c0_144, %c0_145, %c184] : memref<16x16x200xf32, #tpu.memory_space<vmem>>, vector<16x16x8xf32>
    tpu.vector_store %arg8[%c0_144, %c0_145, %c184], %73 {strides = array<i32>} : memref<16x16x200xf32, #tpu.memory_space<vmem>>, vector<16x16x8xf32>,
    %c0_146 = arith.constant 0 : index
    %c4_147 = arith.constant 4 : index
    %c4_148 = arith.constant 4 : index
    %c0_149 = arith.constant 0 : index
    %75 = vector.load %arg1[%c0_146, %c4_147, %c4_148, %c0_149] : memref<1x20x20x8xf32, #tpu.memory_space<vmem>>, vector<1x16x16x8xf32>
    %76 = vector.shape_cast %75 : vector<1x16x16x8xf32> to vector<16x16x8xf32>
    %c0_150 = arith.constant 0 : index
    %c0_151 = arith.constant 0 : index
    %c192 = arith.constant 192 : index
    %77 = vector.load %arg8[%c0_150, %c0_151, %c192] : memref<16x16x200xf32, #tpu.memory_space<vmem>>, vector<16x16x8xf32>
    tpu.vector_store %arg8[%c0_150, %c0_151, %c192], %76 {strides = array<i32>} : memref<16x16x200xf32, #tpu.memory_space<vmem>>, vector<16x16x8xf32>,
    %c0_152 = arith.constant 0 : index
    %c0_153 = arith.constant 0 : index
    %c0_154 = arith.constant 0 : index
    %78 = vector.load %arg8[%c0_152, %c0_153, %c0_154] : memref<16x16x200xf32, #tpu.memory_space<vmem>>, vector<16x16x200xf32>
    %79 = vector.shape_cast %78 : vector<16x16x200xf32> to vector<256x200xf32>
    %c0_155 = arith.constant 0 : index
    %c0_156 = arith.constant 0 : index
    %80 = vector.load %arg2[%c0_155, %c0_156] : memref<200x32xf32, #tpu.memory_space<vmem>>, vector<200x32xf32>
    %cst = arith.constant dense<0.000000e+00> : vector<256x32xf32>
    %81 = tpu.matmul %79, %80, %cst {dimension_numbers = #tpu.dot_dimension_numbers<[1], [0], [0], [1], [0, 0, 1, 1], [], []>} : vector<256x200xf32>, vector<200x32xf32>, vector<256x32xf32> -> vector<256x32xf32>
    %82 = vector.broadcast %0 : vector<1x32xf32> to vector<256x32xf32>
    %83 = arith.addf %81, %82 : vector<256x32xf32>
    %cst_157 = arith.constant 0.000000e+00 : f32
    %84 = vector.broadcast %cst_157 : f32 to vector<256x32xf32>
    %85 = arith.maximumf %83, %84 : vector<256x32xf32>
    %cst_158 = arith.constant 0.000000e+00 : f32
    %86 = vector.broadcast %cst_158 : f32 to vector<16x32xf32>
    %c0_159 = arith.constant 0 : index
    %c1_160 = arith.constant 1 : index
    %c0_161 = arith.constant 0 : index
    %c0_162 = arith.constant 0 : index
    %87 = vector.load %arg9[%c0_159, %c1_160, %c0_161, %c0_162] : memref<9x2x16x32xf32, #tpu.memory_space<vmem>>, vector<1x1x16x32xf32>
    %88 = vector.shape_cast %87 : vector<1x1x16x32xf32> to vector<16x32xf32>
    %89 = vector.shape_cast %86 : vector<16x32xf32> to vector<1x1x16x32xf32>
    tpu.vector_store %arg9[%c0_159, %c1_160, %c0_161, %c0_162], %89 {strides = array<i32>} : memref<9x2x16x32xf32, #tpu.memory_space<vmem>>, vector<1x1x16x32xf32>,
    %90 = vector.shape_cast %85 : vector<256x32xf32> to vector<8x2x16x32xf32>
    %c1_163 = arith.constant 1 : index
    %c0_164 = arith.constant 0 : index
    %c0_165 = arith.constant 0 : index
    %c0_166 = arith.constant 0 : index
    %91 = vector.load %arg9[%c1_163, %c0_164, %c0_165, %c0_166] : memref<9x2x16x32xf32, #tpu.memory_space<vmem>>, vector<8x2x16x32xf32>
    tpu.vector_store %arg9[%c1_163, %c0_164, %c0_165, %c0_166], %90 {strides = array<i32>} : memref<9x2x16x32xf32, #tpu.memory_space<vmem>>, vector<8x2x16x32xf32>,
    %c1_167 = arith.constant 1 : index
    %c0_168 = arith.constant 0 : index
    %c0_169 = arith.constant 0 : index
    %c0_170 = arith.constant 0 : index
    %92 = vector.load %arg9[%c1_167, %c0_168, %c0_169, %c0_170] : memref<9x2x16x32xf32, #tpu.memory_space<vmem>>, vector<8x1x16x32xf32>
    %93 = vector.shape_cast %92 : vector<8x1x16x32xf32> to vector<8x16x32xf32>
    %c1_171 = arith.constant 1 : index
    %c1_172 = arith.constant 1 : index
    %c0_173 = arith.constant 0 : index
    %c0_174 = arith.constant 0 : index
    %94 = vector.load %arg9[%c1_171, %c1_172, %c0_173, %c0_174] : memref<9x2x16x32xf32, #tpu.memory_space<vmem>>, vector<8x1x16x32xf32>
    %95 = vector.shape_cast %94 : vector<8x1x16x32xf32> to vector<8x16x32xf32>
    %96 = arith.maximumf %93, %95 : vector<8x16x32xf32>
    %c0_175 = arith.constant 0 : index
    %c1_176 = arith.constant 1 : index
    %c0_177 = arith.constant 0 : index
    %c0_178 = arith.constant 0 : index
    %97 = vector.load %arg9[%c0_175, %c1_176, %c0_177, %c0_178] : memref<9x2x16x32xf32, #tpu.memory_space<vmem>>, vector<8x1x16x32xf32>
    %98 = vector.shape_cast %97 : vector<8x1x16x32xf32> to vector<8x16x32xf32>
    %99 = arith.maximumf %96, %98 : vector<8x16x32xf32>
    %cst_179 = arith.constant 0.000000e+00 : f32
    %100 = vector.broadcast %cst_179 : f32 to vector<8x1x32xf32>
    %c0_180 = arith.constant 0 : index
    %c0_181 = arith.constant 0 : index
    %c0_182 = arith.constant 0 : index
    %101 = vector.load %arg10[%c0_180, %c0_181, %c0_182] : memref<8x17x32xf32, #tpu.memory_space<vmem>>, vector<8x1x32xf32>
    tpu.vector_store %arg10[%c0_180, %c0_181, %c0_182], %100 {strides = array<i32>} : memref<8x17x32xf32, #tpu.memory_space<vmem>>, vector<8x1x32xf32>,
    %c0_183 = arith.constant 0 : index
    %c1_184 = arith.constant 1 : index
    %c0_185 = arith.constant 0 : index
    %102 = vector.load %arg10[%c0_183, %c1_184, %c0_185] : memref<8x17x32xf32, #tpu.memory_space<vmem>>, vector<8x16x32xf32>
    tpu.vector_store %arg10[%c0_183, %c1_184, %c0_185], %99 {strides = array<i32>} : memref<8x17x32xf32, #tpu.memory_space<vmem>>, vector<8x16x32xf32>,
    %c0_186 = arith.constant 0 : index
    %c0_187 = arith.constant 0 : index
    %c0_188 = arith.constant 0 : index
    %103 = tpu.strided_load %arg10[%c0_186, %c0_187, %c0_188] {strides = array<i32: 1, 2, 1>} : memref<8x17x32xf32, #tpu.memory_space<vmem>>, vector<8x8x32xf32>
    %c0_189 = arith.constant 0 : index
    %c1_190 = arith.constant 1 : index
    %c0_191 = arith.constant 0 : index
    %104 = tpu.strided_load %arg10[%c0_189, %c1_190, %c0_191] {strides = array<i32: 1, 2, 1>} : memref<8x17x32xf32, #tpu.memory_space<vmem>>, vector<8x8x32xf32>
    %c0_192 = arith.constant 0 : index
    %c2_193 = arith.constant 2 : index
    %c0_194 = arith.constant 0 : index
    %105 = tpu.strided_load %arg10[%c0_192, %c2_193, %c0_194] {strides = array<i32: 1, 2, 1>} : memref<8x17x32xf32, #tpu.memory_space<vmem>>, vector<8x8x32xf32>
    %106 = arith.maximumf %103, %104 : vector<8x8x32xf32>
    %107 = arith.maximumf %106, %105 : vector<8x8x32xf32>
    %108 = vector.shape_cast %107 : vector<8x8x32xf32> to vector<64x32xf32>
    %109 = arith.mulf %108, %108 : vector<64x32xf32>
    %cst_195 = arith.constant dense<0.000000e+00> : vector<64x32xf32>
    %110 = tpu.matmul %109, %2, %cst_195 {dimension_numbers = #tpu.dot_dimension_numbers<[1], [0], [0], [1], [0, 0, 1, 1], [], []>} : vector<64x32xf32>, vector<32x32xf32>, vector<64x32xf32> -> vector<64x32xf32>
    %cst_196 = arith.constant 1.000000e+00 : f32
    %111 = vector.broadcast %cst_196 : f32 to vector<64x32xf32>
    %112 = arith.addf %111, %110 : vector<64x32xf32>
    %113 = math.rsqrt %112 : vector<64x32xf32>
    %114 = math.sqrt %113 : vector<64x32xf32>
    %115 = arith.mulf %113, %114 : vector<64x32xf32>
    %116 = arith.mulf %108, %115 : vector<64x32xf32>
    %117 = vector.shape_cast %116 : vector<64x32xf32> to vector<8x8x32xf32>
    %cst_197 = arith.constant 0.000000e+00 : f32
    %118 = vector.broadcast %cst_197 : f32 to vector<2x12x32xf32>
    %c0_198 = arith.constant 0 : index
    %c0_199 = arith.constant 0 : index
    %c0_200 = arith.constant 0 : index
    %119 = vector.load %arg11[%c0_198, %c0_199, %c0_200] : memref<12x12x32xf32, #tpu.memory_space<vmem>>, vector<2x12x32xf32>
    tpu.vector_store %arg11[%c0_198, %c0_199, %c0_200], %118 {strides = array<i32>} : memref<12x12x32xf32, #tpu.memory_space<vmem>>, vector<2x12x32xf32>,
    %cst_201 = arith.constant 0.000000e+00 : f32
    %120 = vector.broadcast %cst_201 : f32 to vector<2x12x32xf32>
    %c10 = arith.constant 10 : index
    %c0_202 = arith.constant 0 : index
    %c0_203 = arith.constant 0 : index
    %121 = vector.load %arg11[%c10, %c0_202, %c0_203] : memref<12x12x32xf32, #tpu.memory_space<vmem>>, vector<2x12x32xf32>
    tpu.vector_store %arg11[%c10, %c0_202, %c0_203], %120 {strides = array<i32>} : memref<12x12x32xf32, #tpu.memory_space<vmem>>, vector<2x12x32xf32>,
    %cst_204 = arith.constant 0.000000e+00 : f32
    %122 = vector.broadcast %cst_204 : f32 to vector<8x2x32xf32>
    %c2_205 = arith.constant 2 : index
    %c0_206 = arith.constant 0 : index
    %c0_207 = arith.constant 0 : index
    %123 = vector.load %arg11[%c2_205, %c0_206, %c0_207] : memref<12x12x32xf32, #tpu.memory_space<vmem>>, vector<8x2x32xf32>
    tpu.vector_store %arg11[%c2_205, %c0_206, %c0_207], %122 {strides = array<i32>} : memref<12x12x32xf32, #tpu.memory_space<vmem>>, vector<8x2x32xf32>,
    %cst_208 = arith.constant 0.000000e+00 : f32
    %124 = vector.broadcast %cst_208 : f32 to vector<8x2x32xf32>
    %c2_209 = arith.constant 2 : index
    %c10_210 = arith.constant 10 : index
    %c0_211 = arith.constant 0 : index
    %125 = vector.load %arg11[%c2_209, %c10_210, %c0_211] : memref<12x12x32xf32, #tpu.memory_space<vmem>>, vector<8x2x32xf32>
    tpu.vector_store %arg11[%c2_209, %c10_210, %c0_211], %124 {strides = array<i32>} : memref<12x12x32xf32, #tpu.memory_space<vmem>>, vector<8x2x32xf32>,
    %c2_212 = arith.constant 2 : index
    %c2_213 = arith.constant 2 : index
    %c0_214 = arith.constant 0 : index
    %126 = vector.load %arg11[%c2_212, %c2_213, %c0_214] : memref<12x12x32xf32, #tpu.memory_space<vmem>>, vector<8x8x32xf32>
    tpu.vector_store %arg11[%c2_212, %c2_213, %c0_214], %117 {strides = array<i32>} : memref<12x12x32xf32, #tpu.memory_space<vmem>>, vector<8x8x32xf32>,
    %c0_215 = arith.constant 0 : index
    %c0_216 = arith.constant 0 : index
    %c0_217 = arith.constant 0 : index
    %127 = vector.load %arg11[%c0_215, %c0_216, %c0_217] : memref<12x12x32xf32, #tpu.memory_space<vmem>>, vector<8x8x32xf32>
    %c0_218 = arith.constant 0 : index
    %c0_219 = arith.constant 0 : index
    %c0_220 = arith.constant 0 : index
    %128 = vector.load %arg12[%c0_218, %c0_219, %c0_220] : memref<8x8x800xf32, #tpu.memory_space<vmem>>, vector<8x8x32xf32>
    tpu.vector_store %arg12[%c0_218, %c0_219, %c0_220], %127 {strides = array<i32>} : memref<8x8x800xf32, #tpu.memory_space<vmem>>, vector<8x8x32xf32>,
    %c0_221 = arith.constant 0 : index
    %c1_222 = arith.constant 1 : index
    %c0_223 = arith.constant 0 : index
    %129 = vector.load %arg11[%c0_221, %c1_222, %c0_223] : memref<12x12x32xf32, #tpu.memory_space<vmem>>, vector<8x8x32xf32>
    %c0_224 = arith.constant 0 : index
    %c0_225 = arith.constant 0 : index
    %c32_226 = arith.constant 32 : index
    %130 = vector.load %arg12[%c0_224, %c0_225, %c32_226] : memref<8x8x800xf32, #tpu.memory_space<vmem>>, vector<8x8x32xf32>
    tpu.vector_store %arg12[%c0_224, %c0_225, %c32_226], %129 {strides = array<i32>} : memref<8x8x800xf32, #tpu.memory_space<vmem>>, vector<8x8x32xf32>,
    %c0_227 = arith.constant 0 : index
    %c2_228 = arith.constant 2 : index
    %c0_229 = arith.constant 0 : index
    %131 = vector.load %arg11[%c0_227, %c2_228, %c0_229] : memref<12x12x32xf32, #tpu.memory_space<vmem>>, vector<8x8x32xf32>
    %c0_230 = arith.constant 0 : index
    %c0_231 = arith.constant 0 : index
    %c64_232 = arith.constant 64 : index
    %132 = vector.load %arg12[%c0_230, %c0_231, %c64_232] : memref<8x8x800xf32, #tpu.memory_space<vmem>>, vector<8x8x32xf32>
    tpu.vector_store %arg12[%c0_230, %c0_231, %c64_232], %131 {strides = array<i32>} : memref<8x8x800xf32, #tpu.memory_space<vmem>>, vector<8x8x32xf32>,
    %c0_233 = arith.constant 0 : index
    %c3_234 = arith.constant 3 : index
    %c0_235 = arith.constant 0 : index
    %133 = vector.load %arg11[%c0_233, %c3_234, %c0_235] : memref<12x12x32xf32, #tpu.memory_space<vmem>>, vector<8x8x32xf32>
    %c0_236 = arith.constant 0 : index
    %c0_237 = arith.constant 0 : index
    %c96_238 = arith.constant 96 : index
    %134 = vector.load %arg12[%c0_236, %c0_237, %c96_238] : memref<8x8x800xf32, #tpu.memory_space<vmem>>, vector<8x8x32xf32>
    tpu.vector_store %arg12[%c0_236, %c0_237, %c96_238], %133 {strides = array<i32>} : memref<8x8x800xf32, #tpu.memory_space<vmem>>, vector<8x8x32xf32>,
    %c0_239 = arith.constant 0 : index
    %c4_240 = arith.constant 4 : index
    %c0_241 = arith.constant 0 : index
    %135 = vector.load %arg11[%c0_239, %c4_240, %c0_241] : memref<12x12x32xf32, #tpu.memory_space<vmem>>, vector<8x8x32xf32>
    %c0_242 = arith.constant 0 : index
    %c0_243 = arith.constant 0 : index
    %c128_244 = arith.constant 128 : index
    %136 = vector.load %arg12[%c0_242, %c0_243, %c128_244] : memref<8x8x800xf32, #tpu.memory_space<vmem>>, vector<8x8x32xf32>
    tpu.vector_store %arg12[%c0_242, %c0_243, %c128_244], %135 {strides = array<i32>} : memref<8x8x800xf32, #tpu.memory_space<vmem>>, vector<8x8x32xf32>,
    %c1_245 = arith.constant 1 : index
    %c0_246 = arith.constant 0 : index
    %c0_247 = arith.constant 0 : index
    %137 = vector.load %arg11[%c1_245, %c0_246, %c0_247] : memref<12x12x32xf32, #tpu.memory_space<vmem>>, vector<8x8x32xf32>
    %c0_248 = arith.constant 0 : index
    %c0_249 = arith.constant 0 : index
    %c160_250 = arith.constant 160 : index
    %138 = vector.load %arg12[%c0_248, %c0_249, %c160_250] : memref<8x8x800xf32, #tpu.memory_space<vmem>>, vector<8x8x32xf32>
    tpu.vector_store %arg12[%c0_248, %c0_249, %c160_250], %137 {strides = array<i32>} : memref<8x8x800xf32, #tpu.memory_space<vmem>>, vector<8x8x32xf32>,
    %c1_251 = arith.constant 1 : index
    %c1_252 = arith.constant 1 : index
    %c0_253 = arith.constant 0 : index
    %139 = vector.load %arg11[%c1_251, %c1_252, %c0_253] : memref<12x12x32xf32, #tpu.memory_space<vmem>>, vector<8x8x32xf32>
    %c0_254 = arith.constant 0 : index
    %c0_255 = arith.constant 0 : index
    %c192_256 = arith.constant 192 : index
    %140 = vector.load %arg12[%c0_254, %c0_255, %c192_256] : memref<8x8x800xf32, #tpu.memory_space<vmem>>, vector<8x8x32xf32>
    tpu.vector_store %arg12[%c0_254, %c0_255, %c192_256], %139 {strides = array<i32>} : memref<8x8x800xf32, #tpu.memory_space<vmem>>, vector<8x8x32xf32>,
    %c1_257 = arith.constant 1 : index
    %c2_258 = arith.constant 2 : index
    %c0_259 = arith.constant 0 : index
    %141 = vector.load %arg11[%c1_257, %c2_258, %c0_259] : memref<12x12x32xf32, #tpu.memory_space<vmem>>, vector<8x8x32xf32>
    %c0_260 = arith.constant 0 : index
    %c0_261 = arith.constant 0 : index
    %c224 = arith.constant 224 : index
    %142 = vector.load %arg12[%c0_260, %c0_261, %c224] : memref<8x8x800xf32, #tpu.memory_space<vmem>>, vector<8x8x32xf32>
    tpu.vector_store %arg12[%c0_260, %c0_261, %c224], %141 {strides = array<i32>} : memref<8x8x800xf32, #tpu.memory_space<vmem>>, vector<8x8x32xf32>,
    %c1_262 = arith.constant 1 : index
    %c3_263 = arith.constant 3 : index
    %c0_264 = arith.constant 0 : index
    %143 = vector.load %arg11[%c1_262, %c3_263, %c0_264] : memref<12x12x32xf32, #tpu.memory_space<vmem>>, vector<8x8x32xf32>
    %c0_265 = arith.constant 0 : index
    %c0_266 = arith.constant 0 : index
    %c256 = arith.constant 256 : index
    %144 = vector.load %arg12[%c0_265, %c0_266, %c256] : memref<8x8x800xf32, #tpu.memory_space<vmem>>, vector<8x8x32xf32>
    tpu.vector_store %arg12[%c0_265, %c0_266, %c256], %143 {strides = array<i32>} : memref<8x8x800xf32, #tpu.memory_space<vmem>>, vector<8x8x32xf32>,
    %c1_267 = arith.constant 1 : index
    %c4_268 = arith.constant 4 : index
    %c0_269 = arith.constant 0 : index
    %145 = vector.load %arg11[%c1_267, %c4_268, %c0_269] : memref<12x12x32xf32, #tpu.memory_space<vmem>>, vector<8x8x32xf32>
    %c0_270 = arith.constant 0 : index
    %c0_271 = arith.constant 0 : index
    %c288 = arith.constant 288 : index
    %146 = vector.load %arg12[%c0_270, %c0_271, %c288] : memref<8x8x800xf32, #tpu.memory_space<vmem>>, vector<8x8x32xf32>
    tpu.vector_store %arg12[%c0_270, %c0_271, %c288], %145 {strides = array<i32>} : memref<8x8x800xf32, #tpu.memory_space<vmem>>, vector<8x8x32xf32>,
    %c2_272 = arith.constant 2 : index
    %c0_273 = arith.constant 0 : index
    %c0_274 = arith.constant 0 : index
    %147 = vector.load %arg11[%c2_272, %c0_273, %c0_274] : memref<12x12x32xf32, #tpu.memory_space<vmem>>, vector<8x8x32xf32>
    %c0_275 = arith.constant 0 : index
    %c0_276 = arith.constant 0 : index
    %c320 = arith.constant 320 : index
    %148 = vector.load %arg12[%c0_275, %c0_276, %c320] : memref<8x8x800xf32, #tpu.memory_space<vmem>>, vector<8x8x32xf32>
    tpu.vector_store %arg12[%c0_275, %c0_276, %c320], %147 {strides = array<i32>} : memref<8x8x800xf32, #tpu.memory_space<vmem>>, vector<8x8x32xf32>,
    %c2_277 = arith.constant 2 : index
    %c1_278 = arith.constant 1 : index
    %c0_279 = arith.constant 0 : index
    %149 = vector.load %arg11[%c2_277, %c1_278, %c0_279] : memref<12x12x32xf32, #tpu.memory_space<vmem>>, vector<8x8x32xf32>
    %c0_280 = arith.constant 0 : index
    %c0_281 = arith.constant 0 : index
    %c352 = arith.constant 352 : index
    %150 = vector.load %arg12[%c0_280, %c0_281, %c352] : memref<8x8x800xf32, #tpu.memory_space<vmem>>, vector<8x8x32xf32>
    tpu.vector_store %arg12[%c0_280, %c0_281, %c352], %149 {strides = array<i32>} : memref<8x8x800xf32, #tpu.memory_space<vmem>>, vector<8x8x32xf32>,
    %c2_282 = arith.constant 2 : index
    %c2_283 = arith.constant 2 : index
    %c0_284 = arith.constant 0 : index
    %151 = vector.load %arg11[%c2_282, %c2_283, %c0_284] : memref<12x12x32xf32, #tpu.memory_space<vmem>>, vector<8x8x32xf32>
    %c0_285 = arith.constant 0 : index
    %c0_286 = arith.constant 0 : index
    %c384 = arith.constant 384 : index
    %152 = vector.load %arg12[%c0_285, %c0_286, %c384] : memref<8x8x800xf32, #tpu.memory_space<vmem>>, vector<8x8x32xf32>
    tpu.vector_store %arg12[%c0_285, %c0_286, %c384], %151 {strides = array<i32>} : memref<8x8x800xf32, #tpu.memory_space<vmem>>, vector<8x8x32xf32>,
    %c2_287 = arith.constant 2 : index
    %c3_288 = arith.constant 3 : index
    %c0_289 = arith.constant 0 : index
    %153 = vector.load %arg11[%c2_287, %c3_288, %c0_289] : memref<12x12x32xf32, #tpu.memory_space<vmem>>, vector<8x8x32xf32>
    %c0_290 = arith.constant 0 : index
    %c0_291 = arith.constant 0 : index
    %c416 = arith.constant 416 : index
    %154 = vector.load %arg12[%c0_290, %c0_291, %c416] : memref<8x8x800xf32, #tpu.memory_space<vmem>>, vector<8x8x32xf32>
    tpu.vector_store %arg12[%c0_290, %c0_291, %c416], %153 {strides = array<i32>} : memref<8x8x800xf32, #tpu.memory_space<vmem>>, vector<8x8x32xf32>,
    %c2_292 = arith.constant 2 : index
    %c4_293 = arith.constant 4 : index
    %c0_294 = arith.constant 0 : index
    %155 = vector.load %arg11[%c2_292, %c4_293, %c0_294] : memref<12x12x32xf32, #tpu.memory_space<vmem>>, vector<8x8x32xf32>
    %c0_295 = arith.constant 0 : index
    %c0_296 = arith.constant 0 : index
    %c448 = arith.constant 448 : index
    %156 = vector.load %arg12[%c0_295, %c0_296, %c448] : memref<8x8x800xf32, #tpu.memory_space<vmem>>, vector<8x8x32xf32>
    tpu.vector_store %arg12[%c0_295, %c0_296, %c448], %155 {strides = array<i32>} : memref<8x8x800xf32, #tpu.memory_space<vmem>>, vector<8x8x32xf32>,
    %c3_297 = arith.constant 3 : index
    %c0_298 = arith.constant 0 : index
    %c0_299 = arith.constant 0 : index
    %157 = vector.load %arg11[%c3_297, %c0_298, %c0_299] : memref<12x12x32xf32, #tpu.memory_space<vmem>>, vector<8x8x32xf32>
    %c0_300 = arith.constant 0 : index
    %c0_301 = arith.constant 0 : index
    %c480 = arith.constant 480 : index
    %158 = vector.load %arg12[%c0_300, %c0_301, %c480] : memref<8x8x800xf32, #tpu.memory_space<vmem>>, vector<8x8x32xf32>
    tpu.vector_store %arg12[%c0_300, %c0_301, %c480], %157 {strides = array<i32>} : memref<8x8x800xf32, #tpu.memory_space<vmem>>, vector<8x8x32xf32>,
    %c3_302 = arith.constant 3 : index
    %c1_303 = arith.constant 1 : index
    %c0_304 = arith.constant 0 : index
    %159 = vector.load %arg11[%c3_302, %c1_303, %c0_304] : memref<12x12x32xf32, #tpu.memory_space<vmem>>, vector<8x8x32xf32>
    %c0_305 = arith.constant 0 : index
    %c0_306 = arith.constant 0 : index
    %c512 = arith.constant 512 : index
    %160 = vector.load %arg12[%c0_305, %c0_306, %c512] : memref<8x8x800xf32, #tpu.memory_space<vmem>>, vector<8x8x32xf32>
    tpu.vector_store %arg12[%c0_305, %c0_306, %c512], %159 {strides = array<i32>} : memref<8x8x800xf32, #tpu.memory_space<vmem>>, vector<8x8x32xf32>,
    %c3_307 = arith.constant 3 : index
    %c2_308 = arith.constant 2 : index
    %c0_309 = arith.constant 0 : index
    %161 = vector.load %arg11[%c3_307, %c2_308, %c0_309] : memref<12x12x32xf32, #tpu.memory_space<vmem>>, vector<8x8x32xf32>
    %c0_310 = arith.constant 0 : index
    %c0_311 = arith.constant 0 : index
    %c544 = arith.constant 544 : index
    %162 = vector.load %arg12[%c0_310, %c0_311, %c544] : memref<8x8x800xf32, #tpu.memory_space<vmem>>, vector<8x8x32xf32>
    tpu.vector_store %arg12[%c0_310, %c0_311, %c544], %161 {strides = array<i32>} : memref<8x8x800xf32, #tpu.memory_space<vmem>>, vector<8x8x32xf32>,
    %c3_312 = arith.constant 3 : index
    %c3_313 = arith.constant 3 : index
    %c0_314 = arith.constant 0 : index
    %163 = vector.load %arg11[%c3_312, %c3_313, %c0_314] : memref<12x12x32xf32, #tpu.memory_space<vmem>>, vector<8x8x32xf32>
    %c0_315 = arith.constant 0 : index
    %c0_316 = arith.constant 0 : index
    %c576 = arith.constant 576 : index
    %164 = vector.load %arg12[%c0_315, %c0_316, %c576] : memref<8x8x800xf32, #tpu.memory_space<vmem>>, vector<8x8x32xf32>
    tpu.vector_store %arg12[%c0_315, %c0_316, %c576], %163 {strides = array<i32>} : memref<8x8x800xf32, #tpu.memory_space<vmem>>, vector<8x8x32xf32>,
    %c3_317 = arith.constant 3 : index
    %c4_318 = arith.constant 4 : index
    %c0_319 = arith.constant 0 : index
    %165 = vector.load %arg11[%c3_317, %c4_318, %c0_319] : memref<12x12x32xf32, #tpu.memory_space<vmem>>, vector<8x8x32xf32>
    %c0_320 = arith.constant 0 : index
    %c0_321 = arith.constant 0 : index
    %c608 = arith.constant 608 : index
    %166 = vector.load %arg12[%c0_320, %c0_321, %c608] : memref<8x8x800xf32, #tpu.memory_space<vmem>>, vector<8x8x32xf32>
    tpu.vector_store %arg12[%c0_320, %c0_321, %c608], %165 {strides = array<i32>} : memref<8x8x800xf32, #tpu.memory_space<vmem>>, vector<8x8x32xf32>,
    %c4_322 = arith.constant 4 : index
    %c0_323 = arith.constant 0 : index
    %c0_324 = arith.constant 0 : index
    %167 = vector.load %arg11[%c4_322, %c0_323, %c0_324] : memref<12x12x32xf32, #tpu.memory_space<vmem>>, vector<8x8x32xf32>
    %c0_325 = arith.constant 0 : index
    %c0_326 = arith.constant 0 : index
    %c640 = arith.constant 640 : index
    %168 = vector.load %arg12[%c0_325, %c0_326, %c640] : memref<8x8x800xf32, #tpu.memory_space<vmem>>, vector<8x8x32xf32>
    tpu.vector_store %arg12[%c0_325, %c0_326, %c640], %167 {strides = array<i32>} : memref<8x8x800xf32, #tpu.memory_space<vmem>>, vector<8x8x32xf32>,
    %c4_327 = arith.constant 4 : index
    %c1_328 = arith.constant 1 : index
    %c0_329 = arith.constant 0 : index
    %169 = vector.load %arg11[%c4_327, %c1_328, %c0_329] : memref<12x12x32xf32, #tpu.memory_space<vmem>>, vector<8x8x32xf32>
    %c0_330 = arith.constant 0 : index
    %c0_331 = arith.constant 0 : index
    %c672 = arith.constant 672 : index
    %170 = vector.load %arg12[%c0_330, %c0_331, %c672] : memref<8x8x800xf32, #tpu.memory_space<vmem>>, vector<8x8x32xf32>
    tpu.vector_store %arg12[%c0_330, %c0_331, %c672], %169 {strides = array<i32>} : memref<8x8x800xf32, #tpu.memory_space<vmem>>, vector<8x8x32xf32>,
    %c4_332 = arith.constant 4 : index
    %c2_333 = arith.constant 2 : index
    %c0_334 = arith.constant 0 : index
    %171 = vector.load %arg11[%c4_332, %c2_333, %c0_334] : memref<12x12x32xf32, #tpu.memory_space<vmem>>, vector<8x8x32xf32>
    %c0_335 = arith.constant 0 : index
    %c0_336 = arith.constant 0 : index
    %c704 = arith.constant 704 : index
    %172 = vector.load %arg12[%c0_335, %c0_336, %c704] : memref<8x8x800xf32, #tpu.memory_space<vmem>>, vector<8x8x32xf32>
    tpu.vector_store %arg12[%c0_335, %c0_336, %c704], %171 {strides = array<i32>} : memref<8x8x800xf32, #tpu.memory_space<vmem>>, vector<8x8x32xf32>,
    %c4_337 = arith.constant 4 : index
    %c3_338 = arith.constant 3 : index
    %c0_339 = arith.constant 0 : index
    %173 = vector.load %arg11[%c4_337, %c3_338, %c0_339] : memref<12x12x32xf32, #tpu.memory_space<vmem>>, vector<8x8x32xf32>
    %c0_340 = arith.constant 0 : index
    %c0_341 = arith.constant 0 : index
    %c736 = arith.constant 736 : index
    %174 = vector.load %arg12[%c0_340, %c0_341, %c736] : memref<8x8x800xf32, #tpu.memory_space<vmem>>, vector<8x8x32xf32>
    tpu.vector_store %arg12[%c0_340, %c0_341, %c736], %173 {strides = array<i32>} : memref<8x8x800xf32, #tpu.memory_space<vmem>>, vector<8x8x32xf32>,
    %c4_342 = arith.constant 4 : index
    %c4_343 = arith.constant 4 : index
    %c0_344 = arith.constant 0 : index
    %175 = vector.load %arg11[%c4_342, %c4_343, %c0_344] : memref<12x12x32xf32, #tpu.memory_space<vmem>>, vector<8x8x32xf32>
    %c0_345 = arith.constant 0 : index
    %c0_346 = arith.constant 0 : index
    %c768 = arith.constant 768 : index
    %176 = vector.load %arg12[%c0_345, %c0_346, %c768] : memref<8x8x800xf32, #tpu.memory_space<vmem>>, vector<8x8x32xf32>
    tpu.vector_store %arg12[%c0_345, %c0_346, %c768], %175 {strides = array<i32>} : memref<8x8x800xf32, #tpu.memory_space<vmem>>, vector<8x8x32xf32>,
    %c0_347 = arith.constant 0 : index
    %c0_348 = arith.constant 0 : index
    %c0_349 = arith.constant 0 : index
    %177 = vector.load %arg12[%c0_347, %c0_348, %c0_349] : memref<8x8x800xf32, #tpu.memory_space<vmem>>, vector<8x8x800xf32>
    %178 = vector.shape_cast %177 : vector<8x8x800xf32> to vector<64x800xf32>
    %c0_350 = arith.constant 0 : index
    %c0_351 = arith.constant 0 : index
    %179 = vector.load %arg4[%c0_350, %c0_351] : memref<800x32xf32, #tpu.memory_space<vmem>>, vector<800x32xf32>
    %cst_352 = arith.constant dense<0.000000e+00> : vector<64x32xf32>
    %180 = tpu.matmul %178, %179, %cst_352 {dimension_numbers = #tpu.dot_dimension_numbers<[1], [0], [0], [1], [0, 0, 1, 1], [], []>} : vector<64x800xf32>, vector<800x32xf32>, vector<64x32xf32> -> vector<64x32xf32>
    %181 = vector.broadcast %1 : vector<1x32xf32> to vector<64x32xf32>
    %182 = arith.addf %180, %181 : vector<64x32xf32>
    %cst_353 = arith.constant 0.000000e+00 : f32
    %183 = vector.broadcast %cst_353 : f32 to vector<64x32xf32>
    %184 = arith.maximumf %182, %183 : vector<64x32xf32>
    %185 = arith.mulf %184, %184 : vector<64x32xf32>
    %cst_354 = arith.constant dense<0.000000e+00> : vector<64x32xf32>
    %186 = tpu.matmul %185, %2, %cst_354 {dimension_numbers = #tpu.dot_dimension_numbers<[1], [0], [0], [1], [0, 0, 1, 1], [], []>} : vector<64x32xf32>, vector<32x32xf32>, vector<64x32xf32> -> vector<64x32xf32>
    %cst_355 = arith.constant 1.000000e+00 : f32
    %187 = vector.broadcast %cst_355 : f32 to vector<64x32xf32>
    %188 = arith.addf %187, %186 : vector<64x32xf32>
    %189 = math.rsqrt %188 : vector<64x32xf32>
    %190 = math.sqrt %189 : vector<64x32xf32>
    %191 = arith.mulf %189, %190 : vector<64x32xf32>
    %192 = arith.mulf %184, %191 : vector<64x32xf32>
    %cst_356 = arith.constant 0.000000e+00 : f32
    %193 = vector.broadcast %cst_356 : f32 to vector<8x32xf32>
    %c0_357 = arith.constant 0 : index
    %c1_358 = arith.constant 1 : index
    %c0_359 = arith.constant 0 : index
    %c0_360 = arith.constant 0 : index
    %194 = vector.load %arg13[%c0_357, %c1_358, %c0_359, %c0_360] : memref<5x2x8x32xf32, #tpu.memory_space<vmem>>, vector<1x1x8x32xf32>
    %195 = vector.shape_cast %194 : vector<1x1x8x32xf32> to vector<8x32xf32>
    %196 = vector.shape_cast %193 : vector<8x32xf32> to vector<1x1x8x32xf32>
    tpu.vector_store %arg13[%c0_357, %c1_358, %c0_359, %c0_360], %196 {strides = array<i32>} : memref<5x2x8x32xf32, #tpu.memory_space<vmem>>, vector<1x1x8x32xf32>,
    %197 = vector.shape_cast %192 : vector<64x32xf32> to vector<4x2x8x32xf32>
    %c1_361 = arith.constant 1 : index
    %c0_362 = arith.constant 0 : index
    %c0_363 = arith.constant 0 : index
    %c0_364 = arith.constant 0 : index
    %198 = vector.load %arg13[%c1_361, %c0_362, %c0_363, %c0_364] : memref<5x2x8x32xf32, #tpu.memory_space<vmem>>, vector<4x2x8x32xf32>
    tpu.vector_store %arg13[%c1_361, %c0_362, %c0_363, %c0_364], %197 {strides = array<i32>} : memref<5x2x8x32xf32, #tpu.memory_space<vmem>>, vector<4x2x8x32xf32>,
    %c1_365 = arith.constant 1 : index
    %c0_366 = arith.constant 0 : index
    %c0_367 = arith.constant 0 : index
    %c0_368 = arith.constant 0 : index
    %199 = vector.load %arg13[%c1_365, %c0_366, %c0_367, %c0_368] : memref<5x2x8x32xf32, #tpu.memory_space<vmem>>, vector<4x1x8x32xf32>
    %200 = vector.shape_cast %199 : vector<4x1x8x32xf32> to vector<4x8x32xf32>
    %c1_369 = arith.constant 1 : index
    %c1_370 = arith.constant 1 : index
    %c0_371 = arith.constant 0 : index
    %c0_372 = arith.constant 0 : index
    %201 = vector.load %arg13[%c1_369, %c1_370, %c0_371, %c0_372] : memref<5x2x8x32xf32, #tpu.memory_space<vmem>>, vector<4x1x8x32xf32>
    %202 = vector.shape_cast %201 : vector<4x1x8x32xf32> to vector<4x8x32xf32>
    %203 = arith.maximumf %200, %202 : vector<4x8x32xf32>
    %c0_373 = arith.constant 0 : index
    %c1_374 = arith.constant 1 : index
    %c0_375 = arith.constant 0 : index
    %c0_376 = arith.constant 0 : index
    %204 = vector.load %arg13[%c0_373, %c1_374, %c0_375, %c0_376] : memref<5x2x8x32xf32, #tpu.memory_space<vmem>>, vector<4x1x8x32xf32>
    %205 = vector.shape_cast %204 : vector<4x1x8x32xf32> to vector<4x8x32xf32>
    %206 = arith.maximumf %203, %205 : vector<4x8x32xf32>
    %cst_377 = arith.constant 0.000000e+00 : f32
    %207 = vector.broadcast %cst_377 : f32 to vector<4x1x32xf32>
    %c0_378 = arith.constant 0 : index
    %c0_379 = arith.constant 0 : index
    %c0_380 = arith.constant 0 : index
    %208 = vector.load %arg14[%c0_378, %c0_379, %c0_380] : memref<4x9x32xf32, #tpu.memory_space<vmem>>, vector<4x1x32xf32>
    tpu.vector_store %arg14[%c0_378, %c0_379, %c0_380], %207 {strides = array<i32>} : memref<4x9x32xf32, #tpu.memory_space<vmem>>, vector<4x1x32xf32>,
    %c0_381 = arith.constant 0 : index
    %c1_382 = arith.constant 1 : index
    %c0_383 = arith.constant 0 : index
    %209 = vector.load %arg14[%c0_381, %c1_382, %c0_383] : memref<4x9x32xf32, #tpu.memory_space<vmem>>, vector<4x8x32xf32>
    tpu.vector_store %arg14[%c0_381, %c1_382, %c0_383], %206 {strides = array<i32>} : memref<4x9x32xf32, #tpu.memory_space<vmem>>, vector<4x8x32xf32>,
    %c0_384 = arith.constant 0 : index
    %c0_385 = arith.constant 0 : index
    %c0_386 = arith.constant 0 : index
    %210 = tpu.strided_load %arg14[%c0_384, %c0_385, %c0_386] {strides = array<i32: 1, 2, 1>} : memref<4x9x32xf32, #tpu.memory_space<vmem>>, vector<4x4x32xf32>
    %c0_387 = arith.constant 0 : index
    %c1_388 = arith.constant 1 : index
    %c0_389 = arith.constant 0 : index
    %211 = tpu.strided_load %arg14[%c0_387, %c1_388, %c0_389] {strides = array<i32: 1, 2, 1>} : memref<4x9x32xf32, #tpu.memory_space<vmem>>, vector<4x4x32xf32>
    %c0_390 = arith.constant 0 : index
    %c2_391 = arith.constant 2 : index
    %c0_392 = arith.constant 0 : index
    %212 = tpu.strided_load %arg14[%c0_390, %c2_391, %c0_392] {strides = array<i32: 1, 2, 1>} : memref<4x9x32xf32, #tpu.memory_space<vmem>>, vector<4x4x32xf32>
    %213 = arith.maximumf %210, %211 : vector<4x4x32xf32>
    %214 = arith.maximumf %213, %212 : vector<4x4x32xf32>
    %c0_393 = arith.constant 0 : index
    %c0_394 = arith.constant 0 : index
    %c0_395 = arith.constant 0 : index
    %c0_396 = arith.constant 0 : index
    %215 = vector.load %arg7[%c0_393, %c0_394, %c0_395, %c0_396] : memref<1x4x4x32xf32, #tpu.memory_space<vmem>>, vector<1x4x4x32xf32>
    %216 = vector.shape_cast %215 : vector<1x4x4x32xf32> to vector<4x4x32xf32>
    %217 = vector.shape_cast %214 : vector<4x4x32xf32> to vector<1x4x4x32xf32>
    tpu.vector_store %arg7[%c0_393, %c0_394, %c0_395, %c0_396], %217 {strides = array<i32>} : memref<1x4x4x32xf32, #tpu.memory_space<vmem>>, vector<1x4x4x32xf32>,
    return
  }
  func.func @transform_0(%arg0: i32) -> (i32, i32, i32, i32) {
    %c0_i32 = arith.constant 0 : i32
    %c0_i32_0 = arith.constant 0 : i32
    %c0_i32_1 = arith.constant 0 : i32
    %c0_i32_2 = arith.constant 0 : i32
    return %arg0, %c0_i32, %c0_i32_0, %c0_i32_1 : i32, i32, i32, i32
  }
  func.func @transform_1(%arg0: i32) -> (i32, i32) {
    %c0_i32 = arith.constant 0 : i32
    %c0_i32_0 = arith.constant 0 : i32
    %c0_i32_1 = arith.constant 0 : i32
    return %c0_i32, %c0_i32_0 : i32, i32
  }
  func.func @transform_2(%arg0: i32) -> (i32, i32) {
    %c0_i32 = arith.constant 0 : i32
    %c0_i32_0 = arith.constant 0 : i32
    %c0_i32_1 = arith.constant 0 : i32
    return %c0_i32, %c0_i32_0 : i32, i32
  }
  func.func @transform_3(%arg0: i32) -> (i32, i32) {
    %c0_i32 = arith.constant 0 : i32
    %c0_i32_0 = arith.constant 0 : i32
    %c0_i32_1 = arith.constant 0 : i32
    return %c0_i32, %c0_i32_0 : i32, i32
  }
  func.func @transform_4(%arg0: i32) -> (i32, i32) {
    %c0_i32 = arith.constant 0 : i32
    %c0_i32_0 = arith.constant 0 : i32
    %c0_i32_1 = arith.constant 0 : i32
    return %c0_i32, %c0_i32_0 : i32, i32
  }
  func.func @transform_5(%arg0: i32) -> (i32, i32) {
    %c0_i32 = arith.constant 0 : i32
    %c0_i32_0 = arith.constant 0 : i32
    %c0_i32_1 = arith.constant 0 : i32
    return %c0_i32, %c0_i32_0 : i32, i32
  }
  func.func @transform_6(%arg0: i32) -> (i32, i32, i32, i32) {
    %c0_i32 = arith.constant 0 : i32
    %c0_i32_0 = arith.constant 0 : i32
    %c0_i32_1 = arith.constant 0 : i32
    %c0_i32_2 = arith.constant 0 : i32
    return %arg0, %c0_i32, %c0_i32_0, %c0_i32_1 : i32, i32, i32, i32
  }
}

module attributes {stable_mosaic.version = 11 : i64} {
  func.func @_fc_kernel(%arg0: i32, %arg1: memref<8x512xf32, #tpu.memory_space<vmem>>, %arg2: memref<512x384xf32, #tpu.memory_space<vmem>>, %arg3: memref<1x384xf32, #tpu.memory_space<vmem>>, %arg4: memref<384x64xf32, #tpu.memory_space<vmem>>, %arg5: memref<1x64xf32, #tpu.memory_space<vmem>>, %arg6: memref<8x64xf32, #tpu.memory_space<vmem>>) attributes {dimension_semantics = [#tpu.dimension_semantics<arbitrary>], iteration_bounds = array<i64: 1>, scalar_prefetch = 0 : i64, scratch_operands = 0 : i64, tpu.core_type = #tpu.core_type<tc>, window_params = [{pipeline_mode = #tpu.pipeline_mode<synchronous>, transform_indices = @transform_0, window_bounds = array<i64: 8, 512>}, {pipeline_mode = #tpu.pipeline_mode<synchronous>, transform_indices = @transform_1, window_bounds = array<i64: 512, 384>}, {pipeline_mode = #tpu.pipeline_mode<synchronous>, transform_indices = @transform_2, window_bounds = array<i64: 1, 384>}, {pipeline_mode = #tpu.pipeline_mode<synchronous>, transform_indices = @transform_3, window_bounds = array<i64: 384, 64>}, {pipeline_mode = #tpu.pipeline_mode<synchronous>, transform_indices = @transform_4, window_bounds = array<i64: 1, 64>}, {pipeline_mode = #tpu.pipeline_mode<synchronous>, transform_indices = @transform_5, window_bounds = array<i64: 8, 64>}]} {
    %c0 = arith.constant 0 : index
    %c0_0 = arith.constant 0 : index
    %0 = vector.load %arg1[%c0, %c0_0] : memref<8x512xf32, #tpu.memory_space<vmem>>, vector<8x512xf32>
    %c0_1 = arith.constant 0 : index
    %c0_2 = arith.constant 0 : index
    %1 = vector.load %arg2[%c0_1, %c0_2] : memref<512x384xf32, #tpu.memory_space<vmem>>, vector<512x384xf32>
    %cst = arith.constant dense<0.000000e+00> : vector<8x384xf32>
    %2 = tpu.matmul %0, %1, %cst {dimension_numbers = #tpu.dot_dimension_numbers<[1], [0], [0], [1], [0, 0, 1, 1], [], []>} : vector<8x512xf32>, vector<512x384xf32>, vector<8x384xf32> -> vector<8x384xf32>
    %c0_3 = arith.constant 0 : index
    %c0_4 = arith.constant 0 : index
    %3 = vector.load %arg3[%c0_3, %c0_4] : memref<1x384xf32, #tpu.memory_space<vmem>>, vector<1x384xf32>
    %4 = vector.broadcast %3 : vector<1x384xf32> to vector<8x384xf32>
    %5 = arith.addf %2, %4 : vector<8x384xf32>
    %cst_5 = arith.constant 0.00999999977 : f32
    %6 = vector.broadcast %cst_5 : f32 to vector<8x384xf32>
    %7 = arith.mulf %6, %5 : vector<8x384xf32>
    %8 = arith.maximumf %5, %7 : vector<8x384xf32>
    %c0_6 = arith.constant 0 : index
    %c0_7 = arith.constant 0 : index
    %9 = vector.load %arg4[%c0_6, %c0_7] : memref<384x64xf32, #tpu.memory_space<vmem>>, vector<384x64xf32>
    %cst_8 = arith.constant dense<0.000000e+00> : vector<8x64xf32>
    %10 = tpu.matmul %8, %9, %cst_8 {dimension_numbers = #tpu.dot_dimension_numbers<[1], [0], [0], [1], [0, 0, 1, 1], [], []>} : vector<8x384xf32>, vector<384x64xf32>, vector<8x64xf32> -> vector<8x64xf32>
    %c0_9 = arith.constant 0 : index
    %c0_10 = arith.constant 0 : index
    %11 = vector.load %arg5[%c0_9, %c0_10] : memref<1x64xf32, #tpu.memory_space<vmem>>, vector<1x64xf32>
    %12 = vector.broadcast %11 : vector<1x64xf32> to vector<8x64xf32>
    %13 = arith.addf %10, %12 : vector<8x64xf32>
    %cst_11 = arith.constant 0.00999999977 : f32
    %14 = vector.broadcast %cst_11 : f32 to vector<8x64xf32>
    %15 = arith.mulf %14, %13 : vector<8x64xf32>
    %16 = arith.maximumf %13, %15 : vector<8x64xf32>
    %c0_12 = arith.constant 0 : index
    %c0_13 = arith.constant 0 : index
    %17 = vector.load %arg6[%c0_12, %c0_13] : memref<8x64xf32, #tpu.memory_space<vmem>>, vector<8x64xf32>
    tpu.vector_store %arg6[%c0_12, %c0_13], %16 {strides = array<i32>} : memref<8x64xf32, #tpu.memory_space<vmem>>, vector<8x64xf32>,
    return
  }
  func.func @transform_0(%arg0: i32) -> (i32, i32) {
    %c0_i32 = arith.constant 0 : i32
    %c0_i32_0 = arith.constant 0 : i32
    %c0_i32_1 = arith.constant 0 : i32
    return %c0_i32, %c0_i32_0 : i32, i32
  }
  func.func @transform_1(%arg0: i32) -> (i32, i32) {
    %c0_i32 = arith.constant 0 : i32
    %c0_i32_0 = arith.constant 0 : i32
    %c0_i32_1 = arith.constant 0 : i32
    return %c0_i32, %c0_i32_0 : i32, i32
  }
  func.func @transform_2(%arg0: i32) -> (i32, i32) {
    %c0_i32 = arith.constant 0 : i32
    %c0_i32_0 = arith.constant 0 : i32
    %c0_i32_1 = arith.constant 0 : i32
    return %c0_i32, %c0_i32_0 : i32, i32
  }
  func.func @transform_3(%arg0: i32) -> (i32, i32) {
    %c0_i32 = arith.constant 0 : i32
    %c0_i32_0 = arith.constant 0 : i32
    %c0_i32_1 = arith.constant 0 : i32
    return %c0_i32, %c0_i32_0 : i32, i32
  }
  func.func @transform_4(%arg0: i32) -> (i32, i32) {
    %c0_i32 = arith.constant 0 : i32
    %c0_i32_0 = arith.constant 0 : i32
    %c0_i32_1 = arith.constant 0 : i32
    return %c0_i32, %c0_i32_0 : i32, i32
  }
  func.func @transform_5(%arg0: i32) -> (i32, i32) {
    %c0_i32 = arith.constant 0 : i32
    %c0_i32_0 = arith.constant 0 : i32
    %c0_i32_1 = arith.constant 0 : i32
    return %c0_i32, %c0_i32_0 : i32, i32
  }
}

</mosaic_0001>

<bundles_post_ra>
// kernel: image_embedding_forward.3
= control target key start
LH: loop header
LB: loop body
LE: loop exit
PB: predicated region body
PF: predicated region fallthrough
CT: control target
= control target key end

     0   :  { %vm885_vm0 = vmmov 0   ;;  %vm718_vm1 = vcmask 523264   ;;  %s1673_s1 = inlined_call_operand.vmem [shape: f32[512,384], index: 1, kind: input, shape index: {}]   ;;  %s1674_s0 = inlined_call_operand.vmem [shape: f32[8,512], index: 0, kind: input, shape index: {}]   ;;  %s1675_s3 = inlined_call_operand.vmem [shape: f32[384,64], index: 3, kind: input, shape index: {}]   ;;  %s1676_s2 = inlined_call_operand.vmem [shape: f32[1,384], index: 2, kind: input, shape index: {}]   ;;  %s1677_s4 = inlined_call_operand.vmem [shape: f32[1,64], index: 4, kind: input, shape index: {}]   ;;  %s1678_s5 = inlined_call_operand.vmem [shape: f32[8,64], index: 5, kind: output, shape index: {}]  }
   0x1   :  { %v70_v0 = vld [vmem:[%s1673_s1 + $0x170] sm:$0xff]  ;;  %v69_v2 = vld [vmem:[%s1673_s1 + $0x168] sm:$0xff]  ;;  %v67_v4 = vld [vmem:[%s1673_s1 + $0x158] sm:$0xff] }
   0x2   :  { %v166_v1 = vld [vmem:[%s1673_s1 + $0x470] sm:$0xff]  ;;  %233 = vmatprep.subr.mxu0 %v70_v0  ;;  %v165_v3 = vld [vmem:[%s1673_s1 + $0x468] sm:$0xff]  ;;  %v163_v5 = vld [vmem:[%s1673_s1 + $0x458] sm:$0xff] }
   0x3   :  { %304 = vmatprep.subr.mxu1 %v166_v1  ;;  %234 = vmatpush1.msra.mxu0 %v69_v2  ;;  %v66_v6 = vld [vmem:[%s1673_s1 + $0x150] sm:$0xff]  ;;  %v64_v8 = vld [vmem:[%s1673_s1 + $0x140] sm:$0xff]  ;;  %v63_v10 = vld [vmem:[%s1673_s1 + $0x138] sm:$0xff] }
   0x4   :  { %305 = vmatpush1.msra.mxu1 %v165_v3  ;;  %v162_v7 = vld [vmem:[%s1673_s1 + $0x450] sm:$0xff]  ;;  %235 = vmatprep.subr.mxu0 %v67_v4  ;;  %v160_v9 = vld [vmem:[%s1673_s1 + $0x440] sm:$0xff]  ;;  %v159_v11 = vld [vmem:[%s1673_s1 + $0x438] sm:$0xff] }
   0x5   :  { %306 = vmatprep.subr.mxu1 %v163_v5  ;;  %236 = vmatpush1.msra.mxu0 %v66_v6  ;;  %v61_v12 = vld [vmem:[%s1673_s1 + $0x128] sm:$0xff]  ;;  %v60_v14 = vld [vmem:[%s1673_s1 + $0x120] sm:$0xff]  ;;  %v58_v16 = vld [vmem:[%s1673_s1 + $0x110] sm:$0xff] }
   0x6   :  { %307 = vmatpush1.msra.mxu1 %v162_v7  ;;  %v157_v13 = vld [vmem:[%s1673_s1 + $0x428] sm:$0xff]  ;;  %237 = vmatprep.subr.mxu0 %v64_v8  ;;  %v156_v15 = vld [vmem:[%s1673_s1 + $0x420] sm:$0xff]  ;;  %v154_v17 = vld [vmem:[%s1673_s1 + $0x410] sm:$0xff] }
   0x7   :  { %308 = vmatprep.subr.mxu1 %v160_v9  ;;  %238 = vmatpush1.msra.mxu0 %v63_v10  ;;  %v57_v18 = vld [vmem:[%s1673_s1 + $0x108] sm:$0xff]  ;;  %v55_v20 = vld [vmem:[%s1673_s1 + $0xf8] sm:$0xff]  ;;  %v54_v22 = vld [vmem:[%s1673_s1 + $0xf0] sm:$0xff] }
   0x8   :  { %309 = vmatpush1.msra.mxu1 %v159_v11  ;;  %239 = vmatprep.subr.mxu0 %v61_v12  ;;  %v153_v19 = vld [vmem:[%s1673_s1 + $0x408] sm:$0xff]  ;;  %v151_v21 = vld [vmem:[%s1673_s1 + $0x3f8] sm:$0xff]  ;;  %v150_v23 = vld [vmem:[%s1673_s1 + $0x3f0] sm:$0xff] }
   0x9   :  { %310 = vmatprep.subr.mxu1 %v157_v13  ;;  %240 = vmatpush1.msra.mxu0 %v60_v14  ;;  %v52_v24 = vld [vmem:[%s1673_s1 + $0xe0] sm:$0xff]  ;;  %v51_v26 = vld [vmem:[%s1673_s1 + $0xd8] sm:$0xff]  ;;  %v49_v28 = vld [vmem:[%s1673_s1 + $0xc8] sm:$0xff] }
   0xa   :  { %311 = vmatpush1.msra.mxu1 %v156_v15  ;;  %241 = vmatprep.subr.mxu0 %v58_v16  ;;  %v148_v25 = vld [vmem:[%s1673_s1 + $0x3e0] sm:$0xff]  ;;  %v147_v27 = vld [vmem:[%s1673_s1 + $0x3d8] sm:$0xff]  ;;  %v145_v29 = vld [vmem:[%s1673_s1 + $0x3c8] sm:$0xff] }
   0xb   :  { %312 = vmatprep.subr.mxu1 %v154_v17  ;;  %242 = vmatpush1.msra.mxu0 %v57_v18  ;;  %v48_v30 = vld [vmem:[%s1673_s1 + $0xc0] sm:$0xff]  ;;  %v46_v32 = vld [vmem:[%s1673_s1 + $0xb0] sm:$0xff]  ;;  %v45_v34 = vld [vmem:[%s1673_s1 + $0xa8] sm:$0xff] }
   0xc   :  { %313 = vmatpush1.msra.mxu1 %v153_v19  ;;  %243 = vmatprep.subr.mxu0 %v55_v20  ;;  %v144_v31 = vld [vmem:[%s1673_s1 + $0x3c0] sm:$0xff]  ;;  %v142_v33 = vld [vmem:[%s1673_s1 + $0x3b0] sm:$0xff]  ;;  %v141_v35 = vld [vmem:[%s1673_s1 + $0x3a8] sm:$0xff] }
   0xd   :  { %314 = vmatprep.subr.mxu1 %v151_v21  ;;  %244 = vmatpush1.msra.mxu0 %v54_v22  ;;  %v43_v36 = vld [vmem:[%s1673_s1 + $0x98] sm:$0xff]  ;;  %v42_v38 = vld [vmem:[%s1673_s1 + $0x90] sm:$0xff]  ;;  %v40_v40 = vld [vmem:[%s1673_s1 + $0x80] sm:$0xff] }
   0xe   :  { %315 = vmatpush1.msra.mxu1 %v150_v23  ;;  %245 = vmatprep.subr.mxu0 %v52_v24  ;;  %v139_v37 = vld [vmem:[%s1673_s1 + $0x398] sm:$0xff]  ;;  %v138_v39 = vld [vmem:[%s1673_s1 + $0x390] sm:$0xff]  ;;  %v136_v41 = vld [vmem:[%s1673_s1 + $0x380] sm:$0xff] }
   0xf   :  { %316 = vmatprep.subr.mxu1 %v148_v25  ;;  %246 = vmatpush1.msra.mxu0 %v51_v26  ;;  %v39_v42 = vld [vmem:[%s1673_s1 + $0x78] sm:$0xff]  ;;  %v37_v44 = vld [vmem:[%s1673_s1 + $0x68] sm:$0xff]  ;;  %v36_v46 = vld [vmem:[%s1673_s1 + $0x60] sm:$0xff] }
  0x10   :  { %317 = vmatpush1.msra.mxu1 %v147_v27  ;;  %247 = vmatprep.subr.mxu0 %v49_v28  ;;  %v135_v43 = vld [vmem:[%s1673_s1 + $0x378] sm:$0xff]  ;;  %v133_v45 = vld [vmem:[%s1673_s1 + $0x368] sm:$0xff]  ;;  %v132_v47 = vld [vmem:[%s1673_s1 + $0x360] sm:$0xff] }
  0x11   :  { %318 = vmatprep.subr.mxu1 %v145_v29  ;;  %248 = vmatpush1.msra.mxu0 %v48_v30  ;;  %v34_v48 = vld [vmem:[%s1673_s1 + $0x50] sm:$0xff]  ;;  %v33_v50 = vld [vmem:[%s1673_s1 + $0x48] sm:$0xff]  ;;  %v31_v52 = vld [vmem:[%s1673_s1 + $0x38] sm:$0xff] }
  0x12   :  { %319 = vmatpush1.msra.mxu1 %v144_v31  ;;  %249 = vmatprep.subr.mxu0 %v46_v32  ;;  %v130_v49 = vld [vmem:[%s1673_s1 + $0x350] sm:$0xff]  ;;  %v129_v51 = vld [vmem:[%s1673_s1 + $0x348] sm:$0xff]  ;;  %v127_v53 = vld [vmem:[%s1673_s1 + $0x338] sm:$0xff] }
  0x13   :  { %320 = vmatprep.subr.mxu1 %v142_v33  ;;  %250 = vmatpush1.msra.mxu0 %v45_v34  ;;  %v30_v54 = vld [vmem:[%s1673_s1 + $0x30] sm:$0xff]  ;;  %v28_v56 = vld [vmem:[%s1673_s1 + $0x20] sm:$0xff]  ;;  %v27_v58 = vld [vmem:[%s1673_s1 + $0x18] sm:$0xff] }
  0x14   :  { %321 = vmatpush1.msra.mxu1 %v141_v35  ;;  %251 = vmatprep.subr.mxu0 %v43_v36  ;;  %v126_v55 = vld [vmem:[%s1673_s1 + $0x330] sm:$0xff]  ;;  %v124_v57 = vld [vmem:[%s1673_s1 + $0x320] sm:$0xff]  ;;  %v123_v59 = vld [vmem:[%s1673_s1 + $0x318] sm:$0xff] }
  0x15   :  { %322 = vmatprep.subr.mxu1 %v139_v37  ;;  %252 = vmatpush1.msra.mxu0 %v42_v38  ;;  %v25_v60 = vld [vmem:[%s1673_s1 + $0x8] sm:$0xff]  ;;  %v24_v62 = vld [vmem:[%s1673_s1] sm:$0xff]  ;;  %v118_v0 = vld [vmem:[%s1673_s1 + $0x2f0] sm:$0xff] }
  0x16   :  { %323 = vmatpush1.msra.mxu1 %v138_v39  ;;  %253 = vmatprep.subr.mxu0 %v40_v40  ;;  %v121_v61 = vld [vmem:[%s1673_s1 + $0x308] sm:$0xff]  ;;  %v120_v63 = vld [vmem:[%s1673_s1 + $0x300] sm:$0xff]  ;;  %v214_v1 = vld [vmem:[%s1673_s1 + $0x5f0] sm:$0xff] }
  0x17   :  { %324 = vmatprep.subr.mxu1 %v136_v41  ;;  %254 = vmatpush1.msra.mxu0 %v39_v42  ;;  %v117_v2 = vld [vmem:[%s1673_s1 + $0x2e8] sm:$0xff]  ;;  %v115_v4 = vld [vmem:[%s1673_s1 + $0x2d8] sm:$0xff]  ;;  %v114_v6 = vld [vmem:[%s1673_s1 + $0x2d0] sm:$0xff] }
  0x18   :  { %325 = vmatpush1.msra.mxu1 %v135_v43  ;;  %255 = vmatprep.subr.mxu0 %v37_v44  ;;  %v213_v3 = vld [vmem:[%s1673_s1 + $0x5e8] sm:$0xff]  ;;  %v211_v5 = vld [vmem:[%s1673_s1 + $0x5d8] sm:$0xff]  ;;  %v210_v7 = vld [vmem:[%s1673_s1 + $0x5d0] sm:$0xff] }
  0x19   :  { %326 = vmatprep.subr.mxu1 %v133_v45  ;;  %256 = vmatpush1.msra.mxu0 %v36_v46  ;;  %v112_v8 = vld [vmem:[%s1673_s1 + $0x2c0] sm:$0xff]  ;;  %v111_v10 = vld [vmem:[%s1673_s1 + $0x2b8] sm:$0xff]  ;;  %v109_v12 = vld [vmem:[%s1673_s1 + $0x2a8] sm:$0xff] }
  0x1a   :  { %327 = vmatpush1.msra.mxu1 %v132_v47  ;;  %257 = vmatprep.subr.mxu0 %v34_v48  ;;  %v208_v9 = vld [vmem:[%s1673_s1 + $0x5c0] sm:$0xff]  ;;  %v207_v11 = vld [vmem:[%s1673_s1 + $0x5b8] sm:$0xff]  ;;  %v205_v13 = vld [vmem:[%s1673_s1 + $0x5a8] sm:$0xff] }
  0x1b   :  { %328 = vmatprep.subr.mxu1 %v130_v49  ;;  %258 = vmatpush1.msra.mxu0 %v33_v50  ;;  %v108_v14 = vld [vmem:[%s1673_s1 + $0x2a0] sm:$0xff]  ;;  %v106_v16 = vld [vmem:[%s1673_s1 + $0x290] sm:$0xff]  ;;  %v105_v18 = vld [vmem:[%s1673_s1 + $0x288] sm:$0xff] }
  0x1c   :  { %329 = vmatpush1.msra.mxu1 %v129_v51  ;;  %259 = vmatprep.subr.mxu0 %v31_v52  ;;  %v204_v15 = vld [vmem:[%s1673_s1 + $0x5a0] sm:$0xff]  ;;  %v202_v17 = vld [vmem:[%s1673_s1 + $0x590] sm:$0xff]  ;;  %v201_v19 = vld [vmem:[%s1673_s1 + $0x588] sm:$0xff] }
  0x1d   :  { %330 = vmatprep.subr.mxu1 %v127_v53  ;;  %260 = vmatpush1.msra.mxu0 %v30_v54  ;;  %v103_v20 = vld [vmem:[%s1673_s1 + $0x278] sm:$0xff]  ;;  %v102_v22 = vld [vmem:[%s1673_s1 + $0x270] sm:$0xff]  ;;  %v100_v24 = vld [vmem:[%s1673_s1 + $0x260] sm:$0xff] }
  0x1e   :  { %331 = vmatpush1.msra.mxu1 %v126_v55  ;;  %261 = vmatprep.subr.mxu0 %v28_v56  ;;  %v199_v21 = vld [vmem:[%s1673_s1 + $0x578] sm:$0xff]  ;;  %v198_v23 = vld [vmem:[%s1673_s1 + $0x570] sm:$0xff]  ;;  %v196_v25 = vld [vmem:[%s1673_s1 + $0x560] sm:$0xff] }
  0x1f   :  { %332 = vmatprep.subr.mxu1 %v124_v57  ;;  %262 = vmatpush1.msra.mxu0 %v27_v58  ;;  %v99_v26 = vld [vmem:[%s1673_s1 + $0x258] sm:$0xff]  ;;  %v97_v28 = vld [vmem:[%s1673_s1 + $0x248] sm:$0xff]  ;;  %v96_v30 = vld [vmem:[%s1673_s1 + $0x240] sm:$0xff] }
  0x20   :  { %333 = vmatpush1.msra.mxu1 %v123_v59  ;;  %263 = vmatprep.subr.mxu0 %v25_v60  ;;  %v195_v27 = vld [vmem:[%s1673_s1 + $0x558] sm:$0xff]  ;;  %v193_v29 = vld [vmem:[%s1673_s1 + $0x548] sm:$0xff]  ;;  %v192_v31 = vld [vmem:[%s1673_s1 + $0x540] sm:$0xff] }
  0x21   :  { %334 = vmatprep.subr.mxu1 %v121_v61  ;;  %264 = vmatpush1.msra.mxu0 %v24_v62  ;;  %v94_v32 = vld [vmem:[%s1673_s1 + $0x230] sm:$0xff]  ;;  %v93_v34 = vld [vmem:[%s1673_s1 + $0x228] sm:$0xff]  ;;  %v91_v36 = vld [vmem:[%s1673_s1 + $0x218] sm:$0xff] }
  0x22   :  { %335 = vmatpush1.msra.mxu1 %v120_v63  ;;  %265 = vmatprep.subr.mxu0 %v118_v0  ;;  %v190_v33 = vld [vmem:[%s1673_s1 + $0x530] sm:$0xff]  ;;  %v189_v35 = vld [vmem:[%s1673_s1 + $0x528] sm:$0xff]  ;;  %v187_v37 = vld [vmem:[%s1673_s1 + $0x518] sm:$0xff] }
  0x23   :  { %336 = vmatprep.subr.mxu1 %v214_v1  ;;  %266 = vmatpush2.msra.mxu0 %v117_v2  ;;  %v90_v38 = vld [vmem:[%s1673_s1 + $0x210] sm:$0xff]  ;;  %v88_v40 = vld [vmem:[%s1673_s1 + $0x200] sm:$0xff]  ;;  %v87_v42 = vld [vmem:[%s1673_s1 + $0x1f8] sm:$0xff] }
  0x24   :  { %337 = vmatpush2.msra.mxu1 %v213_v3  ;;  %267 = vmatprep.subr.mxu0 %v115_v4  ;;  %v186_v39 = vld [vmem:[%s1673_s1 + $0x510] sm:$0xff]  ;;  %v184_v41 = vld [vmem:[%s1673_s1 + $0x500] sm:$0xff]  ;;  %v183_v43 = vld [vmem:[%s1673_s1 + $0x4f8] sm:$0xff] }
  0x25   :  { %338 = vmatprep.subr.mxu1 %v211_v5  ;;  %268 = vmatpush2.msra.mxu0 %v114_v6  ;;  %v85_v44 = vld [vmem:[%s1673_s1 + $0x1e8] sm:$0xff]  ;;  %v84_v46 = vld [vmem:[%s1673_s1 + $0x1e0] sm:$0xff]  ;;  %v82_v48 = vld [vmem:[%s1673_s1 + $0x1d0] sm:$0xff] }
  0x26   :  { %339 = vmatpush2.msra.mxu1 %v210_v7  ;;  %269 = vmatprep.subr.mxu0 %v112_v8  ;;  %v181_v45 = vld [vmem:[%s1673_s1 + $0x4e8] sm:$0xff]  ;;  %v180_v47 = vld [vmem:[%s1673_s1 + $0x4e0] sm:$0xff]  ;;  %v178_v49 = vld [vmem:[%s1673_s1 + $0x4d0] sm:$0xff] }
  0x27   :  { %340 = vmatprep.subr.mxu1 %v208_v9  ;;  %270 = vmatpush2.msra.mxu0 %v111_v10  ;;  %v81_v50 = vld [vmem:[%s1673_s1 + $0x1c8] sm:$0xff]  ;;  %v79_v52 = vld [vmem:[%s1673_s1 + $0x1b8] sm:$0xff]  ;;  %v78_v54 = vld [vmem:[%s1673_s1 + $0x1b0] sm:$0xff] }
  0x28   :  { %341 = vmatpush2.msra.mxu1 %v207_v11  ;;  %271 = vmatprep.subr.mxu0 %v109_v12  ;;  %v177_v51 = vld [vmem:[%s1673_s1 + $0x4c8] sm:$0xff]  ;;  %v175_v53 = vld [vmem:[%s1673_s1 + $0x4b8] sm:$0xff]  ;;  %v174_v55 = vld [vmem:[%s1673_s1 + $0x4b0] sm:$0xff] }
  0x29   :  { %342 = vmatprep.subr.mxu1 %v205_v13  ;;  %272 = vmatpush2.msra.mxu0 %v108_v14  ;;  %v76_v56 = vld [vmem:[%s1673_s1 + $0x1a0] sm:$0xff]  ;;  %v75_v58 = vld [vmem:[%s1673_s1 + $0x198] sm:$0xff]  ;;  %v73_v60 = vld [vmem:[%s1673_s1 + $0x188] sm:$0xff] }
  0x2a   :  { %343 = vmatpush2.msra.mxu1 %v204_v15  ;;  %273 = vmatprep.subr.mxu0 %v106_v16  ;;  %v172_v57 = vld [vmem:[%s1673_s1 + $0x4a0] sm:$0xff]  ;;  %v171_v59 = vld [vmem:[%s1673_s1 + $0x498] sm:$0xff]  ;;  %v169_v61 = vld [vmem:[%s1673_s1 + $0x488] sm:$0xff] }
  0x2b   :  { %344 = vmatprep.subr.mxu1 %v202_v17  ;;  %274 = vmatpush2.msra.mxu0 %v105_v18  ;;  %v72_v62 = vld [vmem:[%s1673_s1 + $0x180] sm:$0xff]  ;;  %v1300_v63 = vld [vmem:[%s1674_s0 + $0x8] sm:$0xff]  ;;  %v1313_v2 = vld [vmem:[%s1674_s0 + $0x18] sm:$0xff] }
  0x2c   :  { %345 = vmatpush2.msra.mxu1 %v201_v19  ;;  %275 = vmatprep.subr.mxu0 %v103_v20  ;;  %v168_v0 = vld [vmem:[%s1673_s1 + $0x480] sm:$0xff]  ;;  %v119_v3 = vld [vmem:[%s1673_s1 + $0x2f8] sm:$0xff]  ;;  %v1325_v5 = vld [vmem:[%s1674_s0 + $0x10] sm:$0xff] }
  0x2d   :  { %346 = vmatprep.subr.mxu1 %v199_v21  ;;  %276 = vmatpush2.msra.mxu0 %v102_v22  ;;  %v1308_v1 = vld [vmem:[%s1674_s0] sm:$0xff]  ;;  %v215_v4 = vld [vmem:[%s1673_s1 + $0x5f8] sm:$0xff]  ;;  %v113_v12 = vld [vmem:[%s1673_s1 + $0x2c8] sm:$0xff] }
  0x2e   :  { %347 = vmatpush2.msra.mxu1 %v198_v23  ;;  %277 = vmatprep.subr.mxu0 %v100_v24  ;;  %v71_v6 = vld [vmem:[%s1673_s1 + $0x178] sm:$0xff]  ;;  %v116_v8 = vld [vmem:[%s1673_s1 + $0x2e0] sm:$0xff]  ;;  %v209_v13 = vld [vmem:[%s1673_s1 + $0x5c8] sm:$0xff] }
  0x2f   :  { %348 = vmatprep.subr.mxu1 %v196_v25  ;;  %278 = vmatpush2.msra.mxu0 %v99_v26  ;;  %v167_v7 = vld [vmem:[%s1673_s1 + $0x478] sm:$0xff]  ;;  %v212_v9 = vld [vmem:[%s1673_s1 + $0x5e0] sm:$0xff]  ;;  %v65_v14 = vld [vmem:[%s1673_s1 + $0x148] sm:$0xff] }
  0x30   :  { %349 = vmatpush2.msra.mxu1 %v195_v27  ;;  %279 = vmatprep.subr.mxu0 %v97_v28  ;;  %v68_v10 = vld [vmem:[%s1673_s1 + $0x160] sm:$0xff]  ;;  %v161_v15 = vld [vmem:[%s1673_s1 + $0x448] sm:$0xff]  ;;  %v110_v16 = vld [vmem:[%s1673_s1 + $0x2b0] sm:$0xff] }
  0x31   :  { %350 = vmatprep.subr.mxu1 %v193_v29  ;;  %280 = vmatpush2.msra.mxu0 %v96_v30  ;;  %v164_v11 = vld [vmem:[%s1673_s1 + $0x460] sm:$0xff]  ;;  %v206_v17 = vld [vmem:[%s1673_s1 + $0x5b0] sm:$0xff]  ;;  %v107_v20 = vld [vmem:[%s1673_s1 + $0x298] sm:$0xff] }
  0x32   :  { %351 = vmatpush2.msra.mxu1 %v192_v31  ;;  %281 = vmatprep.subr.mxu0 %v94_v32  ;;  %v62_v18 = vld [vmem:[%s1673_s1 + $0x130] sm:$0xff]  ;;  %v203_v21 = vld [vmem:[%s1673_s1 + $0x598] sm:$0xff]  ;;  %v104_v24 = vld [vmem:[%s1673_s1 + $0x280] sm:$0xff] }
  0x33   :  { %352 = vmatprep.subr.mxu1 %v190_v33  ;;  %282 = vmatpush2.msra.mxu0 %v93_v34  ;;  %v158_v19 = vld [vmem:[%s1673_s1 + $0x430] sm:$0xff]  ;;  %v59_v22 = vld [vmem:[%s1673_s1 + $0x118] sm:$0xff]  ;;  %v200_v25 = vld [vmem:[%s1673_s1 + $0x580] sm:$0xff] }
  0x34   :  { %353 = vmatpush2.msra.mxu1 %v189_v35  ;;  %283 = vmatprep.subr.mxu0 %v91_v36  ;;  %v155_v23 = vld [vmem:[%s1673_s1 + $0x418] sm:$0xff]  ;;  %v56_v26 = vld [vmem:[%s1673_s1 + $0x100] sm:$0xff]  ;;  %v101_v28 = vld [vmem:[%s1673_s1 + $0x268] sm:$0xff] }
  0x35   :  { %354 = vmatprep.subr.mxu1 %v187_v37  ;;  %284 = vmatpush2.msra.mxu0 %v90_v38  ;;  %v152_v27 = vld [vmem:[%s1673_s1 + $0x400] sm:$0xff]  ;;  %v197_v29 = vld [vmem:[%s1673_s1 + $0x568] sm:$0xff]  ;;  %v98_v32 = vld [vmem:[%s1673_s1 + $0x250] sm:$0xff] }
  0x36   :  { %355 = vmatpush2.msra.mxu1 %v186_v39  ;;  %285 = vmatprep.subr.mxu0 %v88_v40  ;;  %v53_v30 = vld [vmem:[%s1673_s1 + $0xe8] sm:$0xff]  ;;  %v194_v33 = vld [vmem:[%s1673_s1 + $0x550] sm:$0xff]  ;;  %v95_v36 = vld [vmem:[%s1673_s1 + $0x238] sm:$0xff] }
  0x37   :  { %356 = vmatprep.subr.mxu1 %v184_v41  ;;  %286 = vmatpush2.msra.mxu0 %v87_v42  ;;  %v149_v31 = vld [vmem:[%s1673_s1 + $0x3e8] sm:$0xff]  ;;  %v50_v34 = vld [vmem:[%s1673_s1 + $0xd0] sm:$0xff]  ;;  %v191_v37 = vld [vmem:[%s1673_s1 + $0x538] sm:$0xff] }
  0x38   :  { %357 = vmatpush2.msra.mxu1 %v183_v43  ;;  %287 = vmatprep.subr.mxu0 %v85_v44  ;;  %v146_v35 = vld [vmem:[%s1673_s1 + $0x3d0] sm:$0xff]  ;;  %v47_v38 = vld [vmem:[%s1673_s1 + $0xb8] sm:$0xff]  ;;  %v92_v40 = vld [vmem:[%s1673_s1 + $0x220] sm:$0xff] }
  0x39   :  { %358 = vmatprep.subr.mxu1 %v181_v45  ;;  %288 = vmatpush2.msra.mxu0 %v84_v46  ;;  %v143_v39 = vld [vmem:[%s1673_s1 + $0x3b8] sm:$0xff]  ;;  %v188_v41 = vld [vmem:[%s1673_s1 + $0x520] sm:$0xff]  ;;  %v89_v44 = vld [vmem:[%s1673_s1 + $0x208] sm:$0xff] }
  0x3a   :  { %359 = vmatpush2.msra.mxu1 %v180_v47  ;;  %289 = vmatprep.subr.mxu0 %v82_v48  ;;  %v44_v42 = vld [vmem:[%s1673_s1 + $0xa0] sm:$0xff]  ;;  %v185_v45 = vld [vmem:[%s1673_s1 + $0x508] sm:$0xff]  ;;  %v86_v48 = vld [vmem:[%s1673_s1 + $0x1f0] sm:$0xff] }
  0x3b   :  { %360 = vmatprep.subr.mxu1 %v178_v49  ;;  %290 = vmatpush2.msra.mxu0 %v81_v50  ;;  %v140_v43 = vld [vmem:[%s1673_s1 + $0x3a0] sm:$0xff]  ;;  %v41_v46 = vld [vmem:[%s1673_s1 + $0x88] sm:$0xff]  ;;  %v182_v49 = vld [vmem:[%s1673_s1 + $0x4f0] sm:$0xff] }
  0x3c   :  { %361 = vmatpush2.msra.mxu1 %v177_v51  ;;  %291 = vmatprep.subr.mxu0 %v79_v52  ;;  %v137_v47 = vld [vmem:[%s1673_s1 + $0x388] sm:$0xff]  ;;  %v38_v50 = vld [vmem:[%s1673_s1 + $0x70] sm:$0xff]  ;;  %v83_v52 = vld [vmem:[%s1673_s1 + $0x1d8] sm:$0xff] }
  0x3d   :  { %362 = vmatprep.subr.mxu1 %v175_v53  ;;  %292 = vmatpush2.msra.mxu0 %v78_v54  ;;  %v134_v51 = vld [vmem:[%s1673_s1 + $0x370] sm:$0xff]  ;;  %v179_v53 = vld [vmem:[%s1673_s1 + $0x4d8] sm:$0xff] }
  0x3e   :  { %363 = vmatpush2.msra.mxu1 %v174_v55  ;;  %293 = vmatprep.subr.mxu0 %v76_v56  ;;  %v35_v54 = vld [vmem:[%s1673_s1 + $0x58] sm:$0xff]  ;;  %v80_v56 = vld [vmem:[%s1673_s1 + $0x1c0] sm:$0xff] }
  0x3f   :  { %364 = vmatprep.subr.mxu1 %v172_v57  ;;  %294 = vmatpush2.msra.mxu0 %v75_v58  ;;  %v131_v55 = vld [vmem:[%s1673_s1 + $0x358] sm:$0xff]  ;;  %v176_v57 = vld [vmem:[%s1673_s1 + $0x4c0] sm:$0xff] }
  0x40   :  { %365 = vmatpush2.msra.mxu1 %v171_v59  ;;  %295 = vmatprep.subr.mxu0 %v73_v60  ;;  %v32_v58 = vld [vmem:[%s1673_s1 + $0x40] sm:$0xff]  ;;  %v77_v60 = vld [vmem:[%s1673_s1 + $0x1a8] sm:$0xff] }
  0x41   :  { %366 = vmatprep.subr.mxu1 %v169_v61  ;;  %296 = vmatpush2.msra.mxu0 %v72_v62  ;;  %v128_v59 = vld [vmem:[%s1673_s1 + $0x340] sm:$0xff]  ;;  %v173_v61 = vld [vmem:[%s1673_s1 + $0x4a8] sm:$0xff] }
  0x42   :  { %297 = vmatprep.mubr.f32.mxu0 %v1300_v63  ;;  %367 = vmatpush2.msra.mxu1 %v168_v0  ;;  %v29_v62 = vld [vmem:[%s1673_s1 + $0x28] sm:$0xff] }
  0x43   :  { %298 = vmatmul.mubr.f32.vlgmr.msra.gmra.mxu0 %v1308_v1  ;;  %368 = vmatprep.mubr.f32.mxu1 %v1313_v2  ;;  %v125_v0 = vld [vmem:[%s1673_s1 + $0x328] sm:$0xff] }
  0x44   :  { %725 = vmatprep.subr.mxu0 %v119_v3  ;;  %760 = vmatprep.subr.mxu1 %v215_v4  ;;  %v74_v3 = vld [vmem:[%s1673_s1 + $0x190] sm:$0xff] }
  0x45   :  { %369 = vmatmul.mubr.f32.vlgmr.msra.gmra.mxu1 %v1325_v5  ;;  %726 = vmatpush3.msra.mxu0 %v71_v6  ;;  %v170_v4 = vld [vmem:[%s1673_s1 + $0x490] sm:$0xff] }
  0x46   :  { %761 = vmatpush3.msra.mxu1 %v167_v7  ;;  %727 = vmatprep.subr.mxu0 %v116_v8  ;;  %v26_v6 = vld [vmem:[%s1673_s1 + $0x10] sm:$0xff]  ;;  %v552_v8 = vld [vmem:[%s1675_s3 + $0xf8] sm:$0xff] }
  0x47   :  { %762 = vmatprep.subr.mxu1 %v212_v9  ;;  %728 = vmatpush3.msra.mxu0 %v68_v10  ;;  %v122_v7 = vld [vmem:[%s1673_s1 + $0x310] sm:$0xff]  ;;  %v536_v9 = vld [vmem:[%s1675_s3 + $0x78] sm:$0xff] }
  0x48   :  { %763 = vmatpush3.msra.mxu1 %v164_v11  ;;  %729 = vmatprep.subr.mxu0 %v113_v12  ;;  %v551_v10 = vld [vmem:[%s1675_s3 + $0xf0] sm:$0xff]  ;;  %v533_v11 = vld [vmem:[%s1675_s3 + $0x60] sm:$0xff]  ;;  %v548_v12 = vld [vmem:[%s1675_s3 + $0xd8] sm:$0xff] }
  0x49   :  { %764 = vmatprep.subr.mxu1 %v209_v13  ;;  %730 = vmatpush3.msra.mxu0 %v65_v14  ;;  %v532_v13 = vld [vmem:[%s1675_s3 + $0x58] sm:$0xff]  ;;  %v547_v14 = vld [vmem:[%s1675_s3 + $0xd0] sm:$0xff] }
  0x4a   :  { %765 = vmatpush3.msra.mxu1 %v161_v15  ;;  %731 = vmatprep.subr.mxu0 %v110_v16  ;;  %v531_v15 = vld [vmem:[%s1675_s3 + $0x50] sm:$0xff]  ;;  %v546_v16 = vld [vmem:[%s1675_s3 + $0xc8] sm:$0xff] }
  0x4b   :  { %766 = vmatprep.subr.mxu1 %v206_v17  ;;  %732 = vmatpush3.msra.mxu0 %v62_v18  ;;  %v530_v17 = vld [vmem:[%s1675_s3 + $0x48] sm:$0xff]  ;;  %v545_v18 = vld [vmem:[%s1675_s3 + $0xc0] sm:$0xff] }
  0x4c   :  { %767 = vmatpush3.msra.mxu1 %v158_v19  ;;  %733 = vmatprep.subr.mxu0 %v107_v20  ;;  %v529_v19 = vld [vmem:[%s1675_s3 + $0x40] sm:$0xff]  ;;  %v544_v20 = vld [vmem:[%s1675_s3 + $0xb8] sm:$0xff] }
  0x4d   :  { %768 = vmatprep.subr.mxu1 %v203_v21  ;;  %734 = vmatpush3.msra.mxu0 %v59_v22  ;;  %v528_v21 = vld [vmem:[%s1675_s3 + $0x38] sm:$0xff]  ;;  %v543_v22 = vld [vmem:[%s1675_s3 + $0xb0] sm:$0xff] }
  0x4e   :  { %769 = vmatpush3.msra.mxu1 %v155_v23  ;;  %735 = vmatprep.subr.mxu0 %v104_v24  ;;  %v527_v23 = vld [vmem:[%s1675_s3 + $0x30] sm:$0xff]  ;;  %v542_v24 = vld [vmem:[%s1675_s3 + $0xa8] sm:$0xff] }
  0x4f   :  { %770 = vmatprep.subr.mxu1 %v200_v25  ;;  %736 = vmatpush3.msra.mxu0 %v56_v26  ;;  %v526_v25 = vld [vmem:[%s1675_s3 + $0x28] sm:$0xff]  ;;  %v541_v26 = vld [vmem:[%s1675_s3 + $0xa0] sm:$0xff] }
  0x50   :  { %771 = vmatpush3.msra.mxu1 %v152_v27  ;;  %737 = vmatprep.subr.mxu0 %v101_v28  ;;  %v525_v27 = vld [vmem:[%s1675_s3 + $0x20] sm:$0xff]  ;;  %v540_v28 = vld [vmem:[%s1675_s3 + $0x98] sm:$0xff] }
  0x51   :  { %772 = vmatprep.subr.mxu1 %v197_v29  ;;  %738 = vmatpush3.msra.mxu0 %v53_v30  ;;  %v524_v29 = vld [vmem:[%s1675_s3 + $0x18] sm:$0xff]  ;;  %v539_v30 = vld [vmem:[%s1675_s3 + $0x90] sm:$0xff] }
  0x52   :  { %773 = vmatpush3.msra.mxu1 %v149_v31  ;;  %739 = vmatprep.subr.mxu0 %v98_v32  ;;  %v523_v31 = vld [vmem:[%s1675_s3 + $0x10] sm:$0xff]  ;;  %v538_v32 = vld [vmem:[%s1675_s3 + $0x88] sm:$0xff] }
  0x53   :  { %774 = vmatprep.subr.mxu1 %v194_v33  ;;  %740 = vmatpush3.msra.mxu0 %v50_v34  ;;  %v522_v33 = vld [vmem:[%s1675_s3 + $0x8] sm:$0xff]  ;;  %v537_v34 = vld [vmem:[%s1675_s3 + $0x80] sm:$0xff] }
  0x54   :  { %775 = vmatpush3.msra.mxu1 %v146_v35  ;;  %741 = vmatprep.subr.mxu0 %v95_v36  ;;  %v521_v35 = vld [vmem:[%s1675_s3] sm:$0xff]  ;;  %v568_v36 = vld [vmem:[%s1675_s3 + $0x178] sm:$0xff] }
  0x55   :  { %776 = vmatprep.subr.mxu1 %v191_v37  ;;  %742 = vmatpush3.msra.mxu0 %v47_v38  ;;  %v884_v37 = vmov 0.0   ;;  %v567_v38 = vld [vmem:[%s1675_s3 + $0x170] sm:$0xff] }
  0x56   :  { %777 = vmatpush3.msra.mxu1 %v143_v39  ;;  %743 = vmatprep.subr.mxu0 %v92_v40  ;;  %v566_v39 = vld [vmem:[%s1675_s3 + $0x168] sm:$0xff]  ;;  %v565_v40 = vld [vmem:[%s1675_s3 + $0x160] sm:$0xff] }
  0x57   :  { %778 = vmatprep.subr.mxu1 %v188_v41  ;;  %744 = vmatpush3.msra.mxu0 %v44_v42  ;;  %v564_v41 = vld [vmem:[%s1675_s3 + $0x158] sm:$0xff]  ;;  %v563_v42 = vld [vmem:[%s1675_s3 + $0x150] sm:$0xff] }
  0x58   :  { %779 = vmatpush3.msra.mxu1 %v140_v43  ;;  %745 = vmatprep.subr.mxu0 %v89_v44  ;;  %v562_v43 = vld [vmem:[%s1675_s3 + $0x148] sm:$0xff]  ;;  %v561_v44 = vld [vmem:[%s1675_s3 + $0x140] sm:$0xff] }
  0x59   :  { %780 = vmatprep.subr.mxu1 %v185_v45  ;;  %746 = vmatpush3.msra.mxu0 %v41_v46  ;;  %v560_v45 = vld [vmem:[%s1675_s3 + $0x138] sm:$0xff]  ;;  %v559_v46 = vld [vmem:[%s1675_s3 + $0x130] sm:$0xff] }
  0x5a   :  { %781 = vmatpush3.msra.mxu1 %v137_v47  ;;  %747 = vmatprep.subr.mxu0 %v86_v48  ;;  %v558_v47 = vld [vmem:[%s1675_s3 + $0x128] sm:$0xff]  ;;  %v557_v48 = vld [vmem:[%s1675_s3 + $0x120] sm:$0xff] }
  0x5b   :  { %782 = vmatprep.subr.mxu1 %v182_v49  ;;  %748 = vmatpush3.msra.mxu0 %v38_v50  ;;  %v556_v49 = vld [vmem:[%s1675_s3 + $0x118] sm:$0xff]  ;;  %v555_v50 = vld [vmem:[%s1675_s3 + $0x110] sm:$0xff] }
  0x5c   :  { %783 = vmatpush3.msra.mxu1 %v134_v51  ;;  %749 = vmatprep.subr.mxu0 %v83_v52  ;;  %v554_v51 = vld [vmem:[%s1675_s3 + $0x108] sm:$0xff]  ;;  %v553_v52 = vld [vmem:[%s1675_s3 + $0x100] sm:$0xff] }
  0x5d   :  { %784 = vmatprep.subr.mxu1 %v179_v53  ;;  %750 = vmatpush3.msra.mxu0 %v35_v54  ;;  %v218_v53 = vlaneseq }
  0x5e   :  { %785 = vmatpush3.msra.mxu1 %v131_v55  ;;  %751 = vmatprep.subr.mxu0 %v80_v56  ;;  %v216_v56 = vld [vmem:[%s1676_s2] sm:$0x7] }
  0x5f   :  { %786 = vmatprep.subr.mxu1 %v176_v57  ;;  %752 = vmatpush3.msra.mxu0 %v32_v58  ;;  %v219_v54 = vshrl.u32 %v218_v53, 7 }
  0x60   :  { %787 = vmatpush3.msra.mxu1 %v128_v59  ;;  %753 = vmatprep.subr.mxu0 %v77_v60 }
  0x61   :  { %788 = vmatprep.subr.mxu1 %v173_v61  ;;  %754 = vmatpush3.msra.mxu0 %v29_v62  ;;  %v220_v55 = vsub.s32 0, %v219_v54  ;;  %v224_v57 = vsub.s32 1, %v219_v54 }
  0x62   :  { %789 = vmatpush3.msra.mxu1 %v125_v0  ;;  %755 = vmatprep.subr.mxu0 %v74_v3 }
  0x63   :  { %790 = vmatprep.subr.mxu1 %v170_v4  ;;  %756 = vmatpush3.msra.mxu0 %v26_v6  ;;  %v221_v58 = vrot.slane %v216_v56, %v220_v55  ;;  %v225_v59 = vrot.slane %v216_v56, %v224_v57 }
  0x64   :  { %439 = vmatprep.mubr.f32.mxu0 %v1300_v63  ;;  %791 = vmatpush3.msra.mxu1 %v122_v7  ;;  %v535_v63 = vld [vmem:[%s1675_s3 + $0x70] sm:$0xff] }
  0x65   :  { %509 = vmatprep.mubr.f32.mxu1 %v1313_v2  ;;  %440 = vmatmul.mubr.f32.vlgmr.msra.gmra.mxu0 %v1308_v1  ;;  %v550_v2 = vld [vmem:[%s1675_s3 + $0xe8] sm:$0xff] }
  0x66   :  { %510 = vmatmul.mubr.f32.vlgmr.msra.gmra.mxu1 %v1325_v5  ;;  %795 = vmatprep.subr.mxu0 %v552_v8  ;;  %v534_v1 = vld [vmem:[%s1675_s3 + $0x68] sm:$0xff]  ;;  %v549_v5 = vld [vmem:[%s1675_s3 + $0xe0] sm:$0xff] }
  0x67   :  { %796 = vmatpush3.msra.mxu0 %v536_v9  ;;  %847 = vmatprep.subr.mxu1 %v884_v37 }
  0x68   :  { %797 = vmatprep.subr.mxu0 %v551_v10  ;;  %848 = vmatpush3.msra.mxu1 %v568_v36 }
  0x69   :  { %798 = vmatpush3.msra.mxu0 %v535_v63  ;;  %849 = vmatprep.subr.mxu1 %v884_v37 }
  0x6a   :  { %799 = vmatprep.subr.mxu0 %v550_v2  ;;  %850 = vmatpush3.msra.mxu1 %v567_v38  ;;  %v228_v2 = vsub.s32 2, %v219_v54 }
  0x6b   :  { %800 = vmatpush3.msra.mxu0 %v534_v1  ;;  %851 = vmatprep.subr.mxu1 %v884_v37 }
  0x6c   :  { %801 = vmatprep.subr.mxu0 %v549_v5  ;;  %852 = vmatpush3.msra.mxu1 %v566_v39 }
  0x6d   :  { %802 = vmatpush3.msra.mxu0 %v533_v11  ;;  %853 = vmatprep.subr.mxu1 %v884_v37  ;;  %v229_v11 = vrot.slane %v216_v56, %v228_v2 }
  0x6e   :  { %803 = vmatprep.subr.mxu0 %v548_v12  ;;  %854 = vmatpush3.msra.mxu1 %v565_v40 }
  0x6f   :  { %804 = vmatpush3.msra.mxu0 %v532_v13  ;;  %855 = vmatprep.subr.mxu1 %v884_v37 }
  0x70   :  { %805 = vmatprep.subr.mxu0 %v547_v14  ;;  %856 = vmatpush3.msra.mxu1 %v564_v41 }
  0x71   :  { %806 = vmatpush3.msra.mxu0 %v531_v15  ;;  %857 = vmatprep.subr.mxu1 %v884_v37 }
  0x72   :  { %807 = vmatprep.subr.mxu0 %v546_v16  ;;  %858 = vmatpush3.msra.mxu1 %v563_v42 }
  0x73   :  { %808 = vmatpush3.msra.mxu0 %v530_v17  ;;  %859 = vmatprep.subr.mxu1 %v884_v37 }
  0x74   :  { %809 = vmatprep.subr.mxu0 %v545_v18  ;;  %860 = vmatpush3.msra.mxu1 %v562_v43 }
  0x75   :  { %810 = vmatpush3.msra.mxu0 %v529_v19  ;;  %861 = vmatprep.subr.mxu1 %v884_v37 }
  0x76   :  { %811 = vmatprep.subr.mxu0 %v544_v20  ;;  %862 = vmatpush3.msra.mxu1 %v561_v44 }
  0x77   :  { %812 = vmatpush3.msra.mxu0 %v528_v21  ;;  %863 = vmatprep.subr.mxu1 %v884_v37 }
  0x78   :  { %813 = vmatprep.subr.mxu0 %v543_v22  ;;  %864 = vmatpush3.msra.mxu1 %v560_v45 }
  0x79   :  { %814 = vmatpush3.msra.mxu0 %v527_v23  ;;  %865 = vmatprep.subr.mxu1 %v884_v37  ;;  %v724_v23 = vld [vmem:[%s1677_s4] ss:$0 sm:$0xff] }
  0x7a   :  { %815 = vmatprep.subr.mxu0 %v542_v24  ;;  %866 = vmatpush3.msra.mxu1 %v559_v46 }
  0x7b   :  { %816 = vmatpush3.msra.mxu0 %v526_v25  ;;  %867 = vmatprep.subr.mxu1 %v884_v37 }
  0x7c   :  { %817 = vmatprep.subr.mxu0 %v541_v26  ;;  %868 = vmatpush3.msra.mxu1 %v558_v47 }
  0x7d   :  { %818 = vmatpush3.msra.mxu0 %v525_v27  ;;  %869 = vmatprep.subr.mxu1 %v884_v37 }
  0x7e   :  { %819 = vmatprep.subr.mxu0 %v540_v28  ;;  %870 = vmatpush3.msra.mxu1 %v557_v48 }
  0x7f   :  { %820 = vmatpush3.msra.mxu0 %v524_v29  ;;  %871 = vmatprep.subr.mxu1 %v884_v37 }
  0x80   :  { %821 = vmatprep.subr.mxu0 %v539_v30  ;;  %872 = vmatpush3.msra.mxu1 %v556_v49 }
  0x81   :  { %822 = vmatpush3.msra.mxu0 %v523_v31  ;;  %873 = vmatprep.subr.mxu1 %v884_v37 }
  0x82   :  { %823 = vmatprep.subr.mxu0 %v538_v32  ;;  %874 = vmatpush3.msra.mxu1 %v555_v50 }
  0x83   :  { %824 = vmatpush3.msra.mxu0 %v522_v33  ;;  %875 = vmatprep.subr.mxu1 %v884_v37 }
  0x84   :  { %825 = vmatprep.subr.mxu0 %v537_v34  ;;  %876 = vmatpush3.msra.mxu1 %v554_v51 }
  0x85   :  { %826 = vmatpush3.msra.mxu0 %v521_v35  ;;  %877 = vmatprep.subr.mxu1 %v884_v37 }
  0x86   :  { %878 = vmatpush3.msra.mxu1 %v553_v52  ;;  %879 = vmatprep.mubr.msk.f32.mxu1 %vm885_vm0, %v884_v37 }
 0x103   :  { %v299_v60 = vpop.f32.mrf.mxu0 }
 0x104   :  { %v300_v61 = vadd.f32 %v299_v60, %v221_v58 }
 0x105   :  { %v370_v62 = vpop.f32.mrf.mxu1  ;;  %v301_v0 = vpop.f32.mrf.mxu0 }
 0x106   :  { %v371_v3 = vadd.f32 %v370_v62, %v300_v61  ;;  %v302_v4 = vadd.f32 %v301_v0, %v225_v59 }
 0x107   :  { %v372_v6 = vpop.f32.mrf.mxu1 }
 0x108   :  { %v373_v7 = vadd.f32 %v372_v6, %v302_v4  ;;  %v515_v8 = vmul.f32 0.01, %v371_v3 }
 0x10a   :  { %v516_v9 = vmul.f32 0.01, %v373_v7  ;;  %v518_v63 = vmax.f32 %v371_v3, %v515_v8 }
 0x10c   :  { %v519_v10 = vmax.f32 %v373_v7, %v516_v9 }
 0x10e   :  { %640 = vmatprep.mubr.f32.mxu0 %v519_v10 }
 0x10f   :  { %641 = vmatmul.mubr.f32.vlgmr.msra.gmra.mxu0 %v518_v63 }
 0x125   :  { %v757_v1 = vpop.f32.mrf.mxu0 }
 0x126   :  { %v792_v5 = vpop.f32.mrf.mxu1 }
 0x127   :  { %v758_v12 = vpop.f32.mrf.mxu0 }
 0x128   :  { %v793_v13 = vpop.f32.mrf.mxu1  ;;  %v759_v14 = vadd.f32 %v758_v12, %v757_v1 }
 0x129   :  { %v794_v16 = vadd.f32 %v793_v13, %v792_v5 }
 0x12a   :  { %v442_v15 = vadd.f32 %v759_v14, %v229_v11 }
 0x12c   :  { %v512_v17 = vadd.f32 %v794_v16, %v442_v15 }
 0x12e   :  { %v517_v18 = vmul.f32 0.01, %v512_v17 }
 0x130   :  { %v520_v19 = vmax.f32 %v512_v17, %v517_v18 }
 0x132   :  { %880 = vmatmul.mubr.f32.vlgmr.msra.gmra.mxu1 %v520_v19 }
 0x1cf   :  { %v827_v20 = vpop.f32.mrf.mxu0 }
 0x1d1   :  { %v828_v21 = vpop.f32.mrf.mxu0 }
 0x1d2   :  { %v829_v22 = vadd.f32 %v828_v21, %v827_v20 }
 0x1d4   :  { %v643_v24 = vadd.f32 %v829_v22, %v724_v23 }
 0x1f2   :  { %v712_v25 = vpop.f32.mrf.mxu1 }
 0x1f3   :  { %v713_v26 = vadd.f32 %v712_v25, %v643_v24 }
 0x1f4   :  { %v881_v27 = vpop.f32.mrf.mxu1 }
 0x1f5   :  { %v716_v28 = vmul.f32 0.01, %v713_v26 }
 0x1f7   :  { %v717_v29 = vmax.f32 %v713_v26, %v716_v28 }
 0x1f9   :  { %719 = vst.msk [vmem:[%s1678_s5] sm:$0xff] %vm718_vm1, %v717_v29 }

// kernel: image_embedding_forward.2
= control target key start
LH: loop header
LB: loop body
LE: loop exit
PB: predicated region body
PF: predicated region fallthrough
CT: control target
= control target key end

     0   :  { %s8805_s21 = smov 0   ;;  %s13184_s0 = inlined_call_operand.vmem [shape: f32[2,20,20,8], index: 0, kind: input, shape index: {}]   ;;  %s13185_s1 = inlined_call_operand.vmem [shape: f32[200,32], index: 1, kind: input, shape index: {}]   ;;  %s13186_s2 = inlined_call_operand.vmem [shape: f32[1,32], index: 2, kind: input, shape index: {}]   ;;  %s13187_s3 = inlined_call_operand.vmem [shape: f32[800,32], index: 3, kind: input, shape index: {}]   ;;  %s13188_s4 = inlined_call_operand.vmem [shape: f32[1,32], index: 4, kind: input, shape index: {}]   ;;  %s13189_s5 = inlined_call_operand.vmem [shape: f32[32,32], index: 5, kind: input, shape index: {}]   ;;  %s13190_s6 = inlined_call_operand.vmem [shape: f32[2,4,4,32], index: 6, kind: output, shape index: {}]  }
   0x1 LB: > { %s7673_s22 = sadd.s32 4294967295, %s8752_s21   ;;  %p7677_p0 = scmp.ge.s32.totalorder %s8752_s21, 1  ;;  %s8752_s21 = sphi %s8805_s21, %s16_s21  }
   0x2   : > { %p212_p1 = scmp.lt.s32.totalorder %s8752_s21, 3 }
   0x4   : > { %p213_p2 = pnand %p7677_p0, %p212_p1 }
   0x5   : > { %p242_p3 = scmp.lt.s32.totalorder (!%p213_p2), %s7673_s22, 1  ;;  %s8754_s27 = smov (!%p213_p2), 8  }
   0x6   : > { %216 = sbr.rel (%p213_p2) target bundleno = 2881 (0xb41), region = 44  ;;  %s8755_s28 = smov (!%p213_p2), 16  }
   0x7   : > { %s8756_s29 = smov (!%p213_p2), 24   ;;  %s8757_s30 = smov (!%p213_p2), 32  }
   0x8   : > { %s8758_s7 = smov (!%p213_p2), 40   ;;  %s8759_s8 = smov (!%p213_p2), 48  }
   0x9   : > { %s8760_s9 = smov (!%p213_p2), 56   ;;  %s8761_s10 = smov (!%p213_p2), 64  }
   0xa   : > { %s8763_s12 = smov (!%p213_p2), 72   ;;  %s8764_s15 = smov (!%p213_p2), 80  }
   0xb   : > { %s13457_s22 = smov (!%p242_p3, %s7673_s22), 1  ;;  %vm290_vm0 = vcmask 64512   ;;  %vm483_vm1 = vcmask 130112   ;;  %vm676_vm2 = vcmask 195712   ;;  %vm869_vm3 = vcmask 261312   ;;  %s8765_s20 = smov 88  }
   0xc   : > { %s8646_s23 = smul.u32 480, %s13457_s22  ;;  %vm13196_vm4 = vcmask 326912   ;;  %vm1256_vm5 = vcmask 392512   ;;  %vm1449_vm6 = vcmask 458112   ;;  %vm13194_vm7 = vcmask 523712   ;;  %s8766_s16 = smov 96  }
   0xd   : > { %s8767_s11 = smov 104   ;;  %s8768_s24 = smov 112   ;;  %vm1835_vm8 = vcmask 589312   ;;  %vm2028_vm9 = vcmask 654912   ;;  %vm13193_vm10 = vcmask 720512   ;;  %vm13191_vm11 = vcmask 786112  }
   0xe   : > { %s8819_s26 = scalar_lea.vmem %s13184_s0, %s8646_s23  ;;  %s8769_s23 = smov 120   ;;  %vm2608_vm12 = vcmask 851712   ;;  %vm2801_vm13 = vcmask 917312   ;;  %vm13192_vm14 = vcmask 982912   ;;  %vm3188_vm15 = vcmask 1048512  }
   0xf   : > { %v325_v0 = vld [vmem:[%s8819_s26 + $0x19] sm:$0xff]  ;;  %v323_v1 = vld [vmem:[%s8819_s26 + $0x1] sm:$0xff]  ;;  %v324_v3 = vld [vmem:[%s8819_s26 + $0x9] sm:$0xff] }
  0x10   : > { %391 = vrot.lane.b32.xlu1 %v325_v0, %s8754_s27  ;;  %387 = vrot.lane.b32.xlu0 %v323_v1, %s8754_s27  ;;  %v326_v2 = vld [vmem:[%s8819_s26 + $0x21] sm:$0xff]  ;;  %v328_v4 = vld [vmem:[%s8819_s26 + $0x39] sm:$0xff] }
  0x11   : > { %v327_v5 = vld [vmem:[%s8819_s26 + $0x31] sm:$0xff]  ;;  %v329_v7 = vld [vmem:[%s8819_s26 + $0x49] sm:$0xff]  ;;  %v331_v9 = vld [vmem:[%s8819_s26 + $0x61] sm:$0xff] }
  0x12   : > { %v330_v6 = vld [vmem:[%s8819_s26 + $0x51] sm:$0xff]  ;;  %v332_v8 = vld [vmem:[%s8819_s26 + $0x69] sm:$0xff]  ;;  %v334_v10 = vld [vmem:[%s8819_s26 + $0x81] sm:$0xff] }
  0x13   : > { %v333_v11 = vld [vmem:[%s8819_s26 + $0x79] sm:$0xff]  ;;  %v335_v15 = vld [vmem:[%s8819_s26 + $0x91] sm:$0xff]  ;;  %v259_v17 = vld [vmem:[%s8819_s26 + $0x8] sm:$0xff] }
  0x14   : > { %393 = vrot.lane.b32.xlu1 %v326_v2, %s8754_s27  ;;  %389 = vrot.lane.b32.xlu0 %v324_v3, %s8754_s27  ;;  %v8846_v12 = vld [vmem:[%s8819_s26 + $0x18] sm:$0xff]  ;;  %v258_v13 = vld [vmem:[%s8819_s26] sm:$0xff]  ;;  %292 = vst.msk [vmem:[#allocation2 + $0x10] sm:$0xff] %vm290_vm0, %v259_v17 }
  0x15   : > { %v336_v14 = vld [vmem:[%s8819_s26 + $0x99] sm:$0xff]  ;;  %293 = vst.msk [vmem:[#allocation2 + $0x20] sm:$0xff] %vm290_vm0, %v8846_v12  ;;  %291 = vst.msk [vmem:[#allocation2] sm:$0xff] %vm290_vm0, %v258_v13  ;;  %v8865_v19 = vld [vmem:[%s8819_s26 + $0x30] sm:$0xff] }
  0x16   : > { %v8855_v16 = vld [vmem:[%s8819_s26 + $0x20] sm:$0xff]  ;;  %v8862_v18 = vld [vmem:[%s8819_s26 + $0x38] sm:$0xff]  ;;  %295 = vst.msk [vmem:[#allocation2 + $0x40] sm:$0xff] %vm290_vm0, %v8865_v19  ;;  %v8874_v20 = vld [vmem:[%s8819_s26 + $0x50] sm:$0xff] }
  0x17   : > { %294 = vst.msk [vmem:[#allocation2 + $0x30] sm:$0xff] %vm290_vm0, %v8855_v16  ;;  %296 = vst.msk [vmem:[#allocation2 + $0x50] sm:$0xff] %vm290_vm0, %v8862_v18  ;;  %v338_v21 = vld [vmem:[%s8819_s26 + $0xb1] sm:$0xff]  ;;  %v337_v22 = vld [vmem:[%s8819_s26 + $0xa9] sm:$0xff] }
  0x18   : > { %397 = vrot.lane.b32.xlu1 %v328_v4, %s8754_s27  ;;  %395 = vrot.lane.b32.xlu0 %v327_v5, %s8754_s27  ;;  %298 = vst.msk [vmem:[#allocation2 + $0x70] sm:$0xff] %vm290_vm0, %v8874_v20  ;;  %v8881_v23 = vld [vmem:[%s8819_s26 + $0x48] sm:$0xff]  ;;  %v8889_v25 = vld [vmem:[%s8819_s26 + $0x60] sm:$0xff] }
  0x19   : > { %297 = vst.msk [vmem:[#allocation2 + $0x60] sm:$0xff] %vm290_vm0, %v8881_v23  ;;  %v8886_v24 = vld [vmem:[%s8819_s26 + $0x68] sm:$0xff]  ;;  %299 = vst.msk [vmem:[#allocation2 + $0x80] sm:$0xff] %vm290_vm0, %v8889_v25  ;;  %v8896_v26 = vld [vmem:[%s8819_s26 + $0x80] sm:$0xff] }
  0x1a   : > { %300 = vst.msk [vmem:[#allocation2 + $0x90] sm:$0xff] %vm290_vm0, %v8886_v24  ;;  %v8899_v27 = vld [vmem:[%s8819_s26 + $0x78] sm:$0xff]  ;;  %v340_v28 = vld [vmem:[%s8819_s26 + $0xc9] sm:$0xff]  ;;  %302 = vst.msk [vmem:[#allocation2 + $0xb0] sm:$0xff] %vm290_vm0, %v8896_v26 }
  0x1b   : > { %301 = vst.msk [vmem:[#allocation2 + $0xa0] sm:$0xff] %vm290_vm0, %v8899_v27  ;;  %v339_v29 = vld [vmem:[%s8819_s26 + $0xc1] sm:$0xff]  ;;  %v8910_v30 = vld [vmem:[%s8819_s26 + $0x98] sm:$0xff]  ;;  %v8913_v31 = vld [vmem:[%s8819_s26 + $0x90] sm:$0xff] }
  0x1c   : > { %401 = vrot.lane.b32.xlu1 %v330_v6, %s8754_s27  ;;  %399 = vrot.lane.b32.xlu0 %v329_v7, %s8754_s27  ;;  %304 = vst.msk [vmem:[#allocation2 + $0xd0] sm:$0xff] %vm290_vm0, %v8910_v30  ;;  %303 = vst.msk [vmem:[#allocation2 + $0xc0] sm:$0xff] %vm290_vm0, %v8913_v31  ;;  %v8920_v32 = vld [vmem:[%s8819_s26 + $0xb0] sm:$0xff]  ;;  %v8923_v33 = vld [vmem:[%s8819_s26 + $0xa8] sm:$0xff] }
  0x1d   : > { %306 = vst.msk [vmem:[#allocation2 + $0xf0] sm:$0xff] %vm290_vm0, %v8920_v32  ;;  %305 = vst.msk [vmem:[#allocation2 + $0xe0] sm:$0xff] %vm290_vm0, %v8923_v33  ;;  %v8930_v34 = vld [vmem:[%s8819_s26 + $0xc8] sm:$0xff]  ;;  %v8938_v36 = vld [vmem:[%s8819_s26 + $0xc0] sm:$0xff] }
  0x1e   : > { %v342_v35 = vld [vmem:[%s8819_s26 + $0xe1] sm:$0xff]  ;;  %308 = vst.msk [vmem:[#allocation2 + $0x110] sm:$0xff] %vm290_vm0, %v8930_v34  ;;  %v341_v37 = vld [vmem:[%s8819_s26 + $0xd9] sm:$0xff]  ;;  %307 = vst.msk [vmem:[#allocation2 + $0x100] sm:$0xff] %vm290_vm0, %v8938_v36 }
  0x1f   : > { %v8944_v38 = vld [vmem:[%s8819_s26 + $0xe0] sm:$0xff]  ;;  %v8947_v39 = vld [vmem:[%s8819_s26 + $0xd8] sm:$0xff]  ;;  %v8959_v41 = vld [vmem:[%s8819_s26 + $0xf0] sm:$0xff] }
  0x20   : > { %405 = vrot.lane.b32.xlu1 %v332_v8, %s8754_s27  ;;  %403 = vrot.lane.b32.xlu0 %v331_v9, %s8754_s27  ;;  %310 = vst.msk [vmem:[#allocation2 + $0x130] sm:$0xff] %vm290_vm0, %v8944_v38  ;;  %309 = vst.msk [vmem:[#allocation2 + $0x120] sm:$0xff] %vm290_vm0, %v8947_v39  ;;  %v8954_v40 = vld [vmem:[%s8819_s26 + $0xf8] sm:$0xff]  ;;  %v8966_v42 = vld [vmem:[%s8819_s26 + $0x110] sm:$0xff] }
  0x21   : > { %312 = vst.msk [vmem:[#allocation2 + $0x150] sm:$0xff] %vm290_vm0, %v8954_v40  ;;  %311 = vst.msk [vmem:[#allocation2 + $0x140] sm:$0xff] %vm290_vm0, %v8959_v41  ;;  %v8969_v43 = vld [vmem:[%s8819_s26 + $0x108] sm:$0xff]  ;;  %v344_v44 = vld [vmem:[%s8819_s26 + $0xf9] sm:$0xff] }
  0x22   : > { %v343_v45 = vld [vmem:[%s8819_s26 + $0xf1] sm:$0xff]  ;;  %314 = vst.msk [vmem:[#allocation2 + $0x170] sm:$0xff] %vm290_vm0, %v8966_v42  ;;  %313 = vst.msk [vmem:[#allocation2 + $0x160] sm:$0xff] %vm290_vm0, %v8969_v43  ;;  %v8978_v46 = vld [vmem:[%s8819_s26 + $0x128] sm:$0xff] }
  0x23   : > { %316 = vst.msk [vmem:[#allocation2 + $0x190] sm:$0xff] %vm290_vm0, %v8978_v46  ;;  %v8983_v47 = vld [vmem:[%s8819_s26 + $0x120] sm:$0xff]  ;;  %v8991_v49 = vld [vmem:[%s8819_s26 + $0x138] sm:$0xff]  ;;  %v345_v51 = vld [vmem:[%s8819_s26 + $0x109] sm:$0xff] }
  0x24   : > { %409 = vrot.lane.b32.xlu1 %v334_v10, %s8754_s27  ;;  %407 = vrot.lane.b32.xlu0 %v333_v11, %s8754_s27  ;;  %315 = vst.msk [vmem:[#allocation2 + $0x180] sm:$0xff] %vm290_vm0, %v8983_v47  ;;  %v8988_v48 = vld [vmem:[%s8819_s26 + $0x140] sm:$0xff]  ;;  %317 = vst.msk [vmem:[#allocation2 + $0x1a0] sm:$0xff] %vm290_vm0, %v8991_v49  ;;  %v346_v50 = vld [vmem:[%s8819_s26 + $0x111] sm:$0xff] }
  0x25   : > { %318 = vst.msk [vmem:[#allocation2 + $0x1b0] sm:$0xff] %vm290_vm0, %v8988_v48  ;;  %v9002_v52 = vld [vmem:[%s8819_s26 + $0x150] sm:$0xff]  ;;  %v9005_v53 = vld [vmem:[%s8819_s26 + $0x158] sm:$0xff]  ;;  %v347_v55 = vld [vmem:[%s8819_s26 + $0x121] sm:$0xff] }
  0x26   : > { %319 = vst.msk [vmem:[#allocation2 + $0x1c0] sm:$0xff] %vm290_vm0, %v9002_v52  ;;  %320 = vst.msk [vmem:[#allocation2 + $0x1d0] sm:$0xff] %vm290_vm0, %v9005_v53  ;;  %v348_v54 = vld [vmem:[%s8819_s26 + $0x129] sm:$0xff]  ;;  %v350_v58 = vld [vmem:[%s8819_s26 + $0x141] sm:$0xff] }
  0x27   : > { %v9016_v56 = vld [vmem:[%s8819_s26 + $0x168] sm:$0xff]  ;;  %v9019_v57 = vld [vmem:[%s8819_s26 + $0x170] sm:$0xff]  ;;  %v349_v59 = vld [vmem:[%s8819_s26 + $0x139] sm:$0xff] }
  0x28   : > { %413 = vrot.lane.b32.xlu1 %v336_v14, %s8754_s27  ;;  %411 = vrot.lane.b32.xlu0 %v335_v15, %s8754_s27  ;;  %321 = vst.msk [vmem:[#allocation2 + $0x1e0] sm:$0xff] %vm290_vm0, %v9016_v56  ;;  %322 = vst.msk [vmem:[#allocation2 + $0x1f0] sm:$0xff] %vm290_vm0, %v9019_v57  ;;  %v352_v60 = vld [vmem:[%s8819_s26 + $0x159] sm:$0xff]  ;;  %v351_v61 = vld [vmem:[%s8819_s26 + $0x151] sm:$0xff] }
  0x29   : > { %v354_v62 = vld [vmem:[%s8819_s26 + $0x171] sm:$0xff]  ;;  %v353_v63 = vld [vmem:[%s8819_s26 + $0x169] sm:$0xff]  ;;  %v518_v3 = vld [vmem:[%s8819_s26 + $0x1a] sm:$0xff] }
  0x2a   : > { %v517_v0 = vld [vmem:[%s8819_s26 + $0xa] sm:$0xff]  ;;  %v516_v1 = vld [vmem:[%s8819_s26 + $0x2] sm:$0xff]  ;;  %v521_v4 = vld [vmem:[%s8819_s26 + $0x3a] sm:$0xff] }
  0x2b   : > { %v519_v2 = vld [vmem:[%s8819_s26 + $0x22] sm:$0xff]  ;;  %v520_v5 = vld [vmem:[%s8819_s26 + $0x32] sm:$0xff]  ;;  %v522_v7 = vld [vmem:[%s8819_s26 + $0x4a] sm:$0xff] }
  0x2c   : > { %417 = vrot.lane.b32.xlu1 %v338_v21, %s8754_s27  ;;  %415 = vrot.lane.b32.xlu0 %v337_v22, %s8754_s27  ;;  %v523_v6 = vld [vmem:[%s8819_s26 + $0x52] sm:$0xff]  ;;  %v525_v8 = vld [vmem:[%s8819_s26 + $0x6a] sm:$0xff] }
  0x2d   : > { %v524_v9 = vld [vmem:[%s8819_s26 + $0x62] sm:$0xff]  ;;  %v526_v11 = vld [vmem:[%s8819_s26 + $0x7a] sm:$0xff]  ;;  %v528_v14 = vld [vmem:[%s8819_s26 + $0x92] sm:$0xff] }
  0x2e   : > { %v527_v10 = vld [vmem:[%s8819_s26 + $0x82] sm:$0xff]  ;;  %v529_v13 = vld [vmem:[%s8819_s26 + $0x9a] sm:$0xff]  ;;  %v531_v15 = vld [vmem:[%s8819_s26 + $0xb2] sm:$0xff] }
  0x2f   : > { %v530_v17 = vld [vmem:[%s8819_s26 + $0xaa] sm:$0xff]  ;;  %v532_v22 = vld [vmem:[%s8819_s26 + $0xc2] sm:$0xff] }
  0x30   : > { %421 = vrot.lane.b32.xlu1 %v340_v28, %s8754_s27  ;;  %419 = vrot.lane.b32.xlu0 %v339_v29, %s8754_s27  ;;  %v533_v21 = vld [vmem:[%s8819_s26 + $0xca] sm:$0xff]  ;;  %v535_v28 = vld [vmem:[%s8819_s26 + $0xe2] sm:$0xff] }
  0x31   : > { %v534_v29 = vld [vmem:[%s8819_s26 + $0xda] sm:$0xff] }
  0x34   : > { %425 = vrot.lane.b32.xlu1 %v342_v35, %s8754_s27  ;;  %423 = vrot.lane.b32.xlu0 %v341_v37, %s8754_s27  ;;  %v537_v35 = vld [vmem:[%s8819_s26 + $0xfa] sm:$0xff]  ;;  %v536_v37 = vld [vmem:[%s8819_s26 + $0xf2] sm:$0xff] }
  0x38   : > { %429 = vrot.lane.b32.xlu1 %v344_v44, %s8754_s27  ;;  %427 = vrot.lane.b32.xlu0 %v343_v45, %s8754_s27  ;;  %v539_v44 = vld [vmem:[%s8819_s26 + $0x112] sm:$0xff]  ;;  %v538_v45 = vld [vmem:[%s8819_s26 + $0x10a] sm:$0xff] }
  0x3c   : > { %433 = vrot.lane.b32.xlu1 %v346_v50, %s8754_s27  ;;  %431 = vrot.lane.b32.xlu0 %v345_v51, %s8754_s27  ;;  %v541_v50 = vld [vmem:[%s8819_s26 + $0x12a] sm:$0xff]  ;;  %v540_v51 = vld [vmem:[%s8819_s26 + $0x122] sm:$0xff] }
  0x40   : > { %437 = vrot.lane.b32.xlu1 %v348_v54, %s8754_s27  ;;  %435 = vrot.lane.b32.xlu0 %v347_v55, %s8754_s27  ;;  %v543_v54 = vld [vmem:[%s8819_s26 + $0x142] sm:$0xff]  ;;  %v542_v55 = vld [vmem:[%s8819_s26 + $0x13a] sm:$0xff] }
  0x44   : > { %441 = vrot.lane.b32.xlu1 %v350_v58, %s8754_s27  ;;  %439 = vrot.lane.b32.xlu0 %v349_v59, %s8754_s27 }
  0x48   : > { %445 = vrot.lane.b32.xlu1 %v352_v60, %s8754_s27  ;;  %443 = vrot.lane.b32.xlu0 %v351_v61, %s8754_s27  ;;  %v545_v60 = vld [vmem:[%s8819_s26 + $0x15a] sm:$0xff]  ;;  %v544_v61 = vld [vmem:[%s8819_s26 + $0x152] sm:$0xff] }
  0x4c   : > { %449 = vrot.lane.b32.xlu1 %v354_v62, %s8754_s27  ;;  %447 = vrot.lane.b32.xlu0 %v353_v63, %s8754_s27 }
  0x50   : > { %582 = vrot.lane.b32.xlu1 %v517_v0, %s8755_s28  ;;  %580 = vrot.lane.b32.xlu0 %v516_v1, %s8755_s28  ;;  %v547_v0 = vld [vmem:[%s8819_s26 + $0x172] sm:$0xff]  ;;  %v546_v1 = vld [vmem:[%s8819_s26 + $0x16a] sm:$0xff] }
  0x54   : > { %586 = vrot.lane.b32.xlu1 %v519_v2, %s8755_s28  ;;  %584 = vrot.lane.b32.xlu0 %v518_v3, %s8755_s28 }
  0x58   : > { %590 = vrot.lane.b32.xlu1 %v521_v4, %s8755_s28  ;;  %588 = vrot.lane.b32.xlu0 %v520_v5, %s8755_s28  ;;  %v710_v4 = vld [vmem:[%s8819_s26 + $0xb] sm:$0xff]  ;;  %v709_v5 = vld [vmem:[%s8819_s26 + $0x3] sm:$0xff] }
  0x5c   : > { %594 = vrot.lane.b32.xlu1 %v523_v6, %s8755_s28  ;;  %592 = vrot.lane.b32.xlu0 %v522_v7, %s8755_s28 }
  0x60   : > { %598 = vrot.lane.b32.xlu1 %v525_v8, %s8755_s28  ;;  %596 = vrot.lane.b32.xlu0 %v524_v9, %s8755_s28  ;;  %v712_v8 = vld [vmem:[%s8819_s26 + $0x23] sm:$0xff]  ;;  %v711_v9 = vld [vmem:[%s8819_s26 + $0x1b] sm:$0xff] }
  0x64   : > { %602 = vrot.lane.b32.xlu1 %v527_v10, %s8755_s28  ;;  %600 = vrot.lane.b32.xlu0 %v526_v11, %s8755_s28 }
  0x68   : > { %606 = vrot.lane.b32.xlu1 %v529_v13, %s8755_s28  ;;  %604 = vrot.lane.b32.xlu0 %v528_v14, %s8755_s28  ;;  %v714_v13 = vld [vmem:[%s8819_s26 + $0x3b] sm:$0xff]  ;;  %v713_v14 = vld [vmem:[%s8819_s26 + $0x33] sm:$0xff] }
  0x6c   : > { %610 = vrot.lane.b32.xlu1 %v531_v15, %s8755_s28  ;;  %608 = vrot.lane.b32.xlu0 %v530_v17, %s8755_s28 }
  0x70   : > { %614 = vrot.lane.b32.xlu1 %v533_v21, %s8755_s28  ;;  %612 = vrot.lane.b32.xlu0 %v532_v22, %s8755_s28  ;;  %v716_v21 = vld [vmem:[%s8819_s26 + $0x53] sm:$0xff]  ;;  %v715_v22 = vld [vmem:[%s8819_s26 + $0x4b] sm:$0xff] }
  0x74   : > { %618 = vrot.lane.b32.xlu1 %v535_v28, %s8755_s28  ;;  %616 = vrot.lane.b32.xlu0 %v534_v29, %s8755_s28 }
  0x78   : > { %622 = vrot.lane.b32.xlu1 %v537_v35, %s8755_s28  ;;  %620 = vrot.lane.b32.xlu0 %v536_v37, %s8755_s28  ;;  %v718_v35 = vld [vmem:[%s8819_s26 + $0x6b] sm:$0xff]  ;;  %v717_v37 = vld [vmem:[%s8819_s26 + $0x63] sm:$0xff] }
  0x7c   : > { %626 = vrot.lane.b32.xlu1 %v539_v44, %s8755_s28  ;;  %624 = vrot.lane.b32.xlu0 %v538_v45, %s8755_s28 }
  0x80   : > { %630 = vrot.lane.b32.xlu1 %v541_v50, %s8755_s28  ;;  %628 = vrot.lane.b32.xlu0 %v540_v51, %s8755_s28  ;;  %v720_v50 = vld [vmem:[%s8819_s26 + $0x83] sm:$0xff]  ;;  %v719_v51 = vld [vmem:[%s8819_s26 + $0x7b] sm:$0xff] }
  0x82   : > { %v392_v58 = vpop.permute.xlu1 %391  ;;  %v388_v59 = vpop.permute.xlu0 %387 }
  0x83   : > { %486 = vst.msk [vmem:[#allocation2 + $0x20] sm:$0xff] %vm483_vm1, %v392_v58  ;;  %484 = vst.msk [vmem:[#allocation2] sm:$0xff] %vm483_vm1, %v388_v59  ;;  %v722_v58 = vld [vmem:[%s8819_s26 + $0x9b] sm:$0xff]  ;;  %v721_v59 = vld [vmem:[%s8819_s26 + $0x93] sm:$0xff] }
  0x84   : > { %634 = vrot.lane.b32.xlu1 %v543_v54, %s8755_s28  ;;  %632 = vrot.lane.b32.xlu0 %v542_v55, %s8755_s28 }
  0x86   : > { %v394_v62 = vpop.permute.xlu1 %393  ;;  %v390_v63 = vpop.permute.xlu0 %389 }
  0x87   : > { %487 = vst.msk [vmem:[#allocation2 + $0x30] sm:$0xff] %vm483_vm1, %v394_v62  ;;  %485 = vst.msk [vmem:[#allocation2 + $0x10] sm:$0xff] %vm483_vm1, %v390_v63  ;;  %v724_v62 = vld [vmem:[%s8819_s26 + $0xb3] sm:$0xff]  ;;  %v723_v63 = vld [vmem:[%s8819_s26 + $0xab] sm:$0xff] }
  0x88   : > { %638 = vrot.lane.b32.xlu1 %v545_v60, %s8755_s28  ;;  %636 = vrot.lane.b32.xlu0 %v544_v61, %s8755_s28 }
  0x8a   : > { %v398_v2 = vpop.permute.xlu1 %397  ;;  %v396_v3 = vpop.permute.xlu0 %395 }
  0x8b   : > { %489 = vst.msk [vmem:[#allocation2 + $0x50] sm:$0xff] %vm483_vm1, %v398_v2  ;;  %488 = vst.msk [vmem:[#allocation2 + $0x40] sm:$0xff] %vm483_vm1, %v396_v3  ;;  %v726_v2 = vld [vmem:[%s8819_s26 + $0xcb] sm:$0xff]  ;;  %v725_v3 = vld [vmem:[%s8819_s26 + $0xc3] sm:$0xff] }
  0x8c   : > { %642 = vrot.lane.b32.xlu1 %v547_v0, %s8755_s28  ;;  %640 = vrot.lane.b32.xlu0 %v546_v1, %s8755_s28 }
  0x8e   : > { %v402_v6 = vpop.permute.xlu1 %401  ;;  %v400_v7 = vpop.permute.xlu0 %399 }
  0x8f   : > { %491 = vst.msk [vmem:[#allocation2 + $0x70] sm:$0xff] %vm483_vm1, %v402_v6  ;;  %490 = vst.msk [vmem:[#allocation2 + $0x60] sm:$0xff] %vm483_vm1, %v400_v7  ;;  %v728_v6 = vld [vmem:[%s8819_s26 + $0xe3] sm:$0xff]  ;;  %v727_v7 = vld [vmem:[%s8819_s26 + $0xdb] sm:$0xff] }
  0x90   : > { %775 = vrot.lane.b32.xlu1 %v710_v4, %s8756_s29  ;;  %773 = vrot.lane.b32.xlu0 %v709_v5, %s8756_s29 }
  0x92   : > { %v406_v10 = vpop.permute.xlu1 %405  ;;  %v404_v11 = vpop.permute.xlu0 %403 }
  0x93   : > { %493 = vst.msk [vmem:[#allocation2 + $0x90] sm:$0xff] %vm483_vm1, %v406_v10  ;;  %492 = vst.msk [vmem:[#allocation2 + $0x80] sm:$0xff] %vm483_vm1, %v404_v11  ;;  %v730_v10 = vld [vmem:[%s8819_s26 + $0xfb] sm:$0xff]  ;;  %v729_v11 = vld [vmem:[%s8819_s26 + $0xf3] sm:$0xff] }
  0x94   : > { %779 = vrot.lane.b32.xlu1 %v712_v8, %s8756_s29  ;;  %777 = vrot.lane.b32.xlu0 %v711_v9, %s8756_s29 }
  0x96   : > { %v410_v15 = vpop.permute.xlu1 %409  ;;  %v408_v17 = vpop.permute.xlu0 %407 }
  0x97   : > { %495 = vst.msk [vmem:[#allocation2 + $0xb0] sm:$0xff] %vm483_vm1, %v410_v15  ;;  %494 = vst.msk [vmem:[#allocation2 + $0xa0] sm:$0xff] %vm483_vm1, %v408_v17  ;;  %v732_v15 = vld [vmem:[%s8819_s26 + $0x113] sm:$0xff]  ;;  %v731_v17 = vld [vmem:[%s8819_s26 + $0x10b] sm:$0xff] }
  0x98   : > { %783 = vrot.lane.b32.xlu1 %v714_v13, %s8756_s29  ;;  %781 = vrot.lane.b32.xlu0 %v713_v14, %s8756_s29 }
  0x9a   : > { %v414_v28 = vpop.permute.xlu1 %413  ;;  %v412_v29 = vpop.permute.xlu0 %411 }
  0x9b   : > { %497 = vst.msk [vmem:[#allocation2 + $0xd0] sm:$0xff] %vm483_vm1, %v414_v28  ;;  %496 = vst.msk [vmem:[#allocation2 + $0xc0] sm:$0xff] %vm483_vm1, %v412_v29  ;;  %v734_v28 = vld [vmem:[%s8819_s26 + $0x12b] sm:$0xff]  ;;  %v733_v29 = vld [vmem:[%s8819_s26 + $0x123] sm:$0xff] }
  0x9c   : > { %787 = vrot.lane.b32.xlu1 %v716_v21, %s8756_s29  ;;  %785 = vrot.lane.b32.xlu0 %v715_v22, %s8756_s29 }
  0x9e   : > { %v418_v44 = vpop.permute.xlu1 %417  ;;  %v416_v45 = vpop.permute.xlu0 %415 }
  0x9f   : > { %499 = vst.msk [vmem:[#allocation2 + $0xf0] sm:$0xff] %vm483_vm1, %v418_v44  ;;  %498 = vst.msk [vmem:[#allocation2 + $0xe0] sm:$0xff] %vm483_vm1, %v416_v45  ;;  %v736_v44 = vld [vmem:[%s8819_s26 + $0x143] sm:$0xff]  ;;  %v735_v45 = vld [vmem:[%s8819_s26 + $0x13b] sm:$0xff] }
  0xa0   : > { %791 = vrot.lane.b32.xlu1 %v718_v35, %s8756_s29  ;;  %789 = vrot.lane.b32.xlu0 %v717_v37, %s8756_s29 }
  0xa2   : > { %v422_v54 = vpop.permute.xlu1 %421  ;;  %v420_v55 = vpop.permute.xlu0 %419 }
  0xa3   : > { %501 = vst.msk [vmem:[#allocation2 + $0x110] sm:$0xff] %vm483_vm1, %v422_v54  ;;  %500 = vst.msk [vmem:[#allocation2 + $0x100] sm:$0xff] %vm483_vm1, %v420_v55  ;;  %v738_v54 = vld [vmem:[%s8819_s26 + $0x15b] sm:$0xff]  ;;  %v737_v55 = vld [vmem:[%s8819_s26 + $0x153] sm:$0xff] }
  0xa4   : > { %795 = vrot.lane.b32.xlu1 %v720_v50, %s8756_s29  ;;  %793 = vrot.lane.b32.xlu0 %v719_v51, %s8756_s29 }
  0xa6   : > { %v426_v60 = vpop.permute.xlu1 %425  ;;  %v424_v61 = vpop.permute.xlu0 %423 }
  0xa7   : > { %503 = vst.msk [vmem:[#allocation2 + $0x130] sm:$0xff] %vm483_vm1, %v426_v60  ;;  %502 = vst.msk [vmem:[#allocation2 + $0x120] sm:$0xff] %vm483_vm1, %v424_v61  ;;  %v740_v60 = vld [vmem:[%s8819_s26 + $0x173] sm:$0xff]  ;;  %v739_v61 = vld [vmem:[%s8819_s26 + $0x16b] sm:$0xff] }
  0xa8   : > { %799 = vrot.lane.b32.xlu1 %v722_v58, %s8756_s29  ;;  %797 = vrot.lane.b32.xlu0 %v721_v59, %s8756_s29 }
  0xaa   : > { %v430_v0 = vpop.permute.xlu1 %429  ;;  %v428_v1 = vpop.permute.xlu0 %427 }
  0xab   : > { %505 = vst.msk [vmem:[#allocation2 + $0x150] sm:$0xff] %vm483_vm1, %v430_v0  ;;  %504 = vst.msk [vmem:[#allocation2 + $0x140] sm:$0xff] %vm483_vm1, %v428_v1  ;;  %v903_v0 = vld [vmem:[%s8819_s26 + $0xc] sm:$0xff]  ;;  %v902_v1 = vld [vmem:[%s8819_s26 + $0x4] sm:$0xff] }
  0xac   : > { %803 = vrot.lane.b32.xlu1 %v724_v62, %s8756_s29  ;;  %801 = vrot.lane.b32.xlu0 %v723_v63, %s8756_s29 }
  0xae   : > { %v434_v4 = vpop.permute.xlu1 %433  ;;  %v432_v5 = vpop.permute.xlu0 %431 }
  0xaf   : > { %507 = vst.msk [vmem:[#allocation2 + $0x170] sm:$0xff] %vm483_vm1, %v434_v4  ;;  %506 = vst.msk [vmem:[#allocation2 + $0x160] sm:$0xff] %vm483_vm1, %v432_v5  ;;  %v905_v4 = vld [vmem:[%s8819_s26 + $0x24] sm:$0xff]  ;;  %v904_v5 = vld [vmem:[%s8819_s26 + $0x1c] sm:$0xff] }
  0xb0   : > { %807 = vrot.lane.b32.xlu1 %v726_v2, %s8756_s29  ;;  %805 = vrot.lane.b32.xlu0 %v725_v3, %s8756_s29 }
  0xb2   : > { %v438_v8 = vpop.permute.xlu1 %437  ;;  %v436_v9 = vpop.permute.xlu0 %435 }
  0xb3   : > { %509 = vst.msk [vmem:[#allocation2 + $0x190] sm:$0xff] %vm483_vm1, %v438_v8  ;;  %508 = vst.msk [vmem:[#allocation2 + $0x180] sm:$0xff] %vm483_vm1, %v436_v9  ;;  %v907_v8 = vld [vmem:[%s8819_s26 + $0x3c] sm:$0xff]  ;;  %v906_v9 = vld [vmem:[%s8819_s26 + $0x34] sm:$0xff] }
  0xb4   : > { %811 = vrot.lane.b32.xlu1 %v728_v6, %s8756_s29  ;;  %809 = vrot.lane.b32.xlu0 %v727_v7, %s8756_s29 }
  0xb6   : > { %v442_v13 = vpop.permute.xlu1 %441  ;;  %v440_v14 = vpop.permute.xlu0 %439 }
  0xb7   : > { %511 = vst.msk [vmem:[#allocation2 + $0x1b0] sm:$0xff] %vm483_vm1, %v442_v13  ;;  %510 = vst.msk [vmem:[#allocation2 + $0x1a0] sm:$0xff] %vm483_vm1, %v440_v14  ;;  %v909_v13 = vld [vmem:[%s8819_s26 + $0x54] sm:$0xff]  ;;  %v908_v14 = vld [vmem:[%s8819_s26 + $0x4c] sm:$0xff] }
  0xb8   : > { %815 = vrot.lane.b32.xlu1 %v730_v10, %s8756_s29  ;;  %813 = vrot.lane.b32.xlu0 %v729_v11, %s8756_s29 }
  0xba   : > { %v446_v21 = vpop.permute.xlu1 %445  ;;  %v444_v22 = vpop.permute.xlu0 %443 }
  0xbb   : > { %513 = vst.msk [vmem:[#allocation2 + $0x1d0] sm:$0xff] %vm483_vm1, %v446_v21  ;;  %512 = vst.msk [vmem:[#allocation2 + $0x1c0] sm:$0xff] %vm483_vm1, %v444_v22  ;;  %v911_v21 = vld [vmem:[%s8819_s26 + $0x6c] sm:$0xff]  ;;  %v910_v22 = vld [vmem:[%s8819_s26 + $0x64] sm:$0xff] }
  0xbc   : > { %819 = vrot.lane.b32.xlu1 %v732_v15, %s8756_s29  ;;  %817 = vrot.lane.b32.xlu0 %v731_v17, %s8756_s29 }
  0xbe   : > { %v450_v35 = vpop.permute.xlu1 %449  ;;  %v448_v37 = vpop.permute.xlu0 %447 }
  0xbf   : > { %515 = vst.msk [vmem:[#allocation2 + $0x1f0] sm:$0xff] %vm483_vm1, %v450_v35  ;;  %514 = vst.msk [vmem:[#allocation2 + $0x1e0] sm:$0xff] %vm483_vm1, %v448_v37  ;;  %v913_v35 = vld [vmem:[%s8819_s26 + $0x84] sm:$0xff]  ;;  %v912_v37 = vld [vmem:[%s8819_s26 + $0x7c] sm:$0xff] }
  0xc0   : > { %823 = vrot.lane.b32.xlu1 %v734_v28, %s8756_s29  ;;  %821 = vrot.lane.b32.xlu0 %v733_v29, %s8756_s29 }
  0xc2   : > { %v583_v50 = vpop.permute.xlu1 %582  ;;  %v581_v51 = vpop.permute.xlu0 %580 }
  0xc3   : > { %678 = vst.msk [vmem:[#allocation2 + $0x10] sm:$0xff] %vm676_vm2, %v583_v50  ;;  %677 = vst.msk [vmem:[#allocation2] sm:$0xff] %vm676_vm2, %v581_v51  ;;  %v915_v50 = vld [vmem:[%s8819_s26 + $0x9c] sm:$0xff]  ;;  %v914_v51 = vld [vmem:[%s8819_s26 + $0x94] sm:$0xff] }
  0xc4   : > { %827 = vrot.lane.b32.xlu1 %v736_v44, %s8756_s29  ;;  %825 = vrot.lane.b32.xlu0 %v735_v45, %s8756_s29 }
  0xc6   : > { %v587_v58 = vpop.permute.xlu1 %586  ;;  %v585_v59 = vpop.permute.xlu0 %584 }
  0xc7   : > { %680 = vst.msk [vmem:[#allocation2 + $0x30] sm:$0xff] %vm676_vm2, %v587_v58  ;;  %679 = vst.msk [vmem:[#allocation2 + $0x20] sm:$0xff] %vm676_vm2, %v585_v59  ;;  %v917_v58 = vld [vmem:[%s8819_s26 + $0xb4] sm:$0xff]  ;;  %v916_v59 = vld [vmem:[%s8819_s26 + $0xac] sm:$0xff] }
  0xc8   : > { %831 = vrot.lane.b32.xlu1 %v738_v54, %s8756_s29  ;;  %829 = vrot.lane.b32.xlu0 %v737_v55, %s8756_s29 }
  0xca   : > { %v591_v62 = vpop.permute.xlu1 %590  ;;  %v589_v63 = vpop.permute.xlu0 %588 }
  0xcb   : > { %682 = vst.msk [vmem:[#allocation2 + $0x50] sm:$0xff] %vm676_vm2, %v591_v62  ;;  %681 = vst.msk [vmem:[#allocation2 + $0x40] sm:$0xff] %vm676_vm2, %v589_v63  ;;  %v919_v62 = vld [vmem:[%s8819_s26 + $0xcc] sm:$0xff]  ;;  %v918_v63 = vld [vmem:[%s8819_s26 + $0xc4] sm:$0xff] }
  0xcc   : > { %835 = vrot.lane.b32.xlu1 %v740_v60, %s8756_s29  ;;  %833 = vrot.lane.b32.xlu0 %v739_v61, %s8756_s29 }
  0xce   : > { %v595_v2 = vpop.permute.xlu1 %594  ;;  %v593_v3 = vpop.permute.xlu0 %592 }
  0xcf   : > { %684 = vst.msk [vmem:[#allocation2 + $0x70] sm:$0xff] %vm676_vm2, %v595_v2  ;;  %683 = vst.msk [vmem:[#allocation2 + $0x60] sm:$0xff] %vm676_vm2, %v593_v3  ;;  %v921_v2 = vld [vmem:[%s8819_s26 + $0xe4] sm:$0xff]  ;;  %v920_v3 = vld [vmem:[%s8819_s26 + $0xdc] sm:$0xff] }
  0xd0   : > { %968 = vrot.lane.b32.xlu1 %v903_v0, %s8757_s30  ;;  %966 = vrot.lane.b32.xlu0 %v902_v1, %s8757_s30 }
  0xd2   : > { %v599_v6 = vpop.permute.xlu1 %598  ;;  %v597_v7 = vpop.permute.xlu0 %596 }
  0xd3   : > { %686 = vst.msk [vmem:[#allocation2 + $0x90] sm:$0xff] %vm676_vm2, %v599_v6  ;;  %685 = vst.msk [vmem:[#allocation2 + $0x80] sm:$0xff] %vm676_vm2, %v597_v7  ;;  %v923_v6 = vld [vmem:[%s8819_s26 + $0xfc] sm:$0xff]  ;;  %v922_v7 = vld [vmem:[%s8819_s26 + $0xf4] sm:$0xff] }
  0xd4   : > { %972 = vrot.lane.b32.xlu1 %v905_v4, %s8757_s30  ;;  %970 = vrot.lane.b32.xlu0 %v904_v5, %s8757_s30 }
  0xd6   : > { %v603_v10 = vpop.permute.xlu1 %602  ;;  %v601_v11 = vpop.permute.xlu0 %600 }
  0xd7   : > { %688 = vst.msk [vmem:[#allocation2 + $0xb0] sm:$0xff] %vm676_vm2, %v603_v10  ;;  %687 = vst.msk [vmem:[#allocation2 + $0xa0] sm:$0xff] %vm676_vm2, %v601_v11  ;;  %v925_v10 = vld [vmem:[%s8819_s26 + $0x114] sm:$0xff]  ;;  %v924_v11 = vld [vmem:[%s8819_s26 + $0x10c] sm:$0xff] }
  0xd8   : > { %976 = vrot.lane.b32.xlu1 %v907_v8, %s8757_s30  ;;  %974 = vrot.lane.b32.xlu0 %v906_v9, %s8757_s30 }
  0xda   : > { %v607_v15 = vpop.permute.xlu1 %606  ;;  %v605_v17 = vpop.permute.xlu0 %604 }
  0xdb   : > { %690 = vst.msk [vmem:[#allocation2 + $0xd0] sm:$0xff] %vm676_vm2, %v607_v15  ;;  %689 = vst.msk [vmem:[#allocation2 + $0xc0] sm:$0xff] %vm676_vm2, %v605_v17  ;;  %v927_v15 = vld [vmem:[%s8819_s26 + $0x12c] sm:$0xff]  ;;  %v926_v17 = vld [vmem:[%s8819_s26 + $0x124] sm:$0xff] }
  0xdc   : > { %980 = vrot.lane.b32.xlu1 %v909_v13, %s8757_s30  ;;  %978 = vrot.lane.b32.xlu0 %v908_v14, %s8757_s30 }
  0xde   : > { %v611_v28 = vpop.permute.xlu1 %610  ;;  %v609_v29 = vpop.permute.xlu0 %608 }
  0xdf   : > { %692 = vst.msk [vmem:[#allocation2 + $0xf0] sm:$0xff] %vm676_vm2, %v611_v28  ;;  %691 = vst.msk [vmem:[#allocation2 + $0xe0] sm:$0xff] %vm676_vm2, %v609_v29  ;;  %v929_v28 = vld [vmem:[%s8819_s26 + $0x144] sm:$0xff]  ;;  %v928_v29 = vld [vmem:[%s8819_s26 + $0x13c] sm:$0xff] }
  0xe0   : > { %984 = vrot.lane.b32.xlu1 %v911_v21, %s8757_s30  ;;  %982 = vrot.lane.b32.xlu0 %v910_v22, %s8757_s30 }
  0xe2   : > { %v615_v44 = vpop.permute.xlu1 %614  ;;  %v613_v45 = vpop.permute.xlu0 %612 }
  0xe3   : > { %694 = vst.msk [vmem:[#allocation2 + $0x110] sm:$0xff] %vm676_vm2, %v615_v44  ;;  %693 = vst.msk [vmem:[#allocation2 + $0x100] sm:$0xff] %vm676_vm2, %v613_v45  ;;  %v931_v44 = vld [vmem:[%s8819_s26 + $0x15c] sm:$0xff]  ;;  %v930_v45 = vld [vmem:[%s8819_s26 + $0x154] sm:$0xff] }
  0xe4   : > { %988 = vrot.lane.b32.xlu1 %v913_v35, %s8757_s30  ;;  %986 = vrot.lane.b32.xlu0 %v912_v37, %s8757_s30 }
  0xe6   : > { %v619_v54 = vpop.permute.xlu1 %618  ;;  %v617_v55 = vpop.permute.xlu0 %616 }
  0xe7   : > { %696 = vst.msk [vmem:[#allocation2 + $0x130] sm:$0xff] %vm676_vm2, %v619_v54  ;;  %695 = vst.msk [vmem:[#allocation2 + $0x120] sm:$0xff] %vm676_vm2, %v617_v55  ;;  %v933_v54 = vld [vmem:[%s8819_s26 + $0x174] sm:$0xff]  ;;  %v932_v55 = vld [vmem:[%s8819_s26 + $0x16c] sm:$0xff] }
  0xe8   : > { %992 = vrot.lane.b32.xlu1 %v915_v50, %s8757_s30  ;;  %990 = vrot.lane.b32.xlu0 %v914_v51, %s8757_s30 }
  0xea   : > { %v623_v60 = vpop.permute.xlu1 %622  ;;  %v621_v61 = vpop.permute.xlu0 %620 }
  0xeb   : > { %698 = vst.msk [vmem:[#allocation2 + $0x150] sm:$0xff] %vm676_vm2, %v623_v60  ;;  %697 = vst.msk [vmem:[#allocation2 + $0x140] sm:$0xff] %vm676_vm2, %v621_v61 }
  0xec   : > { %996 = vrot.lane.b32.xlu1 %v917_v58, %s8757_s30  ;;  %994 = vrot.lane.b32.xlu0 %v916_v59, %s8757_s30 }
  0xee   : > { %v627_v0 = vpop.permute.xlu1 %626  ;;  %v625_v1 = vpop.permute.xlu0 %624 }
  0xef   : > { %700 = vst.msk [vmem:[#allocation2 + $0x170] sm:$0xff] %vm676_vm2, %v627_v0  ;;  %699 = vst.msk [vmem:[#allocation2 + $0x160] sm:$0xff] %vm676_vm2, %v625_v1 }
  0xf0   : > { %1000 = vrot.lane.b32.xlu1 %v919_v62, %s8757_s30  ;;  %998 = vrot.lane.b32.xlu0 %v918_v63, %s8757_s30 }
  0xf2   : > { %v631_v4 = vpop.permute.xlu1 %630  ;;  %v629_v5 = vpop.permute.xlu0 %628 }
  0xf3   : > { %702 = vst.msk [vmem:[#allocation2 + $0x190] sm:$0xff] %vm676_vm2, %v631_v4  ;;  %701 = vst.msk [vmem:[#allocation2 + $0x180] sm:$0xff] %vm676_vm2, %v629_v5  ;;  %v9404_v4 = vld [vmem:[%s8819_s26 + $0x39] sm:$0xff]  ;;  %v9407_v5 = vld [vmem:[%s8819_s26 + $0x31] sm:$0xff] }
  0xf4   : > { %1004 = vrot.lane.b32.xlu1 %v921_v2, %s8757_s30  ;;  %1002 = vrot.lane.b32.xlu0 %v920_v3, %s8757_s30  ;;  %v7713_v3 = vld [vmem:[%s8819_s26 + $0x19] sm:$0xff] }
  0xf6   : > { %v635_v8 = vpop.permute.xlu1 %634  ;;  %v633_v9 = vpop.permute.xlu0 %632 }
  0xf7   : > { %704 = vst.msk [vmem:[#allocation2 + $0x1b0] sm:$0xff] %vm676_vm2, %v635_v8  ;;  %703 = vst.msk [vmem:[#allocation2 + $0x1a0] sm:$0xff] %vm676_vm2, %v633_v9  ;;  %v7718_v8 = vld [vmem:[%s8819_s26 + $0x51] sm:$0xff]  ;;  %v7717_v9 = vld [vmem:[%s8819_s26 + $0x49] sm:$0xff] }
  0xf8   : > { %1008 = vrot.lane.b32.xlu1 %v923_v6, %s8757_s30  ;;  %1006 = vrot.lane.b32.xlu0 %v922_v7, %s8757_s30 }
  0xfa   : > { %v639_v13 = vpop.permute.xlu1 %638  ;;  %v637_v14 = vpop.permute.xlu0 %636 }
  0xfb   : > { %706 = vst.msk [vmem:[#allocation2 + $0x1d0] sm:$0xff] %vm676_vm2, %v639_v13  ;;  %705 = vst.msk [vmem:[#allocation2 + $0x1c0] sm:$0xff] %vm676_vm2, %v637_v14  ;;  %v9422_v13 = vld [vmem:[%s8819_s26 + $0x69] sm:$0xff]  ;;  %v9425_v14 = vld [vmem:[%s8819_s26 + $0x61] sm:$0xff] }
  0xfc   : > { %1012 = vrot.lane.b32.xlu1 %v925_v10, %s8757_s30  ;;  %1010 = vrot.lane.b32.xlu0 %v924_v11, %s8757_s30 }
  0xfe   : > { %v643_v21 = vpop.permute.xlu1 %642  ;;  %v641_v22 = vpop.permute.xlu0 %640 }
  0xff   : > { %708 = vst.msk [vmem:[#allocation2 + $0x1f0] sm:$0xff] %vm676_vm2, %v643_v21  ;;  %707 = vst.msk [vmem:[#allocation2 + $0x1e0] sm:$0xff] %vm676_vm2, %v641_v22  ;;  %v7722_v21 = vld [vmem:[%s8819_s26 + $0x81] sm:$0xff]  ;;  %v7721_v22 = vld [vmem:[%s8819_s26 + $0x79] sm:$0xff] }
 0x100   : > { %1016 = vrot.lane.b32.xlu1 %v927_v15, %s8757_s30  ;;  %1014 = vrot.lane.b32.xlu0 %v926_v17, %s8757_s30 }
 0x102   : > { %v776_v35 = vpop.permute.xlu1 %775  ;;  %v774_v37 = vpop.permute.xlu0 %773 }
 0x103   : > { %871 = vst.msk [vmem:[#allocation2 + $0x10] sm:$0xff] %vm869_vm3, %v776_v35  ;;  %870 = vst.msk [vmem:[#allocation2] sm:$0xff] %vm869_vm3, %v774_v37  ;;  %v7724_v35 = vld [vmem:[%s8819_s26 + $0x99] sm:$0xff]  ;;  %v7723_v37 = vld [vmem:[%s8819_s26 + $0x91] sm:$0xff] }
 0x104   : > { %1020 = vrot.lane.b32.xlu1 %v929_v28, %s8757_s30  ;;  %1018 = vrot.lane.b32.xlu0 %v928_v29, %s8757_s30 }
 0x106   : > { %v780_v50 = vpop.permute.xlu1 %779  ;;  %v778_v51 = vpop.permute.xlu0 %777 }
 0x107   : > { %873 = vst.msk [vmem:[#allocation2 + $0x30] sm:$0xff] %vm869_vm3, %v780_v50  ;;  %872 = vst.msk [vmem:[#allocation2 + $0x20] sm:$0xff] %vm869_vm3, %v778_v51  ;;  %v7726_v50 = vld [vmem:[%s8819_s26 + $0xb1] sm:$0xff]  ;;  %v7725_v51 = vld [vmem:[%s8819_s26 + $0xa9] sm:$0xff] }
 0x108   : > { %1024 = vrot.lane.b32.xlu1 %v931_v44, %s8757_s30  ;;  %1022 = vrot.lane.b32.xlu0 %v930_v45, %s8757_s30 }
 0x10a   : > { %v784_v58 = vpop.permute.xlu1 %783  ;;  %v782_v59 = vpop.permute.xlu0 %781 }
 0x10b   : > { %875 = vst.msk [vmem:[#allocation2 + $0x50] sm:$0xff] %vm869_vm3, %v784_v58  ;;  %874 = vst.msk [vmem:[#allocation2 + $0x40] sm:$0xff] %vm869_vm3, %v782_v59  ;;  %v7728_v58 = vld [vmem:[%s8819_s26 + $0xc9] sm:$0xff]  ;;  %v7727_v59 = vld [vmem:[%s8819_s26 + $0xc1] sm:$0xff] }
 0x10c   : > { %1028 = vrot.lane.b32.xlu1 %v933_v54, %s8757_s30  ;;  %1026 = vrot.lane.b32.xlu0 %v932_v55, %s8757_s30 }
 0x10e   : > { %v788_v60 = vpop.permute.xlu1 %787  ;;  %v786_v61 = vpop.permute.xlu0 %785 }
 0x10f   : > { %877 = vst.msk [vmem:[#allocation2 + $0x70] sm:$0xff] %vm869_vm3, %v788_v60  ;;  %876 = vst.msk [vmem:[#allocation2 + $0x60] sm:$0xff] %vm869_vm3, %v786_v61 }
 0x110   : > { %1162 = vrot.lane.b32.xlu1 %v8855_v16, %s8758_s7  ;;  %1160 = vrot.lane.b32.xlu0 %v8846_v12, %s8758_s7 }
 0x112   : > { %v792_v62 = vpop.permute.xlu1 %791  ;;  %v790_v63 = vpop.permute.xlu0 %789 }
 0x113   : > { %879 = vst.msk [vmem:[#allocation2 + $0x90] sm:$0xff] %vm869_vm3, %v792_v62  ;;  %878 = vst.msk [vmem:[#allocation2 + $0x80] sm:$0xff] %vm869_vm3, %v790_v63  ;;  %v7730_v62 = vld [vmem:[%s8819_s26 + $0xe1] sm:$0xff]  ;;  %v7729_v63 = vld [vmem:[%s8819_s26 + $0xd9] sm:$0xff] }
 0x114   : > { %1166 = vrot.lane.b32.xlu1 %v8862_v18, %s8758_s7  ;;  %1164 = vrot.lane.b32.xlu0 %v8865_v19, %s8758_s7 }
 0x116   : > { %v796_v0 = vpop.permute.xlu1 %795  ;;  %v794_v1 = vpop.permute.xlu0 %793 }
 0x117   : > { %881 = vst.msk [vmem:[#allocation2 + $0xb0] sm:$0xff] %vm869_vm3, %v796_v0  ;;  %880 = vst.msk [vmem:[#allocation2 + $0xa0] sm:$0xff] %vm869_vm3, %v794_v1 }
 0x118   : > { %1170 = vrot.lane.b32.xlu1 %v8874_v20, %s8758_s7  ;;  %1168 = vrot.lane.b32.xlu0 %v8881_v23, %s8758_s7 }
 0x11a   : > { %v800_v12 = vpop.permute.xlu1 %799  ;;  %v798_v16 = vpop.permute.xlu0 %797 }
 0x11b   : > { %883 = vst.msk [vmem:[#allocation2 + $0xd0] sm:$0xff] %vm869_vm3, %v800_v12  ;;  %882 = vst.msk [vmem:[#allocation2 + $0xc0] sm:$0xff] %vm869_vm3, %v798_v16  ;;  %v7732_v12 = vld [vmem:[%s8819_s26 + $0xf9] sm:$0xff]  ;;  %v7731_v16 = vld [vmem:[%s8819_s26 + $0xf1] sm:$0xff] }
 0x11c   : > { %1174 = vrot.lane.b32.xlu1 %v8886_v24, %s8758_s7  ;;  %1172 = vrot.lane.b32.xlu0 %v8889_v25, %s8758_s7 }
 0x11e   : > { %v804_v18 = vpop.permute.xlu1 %803  ;;  %v802_v19 = vpop.permute.xlu0 %801 }
 0x11f   : > { %885 = vst.msk [vmem:[#allocation2 + $0xf0] sm:$0xff] %vm869_vm3, %v804_v18  ;;  %884 = vst.msk [vmem:[#allocation2 + $0xe0] sm:$0xff] %vm869_vm3, %v802_v19 }
 0x120   : > { %1178 = vrot.lane.b32.xlu1 %v8896_v26, %s8758_s7  ;;  %1176 = vrot.lane.b32.xlu0 %v8899_v27, %s8758_s7 }
 0x122   : > { %v808_v20 = vpop.permute.xlu1 %807  ;;  %v806_v23 = vpop.permute.xlu0 %805 }
 0x123   : > { %887 = vst.msk [vmem:[#allocation2 + $0x110] sm:$0xff] %vm869_vm3, %v808_v20  ;;  %886 = vst.msk [vmem:[#allocation2 + $0x100] sm:$0xff] %vm869_vm3, %v806_v23  ;;  %v7734_v20 = vld [vmem:[%s8819_s26 + $0x111] sm:$0xff]  ;;  %v7733_v23 = vld [vmem:[%s8819_s26 + $0x109] sm:$0xff] }
 0x124   : > { %1182 = vrot.lane.b32.xlu1 %v8910_v30, %s8758_s7  ;;  %1180 = vrot.lane.b32.xlu0 %v8913_v31, %s8758_s7 }
 0x126   : > { %v812_v24 = vpop.permute.xlu1 %811  ;;  %v810_v25 = vpop.permute.xlu0 %809 }
 0x127   : > { %889 = vst.msk [vmem:[#allocation2 + $0x130] sm:$0xff] %vm869_vm3, %v812_v24  ;;  %888 = vst.msk [vmem:[#allocation2 + $0x120] sm:$0xff] %vm869_vm3, %v810_v25 }
 0x128   : > { %1186 = vrot.lane.b32.xlu1 %v8920_v32, %s8758_s7  ;;  %1184 = vrot.lane.b32.xlu0 %v8923_v33, %s8758_s7 }
 0x12a   : > { %v816_v26 = vpop.permute.xlu1 %815  ;;  %v814_v27 = vpop.permute.xlu0 %813 }
 0x12b   : > { %891 = vst.msk [vmem:[#allocation2 + $0x150] sm:$0xff] %vm869_vm3, %v816_v26  ;;  %890 = vst.msk [vmem:[#allocation2 + $0x140] sm:$0xff] %vm869_vm3, %v814_v27  ;;  %v7736_v26 = vld [vmem:[%s8819_s26 + $0x129] sm:$0xff]  ;;  %v7735_v27 = vld [vmem:[%s8819_s26 + $0x121] sm:$0xff] }
 0x12c   : > { %1190 = vrot.lane.b32.xlu1 %v8930_v34, %s8758_s7  ;;  %1188 = vrot.lane.b32.xlu0 %v8938_v36, %s8758_s7 }
 0x12e   : > { %v820_v30 = vpop.permute.xlu1 %819  ;;  %v818_v31 = vpop.permute.xlu0 %817 }
 0x12f   : > { %893 = vst.msk [vmem:[#allocation2 + $0x170] sm:$0xff] %vm869_vm3, %v820_v30  ;;  %892 = vst.msk [vmem:[#allocation2 + $0x160] sm:$0xff] %vm869_vm3, %v818_v31 }
 0x130   : > { %1194 = vrot.lane.b32.xlu1 %v8944_v38, %s8758_s7  ;;  %1192 = vrot.lane.b32.xlu0 %v8947_v39, %s8758_s7 }
 0x132   : > { %v824_v32 = vpop.permute.xlu1 %823  ;;  %v822_v33 = vpop.permute.xlu0 %821 }
 0x133   : > { %895 = vst.msk [vmem:[#allocation2 + $0x190] sm:$0xff] %vm869_vm3, %v824_v32  ;;  %894 = vst.msk [vmem:[#allocation2 + $0x180] sm:$0xff] %vm869_vm3, %v822_v33  ;;  %v7738_v32 = vld [vmem:[%s8819_s26 + $0x141] sm:$0xff]  ;;  %v7737_v33 = vld [vmem:[%s8819_s26 + $0x139] sm:$0xff] }
 0x134   : > { %1198 = vrot.lane.b32.xlu1 %v8954_v40, %s8758_s7  ;;  %1196 = vrot.lane.b32.xlu0 %v8959_v41, %s8758_s7 }
 0x136   : > { %v828_v34 = vpop.permute.xlu1 %827  ;;  %v826_v36 = vpop.permute.xlu0 %825 }
 0x137   : > { %897 = vst.msk [vmem:[#allocation2 + $0x1b0] sm:$0xff] %vm869_vm3, %v828_v34  ;;  %896 = vst.msk [vmem:[#allocation2 + $0x1a0] sm:$0xff] %vm869_vm3, %v826_v36 }
 0x138   : > { %1202 = vrot.lane.b32.xlu1 %v8966_v42, %s8758_s7  ;;  %1200 = vrot.lane.b32.xlu0 %v8969_v43, %s8758_s7 }
 0x13a   : > { %v832_v38 = vpop.permute.xlu1 %831  ;;  %v830_v39 = vpop.permute.xlu0 %829 }
 0x13b   : > { %899 = vst.msk [vmem:[#allocation2 + $0x1d0] sm:$0xff] %vm869_vm3, %v832_v38  ;;  %898 = vst.msk [vmem:[#allocation2 + $0x1c0] sm:$0xff] %vm869_vm3, %v830_v39  ;;  %v7740_v38 = vld [vmem:[%s8819_s26 + $0x159] sm:$0xff]  ;;  %v7739_v39 = vld [vmem:[%s8819_s26 + $0x151] sm:$0xff] }
 0x13c   : > { %1206 = vrot.lane.b32.xlu1 %v8978_v46, %s8758_s7  ;;  %1204 = vrot.lane.b32.xlu0 %v8983_v47, %s8758_s7 }
 0x13e   : > { %v836_v40 = vpop.permute.xlu1 %835  ;;  %v834_v41 = vpop.permute.xlu0 %833 }
 0x13f   : > { %901 = vst.msk [vmem:[#allocation2 + $0x1f0] sm:$0xff] %vm869_vm3, %v836_v40  ;;  %900 = vst.msk [vmem:[#allocation2 + $0x1e0] sm:$0xff] %vm869_vm3, %v834_v41 }
 0x140   : > { %1210 = vrot.lane.b32.xlu1 %v8988_v48, %s8758_s7  ;;  %1208 = vrot.lane.b32.xlu0 %v8991_v49, %s8758_s7  ;;  %v7712_v48 = vld [vmem:[%s8819_s26 + $0x188] sm:$0xff]  ;;  %v7711_v49 = vld [vmem:[%s8819_s26 + $0x180] sm:$0xff] }
 0x142   : > { %v969_v42 = vpop.permute.xlu1 %968  ;;  %v967_v43 = vpop.permute.xlu0 %966 }
 0x143   : > { %1064 = vst.msk [vmem:[#allocation2 + $0x10] sm:$0xff] %vm13196_vm4, %v969_v42  ;;  %1063 = vst.msk [vmem:[#allocation2] sm:$0xff] %vm13196_vm4, %v967_v43  ;;  %v7742_v42 = vld [vmem:[%s8819_s26 + $0x171] sm:$0xff]  ;;  %v7741_v43 = vld [vmem:[%s8819_s26 + $0x169] sm:$0xff] }
 0x144   : > { %1214 = vrot.lane.b32.xlu1 %v9005_v53, %s8758_s7  ;;  %1212 = vrot.lane.b32.xlu0 %v9002_v52, %s8758_s7  ;;  %v7714_v52 = vld [vmem:[%s8819_s26 + $0x21] sm:$0xff] }
 0x146   : > { %v973_v46 = vpop.permute.xlu1 %972  ;;  %v971_v47 = vpop.permute.xlu0 %970 }
 0x147   : > { %1066 = vst.msk [vmem:[#allocation2 + $0x30] sm:$0xff] %vm13196_vm4, %v973_v46  ;;  %1065 = vst.msk [vmem:[#allocation2 + $0x20] sm:$0xff] %vm13196_vm4, %v971_v47 }
 0x148   : > { %1218 = vrot.lane.b32.xlu1 %v9019_v57, %s8758_s7  ;;  %1216 = vrot.lane.b32.xlu0 %v9016_v56, %s8758_s7 }
 0x14a   : > { %v977_v53 = vpop.permute.xlu1 %976  ;;  %v975_v2 = vpop.permute.xlu0 %974 }
 0x14b   : > { %1068 = vst.msk [vmem:[#allocation2 + $0x50] sm:$0xff] %vm13196_vm4, %v977_v53  ;;  %1067 = vst.msk [vmem:[#allocation2 + $0x40] sm:$0xff] %vm13196_vm4, %v975_v2 }
 0x14c   : > { %1222 = vrot.lane.b32.xlu1 %v7712_v48, %s8758_s7  ;;  %1220 = vrot.lane.b32.xlu0 %v7711_v49, %s8758_s7  ;;  %v7744_v48 = vld [vmem:[%s8819_s26 + $0x189] sm:$0xff]  ;;  %v7743_v49 = vld [vmem:[%s8819_s26 + $0x181] sm:$0xff] }
 0x14e   : > { %v981_v57 = vpop.permute.xlu1 %980  ;;  %v979_v56 = vpop.permute.xlu0 %978 }
 0x14f   : > { %1070 = vst.msk [vmem:[#allocation2 + $0x70] sm:$0xff] %vm13196_vm4, %v981_v57  ;;  %1069 = vst.msk [vmem:[#allocation2 + $0x60] sm:$0xff] %vm13196_vm4, %v979_v56 }
 0x150   : > { %1355 = vrot.lane.b32.xlu1 %v7714_v52, %s8759_s8  ;;  %1353 = vrot.lane.b32.xlu0 %v7713_v3, %s8759_s8  ;;  %v7746_v52 = vld [vmem:[%s8819_s26 + $0x22] sm:$0xff]  ;;  %v7745_v3 = vld [vmem:[%s8819_s26 + $0x1a] sm:$0xff] }
 0x152   : > { %v985_v6 = vpop.permute.xlu1 %984  ;;  %v983_v7 = vpop.permute.xlu0 %982 }
 0x153   : > { %1072 = vst.msk [vmem:[#allocation2 + $0x90] sm:$0xff] %vm13196_vm4, %v985_v6  ;;  %1071 = vst.msk [vmem:[#allocation2 + $0x80] sm:$0xff] %vm13196_vm4, %v983_v7  ;;  %v9512_v6 = vld [vmem:[%s8819_s26 + $0x3a] sm:$0xff]  ;;  %v9515_v7 = vld [vmem:[%s8819_s26 + $0x32] sm:$0xff] }
 0x154   : > { %1359 = vrot.lane.b32.xlu1 %v9404_v4, %s8759_s8  ;;  %1357 = vrot.lane.b32.xlu0 %v9407_v5, %s8759_s8 }
 0x156   : > { %v989_v10 = vpop.permute.xlu1 %988  ;;  %v987_v11 = vpop.permute.xlu0 %986 }
 0x157   : > { %1074 = vst.msk [vmem:[#allocation2 + $0xb0] sm:$0xff] %vm13196_vm4, %v989_v10  ;;  %1073 = vst.msk [vmem:[#allocation2 + $0xa0] sm:$0xff] %vm13196_vm4, %v987_v11  ;;  %v9524_v10 = vld [vmem:[%s8819_s26 + $0x52] sm:$0xff]  ;;  %v9527_v11 = vld [vmem:[%s8819_s26 + $0x4a] sm:$0xff] }
 0x158   : > { %1363 = vrot.lane.b32.xlu1 %v7718_v8, %s8759_s8  ;;  %1361 = vrot.lane.b32.xlu0 %v7717_v9, %s8759_s8 }
 0x15a   : > { %v993_v15 = vpop.permute.xlu1 %992  ;;  %v991_v17 = vpop.permute.xlu0 %990 }
 0x15b   : > { %1076 = vst.msk [vmem:[#allocation2 + $0xd0] sm:$0xff] %vm13196_vm4, %v993_v15  ;;  %1075 = vst.msk [vmem:[#allocation2 + $0xc0] sm:$0xff] %vm13196_vm4, %v991_v17 }
 0x15c   : > { %1367 = vrot.lane.b32.xlu1 %v9422_v13, %s8759_s8  ;;  %1365 = vrot.lane.b32.xlu0 %v9425_v14, %s8759_s8 }
 0x15e   : > { %v997_v28 = vpop.permute.xlu1 %996  ;;  %v995_v29 = vpop.permute.xlu0 %994 }
 0x15f   : > { %1078 = vst.msk [vmem:[#allocation2 + $0xf0] sm:$0xff] %vm13196_vm4, %v997_v28  ;;  %1077 = vst.msk [vmem:[#allocation2 + $0xe0] sm:$0xff] %vm13196_vm4, %v995_v29 }
 0x160   : > { %1371 = vrot.lane.b32.xlu1 %v7722_v21, %s8759_s8  ;;  %1369 = vrot.lane.b32.xlu0 %v7721_v22, %s8759_s8  ;;  %v9536_v21 = vld [vmem:[%s8819_s26 + $0x6a] sm:$0xff]  ;;  %v9539_v22 = vld [vmem:[%s8819_s26 + $0x62] sm:$0xff] }
 0x162   : > { %v1001_v44 = vpop.permute.xlu1 %1000  ;;  %v999_v45 = vpop.permute.xlu0 %998 }
 0x163   : > { %1080 = vst.msk [vmem:[#allocation2 + $0x110] sm:$0xff] %vm13196_vm4, %v1001_v44  ;;  %1079 = vst.msk [vmem:[#allocation2 + $0x100] sm:$0xff] %vm13196_vm4, %v999_v45 }
 0x164   : > { %1375 = vrot.lane.b32.xlu1 %v7724_v35, %s8759_s8  ;;  %1373 = vrot.lane.b32.xlu0 %v7723_v37, %s8759_s8  ;;  %v9548_v35 = vld [vmem:[%s8819_s26 + $0x82] sm:$0xff]  ;;  %v9551_v37 = vld [vmem:[%s8819_s26 + $0x7a] sm:$0xff] }
 0x166   : > { %v1005_v54 = vpop.permute.xlu1 %1004  ;;  %v1003_v55 = vpop.permute.xlu0 %1002 }
 0x167   : > { %1082 = vst.msk [vmem:[#allocation2 + $0x130] sm:$0xff] %vm13196_vm4, %v1005_v54  ;;  %1081 = vst.msk [vmem:[#allocation2 + $0x120] sm:$0xff] %vm13196_vm4, %v1003_v55 }
 0x168   : > { %1379 = vrot.lane.b32.xlu1 %v7726_v50, %s8759_s8  ;;  %1377 = vrot.lane.b32.xlu0 %v7725_v51, %s8759_s8  ;;  %v7756_v50 = vld [vmem:[%s8819_s26 + $0x9a] sm:$0xff]  ;;  %v7755_v51 = vld [vmem:[%s8819_s26 + $0x92] sm:$0xff] }
 0x16a   : > { %v1009_v60 = vpop.permute.xlu1 %1008  ;;  %v1007_v61 = vpop.permute.xlu0 %1006 }
 0x16b   : > { %1084 = vst.msk [vmem:[#allocation2 + $0x150] sm:$0xff] %vm13196_vm4, %v1009_v60  ;;  %1083 = vst.msk [vmem:[#allocation2 + $0x140] sm:$0xff] %vm13196_vm4, %v1007_v61 }
 0x16c   : > { %1383 = vrot.lane.b32.xlu1 %v7728_v58, %s8759_s8  ;;  %1381 = vrot.lane.b32.xlu0 %v7727_v59, %s8759_s8  ;;  %v7758_v58 = vld [vmem:[%s8819_s26 + $0xb2] sm:$0xff]  ;;  %v7757_v59 = vld [vmem:[%s8819_s26 + $0xaa] sm:$0xff] }
 0x16e   : > { %v1013_v0 = vpop.permute.xlu1 %1012  ;;  %v1011_v1 = vpop.permute.xlu0 %1010 }
 0x16f   : > { %1086 = vst.msk [vmem:[#allocation2 + $0x170] sm:$0xff] %vm13196_vm4, %v1013_v0  ;;  %1085 = vst.msk [vmem:[#allocation2 + $0x160] sm:$0xff] %vm13196_vm4, %v1011_v1 }
 0x170   : > { %1387 = vrot.lane.b32.xlu1 %v7730_v62, %s8759_s8  ;;  %1385 = vrot.lane.b32.xlu0 %v7729_v63, %s8759_s8  ;;  %v7760_v62 = vld [vmem:[%s8819_s26 + $0xca] sm:$0xff]  ;;  %v7759_v63 = vld [vmem:[%s8819_s26 + $0xc2] sm:$0xff] }
 0x172   : > { %v1017_v18 = vpop.permute.xlu1 %1016  ;;  %v1015_v19 = vpop.permute.xlu0 %1014 }
 0x173   : > { %1088 = vst.msk [vmem:[#allocation2 + $0x190] sm:$0xff] %vm13196_vm4, %v1017_v18  ;;  %1087 = vst.msk [vmem:[#allocation2 + $0x180] sm:$0xff] %vm13196_vm4, %v1015_v19 }
 0x174   : > { %1391 = vrot.lane.b32.xlu1 %v7732_v12, %s8759_s8  ;;  %1389 = vrot.lane.b32.xlu0 %v7731_v16, %s8759_s8  ;;  %v7762_v12 = vld [vmem:[%s8819_s26 + $0xe2] sm:$0xff]  ;;  %v7761_v16 = vld [vmem:[%s8819_s26 + $0xda] sm:$0xff] }
 0x176   : > { %v1021_v24 = vpop.permute.xlu1 %1020  ;;  %v1019_v25 = vpop.permute.xlu0 %1018 }
 0x177   : > { %1090 = vst.msk [vmem:[#allocation2 + $0x1b0] sm:$0xff] %vm13196_vm4, %v1021_v24  ;;  %1089 = vst.msk [vmem:[#allocation2 + $0x1a0] sm:$0xff] %vm13196_vm4, %v1019_v25 }
 0x178   : > { %1395 = vrot.lane.b32.xlu1 %v7734_v20, %s8759_s8  ;;  %1393 = vrot.lane.b32.xlu0 %v7733_v23, %s8759_s8  ;;  %v7764_v20 = vld [vmem:[%s8819_s26 + $0xfa] sm:$0xff]  ;;  %v7763_v23 = vld [vmem:[%s8819_s26 + $0xf2] sm:$0xff] }
 0x17a   : > { %v1025_v30 = vpop.permute.xlu1 %1024  ;;  %v1023_v31 = vpop.permute.xlu0 %1022 }
 0x17b   : > { %1092 = vst.msk [vmem:[#allocation2 + $0x1d0] sm:$0xff] %vm13196_vm4, %v1025_v30  ;;  %1091 = vst.msk [vmem:[#allocation2 + $0x1c0] sm:$0xff] %vm13196_vm4, %v1023_v31 }
 0x17c   : > { %1399 = vrot.lane.b32.xlu1 %v7736_v26, %s8759_s8  ;;  %1397 = vrot.lane.b32.xlu0 %v7735_v27, %s8759_s8  ;;  %v7766_v26 = vld [vmem:[%s8819_s26 + $0x112] sm:$0xff]  ;;  %v7765_v27 = vld [vmem:[%s8819_s26 + $0x10a] sm:$0xff] }
 0x17e   : > { %v1029_v34 = vpop.permute.xlu1 %1028  ;;  %v1027_v36 = vpop.permute.xlu0 %1026 }
 0x17f   : > { %1094 = vst.msk [vmem:[#allocation2 + $0x1f0] sm:$0xff] %vm13196_vm4, %v1029_v34  ;;  %1093 = vst.msk [vmem:[#allocation2 + $0x1e0] sm:$0xff] %vm13196_vm4, %v1027_v36 }
 0x180   : > { %1403 = vrot.lane.b32.xlu1 %v7738_v32, %s8759_s8  ;;  %1401 = vrot.lane.b32.xlu0 %v7737_v33, %s8759_s8  ;;  %v7768_v32 = vld [vmem:[%s8819_s26 + $0x12a] sm:$0xff]  ;;  %v7767_v33 = vld [vmem:[%s8819_s26 + $0x122] sm:$0xff] }
 0x182   : > { %v1163_v40 = vpop.permute.xlu1 %1162  ;;  %v1161_v41 = vpop.permute.xlu0 %1160 }
 0x183   : > { %1258 = vst.msk [vmem:[#allocation2 + $0x10] sm:$0xff] %vm1256_vm5, %v1163_v40  ;;  %1257 = vst.msk [vmem:[#allocation2] sm:$0xff] %vm1256_vm5, %v1161_v41 }
 0x184   : > { %1407 = vrot.lane.b32.xlu1 %v7740_v38, %s8759_s8  ;;  %1405 = vrot.lane.b32.xlu0 %v7739_v39, %s8759_s8  ;;  %v7770_v38 = vld [vmem:[%s8819_s26 + $0x142] sm:$0xff]  ;;  %v7769_v39 = vld [vmem:[%s8819_s26 + $0x13a] sm:$0xff] }
 0x186   : > { %v1167_v46 = vpop.permute.xlu1 %1166  ;;  %v1165_v47 = vpop.permute.xlu0 %1164 }
 0x187   : > { %1260 = vst.msk [vmem:[#allocation2 + $0x30] sm:$0xff] %vm1256_vm5, %v1167_v46  ;;  %1259 = vst.msk [vmem:[#allocation2 + $0x20] sm:$0xff] %vm1256_vm5, %v1165_v47 }
 0x188   : > { %1411 = vrot.lane.b32.xlu1 %v7742_v42, %s8759_s8  ;;  %1409 = vrot.lane.b32.xlu0 %v7741_v43, %s8759_s8  ;;  %v7772_v42 = vld [vmem:[%s8819_s26 + $0x15a] sm:$0xff]  ;;  %v7771_v43 = vld [vmem:[%s8819_s26 + $0x152] sm:$0xff] }
 0x18a   : > { %v1171_v53 = vpop.permute.xlu1 %1170  ;;  %v1169_v2 = vpop.permute.xlu0 %1168 }
 0x18b   : > { %1262 = vst.msk [vmem:[#allocation2 + $0x50] sm:$0xff] %vm1256_vm5, %v1171_v53  ;;  %1261 = vst.msk [vmem:[#allocation2 + $0x40] sm:$0xff] %vm1256_vm5, %v1169_v2 }
 0x18c   : > { %1415 = vrot.lane.b32.xlu1 %v7744_v48, %s8759_s8  ;;  %1413 = vrot.lane.b32.xlu0 %v7743_v49, %s8759_s8  ;;  %v7774_v48 = vld [vmem:[%s8819_s26 + $0x172] sm:$0xff]  ;;  %v7773_v49 = vld [vmem:[%s8819_s26 + $0x16a] sm:$0xff] }
 0x18e   : > { %v1175_v57 = vpop.permute.xlu1 %1174  ;;  %v1173_v56 = vpop.permute.xlu0 %1172 }
 0x18f   : > { %1264 = vst.msk [vmem:[#allocation2 + $0x70] sm:$0xff] %vm1256_vm5, %v1175_v57  ;;  %1263 = vst.msk [vmem:[#allocation2 + $0x60] sm:$0xff] %vm1256_vm5, %v1173_v56 }
 0x190   : > { %1548 = vrot.lane.b32.xlu1 %v7746_v52, %s8760_s9  ;;  %1546 = vrot.lane.b32.xlu0 %v7745_v3, %s8760_s9  ;;  %v7776_v52 = vld [vmem:[%s8819_s26 + $0x18a] sm:$0xff]  ;;  %v7775_v3 = vld [vmem:[%s8819_s26 + $0x182] sm:$0xff] }
 0x192   : > { %v1179_v8 = vpop.permute.xlu1 %1178  ;;  %v1177_v9 = vpop.permute.xlu0 %1176 }
 0x193   : > { %1266 = vst.msk [vmem:[#allocation2 + $0x90] sm:$0xff] %vm1256_vm5, %v1179_v8  ;;  %1265 = vst.msk [vmem:[#allocation2 + $0x80] sm:$0xff] %vm1256_vm5, %v1177_v9  ;;  %v7778_v8 = vld [vmem:[%s8819_s26 + $0x23] sm:$0xff]  ;;  %v7777_v9 = vld [vmem:[%s8819_s26 + $0x1b] sm:$0xff] }
 0x194   : > { %1552 = vrot.lane.b32.xlu1 %v9512_v6, %s8760_s9  ;;  %1550 = vrot.lane.b32.xlu0 %v9515_v7, %s8760_s9 }
 0x196   : > { %v1183_v15 = vpop.permute.xlu1 %1182  ;;  %v1181_v17 = vpop.permute.xlu0 %1180 }
 0x197   : > { %1268 = vst.msk [vmem:[#allocation2 + $0xb0] sm:$0xff] %vm1256_vm5, %v1183_v15  ;;  %1267 = vst.msk [vmem:[#allocation2 + $0xa0] sm:$0xff] %vm1256_vm5, %v1181_v17 }
 0x198   : > { %1556 = vrot.lane.b32.xlu1 %v9524_v10, %s8760_s9  ;;  %1554 = vrot.lane.b32.xlu0 %v9527_v11, %s8760_s9 }
 0x19a   : > { %v1187_v28 = vpop.permute.xlu1 %1186  ;;  %v1185_v29 = vpop.permute.xlu0 %1184 }
 0x19b   : > { %1270 = vst.msk [vmem:[#allocation2 + $0xd0] sm:$0xff] %vm1256_vm5, %v1187_v28  ;;  %1269 = vst.msk [vmem:[#allocation2 + $0xc0] sm:$0xff] %vm1256_vm5, %v1185_v29  ;;  %v9632_v28 = vld [vmem:[%s8819_s26 + $0x3b] sm:$0xff]  ;;  %v9635_v29 = vld [vmem:[%s8819_s26 + $0x33] sm:$0xff] }
 0x19c   : > { %1560 = vrot.lane.b32.xlu1 %v9536_v21, %s8760_s9  ;;  %1558 = vrot.lane.b32.xlu0 %v9539_v22, %s8760_s9 }
 0x19e   : > { %v1191_v44 = vpop.permute.xlu1 %1190  ;;  %v1189_v45 = vpop.permute.xlu0 %1188 }
 0x19f   : > { %1272 = vst.msk [vmem:[#allocation2 + $0xf0] sm:$0xff] %vm1256_vm5, %v1191_v44  ;;  %1271 = vst.msk [vmem:[#allocation2 + $0xe0] sm:$0xff] %vm1256_vm5, %v1189_v45 }
 0x1a0   : > { %1564 = vrot.lane.b32.xlu1 %v9548_v35, %s8760_s9  ;;  %1562 = vrot.lane.b32.xlu0 %v9551_v37, %s8760_s9 }
 0x1a2   : > { %v1195_v54 = vpop.permute.xlu1 %1194  ;;  %v1193_v55 = vpop.permute.xlu0 %1192 }
 0x1a3   : > { %1274 = vst.msk [vmem:[#allocation2 + $0x110] sm:$0xff] %vm1256_vm5, %v1195_v54  ;;  %1273 = vst.msk [vmem:[#allocation2 + $0x100] sm:$0xff] %vm1256_vm5, %v1193_v55 }
 0x1a4   : > { %1568 = vrot.lane.b32.xlu1 %v7756_v50, %s8760_s9  ;;  %1566 = vrot.lane.b32.xlu0 %v7755_v51, %s8760_s9  ;;  %v9644_v50 = vld [vmem:[%s8819_s26 + $0x53] sm:$0xff]  ;;  %v9647_v51 = vld [vmem:[%s8819_s26 + $0x4b] sm:$0xff] }
 0x1a6   : > { %v1199_v60 = vpop.permute.xlu1 %1198  ;;  %v1197_v61 = vpop.permute.xlu0 %1196 }
 0x1a7   : > { %1276 = vst.msk [vmem:[#allocation2 + $0x130] sm:$0xff] %vm1256_vm5, %v1199_v60  ;;  %1275 = vst.msk [vmem:[#allocation2 + $0x120] sm:$0xff] %vm1256_vm5, %v1197_v61 }
 0x1a8   : > { %1572 = vrot.lane.b32.xlu1 %v7758_v58, %s8760_s9  ;;  %1570 = vrot.lane.b32.xlu0 %v7757_v59, %s8760_s9  ;;  %v9656_v58 = vld [vmem:[%s8819_s26 + $0x6b] sm:$0xff]  ;;  %v9659_v59 = vld [vmem:[%s8819_s26 + $0x63] sm:$0xff] }
 0x1aa   : > { %v1203_v0 = vpop.permute.xlu1 %1202  ;;  %v1201_v1 = vpop.permute.xlu0 %1200 }
 0x1ab   : > { %1278 = vst.msk [vmem:[#allocation2 + $0x150] sm:$0xff] %vm1256_vm5, %v1203_v0  ;;  %1277 = vst.msk [vmem:[#allocation2 + $0x140] sm:$0xff] %vm1256_vm5, %v1201_v1  ;;  %v9676_v0 = vld [vmem:[%s8819_s26 + $0x7b] sm:$0xff] }
 0x1ac   : > { %1576 = vrot.lane.b32.xlu1 %v7760_v62, %s8760_s9  ;;  %1574 = vrot.lane.b32.xlu0 %v7759_v63, %s8760_s9  ;;  %v9664_v62 = vld [vmem:[%s8819_s26 + $0x51] sm:$0xff]  ;;  %v9673_v63 = vld [vmem:[%s8819_s26 + $0x83] sm:$0xff] }
 0x1ad   : > { %3254 = vst.msk [vmem:[#allocation2 + $0x18] sm:$0xff] %vm290_vm0, %v9664_v62 }
 0x1ae   : > { %v1207_v18 = vpop.permute.xlu1 %1206  ;;  %v1205_v19 = vpop.permute.xlu0 %1204 }
 0x1af   : > { %1280 = vst.msk [vmem:[#allocation2 + $0x170] sm:$0xff] %vm1256_vm5, %v1207_v18  ;;  %1279 = vst.msk [vmem:[#allocation2 + $0x160] sm:$0xff] %vm1256_vm5, %v1205_v19  ;;  %v9688_v18 = vld [vmem:[%s8819_s26 + $0x93] sm:$0xff] }
 0x1b0   : > { %1580 = vrot.lane.b32.xlu1 %v7762_v12, %s8760_s9  ;;  %1578 = vrot.lane.b32.xlu0 %v7761_v16, %s8760_s9  ;;  %v9685_v16 = vld [vmem:[%s8819_s26 + $0x9b] sm:$0xff] }
 0x1b2   : > { %v1211_v24 = vpop.permute.xlu1 %1210  ;;  %v1209_v25 = vpop.permute.xlu0 %1208 }
 0x1b3   : > { %1282 = vst.msk [vmem:[#allocation2 + $0x190] sm:$0xff] %vm1256_vm5, %v1211_v24  ;;  %1281 = vst.msk [vmem:[#allocation2 + $0x180] sm:$0xff] %vm1256_vm5, %v1209_v25  ;;  %v7790_v24 = vld [vmem:[%s8819_s26 + $0xb3] sm:$0xff]  ;;  %v7789_v25 = vld [vmem:[%s8819_s26 + $0xab] sm:$0xff] }
 0x1b4   : > { %1584 = vrot.lane.b32.xlu1 %v7764_v20, %s8760_s9  ;;  %1582 = vrot.lane.b32.xlu0 %v7763_v23, %s8760_s9  ;;  %v9693_v23 = vld [vmem:[%s8819_s26 + $0x81] sm:$0xff] }
 0x1b5   : > { %3258 = vst.msk [vmem:[#allocation2 + $0x58] sm:$0xff] %vm290_vm0, %v9693_v23 }
 0x1b6   : > { %v1215_v30 = vpop.permute.xlu1 %1214  ;;  %v1213_v31 = vpop.permute.xlu0 %1212 }
 0x1b7   : > { %1284 = vst.msk [vmem:[#allocation2 + $0x1b0] sm:$0xff] %vm1256_vm5, %v1215_v30  ;;  %1283 = vst.msk [vmem:[#allocation2 + $0x1a0] sm:$0xff] %vm1256_vm5, %v1213_v31  ;;  %v8033_v30 = vld [vmem:[%s8819_s26 + $0x49] sm:$0xff] }
 0x1b8   : > { %1588 = vrot.lane.b32.xlu1 %v7766_v26, %s8760_s9  ;;  %1586 = vrot.lane.b32.xlu0 %v7765_v27, %s8760_s9  ;;  %v7792_v31 = vld [vmem:[%s8819_s26 + $0xcb] sm:$0xff]  ;;  %3253 = vst.msk [vmem:[#allocation2 + $0x8] sm:$0xff] %vm290_vm0, %v8033_v30 }
 0x1ba   : > { %v1219_v34 = vpop.permute.xlu1 %1218  ;;  %v1217_v36 = vpop.permute.xlu0 %1216 }
 0x1bb   : > { %1286 = vst.msk [vmem:[#allocation2 + $0x1d0] sm:$0xff] %vm1256_vm5, %v1219_v34  ;;  %1285 = vst.msk [vmem:[#allocation2 + $0x1c0] sm:$0xff] %vm1256_vm5, %v1217_v36  ;;  %v4901_v36 = vld [vmem:[%s13185_s1 + $0x78] sm:$0xff] }
 0x1bc   : > { %1592 = vrot.lane.b32.xlu1 %v7768_v32, %s8760_s9  ;;  %1590 = vrot.lane.b32.xlu0 %v7767_v33, %s8760_s9  ;;  %v7791_v32 = vld [vmem:[%s8819_s26 + $0xc3] sm:$0xff] }
 0x1be   : > { %v1223_v40 = vpop.permute.xlu1 %1222  ;;  %v1221_v41 = vpop.permute.xlu0 %1220 }
 0x1bf   : > { %1288 = vst.msk [vmem:[#allocation2 + $0x1f0] sm:$0xff] %vm1256_vm5, %v1223_v40  ;;  %1287 = vst.msk [vmem:[#allocation2 + $0x1e0] sm:$0xff] %vm1256_vm5, %v1221_v41  ;;  %v8762_v40 = vmov 0.0  }
 0x1c0   : > { %1596 = vrot.lane.b32.xlu1 %v7770_v38, %s8760_s9  ;;  %1594 = vrot.lane.b32.xlu0 %v7769_v39, %s8760_s9  ;;  %v7794_v38 = vld [vmem:[%s8819_s26 + $0xe3] sm:$0xff]  ;;  %v7793_v39 = vld [vmem:[%s8819_s26 + $0xdb] sm:$0xff] }
 0x1c1   : > { %5014 = vmatprep.subr.mxu0 %v8762_v40 }
 0x1c2   : > { %v1356_v46 = vpop.permute.xlu1 %1355  ;;  %v1354_v47 = vpop.permute.xlu0 %1353  ;;  %5015 = vmatpush1.msra.mxu0 %v4901_v36 }
 0x1c3   : > { %1451 = vst.msk [vmem:[#allocation2 + $0x10] sm:$0xff] %vm1449_vm6, %v1356_v46  ;;  %1450 = vst.msk [vmem:[#allocation2] sm:$0xff] %vm1449_vm6, %v1354_v47  ;;  %5016 = vmatprep.subr.mxu0 %v8762_v40  ;;  %v4899_v46 = vld [vmem:[%s13185_s1 + $0x68] sm:$0xff]  ;;  %v7796_v47 = vld [vmem:[%s8819_s26 + $0xfb] sm:$0xff] }
 0x1c4   : > { %1600 = vrot.lane.b32.xlu1 %v7772_v42, %s8760_s9  ;;  %1598 = vrot.lane.b32.xlu0 %v7771_v43, %s8760_s9  ;;  %v4900_v43 = vld [vmem:[%s13185_s1 + $0x70] sm:$0xff] }
 0x1c5   : > { %5017 = vmatpush1.msra.mxu0 %v4900_v43 }
 0x1c6   : > { %v1360_v53 = vpop.permute.xlu1 %1359  ;;  %v1358_v2 = vpop.permute.xlu0 %1357  ;;  %5018 = vmatprep.subr.mxu0 %v8762_v40 }
 0x1c7   : > { %1453 = vst.msk [vmem:[#allocation2 + $0x30] sm:$0xff] %vm1449_vm6, %v1360_v53  ;;  %1452 = vst.msk [vmem:[#allocation2 + $0x20] sm:$0xff] %vm1449_vm6, %v1358_v2  ;;  %5019 = vmatpush1.msra.mxu0 %v4899_v46  ;;  %v4898_v2 = vld [vmem:[%s13185_s1 + $0x60] sm:$0xff] }
 0x1c8   : > { %1604 = vrot.lane.b32.xlu1 %v7774_v48, %s8760_s9  ;;  %1602 = vrot.lane.b32.xlu0 %v7773_v49, %s8760_s9  ;;  %v7795_v48 = vld [vmem:[%s8819_s26 + $0xf3] sm:$0xff]  ;;  %v4886_v46 = vld [vmem:[%s13185_s1] sm:$0xff] }
 0x1c9   : > { %5020 = vmatprep.subr.mxu0 %v8762_v40 }
 0x1ca   : > { %v1364_v57 = vpop.permute.xlu1 %1363  ;;  %v1362_v56 = vpop.permute.xlu0 %1361  ;;  %5021 = vmatpush1.msra.mxu0 %v4898_v2  ;;  %v9866_v2 = vld [vmem:[%s8819_s26 + $0x69] sm:$0xff] }
 0x1cb   : > { %1455 = vst.msk [vmem:[#allocation2 + $0x50] sm:$0xff] %vm1449_vm6, %v1364_v57  ;;  %1454 = vst.msk [vmem:[#allocation2 + $0x40] sm:$0xff] %vm1449_vm6, %v1362_v56  ;;  %v4897_v56 = vld [vmem:[%s13185_s1 + $0x58] sm:$0xff]  ;;  %5022 = vmatprep.subr.mxu0 %v8762_v40 }
 0x1cc   : > { %1608 = vrot.lane.b32.xlu1 %v7776_v52, %s8760_s9  ;;  %1606 = vrot.lane.b32.xlu0 %v7775_v3, %s8760_s9  ;;  %v7797_v52 = vld [vmem:[%s8819_s26 + $0x10b] sm:$0xff]  ;;  %3256 = vst.msk [vmem:[#allocation2 + $0x38] sm:$0xff] %vm290_vm0, %v9866_v2 }
 0x1cd   : > { %5023 = vmatpush1.msra.mxu0 %v4897_v56 }
 0x1ce   : > { %v1368_v15 = vpop.permute.xlu1 %1367  ;;  %v1366_v17 = vpop.permute.xlu0 %1365  ;;  %5024 = vmatprep.subr.mxu0 %v8762_v40 }
 0x1cf   : > { %1457 = vst.msk [vmem:[#allocation2 + $0x70] sm:$0xff] %vm1449_vm6, %v1368_v15  ;;  %1456 = vst.msk [vmem:[#allocation2 + $0x60] sm:$0xff] %vm1449_vm6, %v1366_v17 }
 0x1d0   : > { %1741 = vrot.lane.b32.xlu1 %v7778_v8, %s8761_s10  ;;  %1739 = vrot.lane.b32.xlu0 %v7777_v9, %s8761_s10  ;;  %v4896_v8 = vld [vmem:[%s13185_s1 + $0x50] sm:$0xff]  ;;  %v7809_v9 = vld [vmem:[%s8819_s26 + $0x1c] sm:$0xff] }
 0x1d1   : > { %5025 = vmatpush1.msra.mxu0 %v4896_v8  ;;  %v4908_v8 = vld [vmem:[%s13185_s1 + $0xb0] sm:$0xff] }
 0x1d2   : > { %v1372_v44 = vpop.permute.xlu1 %1371  ;;  %v1370_v45 = vpop.permute.xlu0 %1369  ;;  %5026 = vmatprep.subr.mxu0 %v8762_v40 }
 0x1d3   : > { %1459 = vst.msk [vmem:[#allocation2 + $0x90] sm:$0xff] %vm1449_vm6, %v1372_v44  ;;  %1458 = vst.msk [vmem:[#allocation2 + $0x80] sm:$0xff] %vm1449_vm6, %v1370_v45  ;;  %v4895_v44 = vld [vmem:[%s13185_s1 + $0x48] sm:$0xff] }
 0x1d4   : > { %1745 = vrot.lane.b32.xlu1 %v9632_v28, %s8761_s10  ;;  %1743 = vrot.lane.b32.xlu0 %v9635_v29, %s8761_s10  ;;  %v9764_v45 = vld [vmem:[%s8819_s26 + $0x61] sm:$0xff] }
 0x1d5   : > { %3255 = vst.msk [vmem:[#allocation2 + $0x28] sm:$0xff] %vm290_vm0, %v9764_v45  ;;  %5027 = vmatpush1.msra.mxu0 %v4895_v44  ;;  %v4907_v44 = vld [vmem:[%s13185_s1 + $0xa8] sm:$0xff] }
 0x1d6   : > { %v1376_v54 = vpop.permute.xlu1 %1375  ;;  %v1374_v55 = vpop.permute.xlu0 %1373  ;;  %5028 = vmatprep.subr.mxu0 %v8762_v40 }
 0x1d7   : > { %1461 = vst.msk [vmem:[#allocation2 + $0xb0] sm:$0xff] %vm1449_vm6, %v1376_v54  ;;  %1460 = vst.msk [vmem:[#allocation2 + $0xa0] sm:$0xff] %vm1449_vm6, %v1374_v55  ;;  %v7841_v54 = vld [vmem:[%s8819_s26 + $0x30] sm:$0xff] }
 0x1d8   : > { %1749 = vrot.lane.b32.xlu1 %v9644_v50, %s8761_s10  ;;  %1747 = vrot.lane.b32.xlu0 %v9647_v51, %s8761_s10  ;;  %v9773_v55 = vld [vmem:[%s8819_s26 + $0x4c] sm:$0xff] }
 0x1da   : > { %v1380_v60 = vpop.permute.xlu1 %1379  ;;  %v1378_v61 = vpop.permute.xlu0 %1377 }
 0x1db   : > { %1463 = vst.msk [vmem:[#allocation2 + $0xd0] sm:$0xff] %vm1449_vm6, %v1380_v60  ;;  %1462 = vst.msk [vmem:[#allocation2 + $0xc0] sm:$0xff] %vm1449_vm6, %v1378_v61 }
 0x1dc   : > { %1753 = vrot.lane.b32.xlu1 %v9656_v58, %s8761_s10  ;;  %1751 = vrot.lane.b32.xlu0 %v9659_v59, %s8761_s10 }
 0x1de   : > { %v1384_v1 = vpop.permute.xlu1 %1383  ;;  %v1382_v12 = vpop.permute.xlu0 %1381 }
 0x1df   : > { %1465 = vst.msk [vmem:[#allocation2 + $0xf0] sm:$0xff] %vm1449_vm6, %v1384_v1  ;;  %1464 = vst.msk [vmem:[#allocation2 + $0xe0] sm:$0xff] %vm1449_vm6, %v1382_v12  ;;  %v4894_v1 = vld [vmem:[%s13185_s1 + $0x40] sm:$0xff]  ;;  %v9783_v12 = vld [vmem:[%s8819_s26 + $0x91] sm:$0xff] }
 0x1e0   : > { %1757 = vrot.lane.b32.xlu1 %v9673_v63, %s8761_s10  ;;  %1755 = vrot.lane.b32.xlu0 %v9676_v0, %s8761_s10  ;;  %3259 = vst.msk [vmem:[#allocation2 + $0x68] sm:$0xff] %vm290_vm0, %v9783_v12 }
 0x1e1   : > { %5029 = vmatpush1.msra.mxu0 %v4894_v1 }
 0x1e2   : > { %v1388_v19 = vpop.permute.xlu1 %1387  ;;  %v1386_v20 = vpop.permute.xlu0 %1385  ;;  %5030 = vmatprep.subr.mxu0 %v8762_v40 }
 0x1e3   : > { %1467 = vst.msk [vmem:[#allocation2 + $0x110] sm:$0xff] %vm1449_vm6, %v1388_v19  ;;  %1466 = vst.msk [vmem:[#allocation2 + $0x100] sm:$0xff] %vm1449_vm6, %v1386_v20  ;;  %v4893_v19 = vld [vmem:[%s13185_s1 + $0x38] sm:$0xff]  ;;  %v9794_v20 = vld [vmem:[%s8819_s26 + $0x60] sm:$0xff] }
 0x1e4   : > { %1761 = vrot.lane.b32.xlu1 %v9685_v16, %s8761_s10  ;;  %1759 = vrot.lane.b32.xlu0 %v9688_v18, %s8761_s10 }
 0x1e5   : > { %5031 = vmatpush1.msra.mxu0 %v4893_v19 }
 0x1e6   : > { %v1392_v26 = vpop.permute.xlu1 %1391  ;;  %v1390_v27 = vpop.permute.xlu0 %1389  ;;  %5032 = vmatprep.subr.mxu0 %v8762_v40 }
 0x1e7   : > { %1469 = vst.msk [vmem:[#allocation2 + $0x130] sm:$0xff] %vm1449_vm6, %v1392_v26  ;;  %1468 = vst.msk [vmem:[#allocation2 + $0x120] sm:$0xff] %vm1449_vm6, %v1390_v27  ;;  %v4892_v26 = vld [vmem:[%s13185_s1 + $0x30] sm:$0xff] }
 0x1e8   : > { %1765 = vrot.lane.b32.xlu1 %v7790_v24, %s8761_s10  ;;  %1763 = vrot.lane.b32.xlu0 %v7789_v25, %s8761_s10 }
 0x1e9   : > { %5033 = vmatpush1.msra.mxu0 %v4892_v26  ;;  %v4904_v26 = vld [vmem:[%s13185_s1 + $0x90] sm:$0xff] }
 0x1ea   : > { %v1396_v33 = vpop.permute.xlu1 %1395  ;;  %v1394_v34 = vpop.permute.xlu0 %1393  ;;  %5034 = vmatprep.subr.mxu0 %v8762_v40 }
 0x1eb   : > { %1471 = vst.msk [vmem:[#allocation2 + $0x150] sm:$0xff] %vm1449_vm6, %v1396_v33  ;;  %1470 = vst.msk [vmem:[#allocation2 + $0x140] sm:$0xff] %vm1449_vm6, %v1394_v34  ;;  %v7810_v34 = vld [vmem:[%s8819_s26 + $0x24] sm:$0xff] }
 0x1ec   : > { %1769 = vrot.lane.b32.xlu1 %v7792_v31, %s8761_s10  ;;  %1767 = vrot.lane.b32.xlu0 %v7791_v32, %s8761_s10  ;;  %v4891_v31 = vld [vmem:[%s13185_s1 + $0x28] sm:$0xff] }
 0x1ed   : > { %5035 = vmatpush1.msra.mxu0 %v4891_v31 }
 0x1ee   : > { %v1400_v41 = vpop.permute.xlu1 %1399  ;;  %v1398_v42 = vpop.permute.xlu0 %1397  ;;  %5036 = vmatprep.subr.mxu0 %v8762_v40 }
 0x1ef   : > { %1473 = vst.msk [vmem:[#allocation2 + $0x170] sm:$0xff] %vm1449_vm6, %v1400_v41  ;;  %1472 = vst.msk [vmem:[#allocation2 + $0x160] sm:$0xff] %vm1449_vm6, %v1398_v42  ;;  %v9845_v41 = vld [vmem:[%s8819_s26 + $0x54] sm:$0xff] }
 0x1f0   : > { %1773 = vrot.lane.b32.xlu1 %v7794_v38, %s8761_s10  ;;  %1771 = vrot.lane.b32.xlu0 %v7793_v39, %s8761_s10  ;;  %v4888_v39 = vld [vmem:[%s13185_s1 + $0x10] sm:$0xff] }
 0x1f2   : > { %v1404_v49 = vpop.permute.xlu1 %1403  ;;  %v1402_v53 = vpop.permute.xlu0 %1401 }
 0x1f3   : > { %1475 = vst.msk [vmem:[#allocation2 + $0x190] sm:$0xff] %vm1449_vm6, %v1404_v49  ;;  %1474 = vst.msk [vmem:[#allocation2 + $0x180] sm:$0xff] %vm1449_vm6, %v1402_v53  ;;  %v4910_v53 = vld [vmem:[%s13185_s1 + $0xc0] sm:$0xff] }
 0x1f4   : > { %1777 = vrot.lane.b32.xlu1 %v7796_v47, %s8761_s10  ;;  %1775 = vrot.lane.b32.xlu0 %v7795_v48, %s8761_s10  ;;  %v7842_v47 = vld [vmem:[%s8819_s26 + $0x38] sm:$0xff] }
 0x1f6   : > { %v1408_v3 = vpop.permute.xlu1 %1407  ;;  %v1406_v57 = vpop.permute.xlu0 %1405 }
 0x1f7   : > { %1477 = vst.msk [vmem:[#allocation2 + $0x1b0] sm:$0xff] %vm1449_vm6, %v1408_v3  ;;  %1476 = vst.msk [vmem:[#allocation2 + $0x1a0] sm:$0xff] %vm1449_vm6, %v1406_v57  ;;  %v9880_v3 = vld [vmem:[%s8819_s26 + $0x34] sm:$0xff] }
 0x1f8   : > { %3349 = vrot.lane.b32.xlu1 %v9527_v11, %s8754_s27  ;;  %1779 = vrot.lane.b32.xlu0 %v7797_v52, %s8761_s10  ;;  %v9877_v52 = vld [vmem:[%s8819_s26 + $0x68] sm:$0xff] }
 0x1fa   : > { %v1412_v15 = vpop.permute.xlu1 %1411  ;;  %v1410_v17 = vpop.permute.xlu0 %1409 }
 0x1fb   : > { %1479 = vst.msk [vmem:[#allocation2 + $0x1d0] sm:$0xff] %vm1449_vm6, %v1412_v15  ;;  %1478 = vst.msk [vmem:[#allocation2 + $0x1c0] sm:$0xff] %vm1449_vm6, %v1410_v17 }
 0x1fc   : > { %1932 = vrot.lane.b32.xlu1 %v7809_v9, %s8763_s12  ;;  %3541 = vrot.lane.b32.xlu0 %v9647_v51, %s8755_s28  ;;  %v9893_v9 = vld [vmem:[%s8819_s26 + $0x64] sm:$0xff] }
 0x1fe   : > { %v1416_v60 = vpop.permute.xlu1 %1415  ;;  %v1414_v61 = vpop.permute.xlu0 %1413 }
 0x1ff   : > { %1481 = vst.msk [vmem:[#allocation2 + $0x1f0] sm:$0xff] %vm1449_vm6, %v1416_v60  ;;  %1480 = vst.msk [vmem:[#allocation2 + $0x1e0] sm:$0xff] %vm1449_vm6, %v1414_v61  ;;  %v4906_v60 = vld [vmem:[%s13185_s1 + $0xa0] sm:$0xff]  ;;  %v8001_v61 = vld [vmem:[%s8819_s26 + $0x48] sm:$0xff] }
 0x200   : > { %2126 = vrot.lane.b32.xlu1 %v7841_v54, %s8764_s15  ;;  %3733 = vrot.lane.b32.xlu0 %v9773_v55, %s8756_s29  ;;  %v9903_v54 = vld [vmem:[%s8819_s26 + $0x99] sm:$0xff] }
 0x201   : > { %3260 = vst.msk [vmem:[#allocation2 + $0x78] sm:$0xff] %vm290_vm0, %v9903_v54 }
 0x202   : > { %v1549_v24 = vpop.permute.xlu1 %1548  ;;  %v1547_v25 = vpop.permute.xlu0 %1546 }
 0x203   : > { %1644 = vst.msk [vmem:[#allocation2 + $0x10] sm:$0xff] %vm13194_vm7, %v1549_v24  ;;  %1643 = vst.msk [vmem:[#allocation2] sm:$0xff] %vm13194_vm7, %v1547_v25 }
 0x204   : > { %2319 = vrot.lane.b32.xlu1 %v9407_v5, %s8765_s20  ;;  %3926 = vrot.lane.b32.xlu0 %v9794_v20, %s8757_s30  ;;  %v4890_v5 = vld [vmem:[%s13185_s1 + $0x20] sm:$0xff] }
 0x205   : > { %5037 = vmatpush1.msra.mxu0 %v4890_v5 }
 0x206   : > { %v1553_v27 = vpop.permute.xlu1 %1552  ;;  %v1551_v30 = vpop.permute.xlu0 %1550  ;;  %5038 = vmatprep.subr.mxu0 %v8762_v40 }
 0x207   : > { %1646 = vst.msk [vmem:[#allocation2 + $0x30] sm:$0xff] %vm13194_vm7, %v1553_v27  ;;  %1645 = vst.msk [vmem:[#allocation2 + $0x20] sm:$0xff] %vm13194_vm7, %v1551_v30 }
 0x208   : > { %4118 = vrot.lane.b32.xlu1 %v9425_v14, %s8758_s7  ;;  %3351 = vrot.lane.b32.xlu0 %v9524_v10, %s8754_s27  ;;  %v4889_v14 = vld [vmem:[%s13185_s1 + $0x18] sm:$0xff] }
 0x209   : > { %5039 = vmatpush1.msra.mxu0 %v4889_v14 }
 0x20a   : > { %v1557_v32 = vpop.permute.xlu1 %1556  ;;  %v1555_v33 = vpop.permute.xlu0 %1554  ;;  %5040 = vmatprep.subr.mxu0 %v8762_v40 }
 0x20b   : > { %1648 = vst.msk [vmem:[#allocation2 + $0x50] sm:$0xff] %vm13194_vm7, %v1557_v32  ;;  %1647 = vst.msk [vmem:[#allocation2 + $0x40] sm:$0xff] %vm13194_vm7, %v1555_v33  ;;  %5041 = vmatpush1.msra.mxu0 %v4888_v39  ;;  %v7970_v33 = vld [vmem:[%s8819_s26 + $0x3c] sm:$0xff] }
 0x20c   : > { %3543 = vrot.lane.b32.xlu1 %v9644_v50, %s8755_s28  ;;  %2512 = vrot.lane.b32.xlu0 %v9515_v7, %s8766_s16  ;;  %v4887_v7 = vld [vmem:[%s13185_s1 + $0x8] sm:$0xff] }
 0x20d   : > { %5042 = vmatprep.subr.mxu0 %v8762_v40 }
 0x20e   : > { %v1561_v36 = vpop.permute.xlu1 %1560  ;;  %v1559_v38 = vpop.permute.xlu0 %1558  ;;  %5043 = vmatpush1.msra.mxu0 %v4887_v7 }
 0x20f   : > { %1650 = vst.msk [vmem:[#allocation2 + $0x70] sm:$0xff] %vm13194_vm7, %v1561_v36  ;;  %1649 = vst.msk [vmem:[#allocation2 + $0x60] sm:$0xff] %vm13194_vm7, %v1559_v38  ;;  %5044 = vmatprep.subr.mxu0 %v8762_v40  ;;  %v9972_v36 = vld [vmem:[%s8819_s26 + $0x6c] sm:$0xff]  ;;  %v9975_v38 = vld [vmem:[%s8819_s26 + $0x78] sm:$0xff] }
 0x210   : > { %1934 = vrot.lane.b32.xlu1 %v7810_v34, %s8763_s12  ;;  %4310 = vrot.lane.b32.xlu0 %v9539_v22, %s8759_s8  ;;  %v9965_v34 = vld [vmem:[%s8819_s26 + $0x79] sm:$0xff] }
 0x211   : > { %5045 = vmatpush1.msra.mxu0 %v4886_v46  ;;  %3257 = vst.msk [vmem:[#allocation2 + $0x48] sm:$0xff] %vm290_vm0, %v9965_v34 }
 0x212   : > { %v1565_v42 = vpop.permute.xlu1 %1564  ;;  %v1563_v43 = vpop.permute.xlu0 %1562  ;;  %5060 = vmatprep.subr.mxu0 %v8762_v40 }
 0x213   : > { %1652 = vst.msk [vmem:[#allocation2 + $0x90] sm:$0xff] %vm13194_vm7, %v1565_v42  ;;  %1651 = vst.msk [vmem:[#allocation2 + $0x80] sm:$0xff] %vm13194_vm7, %v1563_v43  ;;  %5061 = vmatpush2.msra.mxu0 %v4910_v53  ;;  %v9980_v42 = vld [vmem:[%s8819_s26 + $0xa9] sm:$0xff] }
 0x214   : > { %3735 = vrot.lane.b32.xlu1 %v9845_v41, %s8756_s29  ;;  %2705 = vrot.lane.b32.xlu0 %v9635_v29, %s8767_s11  ;;  %v4909_v29 = vld [vmem:[%s13185_s1 + $0xb8] sm:$0xff]  ;;  %3261 = vst.msk [vmem:[#allocation2 + $0x88] sm:$0xff] %vm290_vm0, %v9980_v42  ;;  %v8002_v43 = vld [vmem:[%s8819_s26 + $0x50] sm:$0xff] }
 0x215   : > { %5062 = vmatprep.subr.mxu0 %v8762_v40 }
 0x216   : > { %v1569_v48 = vpop.permute.xlu1 %1568  ;;  %v1567_v49 = vpop.permute.xlu0 %1566  ;;  %5063 = vmatpush2.msra.mxu0 %v4909_v29  ;;  %v8736_v29 = vld [vmem:[%s8819_s26 + $0x79] sm:$0xff] }
 0x217   : > { %1654 = vst.msk [vmem:[#allocation2 + $0xb0] sm:$0xff] %vm13194_vm7, %v1569_v48  ;;  %1653 = vst.msk [vmem:[#allocation2 + $0xa0] sm:$0xff] %vm13194_vm7, %v1567_v49  ;;  %5064 = vmatprep.subr.mxu0 %v8762_v40  ;;  %v8735_v48 = vld [vmem:[%s8819_s26 + $0x49] sm:$0xff] }
 0x218   : > { %2128 = vrot.lane.b32.xlu1 %v7842_v47, %s8764_s15  ;;  %4502 = vrot.lane.b32.xlu0 %v9659_v59, %s8760_s9 }
 0x219   : > { %5065 = vmatpush2.msra.mxu0 %v4908_v8 }
 0x21a   : > { %v1573_v57 = vpop.permute.xlu1 %1572  ;;  %v1571_v56 = vpop.permute.xlu0 %1570  ;;  %5066 = vmatprep.subr.mxu0 %v8762_v40 }
 0x21b   : > { %1656 = vst.msk [vmem:[#allocation2 + $0xd0] sm:$0xff] %vm13194_vm7, %v1573_v57  ;;  %1655 = vst.msk [vmem:[#allocation2 + $0xc0] sm:$0xff] %vm13194_vm7, %v1571_v56  ;;  %5067 = vmatpush2.msra.mxu0 %v4907_v44  ;;  %v10023_v44 = vld [vmem:[%s8819_s26 + $0x80] sm:$0xff] }
 0x21c   : > { %3928 = vrot.lane.b32.xlu1 %v9877_v52, %s8757_s30  ;;  %2898 = vrot.lane.b32.xlu0 %v9880_v3, %s8768_s24 }
 0x21d   : > { %5068 = vmatprep.subr.mxu0 %v8762_v40 }
 0x21e   : > { %v1577_v15 = vpop.permute.xlu1 %1576  ;;  %v1575_v17 = vpop.permute.xlu0 %1574  ;;  %5069 = vmatpush2.msra.mxu0 %v4906_v60 }
 0x21f   : > { %1658 = vst.msk [vmem:[#allocation2 + $0xf0] sm:$0xff] %vm13194_vm7, %v1577_v15  ;;  %1657 = vst.msk [vmem:[#allocation2 + $0xe0] sm:$0xff] %vm13194_vm7, %v1575_v17  ;;  %5070 = vmatprep.subr.mxu0 %v8762_v40 }
 0x220   : > { %2321 = vrot.lane.b32.xlu1 %v9404_v4, %s8765_s20  ;;  %4694 = vrot.lane.b32.xlu0 %v9893_v9, %s8761_s10  ;;  %v4905_v4 = vld [vmem:[%s13185_s1 + $0x98] sm:$0xff] }
 0x221   : > { %5071 = vmatpush2.msra.mxu0 %v4905_v4  ;;  %v10037_v4 = vld [vmem:[%s8819_s26 + $0xb1] sm:$0xff] }
 0x222   : > { %v1581_v1 = vpop.permute.xlu1 %1580  ;;  %v1579_v19 = vpop.permute.xlu0 %1578  ;;  %5072 = vmatprep.subr.mxu0 %v8762_v40  ;;  %3262 = vst.msk [vmem:[#allocation2 + $0x98] sm:$0xff] %vm290_vm0, %v10037_v4 }
 0x223   : > { %1660 = vst.msk [vmem:[#allocation2 + $0x110] sm:$0xff] %vm13194_vm7, %v1581_v1  ;;  %1659 = vst.msk [vmem:[#allocation2 + $0x100] sm:$0xff] %vm13194_vm7, %v1579_v19  ;;  %5073 = vmatpush2.msra.mxu0 %v4904_v26 }
 0x224   : > { %3353 = vrot.lane.b32.xlu1 %v9539_v22, %s8754_s27  ;;  %3092 = vrot.lane.b32.xlu0 %v8001_v61, %s8769_s23  ;;  %v4903_v22 = vld [vmem:[%s13185_s1 + $0x88] sm:$0xff] }
 0x225   : > { %5074 = vmatprep.subr.mxu0 %v8762_v40 }
 0x226   : > { %v1585_v24 = vpop.permute.xlu1 %1584  ;;  %v1583_v25 = vpop.permute.xlu0 %1582  ;;  %5075 = vmatpush2.msra.mxu0 %v4903_v22 }
 0x227   : > { %1662 = vst.msk [vmem:[#allocation2 + $0x130] sm:$0xff] %vm13194_vm7, %v1585_v24  ;;  %1661 = vst.msk [vmem:[#allocation2 + $0x120] sm:$0xff] %vm13194_vm7, %v1583_v25  ;;  %5076 = vmatprep.subr.mxu0 %v8762_v40 }
 0x228   : > { %2514 = vrot.lane.b32.xlu1 %v9512_v6, %s8766_s16  ;;  %4120 = vrot.lane.b32.xlu0 %v9422_v13, %s8758_s7  ;;  %v4902_v6 = vld [vmem:[%s13185_s1 + $0x80] sm:$0xff] }
 0x229   : > { %5077 = vmatpush2.msra.mxu0 %v4902_v6  ;;  %v10085_v6 = vld [vmem:[%s8819_s26 + $0x90] sm:$0xff] }
 0x22a   : > { %v1589_v27 = vpop.permute.xlu1 %1588  ;;  %v1587_v30 = vpop.permute.xlu0 %1586 }
 0x22b   : > { %1664 = vst.msk [vmem:[#allocation2 + $0x150] sm:$0xff] %vm13194_vm7, %v1589_v27  ;;  %1663 = vst.msk [vmem:[#allocation2 + $0x140] sm:$0xff] %vm13194_vm7, %v1587_v30 }
 0x22c   : > { %4312 = vrot.lane.b32.xlu1 %v9536_v21, %s8759_s8  ;;  %3545 = vrot.lane.b32.xlu0 %v9659_v59, %s8755_s28 }
 0x22e   : > { %v1593_v13 = vpop.permute.xlu1 %1592  ;;  %v1591_v31 = vpop.permute.xlu0 %1590 }
 0x22f   : > { %1666 = vst.msk [vmem:[#allocation2 + $0x170] sm:$0xff] %vm13194_vm7, %v1593_v13  ;;  %1665 = vst.msk [vmem:[#allocation2 + $0x160] sm:$0xff] %vm13194_vm7, %v1591_v31 }
 0x230   : > { %2707 = vrot.lane.b32.xlu1 %v9632_v28, %s8767_s11  ;;  %1936 = vrot.lane.b32.xlu0 %v9880_v3, %s8763_s12 }
 0x232   : > { %v1597_v5 = vpop.permute.xlu1 %1596  ;;  %v1595_v32 = vpop.permute.xlu0 %1594 }
 0x233   : > { %1668 = vst.msk [vmem:[#allocation2 + $0x190] sm:$0xff] %vm13194_vm7, %v1597_v5  ;;  %1667 = vst.msk [vmem:[#allocation2 + $0x180] sm:$0xff] %vm13194_vm7, %v1595_v32  ;;  %v10090_v5 = vld [vmem:[%s8819_s26 + $0xc1] sm:$0xff] }
 0x234   : > { %4504 = vrot.lane.b32.xlu1 %v9656_v58, %s8760_s9  ;;  %3737 = vrot.lane.b32.xlu0 %v9893_v9, %s8756_s29  ;;  %3263 = vst.msk [vmem:[#allocation2 + $0xa8] sm:$0xff] %vm290_vm0, %v10090_v5 }
 0x236   : > { %v1601_v28 = vpop.permute.xlu1 %1600  ;;  %v1599_v14 = vpop.permute.xlu0 %1598 }
 0x237   : > { %1670 = vst.msk [vmem:[#allocation2 + $0x1b0] sm:$0xff] %vm13194_vm7, %v1601_v28  ;;  %1669 = vst.msk [vmem:[#allocation2 + $0x1a0] sm:$0xff] %vm13194_vm7, %v1599_v14  ;;  %v8737_v14 = vld [vmem:[%s8819_s26 + $0x82] sm:$0xff] }
 0x238   : > { %2900 = vrot.lane.b32.xlu1 %v7970_v33, %s8768_s24  ;;  %2130 = vrot.lane.b32.xlu0 %v8001_v61, %s8764_s15 }
 0x23a   : > { %v1605_v39 = vpop.permute.xlu1 %1604  ;;  %v1603_v7 = vpop.permute.xlu0 %1602 }
 0x23b   : > { %1672 = vst.msk [vmem:[#allocation2 + $0x1d0] sm:$0xff] %vm13194_vm7, %v1605_v39  ;;  %1671 = vst.msk [vmem:[#allocation2 + $0x1c0] sm:$0xff] %vm13194_vm7, %v1603_v7  ;;  %v7909_v39 = vld [vmem:[%s8819_s26 + $0x62] sm:$0xff] }
 0x23c   : > { %4696 = vrot.lane.b32.xlu1 %v9972_v36, %s8761_s10  ;;  %3930 = vrot.lane.b32.xlu0 %v9975_v38, %s8757_s30 }
 0x23e   : > { %v1609_v46 = vpop.permute.xlu1 %1608  ;;  %v1607_v47 = vpop.permute.xlu0 %1606 }
 0x23f   : > { %1674 = vst.msk [vmem:[#allocation2 + $0x1f0] sm:$0xff] %vm13194_vm7, %v1609_v46  ;;  %1673 = vst.msk [vmem:[#allocation2 + $0x1e0] sm:$0xff] %vm13194_vm7, %v1607_v47 }
 0x240   : > { %3094 = vrot.lane.b32.xlu1 %v8002_v43, %s8769_s23  ;;  %2323 = vrot.lane.b32.xlu0 %v8735_v48, %s8765_s20 }
 0x242   : > { %v1742_v49 = vpop.permute.xlu1 %1741  ;;  %v1740_v53 = vpop.permute.xlu0 %1739 }
 0x243   : > { %1837 = vst.msk [vmem:[#allocation2 + $0x10] sm:$0xff] %vm1835_vm8, %v1742_v49  ;;  %1836 = vst.msk [vmem:[#allocation2] sm:$0xff] %vm1835_vm8, %v1740_v53 }
 0x244   : > { %4122 = vrot.lane.b32.xlu1 %v8736_v29, %s8758_s7  ;;  %3355 = vrot.lane.b32.xlu0 %v9536_v21, %s8754_s27 }
 0x246   : > { %v1746_v3 = vpop.permute.xlu1 %1745  ;;  %v1744_v57 = vpop.permute.xlu0 %1743 }
 0x247   : > { %1839 = vst.msk [vmem:[#allocation2 + $0x30] sm:$0xff] %vm1835_vm8, %v1746_v3  ;;  %1838 = vst.msk [vmem:[#allocation2 + $0x20] sm:$0xff] %vm1835_vm8, %v1744_v57 }
 0x248   : > { %3547 = vrot.lane.b32.xlu1 %v9656_v58, %s8755_s28  ;;  %2516 = vrot.lane.b32.xlu0 %v9527_v11, %s8766_s16 }
 0x24a   : > { %v1750_v56 = vpop.permute.xlu1 %1749  ;;  %v1748_v8 = vpop.permute.xlu0 %1747 }
 0x24b   : > { %1841 = vst.msk [vmem:[#allocation2 + $0x50] sm:$0xff] %vm1835_vm8, %v1750_v56  ;;  %1840 = vst.msk [vmem:[#allocation2 + $0x40] sm:$0xff] %vm1835_vm8, %v1748_v8  ;;  %v10152_v56 = vld [vmem:[%s8819_s26 + $0xc9] sm:$0xff] }
 0x24c   : > { %1938 = vrot.lane.b32.xlu1 %v7970_v33, %s8763_s12  ;;  %4314 = vrot.lane.b32.xlu0 %v9551_v37, %s8759_s8  ;;  %3264 = vst.msk [vmem:[#allocation2 + $0xb8] sm:$0xff] %vm290_vm0, %v10152_v56 }
 0x24e   : > { %v1754_v21 = vpop.permute.xlu1 %1753  ;;  %v1752_v15 = vpop.permute.xlu0 %1751 }
 0x24f   : > { %1843 = vst.msk [vmem:[#allocation2 + $0x70] sm:$0xff] %vm1835_vm8, %v1754_v21  ;;  %1842 = vst.msk [vmem:[#allocation2 + $0x60] sm:$0xff] %vm1835_vm8, %v1752_v15 }
 0x250   : > { %3739 = vrot.lane.b32.xlu1 %v9972_v36, %s8756_s29  ;;  %2709 = vrot.lane.b32.xlu0 %v9647_v51, %s8767_s11  ;;  %v10032_v51 = vld [vmem:[%s8819_s26 + $0x7c] sm:$0xff] }
 0x252   : > { %v1758_v11 = vpop.permute.xlu1 %1757  ;;  %v1756_v17 = vpop.permute.xlu0 %1755 }
 0x253   : > { %1845 = vst.msk [vmem:[#allocation2 + $0x90] sm:$0xff] %vm1835_vm8, %v1758_v11  ;;  %1844 = vst.msk [vmem:[#allocation2 + $0x80] sm:$0xff] %vm1835_vm8, %v1756_v17 }
 0x254   : > { %2132 = vrot.lane.b32.xlu1 %v8002_v43, %s8764_s15  ;;  %4506 = vrot.lane.b32.xlu0 %v9676_v0, %s8760_s9 }
 0x256   : > { %v1762_v60 = vpop.permute.xlu1 %1761  ;;  %v1760_v61 = vpop.permute.xlu0 %1759 }
 0x257   : > { %1847 = vst.msk [vmem:[#allocation2 + $0xb0] sm:$0xff] %vm1835_vm8, %v1762_v60  ;;  %1846 = vst.msk [vmem:[#allocation2 + $0xa0] sm:$0xff] %vm1835_vm8, %v1760_v61  ;;  %v10174_v61 = vld [vmem:[%s8819_s26 + $0x9a] sm:$0xff] }
 0x258   : > { %3932 = vrot.lane.b32.xlu1 %v10023_v44, %s8757_s30  ;;  %2902 = vrot.lane.b32.xlu0 %v9773_v55, %s8768_s24 }
 0x25a   : > { %v1766_v1 = vpop.permute.xlu1 %1765  ;;  %v1764_v19 = vpop.permute.xlu0 %1763 }
 0x25b   : > { %1849 = vst.msk [vmem:[#allocation2 + $0xd0] sm:$0xff] %vm1835_vm8, %v1766_v1  ;;  %1848 = vst.msk [vmem:[#allocation2 + $0xc0] sm:$0xff] %vm1835_vm8, %v1764_v19 }
 0x25c   : > { %2325 = vrot.lane.b32.xlu1 %v9664_v62, %s8765_s20  ;;  %4698 = vrot.lane.b32.xlu0 %v10032_v51, %s8761_s10 }
 0x25e   : > { %v1770_v24 = vpop.permute.xlu1 %1769  ;;  %v1768_v25 = vpop.permute.xlu0 %1767 }
 0x25f   : > { %1851 = vst.msk [vmem:[#allocation2 + $0xf0] sm:$0xff] %vm1835_vm8, %v1770_v24  ;;  %1850 = vst.msk [vmem:[#allocation2 + $0xe0] sm:$0xff] %vm1835_vm8, %v1768_v25 }
 0x260   : > { %3357 = vrot.lane.b32.xlu1 %v9551_v37, %s8754_s27  ;;  %3096 = vrot.lane.b32.xlu0 %v9794_v20, %s8769_s23 }
 0x262   : > { %v1774_v26 = vpop.permute.xlu1 %1773  ;;  %v1772_v62 = vpop.permute.xlu0 %1771 }
 0x263   : > { %1853 = vst.msk [vmem:[#allocation2 + $0x110] sm:$0xff] %vm1835_vm8, %v1774_v26  ;;  %1852 = vst.msk [vmem:[#allocation2 + $0x100] sm:$0xff] %vm1835_vm8, %v1772_v62 }
 0x264   : > { %2518 = vrot.lane.b32.xlu1 %v9524_v10, %s8766_s16  ;;  %4124 = vrot.lane.b32.xlu0 %v9693_v23, %s8758_s7 }
 0x266   : > { %v1778_v22 = vpop.permute.xlu1 %1777  ;;  %v1776_v27 = vpop.permute.xlu0 %1775 }
 0x267   : > { %1855 = vst.msk [vmem:[#allocation2 + $0x130] sm:$0xff] %vm1835_vm8, %v1778_v22  ;;  %1854 = vst.msk [vmem:[#allocation2 + $0x120] sm:$0xff] %vm1835_vm8, %v1776_v27 }
 0x268   : > { %4316 = vrot.lane.b32.xlu1 %v9548_v35, %s8759_s8  ;;  %3549 = vrot.lane.b32.xlu0 %v9676_v0, %s8755_s28 }
 0x26a   : > { %v3350_v37 = vpop.permute.xlu1 %3349  ;;  %v1780_v30 = vpop.permute.xlu0 %1779 }
 0x26b   : > { %3445 = vst.msk [vmem:[#allocation2 + $0x8] sm:$0xff] %vm483_vm1, %v3350_v37  ;;  %v10209_v37 = vld [vmem:[%s8819_s26 + $0xd9] sm:$0xff] }
 0x26c   : > { %1856 = vst.msk [vmem:[#allocation2 + $0x140] sm:$0xff] %vm1835_vm8, %v1780_v30  ;;  %2711 = vrot.lane.b32.xlu1 %v9644_v50, %s8767_s11  ;;  %1940 = vrot.lane.b32.xlu0 %v9773_v55, %s8763_s12  ;;  %v10082_v55 = vld [vmem:[%s8819_s26 + $0x84] sm:$0xff] }
 0x26d   : > { %3265 = vst.msk [vmem:[#allocation2 + $0xc8] sm:$0xff] %vm290_vm0, %v10209_v37 }
 0x26e   : > { %v1933_v10 = vpop.permute.xlu1 %1932  ;;  %v3542_v35 = vpop.permute.xlu0 %3541 }
 0x26f   : > { %2029 = vst.msk [vmem:[#allocation2] sm:$0xff] %vm2028_vm9, %v1933_v10 }
 0x270   : > { %3637 = vst.msk [vmem:[#allocation2 + $0x8] sm:$0xff] %vm676_vm2, %v3542_v35  ;;  %4508 = vrot.lane.b32.xlu1 %v9673_v63, %s8760_s9  ;;  %3741 = vrot.lane.b32.xlu0 %v10032_v51, %s8756_s29 }
 0x272   : > { %v2127_v50 = vpop.permute.xlu1 %2126  ;;  %v3734_v0 = vpop.permute.xlu0 %3733 }
 0x273   : > { %2223 = vst.msk [vmem:[#allocation2] sm:$0xff] %vm13193_vm10, %v2127_v50 }
 0x274   : > { %3829 = vst.msk [vmem:[#allocation2 + $0x8] sm:$0xff] %vm869_vm3, %v3734_v0  ;;  %2904 = vrot.lane.b32.xlu1 %v9845_v41, %s8768_s24  ;;  %2134 = vrot.lane.b32.xlu0 %v9794_v20, %s8764_s15 }
 0x276   : > { %v2320_v13 = vpop.permute.xlu1 %2319  ;;  %v3927_v31 = vpop.permute.xlu0 %3926 }
 0x277   : > { %2416 = vst.msk [vmem:[#allocation2] sm:$0xff] %vm13191_vm11, %v2320_v13  ;;  %v10231_v13 = vld [vmem:[%s8819_s26 + $0x9b] sm:$0xff] }
 0x278   : > { %4022 = vst.msk [vmem:[#allocation2 + $0x8] sm:$0xff] %vm13196_vm4, %v3927_v31  ;;  %4700 = vrot.lane.b32.xlu1 %v10082_v55, %s8761_s10  ;;  %3934 = vrot.lane.b32.xlu0 %v10085_v6, %s8757_s30  ;;  %v7911_v31 = vld [vmem:[%s8819_s26 + $0x7a] sm:$0xff] }
 0x27a   : > { %v4119_v20 = vpop.permute.xlu1 %4118  ;;  %v3352_v32 = vpop.permute.xlu0 %3351 }
 0x27b   : > { %4214 = vst.msk [vmem:[#allocation2 + $0x8] sm:$0xff] %vm1256_vm5, %v4119_v20 }
 0x27c   : > { %3446 = vst.msk [vmem:[#allocation2 + $0x18] sm:$0xff] %vm483_vm1, %v3352_v32  ;;  %3098 = vrot.lane.b32.xlu1 %v9877_v52, %s8769_s23  ;;  %2327 = vrot.lane.b32.xlu0 %v9764_v45, %s8765_s20  ;;  %v10117_v45 = vld [vmem:[%s8819_s26 + $0x92] sm:$0xff]  ;;  %v10240_v32 = vld [vmem:[%s8819_s26 + $0xaa] sm:$0xff] }
 0x27e   : > { %v3544_v33 = vpop.permute.xlu1 %3543  ;;  %v2513_v28 = vpop.permute.xlu0 %2512 }
 0x27f   : > { %3638 = vst.msk [vmem:[#allocation2 + $0x18] sm:$0xff] %vm676_vm2, %v3544_v33 }
 0x280   : > { %2609 = vst.msk [vmem:[#allocation2] sm:$0xff] %vm2608_vm12, %v2513_v28  ;;  %4126 = vrot.lane.b32.xlu1 %v9783_v12, %s8758_s7  ;;  %3359 = vrot.lane.b32.xlu0 %v8737_v14, %s8754_s27  ;;  %v7943_v14 = vld [vmem:[%s8819_s26 + $0x7b] sm:$0xff] }
 0x282   : > { %v1935_v7 = vpop.permute.xlu1 %1934  ;;  %v4311_v43 = vpop.permute.xlu0 %4310 }
 0x283   : > { %2030 = vst.msk [vmem:[#allocation2 + $0x10] sm:$0xff] %vm2028_vm9, %v1935_v7 }
 0x284   : > { %4406 = vst.msk [vmem:[#allocation2 + $0x8] sm:$0xff] %vm1449_vm6, %v4311_v43  ;;  %3551 = vrot.lane.b32.xlu1 %v9673_v63, %s8755_s28  ;;  %2520 = vrot.lane.b32.xlu0 %v7909_v39, %s8766_s16  ;;  %v10255_v43 = vld [vmem:[%s8819_s26 + $0xab] sm:$0xff] }
 0x286   : > { %v3736_v46 = vpop.permute.xlu1 %3735  ;;  %v2706_v47 = vpop.permute.xlu0 %2705 }
 0x287   : > { %3830 = vst.msk [vmem:[#allocation2 + $0x18] sm:$0xff] %vm869_vm3, %v3736_v46 }
 0x288   : > { %2802 = vst.msk [vmem:[#allocation2] sm:$0xff] %vm2801_vm13, %v2706_v47  ;;  %1942 = vrot.lane.b32.xlu1 %v9845_v41, %s8763_s12  ;;  %4318 = vrot.lane.b32.xlu0 %v10117_v45, %s8759_s8  ;;  %v10138_v41 = vld [vmem:[%s8819_s26 + $0x98] sm:$0xff]  ;;  %v10264_v47 = vld [vmem:[%s8819_s26 + $0xb0] sm:$0xff] }
 0x28a   : > { %v2129_v48 = vpop.permute.xlu1 %2128  ;;  %v4503_v63 = vpop.permute.xlu0 %4502 }
 0x28b   : > { %2224 = vst.msk [vmem:[#allocation2 + $0x10] sm:$0xff] %vm13193_vm10, %v2129_v48 }
 0x28c   : > { %4598 = vst.msk [vmem:[#allocation2 + $0x8] sm:$0xff] %vm13194_vm7, %v4503_v63  ;;  %3743 = vrot.lane.b32.xlu1 %v10082_v55, %s8756_s29  ;;  %2713 = vrot.lane.b32.xlu0 %v9659_v59, %s8767_s11  ;;  %v10147_v59 = vld [vmem:[%s8819_s26 + $0x94] sm:$0xff] }
 0x28e   : > { %v3929_v49 = vpop.permute.xlu1 %3928  ;;  %v2899_v53 = vpop.permute.xlu0 %2898 }
 0x28f   : > { %4023 = vst.msk [vmem:[#allocation2 + $0x18] sm:$0xff] %vm13196_vm4, %v3929_v49  ;;  %v10273_v49 = vld [vmem:[%s8819_s26 + $0xac] sm:$0xff] }
 0x290   : > { %2995 = vst.msk [vmem:[#allocation2] sm:$0xff] %vm13192_vm14, %v2899_v53  ;;  %2136 = vrot.lane.b32.xlu1 %v9877_v52, %s8764_s15  ;;  %4510 = vrot.lane.b32.xlu0 %v9688_v18, %s8760_s9 }
 0x292   : > { %v2322_v29 = vpop.permute.xlu1 %2321  ;;  %v4695_v3 = vpop.permute.xlu0 %4694 }
 0x293   : > { %2417 = vst.msk [vmem:[#allocation2 + $0x10] sm:$0xff] %vm13191_vm11, %v2322_v29  ;;  %vm4917_vm11 = vcmask 588800   ;;  %v10278_v29 = vld [vmem:[%s8819_s26 + $0xe1] sm:$0xff] }
 0x294   : > { %4790 = vst.msk [vmem:[#allocation2 + $0x8] sm:$0xff] %vm1835_vm8, %v4695_v3  ;;  %3936 = vrot.lane.b32.xlu1 %v10138_v41, %s8757_s30  ;;  %2906 = vrot.lane.b32.xlu0 %v9893_v9, %s8768_s24 }
 0x295   : > { %3266 = vst.msk [vmem:[#allocation2 + $0xd8] sm:$0xff] %vm290_vm0, %v10278_v29 }
 0x296   : > { %v3354_v52 = vpop.permute.xlu1 %3353  ;;  %v3093_v57 = vpop.permute.xlu0 %3092 }
 0x297   : > { %3447 = vst.msk [vmem:[#allocation2 + $0x28] sm:$0xff] %vm483_vm1, %v3354_v52 }
 0x298   : > { %3189 = vst.msk [vmem:[#allocation2] sm:$0xff] %vm3188_vm15, %v3093_v57  ;;  %2329 = vrot.lane.b32.xlu1 %v9866_v2, %s8765_s20  ;;  %4702 = vrot.lane.b32.xlu0 %v10147_v59, %s8761_s10  ;;  %v7910_v2 = vld [vmem:[%s8819_s26 + $0x6a] sm:$0xff] }
 0x29a   : > { %v2515_v8 = vpop.permute.xlu1 %2514  ;;  %v4121_v21 = vpop.permute.xlu0 %4120 }
 0x29b   : > { %v4823_v15 = vld [vmem:[#allocation2 + $0x8] sm:$0xff]  ;;  %2610 = vst.msk [vmem:[#allocation2 + $0x10] sm:$0xff] %vm2608_vm12, %v2515_v8 }
 0x29c   : > { %4215 = vst.msk [vmem:[#allocation2 + $0x18] sm:$0xff] %vm1256_vm5, %v4121_v21  ;;  %8322 = vmatprep.mubr.msk.f32.mxu0 %vm4917_vm11, %v4823_v15  ;;  %3361 = vrot.lane.b32.xlu1 %v10117_v45, %s8754_s27 }
 0x29d   : > { %3100 = vrot.lane.b32.xlu0 %v9975_v38, %s8769_s23 }
 0x29e   : > { %v4313_v11 = vpop.permute.xlu1 %4312  ;;  %v3546_v17 = vpop.permute.xlu0 %3545 }
 0x29f   : > { %v4822_v60 = vld [vmem:[#allocation2] sm:$0xff]  ;;  %4407 = vst.msk [vmem:[#allocation2 + $0x18] sm:$0xff] %vm1449_vm6, %v4313_v11 }
 0x2a0   : > { %3639 = vst.msk [vmem:[#allocation2 + $0x28] sm:$0xff] %vm676_vm2, %v3546_v17  ;;  %5079 = vmatmul.mubr.f32.vlgmr.msra.gmra.mxu0 %v4822_v60  ;;  %2522 = vrot.lane.b32.xlu1 %v7910_v2, %s8766_s16  ;;  %v10300_v2 = vld [vmem:[%s8819_s26 + $0xb2] sm:$0xff]  ;;  %v7944_v60 = vld [vmem:[%s8819_s26 + $0x83] sm:$0xff] }
 0x2a1   : > { %4128 = vrot.lane.b32.xlu0 %v9903_v54, %s8758_s7 }
 0x2a2   : > { %v2708_v1 = vpop.permute.xlu1 %2707  ;;  %v1937_v19 = vpop.permute.xlu0 %1936 }
 0x2a3   : > { %2803 = vst.msk [vmem:[#allocation2 + $0x10] sm:$0xff] %vm2801_vm13, %v2708_v1 }
 0x2a4   : > { %2031 = vst.msk [vmem:[#allocation2 + $0x20] sm:$0xff] %vm2028_vm9, %v1937_v19  ;;  %4320 = vrot.lane.b32.xlu1 %v10174_v61, %s8759_s8 }
 0x2a5   : > { %3553 = vrot.lane.b32.xlu0 %v9688_v18, %s8755_s28 }
 0x2a6   : > { %v4505_v24 = vpop.permute.xlu1 %4504  ;;  %v3738_v25 = vpop.permute.xlu0 %3737 }
 0x2a7   : > { %4599 = vst.msk [vmem:[#allocation2 + $0x18] sm:$0xff] %vm13194_vm7, %v4505_v24  ;;  %v10329_v24 = vld [vmem:[%s8819_s26 + $0xb3] sm:$0xff] }
 0x2a8   : > { %3831 = vst.msk [vmem:[#allocation2 + $0x28] sm:$0xff] %vm869_vm3, %v3738_v25  ;;  %2715 = vrot.lane.b32.xlu1 %v9656_v58, %s8767_s11  ;;  %v10201_v58 = vld [vmem:[%s8819_s26 + $0x9c] sm:$0xff] }
 0x2a9   : > { %1944 = vrot.lane.b32.xlu0 %v9893_v9, %s8763_s12  ;;  %v10204_v9 = vld [vmem:[%s8819_s26 + $0xa8] sm:$0xff] }
 0x2aa   : > { %v2901_v26 = vpop.permute.xlu1 %2900  ;;  %v2131_v62 = vpop.permute.xlu0 %2130 }
 0x2ab   : > { %2996 = vst.msk [vmem:[#allocation2 + $0x10] sm:$0xff] %vm13192_vm14, %v2901_v26  ;;  %vm13198_vm14 = vcmask 786112  }
 0x2ac   : > { %2225 = vst.msk [vmem:[#allocation2 + $0x20] sm:$0xff] %vm13193_vm10, %v2131_v62  ;;  %4512 = vrot.lane.b32.xlu1 %v9685_v16, %s8760_s9 }
 0x2ad   : > { %3745 = vrot.lane.b32.xlu0 %v10147_v59, %s8756_s29 }
 0x2ae   : > { %v4697_v18 = vpop.permute.xlu1 %4696  ;;  %v3931_v22 = vpop.permute.xlu0 %3930 }
 0x2af   : > { %4791 = vst.msk [vmem:[#allocation2 + $0x18] sm:$0xff] %vm1835_vm8, %v4697_v18 }
 0x2b0   : > { %4024 = vst.msk [vmem:[#allocation2 + $0x28] sm:$0xff] %vm13196_vm4, %v3931_v22  ;;  %2908 = vrot.lane.b32.xlu1 %v9972_v36, %s8768_s24  ;;  %v10347_v22 = vld [vmem:[%s8819_s26 + $0xc0] sm:$0xff] }
 0x2b1   : > { %2138 = vrot.lane.b32.xlu0 %v9975_v38, %s8764_s15 }
 0x2b2   : > { %v3095_v16 = vpop.permute.xlu1 %3094  ;;  %v2324_v27 = vpop.permute.xlu0 %2323 }
 0x2b3   : > { %3190 = vst.msk [vmem:[#allocation2 + $0x10] sm:$0xff] %vm3188_vm15, %v3095_v16 }
 0x2b4   : > { %2418 = vst.msk [vmem:[#allocation2 + $0x20] sm:$0xff] %vm13198_vm14, %v2324_v27  ;;  %4704 = vrot.lane.b32.xlu1 %v10201_v58, %s8761_s10  ;;  %vm13199_vm14 = vcmask 982912  }
 0x2b5   : > { %3938 = vrot.lane.b32.xlu0 %v10204_v9, %s8757_s30 }
 0x2b6   : > { %v4123_v38 = vpop.permute.xlu1 %4122  ;;  %v3356_v30 = vpop.permute.xlu0 %3355  ;;  %v4825_v10 = vld [vmem:[#allocation2 + $0x18] sm:$0xff] }
 0x2b7   : > { %4216 = vst.msk [vmem:[#allocation2 + $0x28] sm:$0xff] %vm1256_vm5, %v4123_v38  ;;  %8323 = vmatprep.mubr.msk.f32.mxu0 %vm4917_vm11, %v4825_v10  ;;  %v10352_v38 = vld [vmem:[%s8819_s26 + $0xf1] sm:$0xff] }
 0x2b8   : > { %3448 = vst.msk [vmem:[#allocation2 + $0x38] sm:$0xff] %vm483_vm1, %v3356_v30  ;;  %3102 = vrot.lane.b32.xlu1 %v10023_v44, %s8769_s23 }
 0x2b9   : > { %2331 = vrot.lane.b32.xlu0 %v9965_v34, %s8765_s20  ;;  %3267 = vst.msk [vmem:[#allocation2 + $0xe8] sm:$0xff] %vm290_vm0, %v10352_v38 }
 0x2ba   : > { %v3548_v35 = vpop.permute.xlu1 %3547  ;;  %v2517_v50 = vpop.permute.xlu0 %2516  ;;  %v4824_v0 = vld [vmem:[#allocation2 + $0x10] sm:$0xff] }
 0x2bb   : > { %3640 = vst.msk [vmem:[#allocation2 + $0x38] sm:$0xff] %vm676_vm2, %v3548_v35  ;;  %5084 = vmatmul.mubr.f32.gmra.mxu0 %v4824_v0 }
 0x2bc   : > { %2611 = vst.msk [vmem:[#allocation2 + $0x20] sm:$0xff] %vm2608_vm12, %v2517_v50  ;;  %4130 = vrot.lane.b32.xlu1 %v9980_v42, %s8758_s7 }
 0x2bd   : > { %3363 = vrot.lane.b32.xlu0 %v10174_v61, %s8754_s27 }
 0x2be   : > { %v1939_v34 = vpop.permute.xlu1 %1938  ;;  %v4315_v20 = vpop.permute.xlu0 %4314 }
 0x2bf   : > { %2032 = vst.msk [vmem:[#allocation2 + $0x30] sm:$0xff] %vm2028_vm9, %v1939_v34 }
 0x2c0   : > { %4408 = vst.msk [vmem:[#allocation2 + $0x28] sm:$0xff] %vm1449_vm6, %v4315_v20  ;;  %3555 = vrot.lane.b32.xlu1 %v10231_v13, %s8755_s28 }
 0x2c1   : > { %2524 = vrot.lane.b32.xlu0 %v7911_v31, %s8766_s16 }
 0x2c2   : > { %v3740_v33 = vpop.permute.xlu1 %3739  ;;  %v2710_v28 = vpop.permute.xlu0 %2709 }
 0x2c3   : > { %3832 = vst.msk [vmem:[#allocation2 + $0x38] sm:$0xff] %vm869_vm3, %v3740_v33 }
 0x2c4   : > { %2804 = vst.msk [vmem:[#allocation2 + $0x20] sm:$0xff] %vm2801_vm13, %v2710_v28  ;;  %1946 = vrot.lane.b32.xlu1 %v9972_v36, %s8763_s12  ;;  %v7945_v28 = vld [vmem:[%s8819_s26 + $0x93] sm:$0xff] }
 0x2c5   : > { %4322 = vrot.lane.b32.xlu0 %v10240_v32, %s8759_s8 }
 0x2c6   : > { %v2133_v39 = vpop.permute.xlu1 %2132  ;;  %v4507_v7 = vpop.permute.xlu0 %4506 }
 0x2c7   : > { %2226 = vst.msk [vmem:[#allocation2 + $0x30] sm:$0xff] %vm13193_vm10, %v2133_v39  ;;  %vm13200_vm10 = vcmask 786112  }
 0x2c8   : > { %4600 = vst.msk [vmem:[#allocation2 + $0x28] sm:$0xff] %vm13194_vm7, %v4507_v7  ;;  %3747 = vrot.lane.b32.xlu1 %v10201_v58, %s8756_s29 }
 0x2c9   : > { %2717 = vrot.lane.b32.xlu0 %v7943_v14, %s8767_s11 }
 0x2ca   : > { %v3933_v36 = vpop.permute.xlu1 %3932  ;;  %v2903_v46 = vpop.permute.xlu0 %2902 }
 0x2cb   : > { %4025 = vst.msk [vmem:[#allocation2 + $0x38] sm:$0xff] %vm13196_vm4, %v3933_v36  ;;  %v10404_v36 = vld [vmem:[%s8819_s26 + $0xc8] sm:$0xff] }
 0x2cc   : > { %2997 = vst.msk [vmem:[#allocation2 + $0x20] sm:$0xff] %vm13199_vm14, %v2903_v46  ;;  %2140 = vrot.lane.b32.xlu1 %v10023_v44, %s8764_s15 }
 0x2cd   : > { %4514 = vrot.lane.b32.xlu0 %v10255_v43, %s8760_s9 }
 0x2ce   : > { %v2326_v48 = vpop.permute.xlu1 %2325  ;;  %v4699_v63 = vpop.permute.xlu0 %4698 }
 0x2cf   : > { %2419 = vst.msk [vmem:[#allocation2 + $0x30] sm:$0xff] %vm13200_vm10, %v2326_v48  ;;  %vm13195_vm10 = vcmask 261120  }
 0x2d0   : > { %4792 = vst.msk [vmem:[#allocation2 + $0x28] sm:$0xff] %vm1835_vm8, %v4699_v63  ;;  %3940 = vrot.lane.b32.xlu1 %v10264_v47, %s8757_s30  ;;  %v10413_v63 = vld [vmem:[%s8819_s26 + $0xc4] sm:$0xff] }
 0x2d1   : > { %2910 = vrot.lane.b32.xlu0 %v10032_v51, %s8768_s24  ;;  %5273 = vst.msk [vmem:[#allocation3 + $0x10] sm:$0xff] %vm13195_vm10, %v8762_v40  ;;  %5274 = vst.msk [vmem:[#allocation3 + $0x18] sm:$0xff] %vm13195_vm10, %v8762_v40 }
 0x2d2   : > { %v3358_v44 = vpop.permute.xlu1 %3357  ;;  %v3097_v53 = vpop.permute.xlu0 %3096  ;;  %5694 = vst.msk [vmem:[#allocation5] sm:$0xff] %vm13195_vm10, %v8762_v40  ;;  %5697 = vst.msk [vmem:[#allocation5 + $0x10] sm:$0xff] %vm13195_vm10, %v8762_v40 }
 0x2d3   : > { %3449 = vst.msk [vmem:[#allocation2 + $0x48] sm:$0xff] %vm483_vm1, %v3358_v44 }
 0x2d4   : > { %3191 = vst.msk [vmem:[#allocation2 + $0x20] sm:$0xff] %vm3188_vm15, %v3097_v53  ;;  %2333 = vrot.lane.b32.xlu1 %v9693_v23, %s8765_s20  ;;  %v7912_v23 = vld [vmem:[%s8819_s26 + $0x82] sm:$0xff]  ;;  %v10418_v53 = vld [vmem:[%s8819_s26 + $0xf9] sm:$0xff] }
 0x2d5   : > { %4706 = vrot.lane.b32.xlu0 %v10273_v49, %s8761_s10  ;;  %5700 = vst.msk [vmem:[#allocation5 + $0xa0] sm:$0xff] %vm13195_vm10, %v8762_v40  ;;  %5702 = vst.msk [vmem:[#allocation5 + $0xb0] sm:$0xff] %vm13195_vm10, %v8762_v40 }
 0x2d6   : > { %v2519_v3 = vpop.permute.xlu1 %2518  ;;  %v4125_v52 = vpop.permute.xlu0 %4124  ;;  %7544 = vst.msk [vmem:[#allocation7 + $0x8] sm:$0xff] %vm13195_vm10, %v8762_v40  ;;  %vm13205_vm10 = vcmask 982912  }
 0x2d7   : > { %v4827_v57 = vld [vmem:[#allocation2 + $0x28] sm:$0xff]  ;;  %2612 = vst.msk [vmem:[#allocation2 + $0x30] sm:$0xff] %vm2608_vm12, %v2519_v3 }
 0x2d8   : > { %4217 = vst.msk [vmem:[#allocation2 + $0x38] sm:$0xff] %vm1256_vm5, %v4125_v52  ;;  %8324 = vmatprep.mubr.msk.f32.mxu0 %vm4917_vm11, %v4827_v57  ;;  %3365 = vrot.lane.b32.xlu1 %v10240_v32, %s8754_s27 }
 0x2d9   : > { %3104 = vrot.lane.b32.xlu0 %v10085_v6, %s8769_s23  ;;  %3268 = vst.msk [vmem:[#allocation2 + $0xf8] sm:$0xff] %vm290_vm0, %v10418_v53 }
 0x2da   : > { %v4317_v8 = vpop.permute.xlu1 %4316  ;;  %v3550_v21 = vpop.permute.xlu0 %3549 }
 0x2db   : > { %v4826_v15 = vld [vmem:[#allocation2 + $0x20] sm:$0xff]  ;;  %4409 = vst.msk [vmem:[#allocation2 + $0x38] sm:$0xff] %vm1449_vm6, %v4317_v8 }
 0x2dc   : > { %3641 = vst.msk [vmem:[#allocation2 + $0x48] sm:$0xff] %vm676_vm2, %v3550_v21  ;;  %5089 = vmatmul.mubr.f32.gmra.mxu0 %v4826_v15  ;;  %2526 = vrot.lane.b32.xlu1 %v7912_v23, %s8766_s16  ;;  %v10440_v21 = vld [vmem:[%s8819_s26 + $0xca] sm:$0xff] }
 0x2dd   : > { %4132 = vrot.lane.b32.xlu0 %v10037_v4, %s8758_s7 }
 0x2de   : > { %v2712_v11 = vpop.permute.xlu1 %2711  ;;  %v1941_v17 = vpop.permute.xlu0 %1940 }
 0x2df   : > { %2805 = vst.msk [vmem:[#allocation2 + $0x30] sm:$0xff] %vm2801_vm13, %v2712_v11 }
 0x2e0   : > { %2033 = vst.msk [vmem:[#allocation2 + $0x40] sm:$0xff] %vm2028_vm9, %v1941_v17  ;;  %4324 = vrot.lane.b32.xlu1 %v10300_v2, %s8759_s8 }
 0x2e1   : > { %3557 = vrot.lane.b32.xlu0 %v10255_v43, %s8755_s28 }
 0x2e2   : > { %v4509_v1 = vpop.permute.xlu1 %4508  ;;  %v3742_v19 = vpop.permute.xlu0 %3741 }
 0x2e3   : > { %4601 = vst.msk [vmem:[#allocation2 + $0x38] sm:$0xff] %vm13194_vm7, %v4509_v1  ;;  %vm13201_vm7 = vcmask 720512  }
 0x2e4   : > { %3833 = vst.msk [vmem:[#allocation2 + $0x48] sm:$0xff] %vm869_vm3, %v3742_v19  ;;  %2719 = vrot.lane.b32.xlu1 %v7944_v60, %s8767_s11 }
 0x2e5   : > { %1948 = vrot.lane.b32.xlu0 %v10032_v51, %s8763_s12  ;;  %v10344_v51 = vld [vmem:[%s8819_s26 + $0xb4] sm:$0xff] }
 0x2e6   : > { %v2905_v25 = vpop.permute.xlu1 %2904  ;;  %v2135_v26 = vpop.permute.xlu0 %2134 }
 0x2e7   : > { %2998 = vst.msk [vmem:[#allocation2 + $0x30] sm:$0xff] %vm13199_vm14, %v2905_v25  ;;  %vm13203_vm14 = vcmask 720512  }
 0x2e8   : > { %2227 = vst.msk [vmem:[#allocation2 + $0x40] sm:$0xff] %vm13201_vm7, %v2135_v26  ;;  %4516 = vrot.lane.b32.xlu1 %v10329_v24, %s8760_s9  ;;  %vm13202_vm7 = vcmask 786112   ;;  %v10473_v26 = vld [vmem:[%s8819_s26 + $0xd8] sm:$0xff] }
 0x2e9   : > { %3749 = vrot.lane.b32.xlu0 %v10273_v49, %s8756_s29 }
 0x2ea   : > { %v4701_v62 = vpop.permute.xlu1 %4700  ;;  %v3935_v18 = vpop.permute.xlu0 %3934 }
 0x2eb   : > { %4793 = vst.msk [vmem:[#allocation2 + $0x38] sm:$0xff] %vm1835_vm8, %v4701_v62 }
 0x2ec   : > { %4026 = vst.msk [vmem:[#allocation2 + $0x48] sm:$0xff] %vm13196_vm4, %v3935_v18  ;;  %2912 = vrot.lane.b32.xlu1 %v10082_v55, %s8768_s24 }
 0x2ed   : > { %2142 = vrot.lane.b32.xlu0 %v10085_v6, %s8764_s15 }
 0x2ee   : > { %v3099_v16 = vpop.permute.xlu1 %3098  ;;  %v2328_v27 = vpop.permute.xlu0 %2327 }
 0x2ef   : > { %3192 = vst.msk [vmem:[#allocation2 + $0x30] sm:$0xff] %vm3188_vm15, %v3099_v16  ;;  %v10478_v16 = vld [vmem:[%s8819_s26 + $0x109] sm:$0xff] }
 0x2f0   : > { %2420 = vst.msk [vmem:[#allocation2 + $0x40] sm:$0xff] %vm13202_vm7, %v2328_v27  ;;  %4708 = vrot.lane.b32.xlu1 %v10344_v51, %s8761_s10  ;;  %vm13204_vm7 = vcmask 523712  }
 0x2f1   : > { %3942 = vrot.lane.b32.xlu0 %v10347_v22, %s8757_s30  ;;  %3269 = vst.msk [vmem:[#allocation2 + $0x108] sm:$0xff] %vm290_vm0, %v10478_v16 }
 0x2f2   : > { %v4127_v6 = vpop.permute.xlu1 %4126  ;;  %v3360_v30 = vpop.permute.xlu0 %3359  ;;  %v4829_v10 = vld [vmem:[#allocation2 + $0x38] sm:$0xff] }
 0x2f3   : > { %4218 = vst.msk [vmem:[#allocation2 + $0x48] sm:$0xff] %vm1256_vm5, %v4127_v6  ;;  %8325 = vmatprep.mubr.msk.f32.mxu0 %vm4917_vm11, %v4829_v10 }
 0x2f4   : > { %3450 = vst.msk [vmem:[#allocation2 + $0x58] sm:$0xff] %vm483_vm1, %v3360_v30  ;;  %3106 = vrot.lane.b32.xlu1 %v10138_v41, %s8769_s23 }
 0x2f5   : > { %2335 = vrot.lane.b32.xlu0 %v9783_v12, %s8765_s20  ;;  %v10380_v12 = vld [vmem:[%s8819_s26 + $0xc2] sm:$0xff] }
 0x2f6   : > { %v3552_v35 = vpop.permute.xlu1 %3551  ;;  %v2521_v50 = vpop.permute.xlu0 %2520  ;;  %v4828_v0 = vld [vmem:[#allocation2 + $0x30] sm:$0xff] }
 0x2f7   : > { %3642 = vst.msk [vmem:[#allocation2 + $0x58] sm:$0xff] %vm676_vm2, %v3552_v35  ;;  %5094 = vmatmul.mubr.f32.gmra.mxu0 %v4828_v0 }
 0x2f8   : > { %2613 = vst.msk [vmem:[#allocation2 + $0x40] sm:$0xff] %vm2608_vm12, %v2521_v50  ;;  %4134 = vrot.lane.b32.xlu1 %v10090_v5, %s8758_s7 }
 0x2f9   : > { %3367 = vrot.lane.b32.xlu0 %v10300_v2, %s8754_s27 }
 0x2fa   : > { %v1943_v31 = vpop.permute.xlu1 %1942  ;;  %v4319_v34 = vpop.permute.xlu0 %4318 }
 0x2fb   : > { %2034 = vst.msk [vmem:[#allocation2 + $0x50] sm:$0xff] %vm2028_vm9, %v1943_v31 }
 0x2fc   : > { %4410 = vst.msk [vmem:[#allocation2 + $0x48] sm:$0xff] %vm1449_vm6, %v4319_v34  ;;  %3559 = vrot.lane.b32.xlu1 %v10329_v24, %s8755_s28 }
 0x2fd   : > { %2528 = vrot.lane.b32.xlu0 %v10117_v45, %s8766_s16  ;;  %v10395_v45 = vld [vmem:[%s8819_s26 + $0xc3] sm:$0xff] }
 0x2fe   : > { %v3744_v20 = vpop.permute.xlu1 %3743  ;;  %v2714_v33 = vpop.permute.xlu0 %2713 }
 0x2ff   : > { %3834 = vst.msk [vmem:[#allocation2 + $0x58] sm:$0xff] %vm869_vm3, %v3744_v20 }
 0x300   : > { %2806 = vst.msk [vmem:[#allocation2 + $0x40] sm:$0xff] %vm2801_vm13, %v2714_v33  ;;  %1950 = vrot.lane.b32.xlu1 %v10082_v55, %s8763_s12 }
 0x301   : > { %4326 = vrot.lane.b32.xlu0 %v10380_v12, %s8759_s8 }
 0x302   : > { %v2137_v14 = vpop.permute.xlu1 %2136  ;;  %v4511_v39 = vpop.permute.xlu0 %4510 }
 0x303   : > { %2228 = vst.msk [vmem:[#allocation2 + $0x50] sm:$0xff] %vm13203_vm14, %v2137_v14  ;;  %vm13206_vm14 = vcmask 786112  }
 0x304   : > { %4602 = vst.msk [vmem:[#allocation2 + $0x48] sm:$0xff] %vm13204_vm7, %v4511_v39  ;;  %3751 = vrot.lane.b32.xlu1 %v10344_v51, %s8756_s29 }
 0x305   : > { %2721 = vrot.lane.b32.xlu0 %v7945_v28, %s8767_s11 }
 0x306   : > { %v3937_v55 = vpop.permute.xlu1 %3936  ;;  %v2907_v7 = vpop.permute.xlu0 %2906 }
 0x307   : > { %4027 = vst.msk [vmem:[#allocation2 + $0x58] sm:$0xff] %vm13196_vm4, %v3937_v55 }
 0x308   : > { %2999 = vst.msk [vmem:[#allocation2 + $0x40] sm:$0xff] %vm13205_vm10, %v2907_v7  ;;  %2144 = vrot.lane.b32.xlu1 %v10138_v41, %s8764_s15  ;;  %vm13207_vm10 = vmmov %vm13204_vm7  ;;  %vm13208_vm7 = vcmask 982912  }
 0x309   : > { %4518 = vrot.lane.b32.xlu0 %v10395_v45, %s8760_s9 }
 0x30a   : > { %v2330_v46 = vpop.permute.xlu1 %2329  ;;  %v4703_v48 = vpop.permute.xlu0 %4702 }
 0x30b   : > { %2421 = vst.msk [vmem:[#allocation2 + $0x50] sm:$0xff] %vm13206_vm14, %v2330_v46  ;;  %vm13209_vm14 = vcmask 720512   ;;  %v10556_v46 = vld [vmem:[%s8819_s26 + $0x111] sm:$0xff] }
 0x30c   : > { %4794 = vst.msk [vmem:[#allocation2 + $0x48] sm:$0xff] %vm1835_vm8, %v4703_v48  ;;  %3944 = vrot.lane.b32.xlu1 %v10404_v36, %s8757_s30 }
 0x30d   : > { %2914 = vrot.lane.b32.xlu0 %v10147_v59, %s8768_s24  ;;  %3270 = vst.msk [vmem:[#allocation2 + $0x118] sm:$0xff] %vm290_vm0, %v10556_v46 }
 0x30e   : > { %v3362_v41 = vpop.permute.xlu1 %3361 }
 0x30f   : > { %v3101_v44 = vpop.permute.xlu0 %3100  ;;  %3451 = vst.msk [vmem:[#allocation2 + $0x68] sm:$0xff] %vm483_vm1, %v3362_v41 }
 0x310   : > { %3193 = vst.msk [vmem:[#allocation2 + $0x40] sm:$0xff] %vm3188_vm15, %v3101_v44  ;;  %2337 = vrot.lane.b32.xlu1 %v9903_v54, %s8765_s20 }
 0x311   : > { %4710 = vrot.lane.b32.xlu0 %v10413_v63, %s8761_s10 }
 0x312   : > { %v2523_v3 = vpop.permute.xlu1 %2522 }
 0x313   : > { %v4129_v52 = vpop.permute.xlu0 %4128  ;;  %v4831_v57 = vld [vmem:[#allocation2 + $0x48] sm:$0xff]  ;;  %2614 = vst.msk [vmem:[#allocation2 + $0x50] sm:$0xff] %vm2608_vm12, %v2523_v3 }
 0x314   : > { %4219 = vst.msk [vmem:[#allocation2 + $0x58] sm:$0xff] %vm1256_vm5, %v4129_v52  ;;  %8326 = vmatprep.mubr.msk.f32.mxu0 %vm4917_vm11, %v4831_v57  ;;  %3369 = vrot.lane.b32.xlu1 %v10380_v12, %s8754_s27  ;;  %v10578_v57 = vld [vmem:[%s8819_s26 + $0xe2] sm:$0xff] }
 0x315   : > { %3108 = vrot.lane.b32.xlu0 %v10204_v9, %s8769_s23 }
 0x316   : > { %v4321_v54 = vpop.permute.xlu1 %4320 }
 0x317   : > { %v3554_v23 = vpop.permute.xlu0 %3553  ;;  %v4830_v8 = vld [vmem:[#allocation2 + $0x40] sm:$0xff]  ;;  %4411 = vst.msk [vmem:[#allocation2 + $0x58] sm:$0xff] %vm1449_vm6, %v4321_v54 }
 0x318   : > { %3643 = vst.msk [vmem:[#allocation2 + $0x68] sm:$0xff] %vm676_vm2, %v3554_v23  ;;  %5099 = vmatmul.mubr.f32.gmra.mxu0 %v4830_v8  ;;  %2530 = vrot.lane.b32.xlu1 %v10174_v61, %s8766_s16  ;;  %v10455_v61 = vld [vmem:[%s8819_s26 + $0xcb] sm:$0xff] }
 0x319   : > { %4136 = vrot.lane.b32.xlu0 %v10152_v56, %s8758_s7 }
 0x31a   : > { %v2716_v15 = vpop.permute.xlu1 %2715 }
 0x31b   : > { %v1945_v11 = vpop.permute.xlu0 %1944  ;;  %2807 = vst.msk [vmem:[#allocation2 + $0x50] sm:$0xff] %vm2801_vm13, %v2716_v15  ;;  %v10595_v15 = vld [vmem:[%s13186_s2] ss:$0 sm:$0xff] }
 0x31c   : > { %2035 = vst.msk [vmem:[#allocation2 + $0x60] sm:$0xff] %vm2028_vm9, %v1945_v11  ;;  %4328 = vrot.lane.b32.xlu1 %v10440_v21, %s8759_s8  ;;  %v10598_v11 = vld [vmem:[%s8819_s26 + $0xe3] sm:$0xff] }
 0x31d   : > { %3561 = vrot.lane.b32.xlu0 %v10395_v45, %s8755_s28 }
 0x31e   : > { %v4513_v17 = vpop.permute.xlu1 %4512 }
 0x31f   : > { %v3746_v60 = vpop.permute.xlu0 %3745  ;;  %4603 = vst.msk [vmem:[#allocation2 + $0x58] sm:$0xff] %vm13207_vm10, %v4513_v17  ;;  %vm13210_vm10 = vcmask 786112  }
 0x320   : > { %3835 = vst.msk [vmem:[#allocation2 + $0x68] sm:$0xff] %vm869_vm3, %v3746_v60  ;;  %2723 = vrot.lane.b32.xlu1 %v10231_v13, %s8767_s11 }
 0x321   : > { %1952 = vrot.lane.b32.xlu0 %v10147_v59, %s8763_s12  ;;  %v10470_v59 = vld [vmem:[%s8819_s26 + $0xcc] sm:$0xff] }
 0x322   : > { %v2909_v1 = vpop.permute.xlu1 %2908 }
 0x323   : > { %v2139_v19 = vpop.permute.xlu0 %2138  ;;  %3000 = vst.msk [vmem:[#allocation2 + $0x50] sm:$0xff] %vm13208_vm7, %v2909_v1  ;;  %vm13211_vm7 = vmmov %vm13209_vm14 }
 0x324   : > { %2229 = vst.msk [vmem:[#allocation2 + $0x60] sm:$0xff] %vm13209_vm14, %v2139_v19  ;;  %4520 = vrot.lane.b32.xlu1 %v10455_v61, %s8760_s9  ;;  %vm13212_vm14 = vcmask 523712  }
 0x325   : > { %3753 = vrot.lane.b32.xlu0 %v10413_v63, %s8756_s29 }
 0x326   : > { %v4705_v13 = vpop.permute.xlu1 %4704 }
 0x327   : > { %v3939_v25 = vpop.permute.xlu0 %3938  ;;  %4795 = vst.msk [vmem:[#allocation2 + $0x58] sm:$0xff] %vm1835_vm8, %v4705_v13 }
 0x328   : > { %4028 = vst.msk [vmem:[#allocation2 + $0x68] sm:$0xff] %vm13196_vm4, %v3939_v25  ;;  %2916 = vrot.lane.b32.xlu1 %v10201_v58, %s8768_s24 }
 0x329   : > { %2146 = vrot.lane.b32.xlu0 %v10204_v9, %s8764_s15 }
 0x32a   : > { %v3103_v62 = vpop.permute.xlu1 %3102 }
 0x32b   : > { %v2332_v18 = vpop.permute.xlu0 %2331  ;;  %3194 = vst.msk [vmem:[#allocation2 + $0x50] sm:$0xff] %vm3188_vm15, %v3103_v62  ;;  %v10615_v62 = vld [vmem:[%s8819_s26 + $0xe4] sm:$0xff] }
 0x32c   : > { %2422 = vst.msk [vmem:[#allocation2 + $0x60] sm:$0xff] %vm13210_vm10, %v2332_v18  ;;  %4712 = vrot.lane.b32.xlu1 %v10470_v59, %s8761_s10  ;;  %vm13213_vm10 = vcmask 982912   ;;  %v10618_v18 = vld [vmem:[%s8819_s26 + $0xf0] sm:$0xff] }
 0x32d   : > { %3946 = vrot.lane.b32.xlu0 %v10473_v26, %s8757_s30 }
 0x32e   : > { %v4131_v9 = vpop.permute.xlu1 %4130  ;;  %v4833_v6 = vld [vmem:[#allocation2 + $0x58] sm:$0xff] }
 0x32f   : > { %v3364_v27 = vpop.permute.xlu0 %3363  ;;  %4220 = vst.msk [vmem:[#allocation2 + $0x68] sm:$0xff] %vm1256_vm5, %v4131_v9  ;;  %8327 = vmatprep.mubr.msk.f32.mxu0 %vm4917_vm11, %v4833_v6  ;;  %v10623_v6 = vld [vmem:[%s8819_s26 + $0x121] sm:$0xff] }
 0x330   : > { %3452 = vst.msk [vmem:[#allocation2 + $0x78] sm:$0xff] %vm483_vm1, %v3364_v27  ;;  %3110 = vrot.lane.b32.xlu1 %v10264_v47, %s8769_s23 }
 0x331   : > { %2339 = vrot.lane.b32.xlu0 %v9980_v42, %s8765_s20  ;;  %v10506_v42 = vld [vmem:[%s8819_s26 + $0xda] sm:$0xff]  ;;  %3271 = vst.msk [vmem:[#allocation2 + $0x128] sm:$0xff] %vm290_vm0, %v10623_v6 }
 0x332   : > { %v3556_v30 = vpop.permute.xlu1 %3555  ;;  %v4832_v35 = vld [vmem:[#allocation2 + $0x50] sm:$0xff] }
 0x333   : > { %v2525_v10 = vpop.permute.xlu0 %2524  ;;  %3644 = vst.msk [vmem:[#allocation2 + $0x78] sm:$0xff] %vm676_vm2, %v3556_v30  ;;  %5104 = vmatmul.mubr.f32.gmra.mxu0 %v4832_v35 }
 0x334   : > { %2615 = vst.msk [vmem:[#allocation2 + $0x60] sm:$0xff] %vm2608_vm12, %v2525_v10  ;;  %4138 = vrot.lane.b32.xlu1 %v10209_v37, %s8758_s7 }
 0x335   : > { %3371 = vrot.lane.b32.xlu0 %v10440_v21, %s8754_s27 }
 0x336   : > { %v1947_v50 = vpop.permute.xlu1 %1946 }
 0x337   : > { %v4323_v0 = vpop.permute.xlu0 %4322  ;;  %2036 = vst.msk [vmem:[#allocation2 + $0x70] sm:$0xff] %vm2028_vm9, %v1947_v50 }
 0x338   : > { %4412 = vst.msk [vmem:[#allocation2 + $0x68] sm:$0xff] %vm1449_vm6, %v4323_v0  ;;  %3563 = vrot.lane.b32.xlu1 %v10455_v61, %s8755_s28 }
 0x339   : > { %2532 = vrot.lane.b32.xlu0 %v10240_v32, %s8766_s16  ;;  %v10521_v32 = vld [vmem:[%s8819_s26 + $0xdb] sm:$0xff] }
 0x33a   : > { %v3748_v31 = vpop.permute.xlu1 %3747 }
 0x33b   : > { %v2718_v34 = vpop.permute.xlu0 %2717  ;;  %3836 = vst.msk [vmem:[#allocation2 + $0x78] sm:$0xff] %vm869_vm3, %v3748_v31 }
 0x33c   : > { %2808 = vst.msk [vmem:[#allocation2 + $0x60] sm:$0xff] %vm2801_vm13, %v2718_v34  ;;  %1954 = vrot.lane.b32.xlu1 %v10201_v58, %s8763_s12  ;;  %v10530_v58 = vld [vmem:[%s8819_s26 + $0xe0] sm:$0xff] }
 0x33d   : > { %4330 = vrot.lane.b32.xlu0 %v10506_v42, %s8759_s8 }
 0x33e   : > { %v2141_v20 = vpop.permute.xlu1 %2140 }
 0x33f   : > { %v4515_v33 = vpop.permute.xlu0 %4514  ;;  %2230 = vst.msk [vmem:[#allocation2 + $0x70] sm:$0xff] %vm13211_vm7, %v2141_v20  ;;  %vm13214_vm7 = vcmask 786112  }
 0x340   : > { %4604 = vst.msk [vmem:[#allocation2 + $0x68] sm:$0xff] %vm13212_vm14, %v4515_v33  ;;  %3755 = vrot.lane.b32.xlu1 %v10470_v59, %s8756_s29  ;;  %vm5389_vm14 = vcmask 253952  }
 0x341   : > { %2725 = vrot.lane.b32.xlu0 %v10255_v43, %s8767_s11  ;;  %5390 = vst.msk [vmem:[#allocation4] sm:$0x1] %vm5389_vm14, %v8762_v40  ;;  %7575 = vst.msk [vmem:[#allocation8] sm:$0x1] %vm5389_vm14, %v8762_v40  ;;  %v10551_v43 = vld [vmem:[%s8819_s26 + $0xdc] sm:$0xff] }
 0x342   : > { %v3941_v28 = vpop.permute.xlu1 %3940  ;;  %7576 = vst.msk [vmem:[#allocation8 + $0x10] sm:$0x1] %vm5389_vm14, %v8762_v40  ;;  %7577 = vst.msk [vmem:[#allocation8 + $0x20] sm:$0x1] %vm5389_vm14, %v8762_v40 }
 0x343   : > { %v2911_v14 = vpop.permute.xlu0 %2910  ;;  %4029 = vst.msk [vmem:[#allocation2 + $0x78] sm:$0xff] %vm13196_vm4, %v3941_v28 }
 0x344   : > { %3001 = vst.msk [vmem:[#allocation2 + $0x60] sm:$0xff] %vm13213_vm10, %v2911_v14  ;;  %2148 = vrot.lane.b32.xlu1 %v10264_v47, %s8764_s15  ;;  %vm13215_vm10 = vcmask 523712  }
 0x345   : > { %4522 = vrot.lane.b32.xlu0 %v10521_v32, %s8760_s9  ;;  %7578 = vst.msk [vmem:[#allocation8 + $0x30] sm:$0x1] %vm5389_vm14, %v8762_v40  ;;  %5391 = vst.msk [vmem:[#allocation4 + $0x18] sm:$0x1] %vm5389_vm14, %v8762_v40 }
 0x346   : > { %v2334_v39 = vpop.permute.xlu1 %2333  ;;  %5392 = vst.msk [vmem:[#allocation4 + $0x30] sm:$0x1] %vm5389_vm14, %v8762_v40  ;;  %5393 = vst.msk [vmem:[#allocation4 + $0x48] sm:$0x1] %vm5389_vm14, %v8762_v40 }
 0x347   : > { %v4707_v55 = vpop.permute.xlu0 %4706  ;;  %2423 = vst.msk [vmem:[#allocation2 + $0x70] sm:$0xff] %vm13214_vm7, %v2334_v39  ;;  %vm13216_vm7 = vcmask 982912  }
 0x348   : > { %4796 = vst.msk [vmem:[#allocation2 + $0x68] sm:$0xff] %vm1835_vm8, %v4707_v55  ;;  %3948 = vrot.lane.b32.xlu1 %v10530_v58, %s8757_s30  ;;  %v10667_v55 = vld [vmem:[%s8819_s26 + $0xf3] sm:$0xff] }
 0x349   : > { %2918 = vrot.lane.b32.xlu0 %v10273_v49, %s8768_s24  ;;  %5394 = vst.msk [vmem:[#allocation4 + $0x60] sm:$0x1] %vm5389_vm14, %v8762_v40  ;;  %5395 = vst.msk [vmem:[#allocation4 + $0x78] sm:$0x1] %vm5389_vm14, %v8762_v40 }
 0x34a   : > { %5396 = vst.msk [vmem:[#allocation4 + $0x90] sm:$0x1] %vm5389_vm14, %v8762_v40  ;;  %5397 = vst.msk [vmem:[#allocation4 + $0xa8] sm:$0x1] %vm5389_vm14, %v8762_v40  ;;  %v3366_v47 = vpop.permute.xlu1 %3365  ;;  %vm13217_vm14 = vcmask 720512  }
 0x34b   : > { %v3105_v7 = vpop.permute.xlu0 %3104  ;;  %3453 = vst.msk [vmem:[#allocation2 + $0x88] sm:$0xff] %vm483_vm1, %v3366_v47 }
 0x34c   : > { %3195 = vst.msk [vmem:[#allocation2 + $0x60] sm:$0xff] %vm3188_vm15, %v3105_v7  ;;  %2341 = vrot.lane.b32.xlu1 %v10037_v4, %s8765_s20 }
 0x34d   : > { %4714 = vrot.lane.b32.xlu0 %v10551_v43, %s8761_s10 }
 0x34e   : > { %v2527_v48 = vpop.permute.xlu1 %2526 }
 0x34f   : > { %v4133_v41 = vpop.permute.xlu0 %4132  ;;  %v4835_v44 = vld [vmem:[#allocation2 + $0x68] sm:$0xff]  ;;  %2616 = vst.msk [vmem:[#allocation2 + $0x70] sm:$0xff] %vm2608_vm12, %v2527_v48 }
 0x350   : > { %4221 = vst.msk [vmem:[#allocation2 + $0x78] sm:$0xff] %vm1256_vm5, %v4133_v41  ;;  %8328 = vmatprep.mubr.msk.f32.mxu0 %vm4917_vm11, %v4835_v44  ;;  %3373 = vrot.lane.b32.xlu1 %v10506_v42, %s8754_s27 }
 0x351   : > { %3112 = vrot.lane.b32.xlu0 %v10347_v22, %s8769_s23 }
 0x352   : > { %v4325_v4 = vpop.permute.xlu1 %4324 }
 0x353   : > { %v3558_v3 = vpop.permute.xlu0 %3557  ;;  %v4834_v52 = vld [vmem:[#allocation2 + $0x60] sm:$0xff]  ;;  %4413 = vst.msk [vmem:[#allocation2 + $0x78] sm:$0xff] %vm1449_vm6, %v4325_v4  ;;  %v10686_v4 = vld [vmem:[%s8819_s26 + $0xf4] sm:$0xff] }
 0x354   : > { %3645 = vst.msk [vmem:[#allocation2 + $0x88] sm:$0xff] %vm676_vm2, %v3558_v3  ;;  %5109 = vmatmul.mubr.f32.gmra.mxu0 %v4834_v52  ;;  %2534 = vrot.lane.b32.xlu1 %v10300_v2, %s8766_s16  ;;  %v10691_v52 = vld [vmem:[%s8819_s26 + $0x129] sm:$0xff] }
 0x355   : > { %4140 = vrot.lane.b32.xlu0 %v10278_v29, %s8758_s7  ;;  %3272 = vst.msk [vmem:[#allocation2 + $0x138] sm:$0xff] %vm290_vm0, %v10691_v52 }
 0x356   : > { %v2720_v54 = vpop.permute.xlu1 %2719 }
 0x357   : > { %v1949_v23 = vpop.permute.xlu0 %1948  ;;  %2809 = vst.msk [vmem:[#allocation2 + $0x70] sm:$0xff] %vm2801_vm13, %v2720_v54 }
 0x358   : > { %2037 = vst.msk [vmem:[#allocation2 + $0x80] sm:$0xff] %vm2028_vm9, %v1949_v23  ;;  %4332 = vrot.lane.b32.xlu1 %v10578_v57, %s8759_s8 }
 0x359   : > { %3565 = vrot.lane.b32.xlu0 %v10521_v32, %s8755_s28 }
 0x35a   : > { %v4517_v8 = vpop.permute.xlu1 %4516 }
 0x35b   : > { %v3750_v2 = vpop.permute.xlu0 %3749  ;;  %4605 = vst.msk [vmem:[#allocation2 + $0x78] sm:$0xff] %vm13215_vm10, %v4517_v8  ;;  %vm13218_vm10 = vcmask 261120  }
 0x35c   : > { %3837 = vst.msk [vmem:[#allocation2 + $0x88] sm:$0xff] %vm869_vm3, %v3750_v2  ;;  %2727 = vrot.lane.b32.xlu1 %v10329_v24, %s8767_s11 }
 0x35d   : > { %1956 = vrot.lane.b32.xlu0 %v10273_v49, %s8763_s12 }
 0x35e   : > { %v2913_v17 = vpop.permute.xlu1 %2912 }
 0x35f   : > { %v2143_v60 = vpop.permute.xlu0 %2142  ;;  %3002 = vst.msk [vmem:[#allocation2 + $0x70] sm:$0xff] %vm13216_vm7, %v2913_v17  ;;  %vm13219_vm7 = vcmask 786112  }
 0x360   : > { %2231 = vst.msk [vmem:[#allocation2 + $0x80] sm:$0xff] %vm13217_vm14, %v2143_v60  ;;  %v5080_v1 = vpop.f32.mrf.mxu0  ;;  %4524 = vrot.lane.b32.xlu1 %v10598_v11, %s8760_s9  ;;  %v10713_v60 = vld [vmem:[%s8819_s26 + $0xfa] sm:$0xff] }
 0x361   : > { %v5081_v24 = vadd.f32 %v10595_v15, %v5080_v1  ;;  %3757 = vrot.lane.b32.xlu0 %v10551_v43, %s8756_s29 }
 0x362   : > { %v5082_v49 = vpop.f32.mrf.mxu0  ;;  %v4709_v13 = vpop.permute.xlu1 %4708 }
 0x363   : > { %v5239_v19 = vmax.f32 %v5081_v24, 0.0  ;;  %v3943_v25 = vpop.permute.xlu0 %3942  ;;  %4797 = vst.msk [vmem:[#allocation2 + $0x78] sm:$0xff] %vm1835_vm8, %v4709_v13 }
 0x364   : > { %4030 = vst.msk [vmem:[#allocation2 + $0x88] sm:$0xff] %vm13196_vm4, %v3943_v25  ;;  %2920 = vrot.lane.b32.xlu1 %v10344_v51, %s8768_s24 }
 0x365   : > { %5276 = vst.msk [vmem:[#allocation3 + $0x20] sm:$0xff] %vm13218_vm10, %v5239_v19  ;;  %2150 = vrot.lane.b32.xlu0 %v10347_v22, %s8764_s15  ;;  %vm13220_vm10 = vcmask 523712  }
 0x366   : > { %v3107_v9 = vpop.permute.xlu1 %3106 }
 0x367   : > { %v2336_v27 = vpop.permute.xlu0 %2335  ;;  %3196 = vst.msk [vmem:[#allocation2 + $0x70] sm:$0xff] %vm3188_vm15, %v3107_v9 }
 0x368   : > { %2424 = vst.msk [vmem:[#allocation2 + $0x80] sm:$0xff] %vm13219_vm7, %v2336_v27  ;;  %4716 = vrot.lane.b32.xlu1 %v10615_v62, %s8761_s10  ;;  %vm13221_vm7 = vcmask 982912  }
 0x369   : > { %3950 = vrot.lane.b32.xlu0 %v10618_v18, %s8757_s30 }
 0x36a   : > { %v4135_v22 = vpop.permute.xlu1 %4134  ;;  %v4837_v10 = vld [vmem:[#allocation2 + $0x78] sm:$0xff] }
 0x36b   : > { %v3368_v30 = vpop.permute.xlu0 %3367  ;;  %4222 = vst.msk [vmem:[#allocation2 + $0x88] sm:$0xff] %vm1256_vm5, %v4135_v22  ;;  %8329 = vmatprep.mubr.msk.f32.mxu0 %vm4917_vm11, %v4837_v10  ;;  %v10745_v10 = vld [vmem:[%s8819_s26 + $0xfc] sm:$0xff] }
 0x36c   : > { %3454 = vst.msk [vmem:[#allocation2 + $0x98] sm:$0xff] %vm483_vm1, %v3368_v30  ;;  %3114 = vrot.lane.b32.xlu1 %v10404_v36, %s8769_s23 }
 0x36d   : > { %2343 = vrot.lane.b32.xlu0 %v10090_v5, %s8765_s20  ;;  %v10651_v5 = vld [vmem:[%s8819_s26 + $0xf2] sm:$0xff] }
 0x36e   : > { %v3560_v35 = vpop.permute.xlu1 %3559  ;;  %v4836_v0 = vld [vmem:[#allocation2 + $0x70] sm:$0xff] }
 0x36f   : > { %v2529_v50 = vpop.permute.xlu0 %2528  ;;  %3646 = vst.msk [vmem:[#allocation2 + $0x98] sm:$0xff] %vm676_vm2, %v3560_v35  ;;  %5114 = vmatmul.mubr.f32.gmra.mxu0 %v4836_v0  ;;  %v10748_v35 = vld [vmem:[%s8819_s26 + $0x108] sm:$0xff] }
 0x370   : > { %2617 = vst.msk [vmem:[#allocation2 + $0x80] sm:$0xff] %vm2608_vm12, %v2529_v50  ;;  %4142 = vrot.lane.b32.xlu1 %v10352_v38, %s8758_s7 }
 0x371   : > { %3375 = vrot.lane.b32.xlu0 %v10578_v57, %s8754_s27 }
 0x372   : > { %v1951_v31 = vpop.permute.xlu1 %1950 }
 0x373   : > { %v4327_v34 = vpop.permute.xlu0 %4326  ;;  %2038 = vst.msk [vmem:[#allocation2 + $0x90] sm:$0xff] %vm2028_vm9, %v1951_v31  ;;  %v10753_v31 = vld [vmem:[%s8819_s26 + $0x139] sm:$0xff] }
 0x374   : > { %4414 = vst.msk [vmem:[#allocation2 + $0x88] sm:$0xff] %vm1449_vm6, %v4327_v34  ;;  %3567 = vrot.lane.b32.xlu1 %v10598_v11, %s8755_s28 }
 0x375   : > { %2536 = vrot.lane.b32.xlu0 %v10380_v12, %s8766_s16  ;;  %3273 = vst.msk [vmem:[#allocation2 + $0x148] sm:$0xff] %vm290_vm0, %v10753_v31 }
 0x376   : > { %v3752_v20 = vpop.permute.xlu1 %3751 }
 0x377   : > { %v2722_v33 = vpop.permute.xlu0 %2721  ;;  %3838 = vst.msk [vmem:[#allocation2 + $0x98] sm:$0xff] %vm869_vm3, %v3752_v20 }
 0x378   : > { %2810 = vst.msk [vmem:[#allocation2 + $0x80] sm:$0xff] %vm2801_vm13, %v2722_v33  ;;  %1958 = vrot.lane.b32.xlu1 %v10344_v51, %s8763_s12  ;;  %v5308_v33 = vld [vmem:[#allocation3 + $0x20] sm:$0xff] }
 0x379   : > { %4334 = vrot.lane.b32.xlu0 %v10651_v5, %s8759_s8 }
 0x37a   : > { %v2145_v28 = vpop.permute.xlu1 %2144 }
 0x37b   : > { %v4519_v14 = vpop.permute.xlu0 %4518  ;;  %2232 = vst.msk [vmem:[#allocation2 + $0x90] sm:$0xff] %vm13217_vm14, %v2145_v28  ;;  %v5085_v12 = vpop.f32.mrf.mxu0  ;;  %vm13222_vm14 = vcmask 261120  }
 0x37c   : > { %4606 = vst.msk [vmem:[#allocation2 + $0x88] sm:$0xff] %vm13220_vm10, %v4519_v14  ;;  %v5086_v39 = vadd.f32 %v10595_v15, %v5085_v12  ;;  %3759 = vrot.lane.b32.xlu1 %v10615_v62, %s8756_s29  ;;  %vm13223_vm10 = vcmask 786112   ;;  %v5357_v14 = vld [vmem:[#allocation3 + $0x10] sm:$0xff] }
 0x37d   : > { %2729 = vrot.lane.b32.xlu0 %v10395_v45, %s8767_s11  ;;  %v5087_v51 = vpop.f32.mrf.mxu0  ;;  %v10677_v45 = vld [vmem:[%s8819_s26 + $0xf8] sm:$0xff] }
 0x37e   : > { %v5240_v47 = vmax.f32 %v5086_v39, 0.0  ;;  %v3945_v7 = vpop.permute.xlu1 %3944 }
 0x37f   : > { %v2915_v48 = vpop.permute.xlu0 %2914  ;;  %4031 = vst.msk [vmem:[#allocation2 + $0x98] sm:$0xff] %vm13196_vm4, %v3945_v7 }
 0x380   : > { %3003 = vst.msk [vmem:[#allocation2 + $0x80] sm:$0xff] %vm13221_vm7, %v2915_v48  ;;  %2152 = vrot.lane.b32.xlu1 %v10404_v36, %s8764_s15  ;;  %vm13224_vm7 = vcmask 523712  }
 0x381   : > { %5277 = vst.msk [vmem:[#allocation3 + $0x28] sm:$0xff] %vm13222_vm14, %v5240_v47  ;;  %4526 = vrot.lane.b32.xlu0 %v10667_v55, %s8760_s9  ;;  %vm13225_vm14 = vcmask 982912  }
 0x382   : > { %v2338_v41 = vpop.permute.xlu1 %2337 }
 0x383   : > { %v4711_v44 = vpop.permute.xlu0 %4710  ;;  %2425 = vst.msk [vmem:[#allocation2 + $0x90] sm:$0xff] %vm13223_vm10, %v2338_v41  ;;  %vm13226_vm10 = vcmask 720512   ;;  %v10785_v41 = vld [vmem:[%s8819_s26 + $0x10a] sm:$0xff] }
 0x384   : > { %4798 = vst.msk [vmem:[#allocation2 + $0x88] sm:$0xff] %vm1835_vm8, %v4711_v44  ;;  %3952 = vrot.lane.b32.xlu1 %v10677_v45, %s8757_s30 }
 0x385   : > { %2922 = vrot.lane.b32.xlu0 %v10413_v63, %s8768_s24 }
 0x386   : > { %v3370_v36 = vpop.permute.xlu1 %3369 }
 0x387   : > { %v3109_v3 = vpop.permute.xlu0 %3108  ;;  %3455 = vst.msk [vmem:[#allocation2 + $0xa8] sm:$0xff] %vm483_vm1, %v3370_v36 }
 0x388   : > { %3197 = vst.msk [vmem:[#allocation2 + $0x80] sm:$0xff] %vm3188_vm15, %v3109_v3  ;;  %2345 = vrot.lane.b32.xlu1 %v10152_v56, %s8765_s20 }
 0x389   : > { %4718 = vrot.lane.b32.xlu0 %v10686_v4, %s8761_s10 }
 0x38a   : > { %v2531_v54 = vpop.permute.xlu1 %2530 }
 0x38b   : > { %v4137_v23 = vpop.permute.xlu0 %4136  ;;  %v4839_v8 = vld [vmem:[#allocation2 + $0x88] sm:$0xff]  ;;  %2618 = vst.msk [vmem:[#allocation2 + $0x90] sm:$0xff] %vm2608_vm12, %v2531_v54 }
 0x38c   : > { %4223 = vst.msk [vmem:[#allocation2 + $0x98] sm:$0xff] %vm1256_vm5, %v4137_v23  ;;  %8330 = vmatprep.mubr.msk.f32.mxu0 %vm4917_vm11, %v4839_v8  ;;  %3377 = vrot.lane.b32.xlu1 %v10651_v5, %s8754_s27  ;;  %v10801_v8 = vld [vmem:[%s8819_s26 + $0x10b] sm:$0xff] }
 0x38d   : > { %3116 = vrot.lane.b32.xlu0 %v10473_v26, %s8769_s23 }
 0x38e   : > { %v4329_v56 = vpop.permute.xlu1 %4328 }
 0x38f   : > { %v3562_v2 = vpop.permute.xlu0 %3561  ;;  %v4838_v17 = vld [vmem:[#allocation2 + $0x80] sm:$0xff]  ;;  %4415 = vst.msk [vmem:[#allocation2 + $0x98] sm:$0xff] %vm1449_vm6, %v4329_v56 }
 0x390   : > { %3647 = vst.msk [vmem:[#allocation2 + $0xa8] sm:$0xff] %vm676_vm2, %v3562_v2  ;;  %5119 = vmatmul.mubr.f32.gmra.mxu0 %v4838_v17  ;;  %2538 = vrot.lane.b32.xlu1 %v10440_v21, %s8766_s16  ;;  %v10728_v21 = vld [vmem:[%s8819_s26 + $0xfb] sm:$0xff] }
 0x391   : > { %4144 = vrot.lane.b32.xlu0 %v10418_v53, %s8758_s7 }
 0x392   : > { %v2724_v1 = vpop.permute.xlu1 %2723 }
 0x393   : > { %v1953_v24 = vpop.permute.xlu0 %1952  ;;  %2811 = vst.msk [vmem:[#allocation2 + $0x90] sm:$0xff] %vm2801_vm13, %v2724_v1 }
 0x394   : > { %2039 = vst.msk [vmem:[#allocation2 + $0xa0] sm:$0xff] %vm2028_vm9, %v1953_v24  ;;  %4336 = vrot.lane.b32.xlu1 %v10713_v60, %s8759_s8 }
 0x395   : > { %3569 = vrot.lane.b32.xlu0 %v10667_v55, %s8755_s28 }
 0x396   : > { %v4521_v49 = vpop.permute.xlu1 %4520 }
 0x397   : > { %v3754_v19 = vpop.permute.xlu0 %3753  ;;  %4607 = vst.msk [vmem:[#allocation2 + $0x98] sm:$0xff] %vm13224_vm7, %v4521_v49  ;;  %vm13227_vm7 = vcmask 261120   ;;  %v10820_v49 = vld [vmem:[%s8819_s26 + $0x10c] sm:$0xff] }
 0x398   : > { %3839 = vst.msk [vmem:[#allocation2 + $0xa8] sm:$0xff] %vm869_vm3, %v3754_v19  ;;  %2731 = vrot.lane.b32.xlu1 %v10455_v61, %s8767_s11 }
 0x399   : > { %1960 = vrot.lane.b32.xlu0 %v10413_v63, %s8763_s12 }
 0x39a   : > { %v2917_v13 = vpop.permute.xlu1 %2916 }
 0x39b   : > { %v2147_v25 = vpop.permute.xlu0 %2146  ;;  %3004 = vst.msk [vmem:[#allocation2 + $0x90] sm:$0xff] %vm13225_vm14, %v2917_v13  ;;  %vm13228_vm14 = vcmask 786112  }
 0x39c   : > { %2233 = vst.msk [vmem:[#allocation2 + $0xa0] sm:$0xff] %vm13226_vm10, %v2147_v25  ;;  %v5090_v9 = vpop.f32.mrf.mxu0  ;;  %4528 = vrot.lane.b32.xlu1 %v10728_v21, %s8760_s9  ;;  %vm13229_vm10 = vmmov %vm13227_vm7  ;;  %v5309_v25 = vld [vmem:[#allocation3 + $0x28] sm:$0xff] }
 0x39d   : > { %v5091_v27 = vadd.f32 %v10595_v15, %v5090_v9  ;;  %3761 = vrot.lane.b32.xlu0 %v10686_v4, %s8756_s29 }
 0x39e   : > { %v5092_v63 = vpop.f32.mrf.mxu0  ;;  %v4713_v22 = vpop.permute.xlu1 %4712 }
 0x39f   : > { %v5241_v61 = vmax.f32 %v5091_v27, 0.0  ;;  %v3947_v30 = vpop.permute.xlu0 %3946  ;;  %4799 = vst.msk [vmem:[#allocation2 + $0x98] sm:$0xff] %vm1835_vm8, %v4713_v22  ;;  %v10827_v27 = vld [vmem:[%s8819_s26 + $0x141] sm:$0xff] }
 0x3a0   : > { %4032 = vst.msk [vmem:[#allocation2 + $0xa8] sm:$0xff] %vm13196_vm4, %v3947_v30  ;;  %2924 = vrot.lane.b32.xlu1 %v10470_v59, %s8768_s24 }
 0x3a1   : > { %5278 = vst.msk [vmem:[#allocation3 + $0x30] sm:$0xff] %vm13227_vm7, %v5241_v61  ;;  %2154 = vrot.lane.b32.xlu0 %v10473_v26, %s8764_s15  ;;  %vm13230_vm7 = vcmask 720512   ;;  %v257_v61 = vld [vmem:[%s13189_s5 + $0x18] sm:$0xff] }
 0x3a2   : > { %v3111_v50 = vpop.permute.xlu1 %3110  ;;  %3274 = vst.msk [vmem:[#allocation2 + $0x158] sm:$0xff] %vm290_vm0, %v10827_v27  ;;  %8586 = vmatprep.subr.mxu1 %v257_v61 }
 0x3a3   : > { %v2340_v0 = vpop.permute.xlu0 %2339  ;;  %3198 = vst.msk [vmem:[#allocation2 + $0x90] sm:$0xff] %vm3188_vm15, %v3111_v50  ;;  %8587 = vmatpush3.msra.mxu1 %v257_v61 }
 0x3a4   : > { %2426 = vst.msk [vmem:[#allocation2 + $0xa0] sm:$0xff] %vm13228_vm14, %v2340_v0  ;;  %4720 = vrot.lane.b32.xlu1 %v10745_v10, %s8761_s10  ;;  %vm13231_vm14 = vcmask 523712  }
 0x3a5   : > { %3954 = vrot.lane.b32.xlu0 %v10748_v35, %s8757_s30 }
 0x3a6   : > { %v4139_v26 = vpop.permute.xlu1 %4138  ;;  %v4841_v20 = vld [vmem:[#allocation2 + $0x98] sm:$0xff] }
 0x3a7   : > { %v3372_v34 = vpop.permute.xlu0 %3371  ;;  %4224 = vst.msk [vmem:[#allocation2 + $0xa8] sm:$0xff] %vm1256_vm5, %v4139_v26  ;;  %8331 = vmatprep.mubr.msk.f32.mxu0 %vm4917_vm11, %v4841_v20  ;;  %v255_v26 = vld [vmem:[%s13189_s5 + $0x8] sm:$0xff] }
 0x3a8   : > { %v10761_v28 = vld [vmem:[#allocation3 + $0x30] sm:$0xff]  ;;  %3456 = vst.msk [vmem:[#allocation2 + $0xb8] sm:$0xff] %vm483_vm1, %v3372_v34  ;;  %3118 = vrot.lane.b32.xlu1 %v10530_v58, %s8769_s23 }
 0x3a9   : > { %v5341_v12 = vmax.f32 %v5308_v33, %v10761_v28  ;;  %2347 = vrot.lane.b32.xlu0 %v10209_v37, %s8765_s20 }
 0x3aa   : > { %v3564_v51 = vpop.permute.xlu1 %3563  ;;  %v4840_v7 = vld [vmem:[#allocation2 + $0x90] sm:$0xff] }
 0x3ab   : > { %v5373_v39 = vmax.f32 %v5341_v12, %v5357_v14  ;;  %v2533_v47 = vpop.permute.xlu0 %2532  ;;  %3648 = vst.msk [vmem:[#allocation2 + $0xb8] sm:$0xff] %vm676_vm2, %v3564_v51  ;;  %5124 = vmatmul.mubr.f32.gmra.mxu0 %v4840_v7  ;;  %v254_v14 = vld [vmem:[%s13189_s5] sm:$0xff]  ;;  %v10863_v12 = vld [vmem:[%s8819_s26 + $0x112] sm:$0xff] }
 0x3ac   : > { %2619 = vst.msk [vmem:[#allocation2 + $0xa0] sm:$0xff] %vm2608_vm12, %v2533_v47  ;;  %4146 = vrot.lane.b32.xlu1 %v10478_v16, %s8758_s7 }
 0x3ad   : > { %5398 = vst.msk [vmem:[#allocation4 + $0x1] sm:$0xff] %vm13229_vm10, %v5373_v39  ;;  %3379 = vrot.lane.b32.xlu0 %v10713_v60, %s8754_s27  ;;  %vm13232_vm10 = vcmask 982912  }
 0x3ae   : > { %v1955_v48 = vpop.permute.xlu1 %1954 }
 0x3af   : > { %v4331_v37 = vpop.permute.xlu0 %4330  ;;  %2040 = vst.msk [vmem:[#allocation2 + $0xb0] sm:$0xff] %vm2028_vm9, %v1955_v48 }
 0x3b0   : > { %4416 = vst.msk [vmem:[#allocation2 + $0xa8] sm:$0xff] %vm1449_vm6, %v4331_v37  ;;  %3571 = vrot.lane.b32.xlu1 %v10728_v21, %s8755_s28 }
 0x3b1   : > { %2540 = vrot.lane.b32.xlu0 %v10506_v42, %s8766_s16 }
 0x3b2   : > { %v3756_v44 = vpop.permute.xlu1 %3755 }
 0x3b3   : > { %v2726_v36 = vpop.permute.xlu0 %2725  ;;  %3840 = vst.msk [vmem:[#allocation2 + $0xb8] sm:$0xff] %vm869_vm3, %v3756_v44 }
 0x3b4   : > { %2812 = vst.msk [vmem:[#allocation2 + $0xa0] sm:$0xff] %vm2801_vm13, %v2726_v36  ;;  %1962 = vrot.lane.b32.xlu1 %v10470_v59, %s8763_s12 }
 0x3b5   : > { %4338 = vrot.lane.b32.xlu0 %v10785_v41, %s8759_s8 }
 0x3b6   : > { %v2149_v3 = vpop.permute.xlu1 %2148 }
 0x3b7   : > { %v4523_v54 = vpop.permute.xlu0 %4522  ;;  %2234 = vst.msk [vmem:[#allocation2 + $0xb0] sm:$0xff] %vm13230_vm7, %v2149_v3  ;;  %v5095_v42 = vpop.f32.mrf.mxu0  ;;  %vm13233_vm7 = vcmask 261120  }
 0x3b8   : > { %4608 = vst.msk [vmem:[#allocation2 + $0xa8] sm:$0xff] %vm13231_vm14, %v4523_v54  ;;  %v5096_v23 = vadd.f32 %v10595_v15, %v5095_v42  ;;  %3763 = vrot.lane.b32.xlu1 %v10745_v10, %s8756_s29  ;;  %vm13234_vm14 = vcmask 786112   ;;  %v10882_v54 = vld [vmem:[%s8819_s26 + $0x113] sm:$0xff] }
 0x3b9   : > { %2733 = vrot.lane.b32.xlu0 %v10521_v32, %s8767_s11  ;;  %v5097_v59 = vpop.f32.mrf.mxu0  ;;  %v10811_v32 = vld [vmem:[%s8819_s26 + $0x110] sm:$0xff] }
 0x3ba   : > { %v5242_v56 = vmax.f32 %v5096_v23, 0.0  ;;  %v3949_v2 = vpop.permute.xlu1 %3948 }
 0x3bb   : > { %v2919_v17 = vpop.permute.xlu0 %2918  ;;  %4033 = vst.msk [vmem:[#allocation2 + $0xb8] sm:$0xff] %vm13196_vm4, %v3949_v2 }
 0x3bc   : > { %3005 = vst.msk [vmem:[#allocation2 + $0xa0] sm:$0xff] %vm13232_vm10, %v2919_v17  ;;  %2156 = vrot.lane.b32.xlu1 %v10530_v58, %s8764_s15  ;;  %v5358_v58 = vld [vmem:[#allocation3 + $0x18] sm:$0xff]  ;;  %vm13235_vm10 = vmmov %vm13233_vm7 }
 0x3bd   : > { %5279 = vst.msk [vmem:[#allocation3 + $0x38] sm:$0xff] %vm13233_vm7, %v5242_v56  ;;  %4530 = vrot.lane.b32.xlu0 %v10801_v8, %s8760_s9  ;;  %vm13236_vm7 = vcmask 523712  }
 0x3be   : > { %v2342_v1 = vpop.permute.xlu1 %2341 }
 0x3bf   : > { %v4715_v24 = vpop.permute.xlu0 %4714  ;;  %2427 = vst.msk [vmem:[#allocation2 + $0xb0] sm:$0xff] %vm13234_vm14, %v2342_v1  ;;  %vm13237_vm14 = vmmov %vm13235_vm10  ;;  %v10900_v1 = vld [vmem:[%s8819_s26 + $0x114] sm:$0xff] }
 0x3c0   : > { %4800 = vst.msk [vmem:[#allocation2 + $0xa8] sm:$0xff] %vm1835_vm8, %v4715_v24  ;;  %3956 = vrot.lane.b32.xlu1 %v10811_v32, %s8757_s30  ;;  %v10903_v24 = vld [vmem:[%s8819_s26 + $0x120] sm:$0xff] }
 0x3c1   : > { %2926 = vrot.lane.b32.xlu0 %v10551_v43, %s8768_s24 }
 0x3c2   : > { %v3374_v19 = vpop.permute.xlu1 %3373 }
 0x3c3   : > { %v3113_v13 = vpop.permute.xlu0 %3112  ;;  %3457 = vst.msk [vmem:[#allocation2 + $0xc8] sm:$0xff] %vm483_vm1, %v3374_v19 }
 0x3c4   : > { %v10822_v9 = vld [vmem:[#allocation3 + $0x38] sm:$0xff]  ;;  %3199 = vst.msk [vmem:[#allocation2 + $0xa0] sm:$0xff] %vm3188_vm15, %v3113_v13  ;;  %2349 = vrot.lane.b32.xlu1 %v10278_v29, %s8765_s20  ;;  %v256_v29 = vld [vmem:[%s13189_s5 + $0x10] sm:$0xff] }
 0x3c5   : > { %v5342_v63 = vmax.f32 %v5309_v25, %v10822_v9  ;;  %4722 = vrot.lane.b32.xlu0 %v10820_v49, %s8761_s10  ;;  %8588 = vmatprep.subr.mxu1 %v256_v29  ;;  %v10908_v13 = vld [vmem:[%s8819_s26 + $0x151] sm:$0xff] }
 0x3c6   : > { %v2535_v30 = vpop.permute.xlu1 %2534  ;;  %8589 = vmatpush3.msra.mxu1 %v256_v29  ;;  %3275 = vst.msk [vmem:[#allocation2 + $0x168] sm:$0xff] %vm290_vm0, %v10908_v13 }
 0x3c7   : > { %v5374_v22 = vmax.f32 %v5342_v63, %v5358_v58  ;;  %v4141_v50 = vpop.permute.xlu0 %4140  ;;  %v4843_v0 = vld [vmem:[#allocation2 + $0xa8] sm:$0xff]  ;;  %2620 = vst.msk [vmem:[#allocation2 + $0xb0] sm:$0xff] %vm2608_vm12, %v2535_v30  ;;  %8590 = vmatprep.subr.mxu1 %v255_v26 }
 0x3c8   : > { %4225 = vst.msk [vmem:[#allocation2 + $0xb8] sm:$0xff] %vm1256_vm5, %v4141_v50  ;;  %8332 = vmatprep.mubr.msk.f32.mxu0 %vm4917_vm11, %v4843_v0  ;;  %3381 = vrot.lane.b32.xlu1 %v10785_v41, %s8754_s27 }
 0x3c9   : > { %5399 = vst.msk [vmem:[#allocation4 + $0x9] sm:$0xff] %vm13235_vm10, %v5374_v22  ;;  %3120 = vrot.lane.b32.xlu0 %v10618_v18, %s8769_s23  ;;  %8591 = vmatpush3.msra.mxu1 %v255_v26  ;;  %vm13238_vm10 = vcmask 982912  }
 0x3ca   : > { %v4333_v34 = vpop.permute.xlu1 %4332  ;;  %8592 = vmatprep.subr.mxu1 %v254_v14 }
 0x3cb   : > { %v3566_v20 = vpop.permute.xlu0 %3565  ;;  %v4842_v33 = vld [vmem:[#allocation2 + $0xa0] sm:$0xff]  ;;  %4417 = vst.msk [vmem:[#allocation2 + $0xb8] sm:$0xff] %vm1449_vm6, %v4333_v34  ;;  %8593 = vmatpush3.msra.mxu1 %v254_v14 }
 0x3cc   : > { %3649 = vst.msk [vmem:[#allocation2 + $0xc8] sm:$0xff] %vm676_vm2, %v3566_v20  ;;  %5129 = vmatmul.mubr.f32.gmra.mxu0 %v4842_v33  ;;  %2542 = vrot.lane.b32.xlu1 %v10578_v57, %s8766_s16  ;;  %v10952_v14 = vld [vmem:[%s8819_s26 + $0x123] sm:$0xff] }
 0x3cd   : > { %4148 = vrot.lane.b32.xlu0 %v10556_v46, %s8758_s7 }
 0x3ce   : > { %v2728_v39 = vpop.permute.xlu1 %2727 }
 0x3cf   : > { %v1957_v51 = vpop.permute.xlu0 %1956  ;;  %2813 = vst.msk [vmem:[#allocation2 + $0xb0] sm:$0xff] %vm2801_vm13, %v2728_v39 }
 0x3d0   : > { %2041 = vst.msk [vmem:[#allocation2 + $0xc0] sm:$0xff] %vm2028_vm9, %v1957_v51  ;;  %v5414_v47 = vld [vmem:[#allocation4] ss:$2 sm:$0xff]  ;;  %v5430_v7 = vld [vmem:[#allocation4 + $0x1] ss:$2 sm:$0xff]  ;;  %4340 = vrot.lane.b32.xlu1 %v10863_v12, %s8759_s8 }
 0x3d1   : > { %3573 = vrot.lane.b32.xlu0 %v10801_v8, %s8755_s28  ;;  %v5461_v57 = vmax.f32 %v5414_v47, %v5430_v7  ;;  %v5446_v48 = vld [vmem:[#allocation4 + $0x2] ss:$2 sm:$0xff] }
 0x3d2   : > { %v4525_v37 = vpop.permute.xlu1 %4524 }
 0x3d3   : > { %v3758_v44 = vpop.permute.xlu0 %3757  ;;  %v10871_v36 = vmax.f32 %v5461_v57, %v5446_v48  ;;  %4609 = vst.msk [vmem:[#allocation2 + $0xb8] sm:$0xff] %vm13236_vm7, %v4525_v37  ;;  %vm13239_vm7 = vcmask 720512   ;;  %v10971_v48 = vld [vmem:[%s8819_s26 + $0x124] sm:$0xff] }
 0x3d4   : > { %3841 = vst.msk [vmem:[#allocation2 + $0xc8] sm:$0xff] %vm869_vm3, %v3758_v44  ;;  %2735 = vrot.lane.b32.xlu1 %v10598_v11, %s8767_s11  ;;  %v10976_v44 = vld [vmem:[%s8819_s26 + $0x159] sm:$0xff] }
 0x3d5   : > { %1964 = vrot.lane.b32.xlu0 %v10551_v43, %s8763_s12  ;;  %v5477_v3 = vmul.f32 %v10871_v36, %v10871_v36  ;;  %3276 = vst.msk [vmem:[#allocation2 + $0x178] sm:$0xff] %vm290_vm0, %v10976_v44 }
 0x3d6   : > { %v2921_v42 = vpop.permute.xlu1 %2920 }
 0x3d7   : > { %v2151_v23 = vpop.permute.xlu0 %2150  ;;  %8594 = vmatprep.mubr.msk.f32.mxu1 %vm13237_vm14, %v5477_v3  ;;  %3006 = vst.msk [vmem:[#allocation2 + $0xb0] sm:$0xff] %vm13238_vm10, %v2921_v42  ;;  %vm13240_vm10 = vcmask 786112  }
 0x3d8   : > { %2235 = vst.msk [vmem:[#allocation2 + $0xc0] sm:$0xff] %vm13239_vm7, %v2151_v23  ;;  %v5100_v59 = vpop.f32.mrf.mxu0  ;;  %4532 = vrot.lane.b32.xlu1 %v10882_v54, %s8760_s9 }
 0x3d9   : > { %v5101_v11 = vadd.f32 %v10595_v15, %v5100_v59  ;;  %3765 = vrot.lane.b32.xlu0 %v10820_v49, %s8756_s29 }
 0x3da   : > { %v5102_v43 = vpop.f32.mrf.mxu0  ;;  %v4717_v2 = vpop.permute.xlu1 %4716 }
 0x3db   : > { %v5243_v56 = vmax.f32 %v5101_v11, 0.0  ;;  %v3951_v17 = vpop.permute.xlu0 %3950  ;;  %4801 = vst.msk [vmem:[#allocation2 + $0xb8] sm:$0xff] %vm1835_vm8, %v4717_v2  ;;  %v10998_v43 = vld [vmem:[%s8819_s26 + $0x12a] sm:$0xff] }
 0x3dc   : > { %4034 = vst.msk [vmem:[#allocation2 + $0xc8] sm:$0xff] %vm13196_vm4, %v3951_v17  ;;  %2928 = vrot.lane.b32.xlu1 %v10615_v62, %s8768_s24 }
 0x3dd   : > { %5280 = vst.msk [vmem:[#allocation3 + $0x40] sm:$0xff] %vm13237_vm14, %v5243_v56  ;;  %2158 = vrot.lane.b32.xlu0 %v10618_v18, %s8764_s15  ;;  %vm13241_vm14 = vcmask 523712  }
 0x3de   : > { %v3115_v58 = vpop.permute.xlu1 %3114 }
 0x3df   : > { %v2344_v19 = vpop.permute.xlu0 %2343  ;;  %3200 = vst.msk [vmem:[#allocation2 + $0xb0] sm:$0xff] %vm3188_vm15, %v3115_v58 }
 0x3e0   : > { %2428 = vst.msk [vmem:[#allocation2 + $0xc0] sm:$0xff] %vm13240_vm10, %v2344_v19  ;;  %4724 = vrot.lane.b32.xlu1 %v10900_v1, %s8761_s10  ;;  %vm13242_vm10 = vcmask 982912  }
 0x3e1   : > { %3958 = vrot.lane.b32.xlu0 %v10903_v24, %s8757_s30 }
 0x3e2   : > { %v4143_v18 = vpop.permute.xlu1 %4142  ;;  %v4845_v63 = vld [vmem:[#allocation2 + $0xb8] sm:$0xff] }
 0x3e3   : > { %v3376_v25 = vpop.permute.xlu0 %3375  ;;  %4226 = vst.msk [vmem:[#allocation2 + $0xc8] sm:$0xff] %vm1256_vm5, %v4143_v18  ;;  %8333 = vmatprep.mubr.msk.f32.mxu0 %vm4917_vm11, %v4845_v63 }
 0x3e4   : > { %3458 = vst.msk [vmem:[#allocation2 + $0xd8] sm:$0xff] %vm483_vm1, %v3376_v25  ;;  %3122 = vrot.lane.b32.xlu1 %v10677_v45, %s8769_s23 }
 0x3e5   : > { %2351 = vrot.lane.b32.xlu0 %v10352_v38, %s8765_s20  ;;  %v10936_v38 = vld [vmem:[%s8819_s26 + $0x122] sm:$0xff] }
 0x3e6   : > { %v3568_v61 = vpop.permute.xlu1 %3567  ;;  %v4844_v30 = vld [vmem:[#allocation2 + $0xb0] sm:$0xff] }
 0x3e7   : > { %v2537_v22 = vpop.permute.xlu0 %2536  ;;  %3650 = vst.msk [vmem:[#allocation2 + $0xd8] sm:$0xff] %vm676_vm2, %v3568_v61  ;;  %5134 = vmatmul.mubr.f32.gmra.mxu0 %v4844_v30  ;;  %v11030_v30 = vld [vmem:[%s8819_s26 + $0x12c] sm:$0xff] }
 0x3e8   : > { %2621 = vst.msk [vmem:[#allocation2 + $0xc0] sm:$0xff] %vm2608_vm12, %v2537_v22  ;;  %4150 = vrot.lane.b32.xlu1 %v10623_v6, %s8758_s7 }
 0x3e9   : > { %3383 = vrot.lane.b32.xlu0 %v10863_v12, %s8754_s27 }
 0x3ea   : > { %v1959_v50 = vpop.permute.xlu1 %1958 }
 0x3eb   : > { %v4335_v0 = vpop.permute.xlu0 %4334  ;;  %2042 = vst.msk [vmem:[#allocation2 + $0xd0] sm:$0xff] %vm2028_vm9, %v1959_v50  ;;  %v11033_v50 = vld [vmem:[%s8819_s26 + $0x138] sm:$0xff] }
 0x3ec   : > { %4418 = vst.msk [vmem:[#allocation2 + $0xc8] sm:$0xff] %vm1449_vm6, %v4335_v0  ;;  %3575 = vrot.lane.b32.xlu1 %v10882_v54, %s8755_s28 }
 0x3ed   : > { %2544 = vrot.lane.b32.xlu0 %v10651_v5, %s8766_s16 }
 0x3ee   : > { %v3760_v29 = vpop.permute.xlu1 %3759 }
 0x3ef   : > { %v2730_v26 = vpop.permute.xlu0 %2729  ;;  %3842 = vst.msk [vmem:[#allocation2 + $0xd8] sm:$0xff] %vm869_vm3, %v3760_v29 }
 0x3f0   : > { %2814 = vst.msk [vmem:[#allocation2 + $0xc0] sm:$0xff] %vm2801_vm13, %v2730_v26  ;;  %1966 = vrot.lane.b32.xlu1 %v10615_v62, %s8763_s12 }
 0x3f1   : > { %4342 = vrot.lane.b32.xlu0 %v10936_v38, %s8759_s8 }
 0x3f2   : > { %v2153_v34 = vpop.permute.xlu1 %2152 }
 0x3f3   : > { %v4527_v20 = vpop.permute.xlu0 %4526  ;;  %2236 = vst.msk [vmem:[#allocation2 + $0xd0] sm:$0xff] %vm13239_vm7, %v2153_v34  ;;  %v5105_v5 = vpop.f32.mrf.mxu0  ;;  %vm13243_vm7 = vcmask 261120  }
 0x3f4   : > { %4610 = vst.msk [vmem:[#allocation2 + $0xc8] sm:$0xff] %vm13241_vm14, %v4527_v20  ;;  %v5106_v33 = vadd.f32 %v10595_v15, %v5105_v5  ;;  %3767 = vrot.lane.b32.xlu1 %v10900_v1, %s8756_s29  ;;  %vm13244_vm14 = vcmask 786112   ;;  %v5310_v20 = vld [vmem:[#allocation3 + $0x40] sm:$0xff] }
 0x3f5   : > { %2737 = vrot.lane.b32.xlu0 %v10667_v55, %s8767_s11  ;;  %v5107_v62 = vpop.f32.mrf.mxu0  ;;  %v10962_v55 = vld [vmem:[%s8819_s26 + $0x128] sm:$0xff] }
 0x3f6   : > { %v5244_v39 = vmax.f32 %v5106_v33, 0.0  ;;  %v3953_v51 = vpop.permute.xlu1 %3952  ;;  %v11047_v33 = vld [vmem:[%s8819_s26 + $0x169] sm:$0xff] }
 0x3f7   : > { %v2923_v47 = vpop.permute.xlu0 %2922  ;;  %4035 = vst.msk [vmem:[#allocation2 + $0xd8] sm:$0xff] %vm13196_vm4, %v3953_v51 }
 0x3f8   : > { %3007 = vst.msk [vmem:[#allocation2 + $0xc0] sm:$0xff] %vm13242_vm10, %v2923_v47  ;;  %2160 = vrot.lane.b32.xlu1 %v10677_v45, %s8764_s15  ;;  %vm13245_vm10 = vcmask 523712  }
 0x3f9   : > { %5281 = vst.msk [vmem:[#allocation3 + $0x48] sm:$0xff] %vm13243_vm7, %v5244_v39  ;;  %4534 = vrot.lane.b32.xlu0 %v10952_v14, %s8760_s9  ;;  %vm13246_vm7 = vcmask 982912  }
 0x3fa   : > { %v2346_v7 = vpop.permute.xlu1 %2345  ;;  %3277 = vst.msk [vmem:[#allocation2 + $0x188] sm:$0xff] %vm290_vm0, %v11047_v33 }
 0x3fb   : > { %v4719_v57 = vpop.permute.xlu0 %4718  ;;  %2429 = vst.msk [vmem:[#allocation2 + $0xd0] sm:$0xff] %vm13244_vm14, %v2346_v7  ;;  %vm13247_vm14 = vcmask 720512  }
 0x3fc   : > { %4802 = vst.msk [vmem:[#allocation2 + $0xc8] sm:$0xff] %vm1835_vm8, %v4719_v57  ;;  %3960 = vrot.lane.b32.xlu1 %v10962_v55, %s8757_s30 }
 0x3fd   : > { %2930 = vrot.lane.b32.xlu0 %v10686_v4, %s8768_s24 }
 0x3fe   : > { %v3378_v45 = vpop.permute.xlu1 %3377 }
 0x3ff   : > { %v3117_v37 = vpop.permute.xlu0 %3116  ;;  %3459 = vst.msk [vmem:[#allocation2 + $0xe8] sm:$0xff] %vm483_vm1, %v3378_v45 }
 0x400   : > { %3201 = vst.msk [vmem:[#allocation2 + $0xc0] sm:$0xff] %vm3188_vm15, %v3117_v37  ;;  %2353 = vrot.lane.b32.xlu1 %v10418_v53, %s8765_s20 }
 0x401   : > { %4726 = vrot.lane.b32.xlu0 %v10971_v48, %s8761_s10 }
 0x402   : > { %v2539_v3 = vpop.permute.xlu1 %2538 }
 0x403   : > { %v4145_v42 = vpop.permute.xlu0 %4144  ;;  %v4847_v23 = vld [vmem:[#allocation2 + $0xc8] sm:$0xff]  ;;  %2622 = vst.msk [vmem:[#allocation2 + $0xd0] sm:$0xff] %vm2608_vm12, %v2539_v3 }
 0x404   : > { %4227 = vst.msk [vmem:[#allocation2 + $0xd8] sm:$0xff] %vm1256_vm5, %v4145_v42  ;;  %8334 = vmatprep.mubr.msk.f32.mxu0 %vm4917_vm11, %v4847_v23  ;;  %3385 = vrot.lane.b32.xlu1 %v10936_v38, %s8754_s27 }
 0x405   : > { %3124 = vrot.lane.b32.xlu0 %v10748_v35, %s8769_s23 }
 0x406   : > { %v4337_v53 = vpop.permute.xlu1 %4336 }
 0x407   : > { %v3570_v59 = vpop.permute.xlu0 %3569  ;;  %v4846_v11 = vld [vmem:[#allocation2 + $0xc0] sm:$0xff]  ;;  %4419 = vst.msk [vmem:[#allocation2 + $0xd8] sm:$0xff] %vm1449_vm6, %v4337_v53 }
 0x408   : > { %3651 = vst.msk [vmem:[#allocation2 + $0xe8] sm:$0xff] %vm676_vm2, %v3570_v59  ;;  %5139 = vmatmul.mubr.f32.gmra.mxu0 %v4846_v11  ;;  %2546 = vrot.lane.b32.xlu1 %v10713_v60, %s8766_s16  ;;  %v11013_v60 = vld [vmem:[%s8819_s26 + $0x12b] sm:$0xff]  ;;  %v11087_v53 = vld [vmem:[%s8819_s26 + $0x13b] sm:$0xff] }
 0x409   : > { %4152 = vrot.lane.b32.xlu0 %v10691_v52, %s8758_s7 }
 0x40a   : > { %v2732_v56 = vpop.permute.xlu1 %2731 }
 0x40b   : > { %v1961_v2 = vpop.permute.xlu0 %1960  ;;  %2815 = vst.msk [vmem:[#allocation2 + $0xd0] sm:$0xff] %vm2801_vm13, %v2732_v56 }
 0x40c   : > { %2043 = vst.msk [vmem:[#allocation2 + $0xe0] sm:$0xff] %vm2028_vm9, %v1961_v2  ;;  %4344 = vrot.lane.b32.xlu1 %v10998_v43, %s8759_s8 }
 0x40d   : > { %3577 = vrot.lane.b32.xlu0 %v10952_v14, %s8755_s28 }
 0x40e   : > { %v4529_v17 = vpop.permute.xlu1 %4528 }
 0x40f   : > { %v3762_v58 = vpop.permute.xlu0 %3761  ;;  %4611 = vst.msk [vmem:[#allocation2 + $0xd8] sm:$0xff] %vm13245_vm10, %v4529_v17  ;;  %vm13248_vm10 = vcmask 261120   ;;  %v11106_v17 = vld [vmem:[%s8819_s26 + $0x13c] sm:$0xff] }
 0x410   : > { %3843 = vst.msk [vmem:[#allocation2 + $0xe8] sm:$0xff] %vm869_vm3, %v3762_v58  ;;  %2739 = vrot.lane.b32.xlu1 %v10728_v21, %s8767_s11 }
 0x411   : > { %1968 = vrot.lane.b32.xlu0 %v10686_v4, %s8763_s12 }
 0x412   : > { %v2925_v19 = vpop.permute.xlu1 %2924 }
 0x413   : > { %v2155_v18 = vpop.permute.xlu0 %2154  ;;  %3008 = vst.msk [vmem:[#allocation2 + $0xd0] sm:$0xff] %vm13246_vm7, %v2925_v19  ;;  %vm13249_vm7 = vcmask 786112   ;;  %v5311_v19 = vld [vmem:[#allocation3 + $0x48] sm:$0xff] }
 0x414   : > { %2237 = vst.msk [vmem:[#allocation2 + $0xe0] sm:$0xff] %vm13247_vm14, %v2155_v18  ;;  %v5110_v25 = vpop.f32.mrf.mxu0  ;;  %4536 = vrot.lane.b32.xlu1 %v11013_v60, %s8760_s9  ;;  %vm13250_vm14 = vmmov %vm13248_vm10 }
 0x415   : > { %v5111_v63 = vadd.f32 %v10595_v15, %v5110_v25  ;;  %3769 = vrot.lane.b32.xlu0 %v10971_v48, %s8756_s29 }
 0x416   : > { %v5112_v4 = vpop.f32.mrf.mxu0  ;;  %v4721_v61 = vpop.permute.xlu1 %4720 }
 0x417   : > { %v5245_v21 = vmax.f32 %v5111_v63, 0.0  ;;  %v3955_v22 = vpop.permute.xlu0 %3954  ;;  %4803 = vst.msk [vmem:[#allocation2 + $0xd8] sm:$0xff] %vm1835_vm8, %v4721_v61 }
 0x418   : > { %4036 = vst.msk [vmem:[#allocation2 + $0xe8] sm:$0xff] %vm13196_vm4, %v3955_v22  ;;  %2932 = vrot.lane.b32.xlu1 %v10745_v10, %s8768_s24  ;;  %v11122_v22 = vld [vmem:[%s8819_s26 + $0x171] sm:$0xff] }
 0x419   : > { %5282 = vst.msk [vmem:[#allocation3 + $0x50] sm:$0xff] %vm13248_vm10, %v5245_v21  ;;  %2162 = vrot.lane.b32.xlu0 %v10748_v35, %s8764_s15  ;;  %vm13251_vm10 = vcmask 720512  }
 0x41a   : > { %v3119_v0 = vpop.permute.xlu1 %3118  ;;  %3278 = vst.msk [vmem:[#allocation2 + $0x198] sm:$0xff] %vm290_vm0, %v11122_v22 }
 0x41b   : > { %v2348_v29 = vpop.permute.xlu0 %2347  ;;  %3202 = vst.msk [vmem:[#allocation2 + $0xd0] sm:$0xff] %vm3188_vm15, %v3119_v0 }
 0x41c   : > { %2430 = vst.msk [vmem:[#allocation2 + $0xe0] sm:$0xff] %vm13249_vm7, %v2348_v29  ;;  %4728 = vrot.lane.b32.xlu1 %v11030_v30, %s8761_s10  ;;  %vm13252_vm7 = vcmask 523712   ;;  %v11138_v29 = vld [vmem:[%s8819_s26 + $0x142] sm:$0xff] }
 0x41d   : > { %3962 = vrot.lane.b32.xlu0 %v11033_v50, %s8757_s30 }
 0x41e   : > { %v4147_v26 = vpop.permute.xlu1 %4146  ;;  %v4849_v35 = vld [vmem:[#allocation2 + $0xd8] sm:$0xff] }
 0x41f   : > { %v3380_v34 = vpop.permute.xlu0 %3379  ;;  %4228 = vst.msk [vmem:[#allocation2 + $0xe8] sm:$0xff] %vm1256_vm5, %v4147_v26  ;;  %8335 = vmatprep.mubr.msk.f32.mxu0 %vm4917_vm11, %v4849_v35 }
 0x420   : > { %v11041_v5 = vld [vmem:[#allocation3 + $0x50] sm:$0xff]  ;;  %3460 = vst.msk [vmem:[#allocation2 + $0xf8] sm:$0xff] %vm483_vm1, %v3380_v34  ;;  %3126 = vrot.lane.b32.xlu1 %v10811_v32, %s8769_s23 }
 0x421   : > { %v5343_v62 = vmax.f32 %v5310_v20, %v11041_v5  ;;  %2355 = vrot.lane.b32.xlu0 %v10478_v16, %s8765_s20 }
 0x422   : > { %v3572_v51 = vpop.permute.xlu1 %3571  ;;  %v4848_v7 = vld [vmem:[#allocation2 + $0xd0] sm:$0xff] }
 0x423   : > { %v5375_v39 = vmax.f32 %v5343_v62, %v10761_v28  ;;  %v2541_v47 = vpop.permute.xlu0 %2540  ;;  %3652 = vst.msk [vmem:[#allocation2 + $0xf8] sm:$0xff] %vm676_vm2, %v3572_v51  ;;  %5144 = vmatmul.mubr.f32.gmra.mxu0 %v4848_v7  ;;  %v11071_v28 = vld [vmem:[%s8819_s26 + $0x13a] sm:$0xff] }
 0x424   : > { %2623 = vst.msk [vmem:[#allocation2 + $0xe0] sm:$0xff] %vm2608_vm12, %v2541_v47  ;;  %4154 = vrot.lane.b32.xlu1 %v10753_v31, %s8758_s7 }
 0x425   : > { %5400 = vst.msk [vmem:[#allocation4 + $0x19] sm:$0xff] %vm13250_vm14, %v5375_v39  ;;  %3387 = vrot.lane.b32.xlu0 %v10998_v43, %s8754_s27  ;;  %vm13253_vm14 = vcmask 982912  }
 0x426   : > { %v1963_v16 = vpop.permute.xlu1 %1962 }
 0x427   : > { %v4339_v57 = vpop.permute.xlu0 %4338  ;;  %2044 = vst.msk [vmem:[#allocation2 + $0xf0] sm:$0xff] %vm2028_vm9, %v1963_v16  ;;  %v11157_v16 = vld [vmem:[%s8819_s26 + $0x143] sm:$0xff] }
 0x428   : > { %4420 = vst.msk [vmem:[#allocation2 + $0xe8] sm:$0xff] %vm1449_vm6, %v4339_v57  ;;  %3579 = vrot.lane.b32.xlu1 %v11013_v60, %s8755_s28 }
 0x429   : > { %2548 = vrot.lane.b32.xlu0 %v10785_v41, %s8766_s16 }
 0x42a   : > { %v3764_v45 = vpop.permute.xlu1 %3763 }
 0x42b   : > { %v2734_v37 = vpop.permute.xlu0 %2733  ;;  %3844 = vst.msk [vmem:[#allocation2 + $0xf8] sm:$0xff] %vm869_vm3, %v3764_v45 }
 0x42c   : > { %2816 = vst.msk [vmem:[#allocation2 + $0xe0] sm:$0xff] %vm2801_vm13, %v2734_v37  ;;  %1970 = vrot.lane.b32.xlu1 %v10745_v10, %s8763_s12 }
 0x42d   : > { %4346 = vrot.lane.b32.xlu0 %v11071_v28, %s8759_s8 }
 0x42e   : > { %v2157_v3 = vpop.permute.xlu1 %2156 }
 0x42f   : > { %v4531_v42 = vpop.permute.xlu0 %4530  ;;  %2238 = vst.msk [vmem:[#allocation2 + $0xf0] sm:$0xff] %vm13251_vm10, %v2157_v3  ;;  %v5115_v41 = vpop.f32.mrf.mxu0  ;;  %vm13254_vm10 = vcmask 261120  }
 0x430   : > { %4612 = vst.msk [vmem:[#allocation2 + $0xe8] sm:$0xff] %vm13252_vm7, %v4531_v42  ;;  %v5116_v23 = vadd.f32 %v10595_v15, %v5115_v41  ;;  %3771 = vrot.lane.b32.xlu1 %v11030_v30, %s8756_s29  ;;  %v11097_v15 = vld [vmem:[%s8819_s26 + $0x140] sm:$0xff]  ;;  %vm13255_vm7 = vcmask 786112  }
 0x431   : > { %2741 = vrot.lane.b32.xlu0 %v10801_v8, %s8767_s11  ;;  %v5117_v10 = vpop.f32.mrf.mxu0 }
 0x432   : > { %v5246_v59 = vmax.f32 %v5116_v23, 0.0  ;;  %v3957_v11 = vpop.permute.xlu1 %3956 }
 0x433   : > { %v2927_v56 = vpop.permute.xlu0 %2926  ;;  %4037 = vst.msk [vmem:[#allocation2 + $0xf8] sm:$0xff] %vm13196_vm4, %v3957_v11  ;;  %v11183_v11 = vld [vmem:[%s8819_s26 + $0x150] sm:$0xff] }
 0x434   : > { %3009 = vst.msk [vmem:[#allocation2 + $0xe0] sm:$0xff] %vm13253_vm14, %v2927_v56  ;;  %2164 = vrot.lane.b32.xlu1 %v10811_v32, %s8764_s15  ;;  %vm13256_vm14 = vmmov %vm13254_vm10 }
 0x435   : > { %5283 = vst.msk [vmem:[#allocation3 + $0x58] sm:$0xff] %vm13254_vm10, %v5246_v59  ;;  %4538 = vrot.lane.b32.xlu0 %v11087_v53, %s8760_s9  ;;  %vm13257_vm10 = vcmask 523712   ;;  %v11180_v59 = vld [vmem:[%s8819_s26 + $0x144] sm:$0xff] }
 0x436   : > { %v2350_v8 = vpop.permute.xlu1 %2349 }
 0x437   : > { %v4723_v2 = vpop.permute.xlu0 %4722  ;;  %2431 = vst.msk [vmem:[#allocation2 + $0xf0] sm:$0xff] %vm13255_vm7, %v2350_v8  ;;  %vm13258_vm7 = vmmov %vm13256_vm14 }
 0x438   : > { %4804 = vst.msk [vmem:[#allocation2 + $0xe8] sm:$0xff] %vm1835_vm8, %v4723_v2  ;;  %3964 = vrot.lane.b32.xlu1 %v11097_v15, %s8757_s30 }
 0x439   : > { %2934 = vrot.lane.b32.xlu0 %v10820_v49, %s8768_s24 }
 0x43a   : > { %v3382_v32 = vpop.permute.xlu1 %3381 }
 0x43b   : > { %v3121_v58 = vpop.permute.xlu0 %3120  ;;  %3461 = vst.msk [vmem:[#allocation2 + $0x108] sm:$0xff] %vm483_vm1, %v3382_v32 }
 0x43c   : > { %v11108_v18 = vld [vmem:[#allocation3 + $0x58] sm:$0xff]  ;;  %3203 = vst.msk [vmem:[#allocation2 + $0xe0] sm:$0xff] %vm3188_vm15, %v3121_v58  ;;  %2357 = vrot.lane.b32.xlu1 %v10556_v46, %s8765_s20 }
 0x43d   : > { %v5344_v25 = vmax.f32 %v5311_v19, %v11108_v18  ;;  %4730 = vrot.lane.b32.xlu0 %v11106_v17, %s8761_s10 }
 0x43e   : > { %v2543_v4 = vpop.permute.xlu1 %2542 }
 0x43f   : > { %v5376_v63 = vmax.f32 %v5344_v25, %v10822_v9  ;;  %v4149_v21 = vpop.permute.xlu0 %4148  ;;  %v4851_v61 = vld [vmem:[#allocation2 + $0xe8] sm:$0xff]  ;;  %2624 = vst.msk [vmem:[#allocation2 + $0xf0] sm:$0xff] %vm2608_vm12, %v2543_v4 }
 0x440   : > { %4229 = vst.msk [vmem:[#allocation2 + $0xf8] sm:$0xff] %vm1256_vm5, %v4149_v21  ;;  %8336 = vmatprep.mubr.msk.f32.mxu0 %vm4917_vm11, %v4851_v61  ;;  %3389 = vrot.lane.b32.xlu1 %v11071_v28, %s8754_s27  ;;  %v11216_v21 = vld [vmem:[%s8819_s26 + $0x152] sm:$0xff] }
 0x441   : > { %5401 = vst.msk [vmem:[#allocation4 + $0x21] sm:$0xff] %vm13256_vm14, %v5376_v63  ;;  %3128 = vrot.lane.b32.xlu0 %v10903_v24, %s8769_s23  ;;  %vm13259_vm14 = vcmask 982912   ;;  %v11201_v63 = vld [vmem:[%s8819_s26 + $0x181] sm:$0xff] }
 0x442   : > { %v4341_v46 = vpop.permute.xlu1 %4340  ;;  %3279 = vst.msk [vmem:[#allocation2 + $0x1a8] sm:$0xff] %vm290_vm0, %v11201_v63 }
 0x443   : > { %v3574_v9 = vpop.permute.xlu0 %3573  ;;  %v4850_v0 = vld [vmem:[#allocation2 + $0xe0] sm:$0xff]  ;;  %4421 = vst.msk [vmem:[#allocation2 + $0xf8] sm:$0xff] %vm1449_vm6, %v4341_v46 }
 0x444   : > { %3653 = vst.msk [vmem:[#allocation2 + $0x108] sm:$0xff] %vm676_vm2, %v3574_v9  ;;  %5149 = vmatmul.mubr.f32.gmra.mxu0 %v4850_v0  ;;  %2550 = vrot.lane.b32.xlu1 %v10863_v12, %s8766_s16 }
 0x445   : > { %4156 = vrot.lane.b32.xlu0 %v10827_v27, %s8758_s7 }
 0x446   : > { %v2736_v26 = vpop.permute.xlu1 %2735 }
 0x447   : > { %v1965_v34 = vpop.permute.xlu0 %1964  ;;  %2817 = vst.msk [vmem:[#allocation2 + $0xf0] sm:$0xff] %vm2801_vm13, %v2736_v26 }
 0x448   : > { %2045 = vst.msk [vmem:[#allocation2 + $0x100] sm:$0xff] %vm2028_vm9, %v1965_v34  ;;  %v5416_v35 = vld [vmem:[#allocation4 + $0x18] ss:$2 sm:$0xff]  ;;  %v5432_v20 = vld [vmem:[#allocation4 + $0x19] ss:$2 sm:$0xff]  ;;  %4348 = vrot.lane.b32.xlu1 %v11138_v29, %s8759_s8 }
 0x449   : > { %3581 = vrot.lane.b32.xlu0 %v11087_v53, %s8755_s28  ;;  %v5462_v12 = vmax.f32 %v5416_v35, %v5432_v20  ;;  %v5448_v62 = vld [vmem:[#allocation4 + $0x1a] ss:$2 sm:$0xff] }
 0x44a   : > { %v4533_v39 = vpop.permute.xlu1 %4532  ;;  %v11232_v34 = vld [vmem:[%s8819_s26 + $0x153] sm:$0xff] }
 0x44b   : > { %v3766_v51 = vpop.permute.xlu0 %3765  ;;  %v11146_v47 = vmax.f32 %v5462_v12, %v5448_v62  ;;  %4613 = vst.msk [vmem:[#allocation2 + $0xf8] sm:$0xff] %vm13257_vm10, %v4533_v39  ;;  %vm13260_vm10 = vcmask 720512   ;;  %v11248_v39 = vld [vmem:[%s8819_s26 + $0x154] sm:$0xff] }
 0x44c   : > { %3845 = vst.msk [vmem:[#allocation2 + $0x108] sm:$0xff] %vm869_vm3, %v3766_v51  ;;  %2743 = vrot.lane.b32.xlu1 %v10882_v54, %s8767_s11  ;;  %v11251_v51 = vld [vmem:[%s8819_s26 + $0x158] sm:$0xff] }
 0x44d   : > { %1972 = vrot.lane.b32.xlu0 %v10820_v49, %s8763_s12  ;;  %v5478_v7 = vmul.f32 %v11146_v47, %v11146_v47  ;;  %v11165_v49 = vld [vmem:[%s13186_s2] ss:$0 sm:$0xff] }
 0x44e   : > { %v2929_v57 = vpop.permute.xlu1 %2928 }
 0x44f   : > { %v2159_v45 = vpop.permute.xlu0 %2158  ;;  %8595 = vmatmul.mubr.msk.f32.vlgmr.msra.gmra.mxu1 %vm13258_vm7, %v5478_v7  ;;  %3010 = vst.msk [vmem:[#allocation2 + $0xf0] sm:$0xff] %vm13259_vm14, %v2929_v57  ;;  %vm13261_vm14 = vcmask 786112  }
 0x450   : > { %2239 = vst.msk [vmem:[#allocation2 + $0x100] sm:$0xff] %vm13260_vm10, %v2159_v45  ;;  %v5120_v37 = vpop.f32.mrf.mxu0  ;;  %4540 = vrot.lane.b32.xlu1 %v11157_v16, %s8760_s9 }
 0x451   : > { %v5121_v3 = vadd.f32 %v11165_v49, %v5120_v37  ;;  %3773 = vrot.lane.b32.xlu0 %v11106_v17, %s8756_s29 }
 0x452   : > { %v5122_v42 = vpop.f32.mrf.mxu0  ;;  %v4725_v23 = vpop.permute.xlu1 %4724 }
 0x453   : > { %v5247_v41 = vmax.f32 %v5121_v3, 0.0  ;;  %v3959_v10 = vpop.permute.xlu0 %3958  ;;  %4805 = vst.msk [vmem:[#allocation2 + $0xf8] sm:$0xff] %vm1835_vm8, %v4725_v23  ;;  %v11269_v23 = vld [vmem:[%s8819_s26 + $0x189] sm:$0xff] }
 0x454   : > { %4038 = vst.msk [vmem:[#allocation2 + $0x108] sm:$0xff] %vm13196_vm4, %v3959_v10  ;;  %2936 = vrot.lane.b32.xlu1 %v10900_v1, %s8768_s24 }
 0x455   : > { %5284 = vst.msk [vmem:[#allocation3 + $0x60] sm:$0xff] %vm13258_vm7, %v5247_v41  ;;  %2166 = vrot.lane.b32.xlu0 %v10903_v24, %s8764_s15  ;;  %vm13262_vm7 = vcmask 523712  }
 0x456   : > { %v3123_v56 = vpop.permute.xlu1 %3122  ;;  %3280 = vst.msk [vmem:[#allocation2 + $0x1b8] sm:$0xff] %vm290_vm0, %v11269_v23 }
 0x457   : > { %v2352_v8 = vpop.permute.xlu0 %2351  ;;  %3204 = vst.msk [vmem:[#allocation2 + $0xf0] sm:$0xff] %vm3188_vm15, %v3123_v56  ;;  %v11284_v56 = vld [vmem:[%s8819_s26 + $0x15a] sm:$0xff] }
 0x458   : > { %2432 = vst.msk [vmem:[#allocation2 + $0x100] sm:$0xff] %vm13261_vm14, %v2352_v8  ;;  %4732 = vrot.lane.b32.xlu1 %v11180_v59, %s8761_s10  ;;  %vm13263_vm14 = vcmask 982912  }
 0x459   : > { %3966 = vrot.lane.b32.xlu0 %v11183_v11, %s8757_s30 }
 0x45a   : > { %v4151_v2 = vpop.permute.xlu1 %4150  ;;  %v4853_v24 = vld [vmem:[#allocation2 + $0xf8] sm:$0xff] }
 0x45b   : > { %v3384_v32 = vpop.permute.xlu0 %3383  ;;  %4230 = vst.msk [vmem:[#allocation2 + $0x108] sm:$0xff] %vm1256_vm5, %v4151_v2  ;;  %8337 = vmatprep.mubr.msk.f32.mxu0 %vm4917_vm11, %v4853_v24 }
 0x45c   : > { %3462 = vst.msk [vmem:[#allocation2 + $0x118] sm:$0xff] %vm483_vm1, %v3384_v32  ;;  %3130 = vrot.lane.b32.xlu1 %v10962_v55, %s8769_s23 }
 0x45d   : > { %2359 = vrot.lane.b32.xlu0 %v10623_v6, %s8765_s20 }
 0x45e   : > { %v3576_v58 = vpop.permute.xlu1 %3575  ;;  %v4852_v25 = vld [vmem:[#allocation2 + $0xf0] sm:$0xff] }
 0x45f   : > { %v2545_v19 = vpop.permute.xlu0 %2544  ;;  %3654 = vst.msk [vmem:[#allocation2 + $0x118] sm:$0xff] %vm676_vm2, %v3576_v58  ;;  %5154 = vmatmul.mubr.f32.gmra.mxu0 %v4852_v25 }
 0x460   : > { %2625 = vst.msk [vmem:[#allocation2 + $0x100] sm:$0xff] %vm2608_vm12, %v2545_v19  ;;  %4158 = vrot.lane.b32.xlu1 %v10908_v13, %s8758_s7  ;;  %v11300_v19 = vld [vmem:[%s8819_s26 + $0x15b] sm:$0xff] }
 0x461   : > { %3391 = vrot.lane.b32.xlu0 %v11138_v29, %s8754_s27 }
 0x462   : > { %v1967_v6 = vpop.permute.xlu1 %1966 }
 0x463   : > { %v4343_v4 = vpop.permute.xlu0 %4342  ;;  %2046 = vst.msk [vmem:[#allocation2 + $0x110] sm:$0xff] %vm2028_vm9, %v1967_v6 }
 0x464   : > { %4422 = vst.msk [vmem:[#allocation2 + $0x108] sm:$0xff] %vm1449_vm6, %v4343_v4  ;;  %2552 = vrot.lane.b32.xlu1 %v10936_v38, %s8766_s16 }
 0x465   : > { %1781 = vrot.lane.b32.xlu0 %v10882_v54, %s8761_s10 }
 0x466   : > { %v3768_v61 = vpop.permute.xlu1 %3767 }
 0x467   : > { %v2738_v46 = vpop.permute.xlu0 %2737  ;;  %3846 = vst.msk [vmem:[#allocation2 + $0x118] sm:$0xff] %vm869_vm3, %v3768_v61 }
 0x468   : > { %2818 = vst.msk [vmem:[#allocation2 + $0x100] sm:$0xff] %vm2801_vm13, %v2738_v46  ;;  %4350 = vrot.lane.b32.xlu1 %v11216_v21, %s8759_s8  ;;  %v11316_v46 = vld [vmem:[%s8819_s26 + $0x15c] sm:$0xff] }
 0x469   : > { %3583 = vrot.lane.b32.xlu0 %v11157_v16, %s8755_s28 }
 0x46a   : > { %v2161_v9 = vpop.permute.xlu1 %2160 }
 0x46b   : > { %v4535_v38 = vpop.permute.xlu0 %4534  ;;  %2240 = vst.msk [vmem:[#allocation2 + $0x110] sm:$0xff] %vm13260_vm10, %v2161_v9  ;;  %v5125_v54 = vpop.f32.mrf.mxu0  ;;  %vm13264_vm10 = vcmask 261120   ;;  %v11319_v9 = vld [vmem:[%s8819_s26 + $0x168] sm:$0xff] }
 0x46c   : > { %4614 = vst.msk [vmem:[#allocation2 + $0x108] sm:$0xff] %vm13262_vm7, %v4535_v38  ;;  %v5126_v0 = vadd.f32 %v11165_v49, %v5125_v54  ;;  %2745 = vrot.lane.b32.xlu1 %v10952_v14, %s8767_s11  ;;  %vm13265_vm7 = vcmask 786112  }
 0x46d   : > { %1974 = vrot.lane.b32.xlu0 %v10900_v1, %s8763_s12  ;;  %v5127_v26 = vpop.f32.mrf.mxu0 }
 0x46e   : > { %v5248_v35 = vmax.f32 %v5126_v0, 0.0  ;;  %v3961_v20 = vpop.permute.xlu1 %3960  ;;  %v5312_v26 = vld [vmem:[#allocation3 + $0x60] sm:$0xff] }
 0x46f   : > { %v2931_v12 = vpop.permute.xlu0 %2930  ;;  %4039 = vst.msk [vmem:[#allocation2 + $0x118] sm:$0xff] %vm13196_vm4, %v3961_v20 }
 0x470   : > { %3011 = vst.msk [vmem:[#allocation2 + $0x100] sm:$0xff] %vm13263_vm14, %v2931_v12  ;;  %4542 = vrot.lane.b32.xlu1 %v11232_v34, %s8760_s9  ;;  %vm13266_vm14 = vcmask 523712  }
 0x471   : > { %5285 = vst.msk [vmem:[#allocation3 + $0x68] sm:$0xff] %vm13264_vm10, %v5248_v35  ;;  %3775 = vrot.lane.b32.xlu0 %v11180_v59, %s8756_s29  ;;  %vm13267_vm10 = vcmask 982912  }
 0x472   : > { %v2354_v1 = vpop.permute.xlu1 %2353 }
 0x473   : > { %v4727_v62 = vpop.permute.xlu0 %4726  ;;  %2433 = vst.msk [vmem:[#allocation2 + $0x110] sm:$0xff] %vm13265_vm7, %v2354_v1  ;;  %vm13268_vm7 = vcmask 720512  }
 0x474   : > { %4806 = vst.msk [vmem:[#allocation2 + $0x108] sm:$0xff] %vm1835_vm8, %v4727_v62  ;;  %2938 = vrot.lane.b32.xlu1 %v10971_v48, %s8768_s24 }
 0x475   : > { %2168 = vrot.lane.b32.xlu0 %v10962_v55, %s8764_s15 }
 0x476   : > { %v3386_v7 = vpop.permute.xlu1 %3385 }
 0x477   : > { %v3125_v57 = vpop.permute.xlu0 %3124  ;;  %3463 = vst.msk [vmem:[#allocation2 + $0x128] sm:$0xff] %vm483_vm1, %v3386_v7 }
 0x478   : > { %3205 = vst.msk [vmem:[#allocation2 + $0x100] sm:$0xff] %vm3188_vm15, %v3125_v57  ;;  %4734 = vrot.lane.b32.xlu1 %v11248_v39, %s8761_s10  ;;  %v11346_v57 = vld [vmem:[%s8819_s26 + $0x199] sm:$0xff] }
 0x479   : > { %3968 = vrot.lane.b32.xlu0 %v11251_v51, %s8757_s30  ;;  %3281 = vst.msk [vmem:[#allocation2 + $0x1c8] sm:$0xff] %vm290_vm0, %v11346_v57 }
 0x47a   : > { %v2547_v45 = vpop.permute.xlu1 %2546 }
 0x47b   : > { %v4153_v37 = vpop.permute.xlu0 %4152  ;;  %v4855_v55 = vld [vmem:[#allocation2 + $0x108] sm:$0xff]  ;;  %2626 = vst.msk [vmem:[#allocation2 + $0x110] sm:$0xff] %vm2608_vm12, %v2547_v45 }
 0x47c   : > { %4231 = vst.msk [vmem:[#allocation2 + $0x118] sm:$0xff] %vm1256_vm5, %v4153_v37  ;;  %8338 = vmatprep.mubr.msk.f32.mxu0 %vm4917_vm11, %v4855_v55  ;;  %3132 = vrot.lane.b32.xlu1 %v11033_v50, %s8769_s23 }
 0x47d   : > { %2361 = vrot.lane.b32.xlu0 %v10691_v52, %s8765_s20 }
 0x47e   : > { %v4345_v3 = vpop.permute.xlu1 %4344 }
 0x47f   : > { %v3578_v42 = vpop.permute.xlu0 %3577  ;;  %v4854_v41 = vld [vmem:[#allocation2 + $0x100] sm:$0xff]  ;;  %4423 = vst.msk [vmem:[#allocation2 + $0x118] sm:$0xff] %vm1449_vm6, %v4345_v3 }
 0x480   : > { %3655 = vst.msk [vmem:[#allocation2 + $0x128] sm:$0xff] %vm676_vm2, %v3578_v42  ;;  %5159 = vmatmul.mubr.f32.gmra.mxu0 %v4854_v41  ;;  %4160 = vrot.lane.b32.xlu1 %v10976_v44, %s8758_s7 }
 0x481   : > { %3393 = vrot.lane.b32.xlu0 %v11216_v21, %s8754_s27 }
 0x482   : > { %v2740_v52 = vpop.permute.xlu1 %2739 }
 0x483   : > { %v1969_v10 = vpop.permute.xlu0 %1968  ;;  %2819 = vst.msk [vmem:[#allocation2 + $0x110] sm:$0xff] %vm2801_vm13, %v2740_v52 }
 0x484   : > { %2047 = vst.msk [vmem:[#allocation2 + $0x120] sm:$0xff] %vm2028_vm9, %v1969_v10  ;;  %2554 = vrot.lane.b32.xlu1 %v10998_v43, %s8766_s16 }
 0x485   : > { %1783 = vrot.lane.b32.xlu0 %v10952_v14, %s8761_s10 }
 0x486   : > { %v4537_v8 = vpop.permute.xlu1 %4536 }
 0x487   : > { %v3770_v2 = vpop.permute.xlu0 %3769  ;;  %4615 = vst.msk [vmem:[#allocation2 + $0x118] sm:$0xff] %vm13266_vm14, %v4537_v8  ;;  %vm13269_vm14 = vcmask 261120   ;;  %v11374_v8 = vld [vmem:[%s8819_s26 + $0x16b] sm:$0xff] }
 0x488   : > { %3847 = vst.msk [vmem:[#allocation2 + $0x128] sm:$0xff] %vm869_vm3, %v3770_v2  ;;  %4352 = vrot.lane.b32.xlu1 %v11284_v56, %s8759_s8 }
 0x489   : > { %3585 = vrot.lane.b32.xlu0 %v11232_v34, %s8755_s28 }
 0x48a   : > { %v2933_v32 = vpop.permute.xlu1 %2932 }
 0x48b   : > { %v2163_v43 = vpop.permute.xlu0 %2162  ;;  %3012 = vst.msk [vmem:[#allocation2 + $0x110] sm:$0xff] %vm13267_vm10, %v2933_v32  ;;  %vm13270_vm10 = vcmask 786112  }
 0x48c   : > { %2241 = vst.msk [vmem:[#allocation2 + $0x120] sm:$0xff] %vm13268_vm7, %v2163_v43  ;;  %v5130_v14 = vpop.f32.mrf.mxu0  ;;  %2747 = vrot.lane.b32.xlu1 %v11013_v60, %s8767_s11  ;;  %vm13271_vm7 = vmmov %vm13269_vm14 }
 0x48d   : > { %v5131_v24 = vadd.f32 %v11165_v49, %v5130_v14  ;;  %1976 = vrot.lane.b32.xlu0 %v10971_v48, %s8763_s12 }
 0x48e   : > { %v5132_v58 = vpop.f32.mrf.mxu0  ;;  %v4729_v6 = vpop.permute.xlu1 %4728 }
 0x48f   : > { %v5249_v25 = vmax.f32 %v5131_v24, 0.0  ;;  %v3963_v4 = vpop.permute.xlu0 %3962  ;;  %4807 = vst.msk [vmem:[#allocation2 + $0x118] sm:$0xff] %vm1835_vm8, %v4729_v6  ;;  %v5313_v24 = vld [vmem:[#allocation3 + $0x68] sm:$0xff]  ;;  %v11395_v6 = vld [vmem:[%s8819_s26 + $0x170] sm:$0xff] }
 0x490   : > { %4040 = vst.msk [vmem:[#allocation2 + $0x128] sm:$0xff] %vm13196_vm4, %v3963_v4  ;;  %4544 = vrot.lane.b32.xlu1 %v11300_v19, %s8760_s9 }
 0x491   : > { %5286 = vst.msk [vmem:[#allocation3 + $0x70] sm:$0xff] %vm13269_vm14, %v5249_v25  ;;  %3777 = vrot.lane.b32.xlu0 %v11248_v39, %s8756_s29  ;;  %vm13272_vm14 = vcmask 720512   ;;  %v11392_v25 = vld [vmem:[%s8819_s26 + $0x16c] sm:$0xff] }
 0x492   : > { %v3127_v48 = vpop.permute.xlu1 %3126 }
 0x493   : > { %v2356_v61 = vpop.permute.xlu0 %2355  ;;  %3206 = vst.msk [vmem:[#allocation2 + $0x110] sm:$0xff] %vm3188_vm15, %v3127_v48 }
 0x494   : > { %2434 = vst.msk [vmem:[#allocation2 + $0x120] sm:$0xff] %vm13270_vm10, %v2356_v61  ;;  %2940 = vrot.lane.b32.xlu1 %v11030_v30, %s8768_s24  ;;  %vm13273_vm10 = vcmask 523712  }
 0x495   : > { %2170 = vrot.lane.b32.xlu0 %v11033_v50, %s8764_s15 }
 0x496   : > { %v4155_v38 = vpop.permute.xlu1 %4154  ;;  %v4857_v0 = vld [vmem:[#allocation2 + $0x118] sm:$0xff] }
 0x497   : > { %v3388_v54 = vpop.permute.xlu0 %3387  ;;  %4232 = vst.msk [vmem:[#allocation2 + $0x128] sm:$0xff] %vm1256_vm5, %v4155_v38  ;;  %8339 = vmatprep.mubr.msk.f32.mxu0 %vm4917_vm11, %v4857_v0 }
 0x498   : > { %v11321_v35 = vld [vmem:[#allocation3 + $0x70] sm:$0xff]  ;;  %3464 = vst.msk [vmem:[#allocation2 + $0x138] sm:$0xff] %vm483_vm1, %v3388_v54  ;;  %4736 = vrot.lane.b32.xlu1 %v11316_v46, %s8761_s10 }
 0x499   : > { %v5345_v20 = vmax.f32 %v5312_v26, %v11321_v35  ;;  %3970 = vrot.lane.b32.xlu0 %v11319_v9, %s8757_s30 }
 0x49a   : > { %v3580_v12 = vpop.permute.xlu1 %3579  ;;  %v4856_v62 = vld [vmem:[#allocation2 + $0x110] sm:$0xff] }
 0x49b   : > { %v5377_v50 = vmax.f32 %v5345_v20, %v11041_v5  ;;  %v2549_v1 = vpop.permute.xlu0 %2548  ;;  %3656 = vst.msk [vmem:[#allocation2 + $0x138] sm:$0xff] %vm676_vm2, %v3580_v12  ;;  %5164 = vmatmul.mubr.f32.gmra.mxu0 %v4856_v62 }
 0x49c   : > { %2627 = vst.msk [vmem:[#allocation2 + $0x120] sm:$0xff] %vm2608_vm12, %v2549_v1  ;;  %3134 = vrot.lane.b32.xlu1 %v11097_v15, %s8769_s23  ;;  %v11451_v1 = vld [vmem:[%s8819_s26 + $0x1a1] sm:$0xff] }
 0x49d   : > { %5402 = vst.msk [vmem:[#allocation4 + $0x31] sm:$0xff] %vm13271_vm7, %v5377_v50  ;;  %2363 = vrot.lane.b32.xlu0 %v10753_v31, %s8765_s20  ;;  %v11357_v31 = vld [vmem:[%s8819_s26 + $0x16a] sm:$0xff]  ;;  %vm13274_vm7 = vcmask 982912  }
 0x49e   : > { %v1971_v7 = vpop.permute.xlu1 %1970  ;;  %3282 = vst.msk [vmem:[#allocation2 + $0x1d8] sm:$0xff] %vm290_vm0, %v11451_v1 }
 0x49f   : > { %v4347_v5 = vpop.permute.xlu0 %4346  ;;  %2048 = vst.msk [vmem:[#allocation2 + $0x130] sm:$0xff] %vm2028_vm9, %v1971_v7 }
 0x4a0   : > { %4424 = vst.msk [vmem:[#allocation2 + $0x128] sm:$0xff] %vm1449_vm6, %v4347_v5  ;;  %4162 = vrot.lane.b32.xlu1 %v11047_v33, %s8758_s7 }
 0x4a1   : > { %3395 = vrot.lane.b32.xlu0 %v11284_v56, %s8754_s27 }
 0x4a2   : > { %v3772_v45 = vpop.permute.xlu1 %3771 }
 0x4a3   : > { %v2742_v37 = vpop.permute.xlu0 %2741  ;;  %3848 = vst.msk [vmem:[#allocation2 + $0x138] sm:$0xff] %vm869_vm3, %v3772_v45 }
 0x4a4   : > { %2820 = vst.msk [vmem:[#allocation2 + $0x120] sm:$0xff] %vm2801_vm13, %v2742_v37  ;;  %2556 = vrot.lane.b32.xlu1 %v11071_v28, %s8766_s16  ;;  %v11466_v37 = vld [vmem:[%s8819_s26 + $0x172] sm:$0xff] }
 0x4a5   : > { %1785 = vrot.lane.b32.xlu0 %v11013_v60, %s8761_s10 }
 0x4a6   : > { %v2165_v55 = vpop.permute.xlu1 %2164 }
 0x4a7   : > { %v4539_v3 = vpop.permute.xlu0 %4538  ;;  %2242 = vst.msk [vmem:[#allocation2 + $0x130] sm:$0xff] %vm13272_vm14, %v2165_v55  ;;  %v5135_v42 = vpop.f32.mrf.mxu0  ;;  %vm13275_vm14 = vcmask 261120  }
 0x4a8   : > { %4616 = vst.msk [vmem:[#allocation2 + $0x128] sm:$0xff] %vm13273_vm10, %v4539_v3  ;;  %v5136_v41 = vadd.f32 %v11165_v49, %v5135_v42  ;;  %4354 = vrot.lane.b32.xlu1 %v11357_v31, %s8759_s8  ;;  %vm13276_vm10 = vcmask 786112  }
 0x4a9   : > { %3587 = vrot.lane.b32.xlu0 %v11300_v19, %s8755_s28  ;;  %v5137_v28 = vpop.f32.mrf.mxu0 }
 0x4aa   : > { %v5250_v60 = vmax.f32 %v5136_v41, 0.0  ;;  %v3965_v52 = vpop.permute.xlu1 %3964 }
 0x4ab   : > { %v2935_v10 = vpop.permute.xlu0 %2934  ;;  %4041 = vst.msk [vmem:[#allocation2 + $0x138] sm:$0xff] %vm13196_vm4, %v3965_v52  ;;  %v11484_v52 = vld [vmem:[%s8819_s26 + $0x173] sm:$0xff] }
 0x4ac   : > { %3013 = vst.msk [vmem:[#allocation2 + $0x120] sm:$0xff] %vm13274_vm7, %v2935_v10  ;;  %2749 = vrot.lane.b32.xlu1 %v11087_v53, %s8767_s11  ;;  %vm5705_vm7 = vcmask 254976  }
 0x4ad   : > { %5287 = vst.msk [vmem:[#allocation3 + $0x78] sm:$0xff] %vm13275_vm14, %v5250_v60  ;;  %1978 = vrot.lane.b32.xlu0 %v11030_v30, %s8763_s12 }
 0x4ae   : > { %v2358_v2 = vpop.permute.xlu1 %2357  ;;  %5706 = vst.msk [vmem:[#allocation5 + $0x20] sm:$0x3] %vm5705_vm7, %v8762_v40  ;;  %5707 = vst.msk [vmem:[#allocation5 + $0x30] sm:$0x3] %vm5705_vm7, %v8762_v40 }
 0x4af   : > { %v4731_v32 = vpop.permute.xlu0 %4730  ;;  %2435 = vst.msk [vmem:[#allocation2 + $0x130] sm:$0xff] %vm13276_vm10, %v2358_v2  ;;  %vm13277_vm10 = vcmask 523712  }
 0x4b0   : > { %4808 = vst.msk [vmem:[#allocation2 + $0x128] sm:$0xff] %vm1835_vm8, %v4731_v32  ;;  %4546 = vrot.lane.b32.xlu1 %v11374_v8, %s8760_s9 }
 0x4b1   : > { %3779 = vrot.lane.b32.xlu0 %v11316_v46, %s8756_s29  ;;  %5708 = vst.msk [vmem:[#allocation5 + $0x40] sm:$0x3] %vm5705_vm7, %v8762_v40  ;;  %5709 = vst.msk [vmem:[#allocation5 + $0x50] sm:$0x3] %vm5705_vm7, %v8762_v40 }
 0x4b2   : > { %v3390_v43 = vpop.permute.xlu1 %3389  ;;  %5710 = vst.msk [vmem:[#allocation5 + $0x60] sm:$0x3] %vm5705_vm7, %v8762_v40  ;;  %5711 = vst.msk [vmem:[#allocation5 + $0x70] sm:$0x3] %vm5705_vm7, %v8762_v40 }
 0x4b3   : > { %v3129_v14 = vpop.permute.xlu0 %3128  ;;  %3465 = vst.msk [vmem:[#allocation2 + $0x148] sm:$0xff] %vm483_vm1, %v3390_v43 }
 0x4b4   : > { %v11382_v30 = vld [vmem:[#allocation3 + $0x78] sm:$0xff]  ;;  %3207 = vst.msk [vmem:[#allocation2 + $0x120] sm:$0xff] %vm3188_vm15, %v3129_v14  ;;  %2942 = vrot.lane.b32.xlu1 %v11106_v17, %s8768_s24 }
 0x4b5   : > { %v5346_v58 = vmax.f32 %v5313_v24, %v11382_v30  ;;  %2172 = vrot.lane.b32.xlu0 %v11097_v15, %s8764_s15  ;;  %5712 = vst.msk [vmem:[#allocation5 + $0x80] sm:$0x3] %vm5705_vm7, %v8762_v40  ;;  %5713 = vst.msk [vmem:[#allocation5 + $0x90] sm:$0x3] %vm5705_vm7, %v8762_v40  ;;  %v11503_v24 = vld [vmem:[%s8819_s26 + $0x180] sm:$0xff] }
 0x4b6   : > { %v2551_v48 = vpop.permute.xlu1 %2550  ;;  %5714 = vst.msk [vmem:[#allocation5 + $0x2a] sm:$0x3] %vm5705_vm7, %v8762_v40  ;;  %5715 = vst.msk [vmem:[#allocation5 + $0x3a] sm:$0x3] %vm5705_vm7, %v8762_v40 }
 0x4b7   : > { %v5378_v4 = vmax.f32 %v5346_v58, %v11108_v18  ;;  %v4157_v61 = vpop.permute.xlu0 %4156  ;;  %v4859_v38 = vld [vmem:[#allocation2 + $0x128] sm:$0xff]  ;;  %2628 = vst.msk [vmem:[#allocation2 + $0x130] sm:$0xff] %vm2608_vm12, %v2551_v48 }
 0x4b8   : > { %4233 = vst.msk [vmem:[#allocation2 + $0x138] sm:$0xff] %vm1256_vm5, %v4157_v61  ;;  %8340 = vmatprep.mubr.msk.f32.mxu0 %vm4917_vm11, %v4859_v38  ;;  %4738 = vrot.lane.b32.xlu1 %v11392_v25, %s8761_s10 }
 0x4b9   : > { %5716 = vst.msk [vmem:[#allocation5 + $0x4a] sm:$0x3] %vm5705_vm7, %v8762_v40  ;;  %5717 = vst.msk [vmem:[#allocation5 + $0x5a] sm:$0x3] %vm5705_vm7, %v8762_v40  ;;  %3972 = vrot.lane.b32.xlu0 %v11395_v6, %s8757_s30 }
 0x4ba   : > { %5718 = vst.msk [vmem:[#allocation5 + $0x6a] sm:$0x3] %vm5705_vm7, %v8762_v40  ;;  %5719 = vst.msk [vmem:[#allocation5 + $0x7a] sm:$0x3] %vm5705_vm7, %v8762_v40  ;;  %v4349_v15 = vpop.permute.xlu1 %4348 }
 0x4bb   : > { %5720 = vst.msk [vmem:[#allocation5 + $0x8a] sm:$0x3] %vm5705_vm7, %v8762_v40  ;;  %5721 = vst.msk [vmem:[#allocation5 + $0x9a] sm:$0x3] %vm5705_vm7, %v8762_v40  ;;  %v3582_v18 = vpop.permute.xlu0 %3581  ;;  %v4858_v54 = vld [vmem:[#allocation2 + $0x120] sm:$0xff] }
 0x4bc   : > { %5403 = vst.msk [vmem:[#allocation4 + $0x39] sm:$0xff] %vm13275_vm14, %v5378_v4  ;;  %5169 = vmatmul.mubr.f32.gmra.mxu0 %v4858_v54  ;;  %3136 = vrot.lane.b32.xlu1 %v11183_v11, %s8769_s23  ;;  %vm13278_vm7 = vmmov %vm13275_vm14  ;;  %vm13279_vm14 = vcmask 982912  }
 0x4bd   : > { %4425 = vst.msk [vmem:[#allocation2 + $0x138] sm:$0xff] %vm1449_vm6, %v4349_v15  ;;  %2365 = vrot.lane.b32.xlu0 %v10827_v27, %s8765_s20 }
 0x4be   : > { %3657 = vst.msk [vmem:[#allocation2 + $0x148] sm:$0xff] %vm676_vm2, %v3582_v18  ;;  %v2744_v0 = vpop.permute.xlu1 %2743  ;;  %v11524_v18 = vld [vmem:[%s8819_s26 + $0x1b1] sm:$0xff] }
 0x4bf   : > { %v1973_v26 = vpop.permute.xlu0 %1972  ;;  %2821 = vst.msk [vmem:[#allocation2 + $0x130] sm:$0xff] %vm2801_vm13, %v2744_v0 }
 0x4c0   : > { %2049 = vst.msk [vmem:[#allocation2 + $0x140] sm:$0xff] %vm2028_vm9, %v1973_v26  ;;  %4164 = vrot.lane.b32.xlu1 %v11122_v22, %s8758_s7 }
 0x4c1   : > { %3397 = vrot.lane.b32.xlu0 %v11357_v31, %s8754_s27  ;;  %3283 = vst.msk [vmem:[#allocation2 + $0x1e8] sm:$0xff] %vm290_vm0, %v11524_v18 }
 0x4c2   : > { %v4541_v27 = vpop.permute.xlu1 %4540 }
 0x4c3   : > { %v5418_v20 = vld [vmem:[#allocation4 + $0x30] ss:$2 sm:$0xff]  ;;  %v5434_v50 = vld [vmem:[#allocation4 + $0x31] ss:$2 sm:$0xff]  ;;  %v3774_v7 = vpop.permute.xlu0 %3773  ;;  %4617 = vst.msk [vmem:[#allocation2 + $0x138] sm:$0xff] %vm13277_vm10, %v4541_v27  ;;  %vm13280_vm10 = vcmask 720512  }
 0x4c4   : > { %v5463_v12 = vmax.f32 %v5418_v20, %v5434_v50  ;;  %v5450_v62 = vld [vmem:[#allocation4 + $0x32] ss:$2 sm:$0xff]  ;;  %3849 = vst.msk [vmem:[#allocation2 + $0x148] sm:$0xff] %vm869_vm3, %v3774_v7  ;;  %2558 = vrot.lane.b32.xlu1 %v11138_v29, %s8766_s16  ;;  %v11536_v50 = vld [vmem:[%s8819_s26 + $0x182] sm:$0xff] }
 0x4c5   : > { %1787 = vrot.lane.b32.xlu0 %v11087_v53, %s8761_s10  ;;  %v11552_v7 = vld [vmem:[%s8819_s26 + $0x183] sm:$0xff] }
 0x4c6   : > { %v11455_v5 = vmax.f32 %v5463_v12, %v5450_v62  ;;  %v2937_v55 = vpop.permute.xlu1 %2936 }
 0x4c7   : > { %v2167_v3 = vpop.permute.xlu0 %2166  ;;  %3014 = vst.msk [vmem:[#allocation2 + $0x130] sm:$0xff] %vm13279_vm14, %v2937_v55  ;;  %vm13281_vm14 = vcmask 786112  }
 0x4c8   : > { %v5479_v45 = vmul.f32 %v11455_v5, %v11455_v5  ;;  %2243 = vst.msk [vmem:[#allocation2 + $0x140] sm:$0xff] %vm13280_vm10, %v2167_v3  ;;  %v5140_v42 = vpop.f32.mrf.mxu0  ;;  %4356 = vrot.lane.b32.xlu1 %v11466_v37, %s8759_s8  ;;  %vm13282_vm10 = vcmask 523712  }
 0x4c9   : > { %v5141_v29 = vadd.f32 %v11165_v49, %v5140_v42  ;;  %3589 = vrot.lane.b32.xlu0 %v11374_v8, %s8755_s28 }
 0x4ca   : > { %8597 = vmatprep.mubr.msk.f32.mxu1 %vm13278_vm7, %v5479_v45  ;;  %v5142_v53 = vpop.f32.mrf.mxu0  ;;  %v4733_v28 = vpop.permute.xlu1 %4732 }
 0x4cb   : > { %v5251_v41 = vmax.f32 %v5141_v29, 0.0  ;;  %v3967_v60 = vpop.permute.xlu0 %3966  ;;  %4809 = vst.msk [vmem:[#allocation2 + $0x138] sm:$0xff] %vm1835_vm8, %v4733_v28  ;;  %v11571_v53 = vld [vmem:[%s8819_s26 + $0x188] sm:$0xff] }
 0x4cc   : > { %4042 = vst.msk [vmem:[#allocation2 + $0x148] sm:$0xff] %vm13196_vm4, %v3967_v60  ;;  %2751 = vrot.lane.b32.xlu1 %v11157_v16, %s8767_s11 }
 0x4cd   : > { %5288 = vst.msk [vmem:[#allocation3 + $0x80] sm:$0xff] %vm13278_vm7, %v5251_v41  ;;  %1980 = vrot.lane.b32.xlu0 %v11106_v17, %s8763_s12  ;;  %v11500_v17 = vld [vmem:[%s8819_s26 + $0x174] sm:$0xff]  ;;  %vm13283_vm7 = vcmask 982912  }
 0x4ce   : > { %v3131_v10 = vpop.permute.xlu1 %3130 }
 0x4cf   : > { %v2360_v2 = vpop.permute.xlu0 %2359  ;;  %3208 = vst.msk [vmem:[#allocation2 + $0x130] sm:$0xff] %vm3188_vm15, %v3131_v10 }
 0x4d0   : > { %2436 = vst.msk [vmem:[#allocation2 + $0x140] sm:$0xff] %vm13281_vm14, %v2360_v2  ;;  %4548 = vrot.lane.b32.xlu1 %v11484_v52, %s8760_s9  ;;  %vm13284_vm14 = vcmask 720512  }
 0x4d1   : > { %3781 = vrot.lane.b32.xlu0 %v11392_v25, %s8756_s29 }
 0x4d2   : > { %v4159_v32 = vpop.permute.xlu1 %4158  ;;  %v4861_v14 = vld [vmem:[#allocation2 + $0x138] sm:$0xff] }
 0x4d3   : > { %v3392_v43 = vpop.permute.xlu0 %3391  ;;  %4234 = vst.msk [vmem:[#allocation2 + $0x148] sm:$0xff] %vm1256_vm5, %v4159_v32  ;;  %8341 = vmatprep.mubr.msk.f32.mxu0 %vm4917_vm11, %v4861_v14 }
 0x4d4   : > { %3466 = vst.msk [vmem:[#allocation2 + $0x158] sm:$0xff] %vm483_vm1, %v3392_v43  ;;  %2944 = vrot.lane.b32.xlu1 %v11180_v59, %s8768_s24  ;;  %v11592_v43 = vld [vmem:[%s8819_s26 + $0x1b9] sm:$0xff] }
 0x4d5   : > { %2174 = vrot.lane.b32.xlu0 %v11183_v11, %s8764_s15  ;;  %3284 = vst.msk [vmem:[#allocation2 + $0x1f8] sm:$0xff] %vm290_vm0, %v11592_v43  ;;  %vm13288_vm0 = vcmask 982912  }
 0x4d6   : > { %v2553_v58 = vpop.permute.xlu1 %2552  ;;  %v4860_v48 = vld [vmem:[#allocation2 + $0x130] sm:$0xff] }
 0x4d7   : > { %v1782_v4 = vpop.permute.xlu0 %1781  ;;  %2629 = vst.msk [vmem:[#allocation2 + $0x140] sm:$0xff] %vm2608_vm12, %v2553_v58  ;;  %5174 = vmatmul.mubr.f32.gmra.mxu0 %v4860_v48 }
 0x4d8   : > { %1857 = vst.msk [vmem:[#allocation2 + $0x150] sm:$0xff] %vm1835_vm8, %v1782_v4  ;;  %4740 = vrot.lane.b32.xlu1 %v11500_v17, %s8761_s10 }
 0x4d9   : > { %3974 = vrot.lane.b32.xlu0 %v11503_v24, %s8757_s30 }
 0x4da   : > { %v4351_v11 = vpop.permute.xlu1 %4350 }
 0x4db   : > { %v3584_v61 = vpop.permute.xlu0 %3583  ;;  %4426 = vst.msk [vmem:[#allocation2 + $0x148] sm:$0xff] %vm1449_vm6, %v4351_v11  ;;  %v11604_v11 = vld [vmem:[%s8819_s26 + $0x18a] sm:$0xff] }
 0x4dc   : > { %3658 = vst.msk [vmem:[#allocation2 + $0x158] sm:$0xff] %vm676_vm2, %v3584_v61  ;;  %3138 = vrot.lane.b32.xlu1 %v11251_v51, %s8769_s23 }
 0x4dd   : > { %2367 = vrot.lane.b32.xlu0 %v10908_v13, %s8765_s20 }
 0x4de   : > { %v2746_v38 = vpop.permute.xlu1 %2745 }
 0x4df   : > { %v1975_v15 = vpop.permute.xlu0 %1974  ;;  %2822 = vst.msk [vmem:[#allocation2 + $0x140] sm:$0xff] %vm2801_vm13, %v2746_v38 }
 0x4e0   : > { %2050 = vst.msk [vmem:[#allocation2 + $0x150] sm:$0xff] %vm2028_vm9, %v1975_v15  ;;  %4166 = vrot.lane.b32.xlu1 %v11201_v63, %s8758_s7 }
 0x4e1   : > { %3399 = vrot.lane.b32.xlu0 %v11466_v37, %s8754_s27 }
 0x4e2   : > { %v4543_v54 = vpop.permute.xlu1 %4542 }
 0x4e3   : > { %v3776_v13 = vpop.permute.xlu0 %3775  ;;  %4618 = vst.msk [vmem:[#allocation2 + $0x148] sm:$0xff] %vm13282_vm10, %v4543_v54  ;;  %v5145_v0 = vpop.f32.mrf.mxu0  ;;  %vm13285_vm10 = vcmask 261120   ;;  %v11620_v54 = vld [vmem:[%s8819_s26 + $0x18b] sm:$0xff] }
 0x4e4   : > { %3850 = vst.msk [vmem:[#allocation2 + $0x158] sm:$0xff] %vm869_vm3, %v3776_v13  ;;  %v5146_v26 = vadd.f32 %v11165_v49, %v5145_v0  ;;  %2560 = vrot.lane.b32.xlu1 %v11216_v21, %s8766_s16 }
 0x4e5   : > { %1789 = vrot.lane.b32.xlu0 %v11157_v16, %s8761_s10  ;;  %v5147_v20 = vpop.f32.mrf.mxu0 }
 0x4e6   : > { %v5252_v12 = vmax.f32 %v5146_v26, 0.0  ;;  %v2939_v62 = vpop.permute.xlu1 %2938  ;;  %v5314_v26 = vld [vmem:[#allocation3 + $0x80] sm:$0xff] }
 0x4e7   : > { %v2169_v27 = vpop.permute.xlu0 %2168  ;;  %3015 = vst.msk [vmem:[#allocation2 + $0x140] sm:$0xff] %vm13283_vm7, %v2939_v62  ;;  %vm13286_vm7 = vcmask 786112  }
 0x4e8   : > { %2244 = vst.msk [vmem:[#allocation2 + $0x150] sm:$0xff] %vm13284_vm14, %v2169_v27  ;;  %4358 = vrot.lane.b32.xlu1 %v11536_v50, %s8759_s8  ;;  %vm13287_vm14 = vcmask 523712  }
 0x4e9   : > { %5289 = vst.msk [vmem:[#allocation3 + $0x88] sm:$0xff] %vm13285_vm10, %v5252_v12  ;;  %3591 = vrot.lane.b32.xlu0 %v11484_v52, %s8755_s28  ;;  %vm13289_vm10 = vcmask 720512  }
 0x4ea   : > { %v4735_v16 = vpop.permute.xlu1 %4734 }
 0x4eb   : > { %v3969_v21 = vpop.permute.xlu0 %3968  ;;  %4810 = vst.msk [vmem:[#allocation2 + $0x148] sm:$0xff] %vm1835_vm8, %v4735_v16 }
 0x4ec   : > { %4043 = vst.msk [vmem:[#allocation2 + $0x158] sm:$0xff] %vm13196_vm4, %v3969_v21  ;;  %2753 = vrot.lane.b32.xlu1 %v11232_v34, %s8767_s11 }
 0x4ed   : > { %1982 = vrot.lane.b32.xlu0 %v11180_v59, %s8763_s12  ;;  %v11568_v59 = vld [vmem:[%s8819_s26 + $0x184] sm:$0xff] }
 0x4ee   : > { %v3133_v45 = vpop.permute.xlu1 %3132 }
 0x4ef   : > { %v2362_v55 = vpop.permute.xlu0 %2361  ;;  %3209 = vst.msk [vmem:[#allocation2 + $0x140] sm:$0xff] %vm3188_vm15, %v3133_v45 }
 0x4f0   : > { %2437 = vst.msk [vmem:[#allocation2 + $0x150] sm:$0xff] %vm13286_vm7, %v2362_v55  ;;  %4550 = vrot.lane.b32.xlu1 %v11552_v7, %s8760_s9  ;;  %vm13290_vm7 = vcmask 261120  }
 0x4f1   : > { %3783 = vrot.lane.b32.xlu0 %v11500_v17, %s8756_s29 }
 0x4f2   : > { %v4161_v3 = vpop.permute.xlu1 %4160  ;;  %v4863_v29 = vld [vmem:[#allocation2 + $0x148] sm:$0xff] }
 0x4f3   : > { %v3394_v42 = vpop.permute.xlu0 %3393  ;;  %4235 = vst.msk [vmem:[#allocation2 + $0x158] sm:$0xff] %vm1256_vm5, %v4161_v3  ;;  %8342 = vmatprep.mubr.msk.f32.mxu0 %vm4917_vm11, %v4863_v29 }
 0x4f4   : > { %3467 = vst.msk [vmem:[#allocation2 + $0x168] sm:$0xff] %vm483_vm1, %v3394_v42  ;;  %2946 = vrot.lane.b32.xlu1 %v11248_v39, %s8768_s24  ;;  %v11644_v42 = vld [vmem:[%s8819_s26 + $0x198] sm:$0xff] }
 0x4f5   : > { %2176 = vrot.lane.b32.xlu0 %v11251_v51, %s8764_s15 }
 0x4f6   : > { %v2555_v41 = vpop.permute.xlu1 %2554  ;;  %v4862_v60 = vld [vmem:[#allocation2 + $0x140] sm:$0xff] }
 0x4f7   : > { %v1784_v28 = vpop.permute.xlu0 %1783  ;;  %2630 = vst.msk [vmem:[#allocation2 + $0x150] sm:$0xff] %vm2608_vm12, %v2555_v41  ;;  %5179 = vmatmul.mubr.f32.gmra.mxu0 %v4862_v60 }
 0x4f8   : > { %1858 = vst.msk [vmem:[#allocation2 + $0x160] sm:$0xff] %vm1835_vm8, %v1784_v28  ;;  %4742 = vrot.lane.b32.xlu1 %v11568_v59, %s8761_s10 }
 0x4f9   : > { %3976 = vrot.lane.b32.xlu0 %v11571_v53, %s8757_s30 }
 0x4fa   : > { %v4353_v51 = vpop.permute.xlu1 %4352 }
 0x4fb   : > { %v3586_v10 = vpop.permute.xlu0 %3585  ;;  %4427 = vst.msk [vmem:[#allocation2 + $0x158] sm:$0xff] %vm1449_vm6, %v4353_v51 }
 0x4fc   : > { %3659 = vst.msk [vmem:[#allocation2 + $0x168] sm:$0xff] %vm676_vm2, %v3586_v10  ;;  %3140 = vrot.lane.b32.xlu1 %v11319_v9, %s8769_s23 }
 0x4fd   : > { %2369 = vrot.lane.b32.xlu0 %v10976_v44, %s8765_s20 }
 0x4fe   : > { %v2748_v2 = vpop.permute.xlu1 %2747 }
 0x4ff   : > { %v1977_v32 = vpop.permute.xlu0 %1976  ;;  %2823 = vst.msk [vmem:[#allocation2 + $0x150] sm:$0xff] %vm2801_vm13, %v2748_v2 }
 0x500   : > { %2051 = vst.msk [vmem:[#allocation2 + $0x160] sm:$0xff] %vm2028_vm9, %v1977_v32  ;;  %4168 = vrot.lane.b32.xlu1 %v11269_v23, %s8758_s7 }
 0x501   : > { %3401 = vrot.lane.b32.xlu0 %v11536_v50, %s8754_s27 }
 0x502   : > { %v4545_v14 = vpop.permute.xlu1 %4544 }
 0x503   : > { %v3778_v44 = vpop.permute.xlu0 %3777  ;;  %4619 = vst.msk [vmem:[#allocation2 + $0x158] sm:$0xff] %vm13287_vm14, %v4545_v14  ;;  %vm13291_vm14 = vcmask 786112  }
 0x504   : > { %3851 = vst.msk [vmem:[#allocation2 + $0x168] sm:$0xff] %vm869_vm3, %v3778_v44  ;;  %v5150_v58 = vpop.f32.mrf.mxu0  ;;  %2562 = vrot.lane.b32.xlu1 %v11284_v56, %s8766_s16 }
 0x505   : > { %v5151_v4 = vadd.f32 %v11165_v49, %v5150_v58  ;;  %1791 = vrot.lane.b32.xlu0 %v11232_v34, %s8761_s10 }
 0x506   : > { %v5152_v48 = vpop.f32.mrf.mxu0  ;;  %v2941_v38 = vpop.permute.xlu1 %2940 }
 0x507   : > { %v5253_v61 = vmax.f32 %v5151_v4, 0.0  ;;  %v2171_v15 = vpop.permute.xlu0 %2170  ;;  %3016 = vst.msk [vmem:[#allocation2 + $0x150] sm:$0xff] %vm13288_vm0, %v2941_v38  ;;  %vm13292_vm0 = vmmov %vm13290_vm7 }
 0x508   : > { %2245 = vst.msk [vmem:[#allocation2 + $0x160] sm:$0xff] %vm13289_vm10, %v2171_v15  ;;  %4360 = vrot.lane.b32.xlu1 %v11604_v11, %s8759_s8  ;;  %vm13293_vm10 = vcmask 523712  }
 0x509   : > { %5290 = vst.msk [vmem:[#allocation3 + $0x90] sm:$0xff] %vm13290_vm7, %v5253_v61  ;;  %3593 = vrot.lane.b32.xlu0 %v11552_v7, %s8755_s28  ;;  %vm13294_vm7 = vmmov %vm13292_vm0 }
 0x50a   : > { %v4737_v34 = vpop.permute.xlu1 %4736 }
 0x50b   : > { %v3971_v56 = vpop.permute.xlu0 %3970  ;;  %4811 = vst.msk [vmem:[#allocation2 + $0x158] sm:$0xff] %vm1835_vm8, %v4737_v34  ;;  %v5315_v34 = vld [vmem:[#allocation3 + $0x88] sm:$0xff] }
 0x50c   : > { %4044 = vst.msk [vmem:[#allocation2 + $0x168] sm:$0xff] %vm13196_vm4, %v3971_v56  ;;  %2755 = vrot.lane.b32.xlu1 %v11300_v19, %s8767_s11 }
 0x50d   : > { %1984 = vrot.lane.b32.xlu0 %v11248_v39, %s8763_s12 }
 0x50e   : > { %v3135_v13 = vpop.permute.xlu1 %3134 }
 0x50f   : > { %v2364_v0 = vpop.permute.xlu0 %2363  ;;  %3210 = vst.msk [vmem:[#allocation2 + $0x150] sm:$0xff] %vm3188_vm15, %v3135_v13  ;;  %v8596_v12 = vpop.f32.mrf.mxu1 }
 0x510   : > { %v11622_v20 = vld [vmem:[#allocation3 + $0x90] sm:$0xff]  ;;  %2438 = vst.msk [vmem:[#allocation2 + $0x160] sm:$0xff] %vm13291_vm14, %v2364_v0  ;;  %v5581_v27 = vadd.f32 1.0, %v8596_v12  ;;  %4552 = vrot.lane.b32.xlu1 %v11620_v54, %s8760_s9  ;;  %vm13295_vm14 = vcmask 982912   ;;  %v11691_v0 = vld [vmem:[%s8819_s26 + $0x19b] sm:$0xff] }
 0x511   : > { %v5347_v62 = vmax.f32 %v5314_v26, %v11622_v20  ;;  %3785 = vrot.lane.b32.xlu0 %v11568_v59, %s8756_s29  ;;  %v5575_v39 = vpop.f32.mrf.mxu1 }
 0x512   : > { %8671 = vrsqrt.f32 %v5581_v27  ;;  %v5576_v21 = vadd.f32 1.0, %v5575_v39  ;;  %v4163_v45 = vpop.permute.xlu1 %4162  ;;  %v4865_v3 = vld [vmem:[#allocation2 + $0x158] sm:$0xff] }
 0x513   : > { %v5379_v16 = vmax.f32 %v5347_v62, %v11321_v35  ;;  %v3396_v55 = vpop.permute.xlu0 %3395  ;;  %4236 = vst.msk [vmem:[#allocation2 + $0x168] sm:$0xff] %vm1256_vm5, %v4163_v45  ;;  %8343 = vmatprep.mubr.msk.f32.mxu0 %vm4917_vm11, %v4865_v3  ;;  %v11641_v35 = vld [vmem:[%s8819_s26 + $0x18c] sm:$0xff] }
 0x514   : > { %3468 = vst.msk [vmem:[#allocation2 + $0x178] sm:$0xff] %vm483_vm1, %v3396_v55  ;;  %8673 = vrsqrt.f32 %v5576_v21  ;;  %2948 = vrot.lane.b32.xlu1 %v11316_v46, %s8768_s24 }
 0x515   : > { %5404 = vst.msk [vmem:[#allocation4 + $0x49] sm:$0xff] %vm13292_vm0, %v5379_v16  ;;  %2178 = vrot.lane.b32.xlu0 %v11319_v9, %s8764_s15  ;;  %vm13296_vm0 = vcmask 720512  }
 0x516   : > { %v2557_v29 = vpop.permute.xlu1 %2556  ;;  %v4864_v28 = vld [vmem:[#allocation2 + $0x150] sm:$0xff] }
 0x517   : > { %v1786_v41 = vpop.permute.xlu0 %1785  ;;  %2631 = vst.msk [vmem:[#allocation2 + $0x160] sm:$0xff] %vm2608_vm12, %v2557_v29  ;;  %5184 = vmatmul.mubr.f32.gmra.mxu0 %v4864_v28 }
 0x518   : > { %1859 = vst.msk [vmem:[#allocation2 + $0x170] sm:$0xff] %vm1835_vm8, %v1786_v41  ;;  %4744 = vrot.lane.b32.xlu1 %v11641_v35, %s8761_s10 }
 0x519   : > { %3978 = vrot.lane.b32.xlu0 %v11644_v42, %s8757_s30 }
 0x51a   : > { %v4355_v60 = vpop.permute.xlu1 %4354 }
 0x51b   : > { %v3588_v9 = vpop.permute.xlu0 %3587  ;;  %4428 = vst.msk [vmem:[#allocation2 + $0x168] sm:$0xff] %vm1449_vm6, %v4355_v60 }
 0x51c   : > { %3660 = vst.msk [vmem:[#allocation2 + $0x178] sm:$0xff] %vm676_vm2, %v3588_v9  ;;  %3142 = vrot.lane.b32.xlu1 %v11395_v6, %s8769_s23 }
 0x51d   : > { %2371 = vrot.lane.b32.xlu0 %v11047_v33, %s8765_s20 }
 0x51e   : > { %v2750_v51 = vpop.permute.xlu1 %2749 }
 0x51f   : > { %v1979_v10 = vpop.permute.xlu0 %1978  ;;  %v8672_v2 = vpop.eup %8671  ;;  %2824 = vst.msk [vmem:[#allocation2 + $0x160] sm:$0xff] %vm2801_vm13, %v2750_v51 }
 0x520   : > { %2052 = vst.msk [vmem:[#allocation2 + $0x170] sm:$0xff] %vm2028_vm9, %v1979_v10  ;;  %v5155_v32 = vpop.f32.mrf.mxu0  ;;  %4170 = vrot.lane.b32.xlu1 %v11346_v57, %s8758_s7  ;;  %8675 = vrsqrt.f32 %v8672_v2  ;;  %v5634_v16 = vand.u32 2147483648, %v8672_v2  ;;  %v11710_v10 = vld [vmem:[%s8819_s26 + $0x19c] sm:$0xff] }
 0x521   : > { %v5156_v14 = vadd.f32 %v11165_v49, %v5155_v32  ;;  %3403 = vrot.lane.b32.xlu0 %v11604_v11, %s8754_s27  ;;  %v8674_v44 = vpop.eup %8673  ;;  %v11673_v49 = vld [vmem:[%s8819_s26 + $0x19a] sm:$0xff] }
 0x522   : > { %v5157_v33 = vpop.f32.mrf.mxu0  ;;  %v4547_v4 = vpop.permute.xlu1 %4546  ;;  %8677 = vrsqrt.f32 %v8674_v44  ;;  %v5627_v21 = vand.u32 2147483648, %v8674_v44  ;;  %v11713_v32 = vld [vmem:[%s8819_s26 + $0x1a0] sm:$0xff] }
 0x523   : > { %v5254_v58 = vmax.f32 %v5156_v14, 0.0  ;;  %v3780_v48 = vpop.permute.xlu0 %3779  ;;  %4620 = vst.msk [vmem:[#allocation2 + $0x168] sm:$0xff] %vm13293_vm10, %v4547_v4  ;;  %vm13297_vm10 = vcmask 786112  }
 0x524   : > { %3852 = vst.msk [vmem:[#allocation2 + $0x178] sm:$0xff] %vm869_vm3, %v3780_v48  ;;  %2564 = vrot.lane.b32.xlu1 %v11357_v31, %s8766_s16 }
 0x525   : > { %5291 = vst.msk [vmem:[#allocation3 + $0x98] sm:$0xff] %vm13294_vm7, %v5254_v58  ;;  %1793 = vrot.lane.b32.xlu0 %v11300_v19, %s8761_s10  ;;  %vm5631_vm7 = vcmp.eq.f32.partialorder %v8672_v2, inf }
 0x526   : > { %v2943_v61 = vpop.permute.xlu1 %2942 }
 0x527   : > { %v2173_v38 = vpop.permute.xlu0 %2172  ;;  %3017 = vst.msk [vmem:[#allocation2 + $0x160] sm:$0xff] %vm13295_vm14, %v2943_v61  ;;  %vm13298_vm14 = vcmask 261120  }
 0x528   : > { %2246 = vst.msk [vmem:[#allocation2 + $0x170] sm:$0xff] %vm13296_vm0, %v2173_v38  ;;  %4362 = vrot.lane.b32.xlu1 %v11673_v49, %s8759_s8  ;;  %vm5633_vm0 = vcmp.eq.f32.partialorder %v8672_v2, 0.0 }
 0x529   : > { %3595 = vrot.lane.b32.xlu0 %v11620_v54, %s8755_s28 }
 0x52a   : > { %v4739_v15 = vpop.permute.xlu1 %4738 }
 0x52b   : > { %v3973_v31 = vpop.permute.xlu0 %3972  ;;  %4812 = vst.msk [vmem:[#allocation2 + $0x168] sm:$0xff] %vm1835_vm8, %v4739_v15 }
 0x52c   : > { %v11681_v56 = vld [vmem:[#allocation3 + $0x98] sm:$0xff]  ;;  %4045 = vst.msk [vmem:[#allocation2 + $0x178] sm:$0xff] %vm13196_vm4, %v3973_v31  ;;  %2757 = vrot.lane.b32.xlu1 %v11374_v8, %s8767_s11  ;;  %vm5624_vm4 = vcmp.eq.f32.partialorder %v8674_v44, inf }
 0x52d   : > { %v5348_v19 = vmax.f32 %v5315_v34, %v11681_v56  ;;  %1986 = vrot.lane.b32.xlu0 %v11316_v46, %s8763_s12  ;;  %v8676_v13 = vpop.eup %8675 }
 0x52e   : > { %v3137_v12 = vpop.permute.xlu1 %3136  ;;  %v5630_v27 = vmul.f32 %v8676_v13, %v8672_v2 }
 0x52f   : > { %v5380_v26 = vmax.f32 %v5348_v19, %v11382_v30  ;;  %v2366_v62 = vpop.permute.xlu0 %2365  ;;  %v8678_v39 = vpop.eup %8677  ;;  %3211 = vst.msk [vmem:[#allocation2 + $0x160] sm:$0xff] %vm3188_vm15, %v3137_v12  ;;  %v11754_v12 = vld [vmem:[%s13186_s2] ss:$0 sm:$0xff] }
 0x530   : > { %2439 = vst.msk [vmem:[#allocation2 + $0x170] sm:$0xff] %vm13297_vm10, %v2366_v62  ;;  %4554 = vrot.lane.b32.xlu1 %v11691_v0, %s8760_s9  ;;  %v5623_v46 = vmul.f32 %v8678_v39, %v8674_v44  ;;  %v5632_v30 = vsel %vm5631_vm7, %v8672_v2, %v5630_v27  ;;  %vm5626_vm10 = vcmp.eq.f32.partialorder %v8674_v44, 0.0 }
 0x531   : > { %5405 = vst.msk [vmem:[#allocation4 + $0x51] sm:$0xff] %vm13298_vm14, %v5380_v26  ;;  %3787 = vrot.lane.b32.xlu0 %v11641_v35, %s8756_s29  ;;  %v5635_v45 = vsel %vm5633_vm0, %v5634_v16, %v5632_v30 }
 0x532   : > { %v4165_v55 = vpop.permute.xlu1 %4164  ;;  %v4867_v29 = vld [vmem:[#allocation2 + $0x168] sm:$0xff]  ;;  %v5625_v41 = vsel %vm5624_vm4, %v8674_v44, %v5623_v46  ;;  %v5679_v28 = vmul.f32 %v8672_v2, %v5635_v45  ;;  %vm13299_vm4 = vmmov %vm13298_vm14 }
 0x533   : > { %v3398_v3 = vpop.permute.xlu0 %3397  ;;  %4237 = vst.msk [vmem:[#allocation2 + $0x178] sm:$0xff] %vm1256_vm5, %v4165_v55  ;;  %8344 = vmatprep.mubr.msk.f32.mxu0 %vm4917_vm11, %v4867_v29  ;;  %v5628_v60 = vsel %vm5626_vm10, %v5627_v21, %v5625_v41  ;;  %vm13300_vm7 = vmmov %vm13299_vm4  ;;  %v11785_v29 = vld [vmem:[%s8819_s26 + $0x1a2] sm:$0xff] }
 0x534   : > { %3469 = vst.msk [vmem:[#allocation2 + $0x188] sm:$0xff] %vm483_vm1, %v3398_v3  ;;  %2950 = vrot.lane.b32.xlu1 %v11392_v25, %s8768_s24  ;;  %v5678_v9 = vmul.f32 %v8674_v44, %v5628_v60  ;;  %v5687_v51 = vmul.f32 %v5679_v28, %v11146_v47  ;;  %vm13301_vm14 = vmmov %vm13299_vm4  ;;  %v11808_v60 = vld [vmem:[%s8819_s26 + $0x1a3] sm:$0xff] }
 0x535   : > { %2180 = vrot.lane.b32.xlu0 %v11395_v6, %s8764_s15  ;;  %vm13302_vm0 = vmmov %vm13299_vm4 }
 0x536   : > { %v2559_v2 = vpop.permute.xlu1 %2558  ;;  %v4866_v33 = vld [vmem:[#allocation2 + $0x160] sm:$0xff]  ;;  %v5686_v58 = vmul.f32 %v5678_v9, %v10871_v36  ;;  %5723 = vst.msk [vmem:[#allocation5 + $0x32] sm:$0xff] %vm13299_vm4, %v5687_v51  ;;  %vm13303_vm10 = vmmov %vm13302_vm0 }
 0x537   : > { %v1788_v14 = vpop.permute.xlu0 %1787  ;;  %2632 = vst.msk [vmem:[#allocation2 + $0x170] sm:$0xff] %vm2608_vm12, %v2559_v2  ;;  %5189 = vmatmul.mubr.f32.gmra.mxu0 %v4866_v33  ;;  %vm13304_vm4 = vmmov %vm13302_vm0  ;;  %v11828_v33 = vld [vmem:[%s8819_s26 + $0x1a4] sm:$0xff] }
 0x538   : > { %1860 = vst.msk [vmem:[#allocation2 + $0x180] sm:$0xff] %vm1835_vm8, %v1788_v14  ;;  %v5420_v6 = vld [vmem:[#allocation4 + $0x48] ss:$2 sm:$0xff]  ;;  %v5436_v44 = vld [vmem:[#allocation4 + $0x49] ss:$2 sm:$0xff]  ;;  %4746 = vrot.lane.b32.xlu1 %v11710_v10, %s8761_s10 }
 0x539   : > { %3980 = vrot.lane.b32.xlu0 %v11713_v32, %s8757_s30  ;;  %v5464_v47 = vmax.f32 %v5420_v6, %v5436_v44  ;;  %5722 = vst.msk [vmem:[#allocation5 + $0x22] sm:$0xff] %vm13300_vm7, %v5686_v58  ;;  %v5452_v4 = vld [vmem:[#allocation4 + $0x4a] ss:$2 sm:$0xff]  ;;  %vm13305_vm7 = vmmov %vm13302_vm0 }
 0x53a   : > { %v4357_v36 = vpop.permute.xlu1 %4356  ;;  %v11831_v58 = vld [vmem:[%s8819_s26 + $0x1b0] sm:$0xff] }
 0x53b   : > { %v3590_v48 = vpop.permute.xlu0 %3589  ;;  %v11724_v61 = vmax.f32 %v5464_v47, %v5452_v4  ;;  %4429 = vst.msk [vmem:[#allocation2 + $0x178] sm:$0xff] %vm1449_vm6, %v4357_v36 }
 0x53c   : > { %3661 = vst.msk [vmem:[#allocation2 + $0x188] sm:$0xff] %vm676_vm2, %v3590_v48  ;;  %3144 = vrot.lane.b32.xlu1 %v11503_v24, %s8769_s23 }
 0x53d   : > { %2373 = vrot.lane.b32.xlu0 %v11122_v22, %s8765_s20  ;;  %v5480_v38 = vmul.f32 %v11724_v61, %v11724_v61  ;;  %v11734_v15 = vld [vmem:[#allocation5 + $0x30] sm:$0xff] }
 0x53e   : > { %v2752_v31 = vpop.permute.xlu1 %2751  ;;  %5741 = vst.msk [vmem:[#allocation6 + $0xa8] sm:$0xff] %vm13302_vm0, %v11734_v15  ;;  %v11739_v19 = vld [vmem:[#allocation5 + $0x34] sm:$0xff] }
 0x53f   : > { %v1981_v34 = vpop.permute.xlu0 %1980  ;;  %8598 = vmatmul.mubr.msk.f32.gmra.mxu1 %vm13301_vm14, %v5480_v38  ;;  %v11741_v13 = vld [vmem:[#allocation5 + $0x33] sm:$0xff]  ;;  %2825 = vst.msk [vmem:[#allocation2 + $0x170] sm:$0xff] %vm2801_vm13, %v2752_v31  ;;  %vm13306_vm14 = vmmov %vm13302_vm0 }
 0x540   : > { %2053 = vst.msk [vmem:[#allocation2 + $0x180] sm:$0xff] %vm2028_vm9, %v1981_v34  ;;  %v5160_v22 = vpop.f32.mrf.mxu0  ;;  %v11745_v26 = vld [vmem:[#allocation5 + $0x20] sm:$0xff]  ;;  %4172 = vrot.lane.b32.xlu1 %v11451_v1, %s8758_s7  ;;  %v11771_v45 = vld [vmem:[#allocation5 + $0x32] sm:$0xff] }
 0x541   : > { %5904 = vst.msk [vmem:[#allocation6 + $0xb0] sm:$0xff] %vm13303_vm10, %v11739_v19  ;;  %v5161_v62 = vadd.f32 %v11754_v12, %v5160_v22  ;;  %3405 = vrot.lane.b32.xlu0 %v11673_v49, %s8754_s27  ;;  %v11761_v27 = vld [vmem:[#allocation5 + $0x24] sm:$0xff]  ;;  %vm13307_vm10 = vcmask 523712   ;;  %v6375_v3 = vld [vmem:[#allocation5 + $0x31] sm:$0xff] }
 0x542   : > { %6064 = vst.msk [vmem:[#allocation6 + $0x80] sm:$0xff] %vm13304_vm4, %v11741_v13  ;;  %v5162_v39 = vpop.f32.mrf.mxu0  ;;  %v11767_v16 = vld [vmem:[#allocation5 + $0x23] sm:$0xff]  ;;  %v4549_v30 = vpop.permute.xlu1 %4548  ;;  %vm13308_vm4 = vmmov %vm13302_vm0 }
 0x543   : > { %5740 = vst.msk [vmem:[#allocation6 + $0x70] sm:$0xff] %vm13305_vm7, %v11745_v26  ;;  %v5255_v46 = vmax.f32 %v5161_v62, 0.0  ;;  %v3782_v21 = vpop.permute.xlu0 %3781  ;;  %v6214_v55 = vld [vmem:[#allocation5 + $0x22] sm:$0xff]  ;;  %vm13309_vm7 = vmmov %vm13302_vm0 }
 0x544   : > { %5903 = vst.msk [vmem:[#allocation6 + $0x78] sm:$0xff] %vm13306_vm14, %v11761_v27  ;;  %vm13310_vm14 = vmmov %vm13302_vm0  ;;  %2566 = vrot.lane.b32.xlu1 %v11466_v37, %s8766_s16 }
 0x545   : > { %6063 = vst.msk [vmem:[#allocation6 + $0x48] sm:$0xff] %vm13302_vm0, %v11767_v16  ;;  %1795 = vrot.lane.b32.xlu0 %v11374_v8, %s8761_s10  ;;  %6383 = vst.msk [vmem:[#allocation6 + $0x20] sm:$0xff] %vm13302_vm0, %v6375_v3  ;;  %vm13314_vm0 = vcmask 786112  }
 0x546   : > { %4621 = vst.msk [vmem:[#allocation2 + $0x178] sm:$0xff] %vm13307_vm10, %v4549_v30  ;;  %v2945_v41 = vpop.permute.xlu1 %2944  ;;  %vm13311_vm10 = vcmask 982912  }
 0x547   : > { %3853 = vst.msk [vmem:[#allocation2 + $0x188] sm:$0xff] %vm869_vm3, %v3782_v21  ;;  %v2175_v28 = vpop.permute.xlu0 %2174 }
 0x548   : > { %6222 = vst.msk [vmem:[#allocation6 + $0x18] sm:$0xff] %vm13308_vm4, %v6214_v55  ;;  %vm13312_vm4 = vcmask 720512   ;;  %4364 = vrot.lane.b32.xlu1 %v11785_v29, %s8759_s8 }
 0x549   : > { %6223 = vst.msk [vmem:[#allocation6 + $0x50] sm:$0xff] %vm13309_vm7, %v11771_v45  ;;  %3597 = vrot.lane.b32.xlu0 %v11691_v0, %s8755_s28  ;;  %vm13197_vm7 = vcmask 257024  }
 0x54a   : > { %5292 = vst.msk [vmem:[#allocation3 + $0xa0] sm:$0xff] %vm13310_vm14, %v5255_v46  ;;  %v4741_v8 = vpop.permute.xlu1 %4740  ;;  %vm13313_vm14 = vcmask 326912  }
 0x54b   : > { %3018 = vst.msk [vmem:[#allocation2 + $0x170] sm:$0xff] %vm13311_vm10, %v2945_v41  ;;  %v3975_v37 = vpop.permute.xlu0 %3974  ;;  %vm13315_vm10 = vcmask 261120  }
 0x54c   : > { %2247 = vst.msk [vmem:[#allocation2 + $0x180] sm:$0xff] %vm13312_vm4, %v2175_v28  ;;  %2759 = vrot.lane.b32.xlu1 %v11484_v52, %s8767_s11  ;;  %vm13316_vm4 = vmmov %vm13315_vm10 }
 0x54d   : > { %5696 = vst.msk [vmem:[#allocation5 + $0x8] sm:$0xf] %vm13197_vm7, %v8762_v40  ;;  %5698 = vst.msk [vmem:[#allocation5 + $0x18] sm:$0xf] %vm13197_vm7, %v8762_v40  ;;  %1988 = vrot.lane.b32.xlu0 %v11392_v25, %s8763_s12 }
 0x54e   : > { %5701 = vst.msk [vmem:[#allocation5 + $0xa8] sm:$0xf] %vm13197_vm7, %v8762_v40  ;;  %5703 = vst.msk [vmem:[#allocation5 + $0xb8] sm:$0xf] %vm13197_vm7, %v8762_v40  ;;  %v3139_v9 = vpop.permute.xlu1 %3138  ;;  %v11816_v40 = vld [vmem:[#allocation5 + $0x10] sm:$0xff]  ;;  %vm13340_vm7 = vcmask 720512  }
 0x54f   : > { %4813 = vst.msk [vmem:[#allocation2 + $0x178] sm:$0xff] %vm1835_vm8, %v4741_v8  ;;  %v2368_v51 = vpop.permute.xlu0 %2367  ;;  %v11886_v8 = vld [vmem:[%s8819_s26 + $0x1b8] sm:$0xff] }
 0x550   : > { %4046 = vst.msk [vmem:[#allocation2 + $0x188] sm:$0xff] %vm13313_vm14, %v3975_v37  ;;  %4556 = vrot.lane.b32.xlu1 %v11808_v60, %s8760_s9  ;;  %vm13317_vm14 = vcmask 523712  }
 0x551   : > { %3212 = vst.msk [vmem:[#allocation2 + $0x170] sm:$0xff] %vm3188_vm15, %v3139_v9  ;;  %3789 = vrot.lane.b32.xlu0 %v11710_v10, %s8756_s29 }
 0x552   : > { %2440 = vst.msk [vmem:[#allocation2 + $0x180] sm:$0xff] %vm13314_vm0, %v2368_v51  ;;  %v4167_v25 = vpop.permute.xlu1 %4166  ;;  %vm13318_vm0 = vcmask 982912  }
 0x553   : > { %5739 = vst.msk [vmem:[#allocation6 + $0x38] sm:$0xff] %vm13315_vm10, %v11816_v40  ;;  %v3400_v2 = vpop.permute.xlu0 %3399  ;;  %vm13319_vm10 = vcmask 720512  }
 0x554   : > { %4238 = vst.msk [vmem:[#allocation2 + $0x188] sm:$0xff] %vm1256_vm5, %v4167_v25  ;;  %2952 = vrot.lane.b32.xlu1 %v11500_v17, %s8768_s24 }
 0x555   : > { %3470 = vst.msk [vmem:[#allocation2 + $0x198] sm:$0xff] %vm483_vm1, %v3400_v2  ;;  %2182 = vrot.lane.b32.xlu0 %v11503_v24, %s8764_s15 }
 0x556   : > { %v4869_v14 = vld [vmem:[#allocation2 + $0x178] sm:$0xff]  ;;  %v2561_v6 = vpop.permute.xlu1 %2560 }
 0x557   : > { %8345 = vmatprep.mubr.msk.f32.mxu0 %vm4917_vm11, %v4869_v14  ;;  %v1790_v44 = vpop.permute.xlu0 %1789  ;;  %2633 = vst.msk [vmem:[#allocation2 + $0x180] sm:$0xff] %vm2608_vm12, %v2561_v6 }
 0x558   : > { %v4868_v47 = vld [vmem:[#allocation2 + $0x170] sm:$0xff]  ;;  %1861 = vst.msk [vmem:[#allocation2 + $0x190] sm:$0xff] %vm1835_vm8, %v1790_v44  ;;  %4748 = vrot.lane.b32.xlu1 %v11828_v33, %s8761_s10 }
 0x559   : > { %5194 = vmatmul.mubr.f32.gmra.mxu0 %v4868_v47  ;;  %3982 = vrot.lane.b32.xlu0 %v11831_v58, %s8757_s30 }
 0x55a   : > { %v4359_v4 = vpop.permute.xlu1 %4358 }
 0x55b   : > { %v3592_v24 = vpop.permute.xlu0 %3591  ;;  %4430 = vst.msk [vmem:[#allocation2 + $0x188] sm:$0xff] %vm1449_vm6, %v4359_v4  ;;  %v5165_v36 = vpop.f32.mrf.mxu0 }
 0x55c   : > { %3662 = vst.msk [vmem:[#allocation2 + $0x198] sm:$0xff] %vm676_vm2, %v3592_v24  ;;  %v5166_v48 = vadd.f32 %v11754_v12, %v5165_v36  ;;  %3146 = vrot.lane.b32.xlu1 %v11571_v53, %s8769_s23 }
 0x55d   : > { %2375 = vrot.lane.b32.xlu0 %v11201_v63, %s8765_s20  ;;  %v5167_v38 = vpop.f32.mrf.mxu0  ;;  %v8253_v63 = vld [vmem:[%s8819_s26 + $0x1b2] sm:$0xff] }
 0x55e   : > { %v5256_v31 = vmax.f32 %v5166_v48, 0.0  ;;  %v2754_v34 = vpop.permute.xlu1 %2753 }
 0x55f   : > { %v1983_v22 = vpop.permute.xlu0 %1982  ;;  %2826 = vst.msk [vmem:[#allocation2 + $0x180] sm:$0xff] %vm2801_vm13, %v2754_v34 }
 0x560   : > { %2054 = vst.msk [vmem:[#allocation2 + $0x190] sm:$0xff] %vm2028_vm9, %v1983_v22  ;;  %4174 = vrot.lane.b32.xlu1 %v11524_v18, %s8758_s7 }
 0x561   : > { %5293 = vst.msk [vmem:[#allocation3 + $0xa8] sm:$0xff] %vm13316_vm4, %v5256_v31  ;;  %3407 = vrot.lane.b32.xlu0 %v11785_v29, %s8754_s27  ;;  %vm13320_vm4 = vcmask 326912   ;;  %v5316_v31 = vld [vmem:[#allocation3 + $0xa0] sm:$0xff] }
 0x562   : > { %v4551_v62 = vpop.permute.xlu1 %4550 }
 0x563   : > { %v3784_v39 = vpop.permute.xlu0 %3783  ;;  %4622 = vst.msk [vmem:[#allocation2 + $0x188] sm:$0xff] %vm13317_vm14, %v4551_v62  ;;  %vm13321_vm14 = vcmask 786112   ;;  %v8286_v62 = vld [vmem:[%s8819_s26 + $0x1bb] sm:$0xff] }
 0x564   : > { %3854 = vst.msk [vmem:[#allocation2 + $0x198] sm:$0xff] %vm869_vm3, %v3784_v39  ;;  %2568 = vrot.lane.b32.xlu1 %v11536_v50, %s8766_s16 }
 0x565   : > { %1797 = vrot.lane.b32.xlu0 %v11484_v52, %s8761_s10  ;;  %v8285_v52 = vld [vmem:[%s8819_s26 + $0x1b3] sm:$0xff] }
 0x566   : > { %v2947_v46 = vpop.permute.xlu1 %2946 }
 0x567   : > { %v2177_v30 = vpop.permute.xlu0 %2176  ;;  %3019 = vst.msk [vmem:[#allocation2 + $0x180] sm:$0xff] %vm13318_vm0, %v2947_v46  ;;  %vm13322_vm0 = vcmask 261120  }
 0x568   : > { %2248 = vst.msk [vmem:[#allocation2 + $0x190] sm:$0xff] %vm13319_vm10, %v2177_v30  ;;  %4366 = vrot.lane.b32.xlu1 %v8253_v63, %s8759_s8  ;;  %vm13323_vm10 = vcmask 523712  }
 0x569   : > { %3599 = vrot.lane.b32.xlu0 %v11808_v60, %s8755_s28 }
 0x56a   : > { %v4743_v18 = vpop.permute.xlu1 %4742 }
 0x56b   : > { %v3977_v21 = vpop.permute.xlu0 %3976  ;;  %4814 = vst.msk [vmem:[#allocation2 + $0x188] sm:$0xff] %vm1835_vm8, %v4743_v18  ;;  %v8191_v18 = vld [vmem:[%s8819_s26 + $0x1c8] sm:$0xff] }
 0x56c   : > { %4047 = vst.msk [vmem:[#allocation2 + $0x198] sm:$0xff] %vm13320_vm4, %v3977_v21  ;;  %2761 = vrot.lane.b32.xlu1 %v11552_v7, %s8767_s11  ;;  %vm13324_vm4 = vcmask 982912  }
 0x56d   : > { %1990 = vrot.lane.b32.xlu0 %v11500_v17, %s8763_s12  ;;  %v8317_v17 = vld [vmem:[%s8819_s26 + $0x1b4] sm:$0xff] }
 0x56e   : > { %v3141_v50 = vpop.permute.xlu1 %3140 }
 0x56f   : > { %v2370_v55 = vpop.permute.xlu0 %2369  ;;  %3213 = vst.msk [vmem:[#allocation2 + $0x180] sm:$0xff] %vm3188_vm15, %v3141_v50 }
 0x570   : > { %2441 = vst.msk [vmem:[#allocation2 + $0x190] sm:$0xff] %vm13321_vm14, %v2370_v55  ;;  %4558 = vrot.lane.b32.xlu1 %v8285_v52, %s8760_s9  ;;  %vm13325_vm14 = vcmask 720512  }
 0x571   : > { %3791 = vrot.lane.b32.xlu0 %v11828_v33, %s8756_s29 }
 0x572   : > { %v4169_v3 = vpop.permute.xlu1 %4168  ;;  %v4871_v28 = vld [vmem:[#allocation2 + $0x188] sm:$0xff] }
 0x573   : > { %v3402_v41 = vpop.permute.xlu0 %3401  ;;  %4239 = vst.msk [vmem:[#allocation2 + $0x198] sm:$0xff] %vm1256_vm5, %v4169_v3  ;;  %8346 = vmatprep.mubr.msk.f32.mxu0 %vm4917_vm11, %v4871_v28 }
 0x574   : > { %3471 = vst.msk [vmem:[#allocation2 + $0x1a8] sm:$0xff] %vm483_vm1, %v3402_v41  ;;  %2954 = vrot.lane.b32.xlu1 %v11568_v59, %s8768_s24 }
 0x575   : > { %2184 = vrot.lane.b32.xlu0 %v11571_v53, %s8764_s15 }
 0x576   : > { %v2563_v37 = vpop.permute.xlu1 %2562  ;;  %v4870_v51 = vld [vmem:[#allocation2 + $0x180] sm:$0xff] }
 0x577   : > { %v1792_v9 = vpop.permute.xlu0 %1791  ;;  %2634 = vst.msk [vmem:[#allocation2 + $0x190] sm:$0xff] %vm2608_vm12, %v2563_v37  ;;  %5199 = vmatmul.mubr.f32.gmra.mxu0 %v4870_v51  ;;  %v8223_v37 = vld [vmem:[%s8819_s26 + $0x1c9] sm:$0xff] }
 0x578   : > { %1862 = vst.msk [vmem:[#allocation2 + $0x1a0] sm:$0xff] %vm1835_vm8, %v1792_v9  ;;  %4750 = vrot.lane.b32.xlu1 %v8317_v17, %s8761_s10 }
 0x579   : > { %3984 = vrot.lane.b32.xlu0 %v11886_v8, %s8757_s30 }
 0x57a   : > { %v4361_v25 = vpop.permute.xlu1 %4360 }
 0x57b   : > { %v3594_v2 = vpop.permute.xlu0 %3593  ;;  %4431 = vst.msk [vmem:[#allocation2 + $0x198] sm:$0xff] %vm1449_vm6, %v4361_v25 }
 0x57c   : > { %3663 = vst.msk [vmem:[#allocation2 + $0x1a8] sm:$0xff] %vm676_vm2, %v3594_v2  ;;  %v5170_v53 = vpop.f32.mrf.mxu0  ;;  %3148 = vrot.lane.b32.xlu1 %v11644_v42, %s8769_s23 }
 0x57d   : > { %v5171_v14 = vadd.f32 %v11754_v12, %v5170_v53  ;;  %2377 = vrot.lane.b32.xlu0 %v11269_v23, %s8765_s20  ;;  %v8254_v23 = vld [vmem:[%s8819_s26 + $0x1ba] sm:$0xff]  ;;  %v5317_v53 = vld [vmem:[#allocation3 + $0xa8] sm:$0xff] }
 0x57e   : > { %v5172_v6 = vpop.f32.mrf.mxu0  ;;  %v2756_v47 = vpop.permute.xlu1 %2755 }
 0x57f   : > { %v5257_v44 = vmax.f32 %v5171_v14, 0.0  ;;  %v1985_v4 = vpop.permute.xlu0 %1984  ;;  %2827 = vst.msk [vmem:[#allocation2 + $0x190] sm:$0xff] %vm2801_vm13, %v2756_v47  ;;  %v8255_v6 = vld [vmem:[%s8819_s26 + $0x1ca] sm:$0xff] }
 0x580   : > { %2055 = vst.msk [vmem:[#allocation2 + $0x1a0] sm:$0xff] %vm2028_vm9, %v1985_v4  ;;  %4176 = vrot.lane.b32.xlu1 %v11592_v43, %s8758_s7 }
 0x581   : > { %5294 = vst.msk [vmem:[#allocation3 + $0xb0] sm:$0xff] %vm13322_vm0, %v5257_v44  ;;  %3409 = vrot.lane.b32.xlu0 %v8253_v63, %s8754_s27  ;;  %vm13326_vm0 = vcmask 326912  }
 0x582   : > { %v4553_v24 = vpop.permute.xlu1 %4552 }
 0x583   : > { %v3786_v36 = vpop.permute.xlu0 %3785  ;;  %4623 = vst.msk [vmem:[#allocation2 + $0x198] sm:$0xff] %vm13323_vm10, %v4553_v24  ;;  %vm13327_vm10 = vcmask 261120  }
 0x584   : > { %3855 = vst.msk [vmem:[#allocation2 + $0x1a8] sm:$0xff] %vm869_vm3, %v3786_v36  ;;  %2570 = vrot.lane.b32.xlu1 %v11604_v11, %s8766_s16 }
 0x585   : > { %1799 = vrot.lane.b32.xlu0 %v11552_v7, %s8761_s10 }
 0x586   : > { %v2949_v48 = vpop.permute.xlu1 %2948 }
 0x587   : > { %v2179_v38 = vpop.permute.xlu0 %2178  ;;  %3020 = vst.msk [vmem:[#allocation2 + $0x190] sm:$0xff] %vm13324_vm4, %v2949_v48  ;;  %vm13328_vm4 = vcmask 786112  }
 0x588   : > { %v11913_v43 = vld [vmem:[#allocation3 + $0xb0] sm:$0xff]  ;;  %2249 = vst.msk [vmem:[#allocation2 + $0x1a0] sm:$0xff] %vm13325_vm14, %v2179_v38  ;;  %4368 = vrot.lane.b32.xlu1 %v8254_v23, %s8759_s8  ;;  %vm13329_vm14 = vmmov %vm13327_vm10 }
 0x589   : > { %v5349_v34 = vmax.f32 %v5316_v31, %v11913_v43  ;;  %3601 = vrot.lane.b32.xlu0 %v8285_v52, %s8755_s28 }
 0x58a   : > { %v4745_v7 = vpop.permute.xlu1 %4744 }
 0x58b   : > { %v5381_v11 = vmax.f32 %v5349_v34, %v11622_v20  ;;  %v3979_v22 = vpop.permute.xlu0 %3978  ;;  %4815 = vst.msk [vmem:[#allocation2 + $0x198] sm:$0xff] %vm1835_vm8, %v4745_v7 }
 0x58c   : > { %4048 = vst.msk [vmem:[#allocation2 + $0x1a8] sm:$0xff] %vm13326_vm0, %v3979_v22  ;;  %2763 = vrot.lane.b32.xlu1 %v11620_v54, %s8767_s11  ;;  %vm13330_vm0 = vcmask 523712   ;;  %v8319_v22 = vld [vmem:[%s8819_s26 + $0x1cc] sm:$0xff] }
 0x58d   : > { %5406 = vst.msk [vmem:[#allocation4 + $0x61] sm:$0xff] %vm13327_vm10, %v5381_v11  ;;  %1992 = vrot.lane.b32.xlu0 %v11568_v59, %s8763_s12  ;;  %v8318_v59 = vld [vmem:[%s8819_s26 + $0x1bc] sm:$0xff]  ;;  %vm13331_vm10 = vcmask 982912  }
 0x58e   : > { %v3143_v39 = vpop.permute.xlu1 %3142 }
 0x58f   : > { %v2372_v63 = vpop.permute.xlu0 %2371  ;;  %3214 = vst.msk [vmem:[#allocation2 + $0x190] sm:$0xff] %vm3188_vm15, %v3143_v39 }
 0x590   : > { %2442 = vst.msk [vmem:[#allocation2 + $0x1a0] sm:$0xff] %vm13328_vm4, %v2372_v63  ;;  %4560 = vrot.lane.b32.xlu1 %v8286_v62, %s8760_s9  ;;  %vm13332_vm4 = vcmask 720512  }
 0x591   : > { %3793 = vrot.lane.b32.xlu0 %v8317_v17, %s8756_s29 }
 0x592   : > { %v4171_v20 = vpop.permute.xlu1 %4170  ;;  %v4873_v30 = vld [vmem:[#allocation2 + $0x198] sm:$0xff] }
 0x593   : > { %v3404_v46 = vpop.permute.xlu0 %3403  ;;  %4240 = vst.msk [vmem:[#allocation2 + $0x1a8] sm:$0xff] %vm1256_vm5, %v4171_v20  ;;  %8347 = vmatprep.mubr.msk.f32.mxu0 %vm4917_vm11, %v4873_v30 }
 0x594   : > { %3472 = vst.msk [vmem:[#allocation2 + $0x1b8] sm:$0xff] %vm483_vm1, %v3404_v46  ;;  %2956 = vrot.lane.b32.xlu1 %v11641_v35, %s8768_s24 }
 0x595   : > { %2186 = vrot.lane.b32.xlu0 %v11644_v42, %s8764_s15 }
 0x596   : > { %v2565_v21 = vpop.permute.xlu1 %2564  ;;  %v4872_v50 = vld [vmem:[#allocation2 + $0x190] sm:$0xff] }
 0x597   : > { %v1794_v52 = vpop.permute.xlu0 %1793  ;;  %2635 = vst.msk [vmem:[#allocation2 + $0x1a0] sm:$0xff] %vm2608_vm12, %v2565_v21  ;;  %v5175_v55 = vpop.f32.mrf.mxu0  ;;  %5204 = vmatmul.mubr.f32.gmra.mxu0 %v4872_v50  ;;  %v8224_v21 = vld [vmem:[%s8819_s26 + $0x1d1] sm:$0xff] }
 0x598   : > { %1863 = vst.msk [vmem:[#allocation2 + $0x1b0] sm:$0xff] %vm1835_vm8, %v1794_v52  ;;  %v5176_v3 = vadd.f32 %v11754_v12, %v5175_v55  ;;  %4752 = vrot.lane.b32.xlu1 %v8318_v59, %s8761_s10  ;;  %v8256_v55 = vld [vmem:[%s8819_s26 + $0x1d2] sm:$0xff] }
 0x599   : > { %3986 = vrot.lane.b32.xlu0 %v8191_v18, %s8757_s30  ;;  %v5177_v41 = vpop.f32.mrf.mxu0 }
 0x59a   : > { %v5258_v42 = vmax.f32 %v5176_v3, 0.0  ;;  %v4363_v28 = vpop.permute.xlu1 %4362 }
 0x59b   : > { %v3596_v17 = vpop.permute.xlu0 %3595  ;;  %4432 = vst.msk [vmem:[#allocation2 + $0x1a8] sm:$0xff] %vm1449_vm6, %v4363_v28 }
 0x59c   : > { %3664 = vst.msk [vmem:[#allocation2 + $0x1b8] sm:$0xff] %vm676_vm2, %v3596_v17  ;;  %3150 = vrot.lane.b32.xlu1 %v11713_v32, %s8769_s23  ;;  %v8320_v17 = vld [vmem:[%s8819_s26 + $0x1d4] sm:$0xff] }
 0x59d   : > { %5295 = vst.msk [vmem:[#allocation3 + $0xb8] sm:$0xff] %vm13329_vm14, %v5258_v42  ;;  %2379 = vrot.lane.b32.xlu0 %v11346_v57, %s8765_s20 }
 0x59e   : > { %v2758_v9 = vpop.permute.xlu1 %2757 }
 0x59f   : > { %v1987_v51 = vpop.permute.xlu0 %1986  ;;  %2828 = vst.msk [vmem:[#allocation2 + $0x1a0] sm:$0xff] %vm2801_vm13, %v2758_v9  ;;  %v5746_v9 = vld [vmem:[#allocation5 + $0x1] sm:$0xff] }
 0x5a0   : > { %2056 = vst.msk [vmem:[#allocation2 + $0x1b0] sm:$0xff] %vm2028_vm9, %v1987_v51  ;;  %4178 = vrot.lane.b32.xlu1 %v8223_v37, %s8758_s7 }
 0x5a1   : > { %3411 = vrot.lane.b32.xlu0 %v8254_v23, %s8754_s27 }
 0x5a2   : > { %v4555_v25 = vpop.permute.xlu1 %4554 }
 0x5a3   : > { %v3788_v2 = vpop.permute.xlu0 %3787  ;;  %4624 = vst.msk [vmem:[#allocation2 + $0x1a8] sm:$0xff] %vm13330_vm0, %v4555_v25  ;;  %vm13333_vm0 = vcmask 326912  }
 0x5a4   : > { %v11959_v14 = vld [vmem:[#allocation3 + $0xb8] sm:$0xff]  ;;  %3856 = vst.msk [vmem:[#allocation2 + $0x1b8] sm:$0xff] %vm869_vm3, %v3788_v2  ;;  %2572 = vrot.lane.b32.xlu1 %v11673_v49, %s8766_s16 }
 0x5a5   : > { %v5350_v57 = vmax.f32 %v5317_v53, %v11959_v14  ;;  %1801 = vrot.lane.b32.xlu0 %v11620_v54, %s8761_s10  ;;  %v8287_v54 = vld [vmem:[%s8819_s26 + $0x1cb] sm:$0xff] }
 0x5a6   : > { %v2951_v47 = vpop.permute.xlu1 %2950  ;;  %v5958_v2 = vld [vmem:[#allocation5 + $0x11] sm:$0xff] }
 0x5a7   : > { %v5382_v44 = vmax.f32 %v5350_v57, %v11681_v56  ;;  %v2181_v4 = vpop.permute.xlu0 %2180  ;;  %3021 = vst.msk [vmem:[#allocation2 + $0x1a0] sm:$0xff] %vm13331_vm10, %v2951_v47  ;;  %vm13334_vm10 = vcmask 786112  }
 0x5a8   : > { %2250 = vst.msk [vmem:[#allocation2 + $0x1b0] sm:$0xff] %vm13332_vm4, %v2181_v4  ;;  %4370 = vrot.lane.b32.xlu1 %v8255_v6, %s8759_s8  ;;  %vm13335_vm4 = vmmov %vm13329_vm14 }
 0x5a9   : > { %5407 = vst.msk [vmem:[#allocation4 + $0x69] sm:$0xff] %vm13329_vm14, %v5382_v44  ;;  %3603 = vrot.lane.b32.xlu0 %v8286_v62, %s8755_s28  ;;  %v8192_v62 = vld [vmem:[%s8819_s26 + $0x1d0] sm:$0xff]  ;;  %vm13336_vm14 = vmmov %vm13335_vm4  ;;  %v5844_v44 = vld [vmem:[#allocation5 + $0x3] sm:$0xff] }
 0x5aa   : > { %v4747_v49 = vpop.permute.xlu1 %4746 }
 0x5ab   : > { %v3981_v24 = vpop.permute.xlu0 %3980  ;;  %4816 = vst.msk [vmem:[#allocation2 + $0x1a8] sm:$0xff] %vm1835_vm8, %v4747_v49 }
 0x5ac   : > { %4049 = vst.msk [vmem:[#allocation2 + $0x1b8] sm:$0xff] %vm13333_vm0, %v3981_v24  ;;  %2765 = vrot.lane.b32.xlu1 %v11691_v0, %s8767_s11  ;;  %vm13337_vm0 = vcmask 523712  }
 0x5ad   : > { %1994 = vrot.lane.b32.xlu0 %v11641_v35, %s8763_s12 }
 0x5ae   : > { %v3145_v56 = vpop.permute.xlu1 %3144 }
 0x5af   : > { %v2374_v36 = vpop.permute.xlu0 %2373  ;;  %3215 = vst.msk [vmem:[#allocation2 + $0x1a0] sm:$0xff] %vm3188_vm15, %v3145_v56 }
 0x5b0   : > { %2443 = vst.msk [vmem:[#allocation2 + $0x1b0] sm:$0xff] %vm13334_vm10, %v2374_v36  ;;  %v5422_v23 = vld [vmem:[#allocation4 + $0x60] ss:$2 sm:$0xff]  ;;  %v5438_v48 = vld [vmem:[#allocation4 + $0x61] ss:$2 sm:$0xff]  ;;  %4562 = vrot.lane.b32.xlu1 %v8287_v54, %s8760_s9  ;;  %vm13338_vm10 = vmmov %vm13335_vm4 }
 0x5b1   : > { %3795 = vrot.lane.b32.xlu0 %v8318_v59, %s8756_s29  ;;  %v5465_v38 = vmax.f32 %v5422_v23, %v5438_v48  ;;  %v5454_v0 = vld [vmem:[#allocation4 + $0x62] ss:$2 sm:$0xff] }
 0x5b2   : > { %v4173_v31 = vpop.permute.xlu1 %4172  ;;  %v4875_v35 = vld [vmem:[#allocation2 + $0x1a8] sm:$0xff] }
 0x5b3   : > { %v3406_v34 = vpop.permute.xlu0 %3405  ;;  %v11986_v11 = vmax.f32 %v5465_v38, %v5454_v0  ;;  %4241 = vst.msk [vmem:[#allocation2 + $0x1b8] sm:$0xff] %vm1256_vm5, %v4173_v31  ;;  %8348 = vmatprep.mubr.msk.f32.mxu0 %vm4917_vm11, %v4875_v35  ;;  %v5959_v31 = vld [vmem:[#allocation5 + $0x21] sm:$0xff] }
 0x5b4   : > { %3473 = vst.msk [vmem:[#allocation2 + $0x1c8] sm:$0xff] %vm483_vm1, %v3406_v34  ;;  %2958 = vrot.lane.b32.xlu1 %v11710_v10, %s8768_s24  ;;  %v5845_v34 = vld [vmem:[#allocation5 + $0x13] sm:$0xff] }
 0x5b5   : > { %2188 = vrot.lane.b32.xlu0 %v11713_v32, %s8764_s15  ;;  %v5481_v7 = vmul.f32 %v11986_v11, %v11986_v11 }
 0x5b6   : > { %v2567_v39 = vpop.permute.xlu1 %2566  ;;  %v4874_v20 = vld [vmem:[#allocation2 + $0x1a0] sm:$0xff] }
 0x5b7   : > { %v1796_v63 = vpop.permute.xlu0 %1795  ;;  %8600 = vmatprep.mubr.msk.f32.mxu1 %vm13335_vm4, %v5481_v7  ;;  %2636 = vst.msk [vmem:[#allocation2 + $0x1b0] sm:$0xff] %vm2608_vm12, %v2567_v39  ;;  %v5180_v46 = vpop.f32.mrf.mxu0  ;;  %5209 = vmatmul.mubr.f32.gmra.mxu0 %v4874_v20  ;;  %v5960_v20 = vld [vmem:[#allocation5 + $0x31] sm:$0xff] }
 0x5b8   : > { %1864 = vst.msk [vmem:[#allocation2 + $0x1c0] sm:$0xff] %vm1835_vm8, %v1796_v63  ;;  %v5181_v10 = vadd.f32 %v11754_v12, %v5180_v46  ;;  %4754 = vrot.lane.b32.xlu1 %v8319_v22, %s8761_s10  ;;  %v6007_v22 = vld [vmem:[#allocation5 + $0x22] sm:$0xff] }
 0x5b9   : > { %3988 = vrot.lane.b32.xlu0 %v8192_v62, %s8757_s30  ;;  %v5182_v32 = vpop.f32.mrf.mxu0 }
 0x5ba   : > { %v5259_v30 = vmax.f32 %v5181_v10, 0.0  ;;  %v4365_v59 = vpop.permute.xlu1 %4364  ;;  %v6008_v32 = vld [vmem:[#allocation5 + $0x32] sm:$0xff] }
 0x5bb   : > { %v3598_v18 = vpop.permute.xlu0 %3597  ;;  %4433 = vst.msk [vmem:[#allocation2 + $0x1b8] sm:$0xff] %vm1449_vm6, %v4365_v59 }
 0x5bc   : > { %3665 = vst.msk [vmem:[#allocation2 + $0x1c8] sm:$0xff] %vm676_vm2, %v3598_v18  ;;  %3152 = vrot.lane.b32.xlu1 %v11831_v58, %s8769_s23  ;;  %v5893_v58 = vld [vmem:[#allocation5 + $0x4] sm:$0xff] }
 0x5bd   : > { %5296 = vst.msk [vmem:[#allocation3 + $0xc0] sm:$0xff] %vm13336_vm14, %v5259_v30  ;;  %2381 = vrot.lane.b32.xlu0 %v11451_v1, %s8765_s20  ;;  %v5730_v1 = vld [vmem:[#allocation5] sm:$0xff]  ;;  %vm13339_vm14 = vcmask 982912  }
 0x5be   : > { %v2760_v52 = vpop.permute.xlu1 %2759  ;;  %5738 = vst.msk [vmem:[#allocation6] sm:$0xff] %vm13338_vm10, %v5730_v1  ;;  %vm13343_vm10 = vmmov %vm13335_vm4  ;;  %v5846_v30 = vld [vmem:[#allocation5 + $0x23] sm:$0xff] }
 0x5bf   : > { %v1989_v50 = vpop.permute.xlu0 %1988  ;;  %2829 = vst.msk [vmem:[#allocation2 + $0x1b0] sm:$0xff] %vm2801_vm13, %v2760_v52 }
 0x5c0   : > { %2057 = vst.msk [vmem:[#allocation2 + $0x1c0] sm:$0xff] %vm2028_vm9, %v1989_v50  ;;  %2574 = vrot.lane.b32.xlu1 %v11785_v29, %s8766_s16  ;;  %v8288_v29 = vld [vmem:[%s8819_s26 + $0x1d3] sm:$0xff]  ;;  %s8381_s26 = sshll.u32 %s13457_s22, 4 }
 0x5c1   : > { %4180 = vrot.lane.b32.xlu0 %v8224_v21, %s8758_s7  ;;  %5901 = vst.msk [vmem:[#allocation6 + $0x8] sm:$0xff] %vm13335_vm4, %v5893_v58  ;;  %s251_s29 = scalar_lea.vmem %s13190_s6, %s8381_s26 }
 0x5c2   : > { %v4557_v3 = vpop.permute.xlu1 %4556 }
 0x5c3   : > { %v3790_v41 = vpop.permute.xlu0 %3789  ;;  %4625 = vst.msk [vmem:[#allocation2 + $0x1b8] sm:$0xff] %vm13337_vm0, %v4557_v3  ;;  %vm13341_vm0 = vcmask 326912  }
 0x5c4   : > { %3857 = vst.msk [vmem:[#allocation2 + $0x1c8] sm:$0xff] %vm869_vm3, %v3790_v41  ;;  %2767 = vrot.lane.b32.xlu1 %v11808_v60, %s8767_s11 }
 0x5c5   : > { %4372 = vrot.lane.b32.xlu0 %v8256_v55, %s8759_s8 }
 0x5c6   : > { %v2953_v42 = vpop.permute.xlu1 %2952 }
 0x5c7   : > { %v2183_v28 = vpop.permute.xlu0 %2182  ;;  %3022 = vst.msk [vmem:[#allocation2 + $0x1b0] sm:$0xff] %vm13339_vm14, %v2953_v42  ;;  %vm13344_vm14 = vcmask 523712  }
 0x5c8   : > { %2251 = vst.msk [vmem:[#allocation2 + $0x1c0] sm:$0xff] %vm13340_vm7, %v2183_v28  ;;  %2960 = vrot.lane.b32.xlu1 %v11828_v33, %s8768_s24  ;;  %vm13342_vm7 = vcmask 786112   ;;  %v12040_v33 = vld [vmem:[#allocation5 + $0x14] sm:$0xff] }
 0x5c9   : > { %4564 = vrot.lane.b32.xlu0 %v8288_v29, %s8760_s9  ;;  %5902 = vst.msk [vmem:[#allocation6 + $0x40] sm:$0xff] %vm13343_vm10, %v12040_v33  ;;  %vm13347_vm10 = vcmask 326912   ;;  %v5847_v28 = vld [vmem:[#allocation5 + $0x33] sm:$0xff] }
 0x5ca   : > { %v4749_v60 = vpop.permute.xlu1 %4748 }
 0x5cb   : > { %v3983_v37 = vpop.permute.xlu0 %3982  ;;  %4817 = vst.msk [vmem:[#allocation2 + $0x1b8] sm:$0xff] %vm1835_vm8, %v4749_v60 }
 0x5cc   : > { %4050 = vst.msk [vmem:[#allocation2 + $0x1c8] sm:$0xff] %vm13341_vm0, %v3983_v37  ;;  %3154 = vrot.lane.b32.xlu1 %v11886_v8, %s8769_s23  ;;  %v5795_v8 = vld [vmem:[#allocation5 + $0x2] sm:$0xff]  ;;  %vm13345_vm0 = vcmask 982912  }
 0x5cd   : > { %4756 = vrot.lane.b32.xlu0 %v8320_v17, %s8761_s10 }
 0x5ce   : > { %v3147_v51 = vpop.permute.xlu1 %3146 }
 0x5cf   : > { %v2376_v25 = vpop.permute.xlu0 %2375  ;;  %3216 = vst.msk [vmem:[#allocation2 + $0x1b0] sm:$0xff] %vm3188_vm15, %v3147_v51 }
 0x5d0   : > { %2444 = vst.msk [vmem:[#allocation2 + $0x1c0] sm:$0xff] %vm13342_vm7, %v2376_v25  ;;  %5762 = vrot.lane.b32.xlu1 %v5746_v9, %s8757_s30  ;;  %vm13346_vm7 = vcmask 720512  }
 0x5d1   : > { %5926 = vrot.lane.b32.xlu0 %v11816_v40, %s8757_s30  ;;  %v6006_v40 = vld [vmem:[#allocation5 + $0x12] sm:$0xff] }
 0x5d2   : > { %v4175_v53 = vpop.permute.xlu1 %4174  ;;  %v4877_v6 = vld [vmem:[#allocation2 + $0x1b8] sm:$0xff] }
 0x5d3   : > { %v3408_v57 = vpop.permute.xlu0 %3407  ;;  %4242 = vst.msk [vmem:[#allocation2 + $0x1c8] sm:$0xff] %vm1256_vm5, %v4175_v53  ;;  %8349 = vmatprep.mubr.msk.f32.mxu0 %vm4917_vm11, %v4877_v6  ;;  %v5318_v53 = vld [vmem:[#allocation3 + $0xc0] sm:$0xff] }
 0x5d4   : > { %3474 = vst.msk [vmem:[#allocation2 + $0x1d8] sm:$0xff] %vm483_vm1, %v3408_v57  ;;  %5811 = vrot.lane.b32.xlu1 %v5795_v8, %s8761_s10 }
 0x5d5   : > { %5974 = vrot.lane.b32.xlu0 %v5958_v2, %s8761_s10 }
 0x5d6   : > { %v2569_v47 = vpop.permute.xlu1 %2568  ;;  %v4876_v49 = vld [vmem:[#allocation2 + $0x1b0] sm:$0xff] }
 0x5d7   : > { %v1798_v4 = vpop.permute.xlu0 %1797  ;;  %2637 = vst.msk [vmem:[#allocation2 + $0x1c0] sm:$0xff] %vm2608_vm12, %v2569_v47  ;;  %v5185_v24 = vpop.f32.mrf.mxu0  ;;  %5214 = vmatmul.mubr.f32.gmra.mxu0 %v4876_v49 }
 0x5d8   : > { %1865 = vst.msk [vmem:[#allocation2 + $0x1d0] sm:$0xff] %vm1835_vm8, %v1798_v4  ;;  %v5186_v54 = vadd.f32 %v11754_v12, %v5185_v24  ;;  %5860 = vrot.lane.b32.xlu1 %v5844_v44, %s8766_s16 }
 0x5d9   : > { %6022 = vrot.lane.b32.xlu0 %v6006_v40, %s8766_s16  ;;  %v5187_v56 = vpop.f32.mrf.mxu0 }
 0x5da   : > { %v5260_v36 = vmax.f32 %v5186_v54, 0.0  ;;  %v4367_v23 = vpop.permute.xlu1 %4366 }
 0x5db   : > { %v3600_v48 = vpop.permute.xlu0 %3599  ;;  %4434 = vst.msk [vmem:[#allocation2 + $0x1c8] sm:$0xff] %vm1449_vm6, %v4367_v23 }
 0x5dc   : > { %3666 = vst.msk [vmem:[#allocation2 + $0x1d8] sm:$0xff] %vm676_vm2, %v3600_v48  ;;  %5764 = vrot.lane.b32.xlu1 %v5958_v2, %s8757_s30 }
 0x5dd   : > { %5297 = vst.msk [vmem:[#allocation3 + $0xc8] sm:$0xff] %vm13335_vm4, %v5260_v36  ;;  %5928 = vrot.lane.b32.xlu0 %v11745_v26, %s8757_s30  ;;  %vm13348_vm4 = vcmask 786112  }
 0x5de   : > { %v2762_v38 = vpop.permute.xlu1 %2761 }
 0x5df   : > { %v1991_v0 = vpop.permute.xlu0 %1990  ;;  %2830 = vst.msk [vmem:[#allocation2 + $0x1c0] sm:$0xff] %vm2801_vm13, %v2762_v38 }
 0x5e0   : > { %2058 = vst.msk [vmem:[#allocation2 + $0x1d0] sm:$0xff] %vm2028_vm9, %v1991_v0  ;;  %5813 = vrot.lane.b32.xlu1 %v6006_v40, %s8761_s10 }
 0x5e1   : > { %5976 = vrot.lane.b32.xlu0 %v5959_v31, %s8761_s10 }
 0x5e2   : > { %v4559_v35 = vpop.permute.xlu1 %4558 }
 0x5e3   : > { %v3792_v7 = vpop.permute.xlu0 %3791  ;;  %4626 = vst.msk [vmem:[#allocation2 + $0x1c8] sm:$0xff] %vm13344_vm14, %v4559_v35  ;;  %vm13349_vm14 = vcmask 261120  }
 0x5e4   : > { %3858 = vst.msk [vmem:[#allocation2 + $0x1d8] sm:$0xff] %vm869_vm3, %v3792_v7  ;;  %5862 = vrot.lane.b32.xlu1 %v5845_v34, %s8766_s16 }
 0x5e5   : > { %6024 = vrot.lane.b32.xlu0 %v6007_v22, %s8766_s16 }
 0x5e6   : > { %v2955_v26 = vpop.permute.xlu1 %2954 }
 0x5e7   : > { %v2185_v62 = vpop.permute.xlu0 %2184  ;;  %3023 = vst.msk [vmem:[#allocation2 + $0x1c0] sm:$0xff] %vm13345_vm0, %v2955_v26  ;;  %vm13350_vm0 = vcmask 523712  }
 0x5e8   : > { %2252 = vst.msk [vmem:[#allocation2 + $0x1d0] sm:$0xff] %vm13346_vm7, %v2185_v62  ;;  %5766 = vrot.lane.b32.xlu1 %v5959_v31, %s8757_s30  ;;  %vm13351_vm7 = vcmask 982912  }
 0x5e9   : > { %5930 = vrot.lane.b32.xlu0 %v11734_v15, %s8757_s30 }
 0x5ea   : > { %v4751_v39 = vpop.permute.xlu1 %4750 }
 0x5eb   : > { %v3985_v63 = vpop.permute.xlu0 %3984  ;;  %4818 = vst.msk [vmem:[#allocation2 + $0x1c8] sm:$0xff] %vm1835_vm8, %v4751_v39 }
 0x5ec   : > { %4051 = vst.msk [vmem:[#allocation2 + $0x1d8] sm:$0xff] %vm13347_vm10, %v3985_v63  ;;  %5815 = vrot.lane.b32.xlu1 %v6007_v22, %s8761_s10  ;;  %vm13352_vm10 = vcmask 720512  }
 0x5ed   : > { %5978 = vrot.lane.b32.xlu0 %v5960_v20, %s8761_s10 }
 0x5ee   : > { %v3149_v46 = vpop.permute.xlu1 %3148 }
 0x5ef   : > { %v2378_v10 = vpop.permute.xlu0 %2377  ;;  %3217 = vst.msk [vmem:[#allocation2 + $0x1c0] sm:$0xff] %vm3188_vm15, %v3149_v46 }
 0x5f0   : > { %2445 = vst.msk [vmem:[#allocation2 + $0x1d0] sm:$0xff] %vm13348_vm4, %v2378_v10  ;;  %5864 = vrot.lane.b32.xlu1 %v5846_v30, %s8766_s16  ;;  %vm13353_vm4 = vmmov %vm13349_vm14 }
 0x5f1   : > { %6026 = vrot.lane.b32.xlu0 %v6008_v32, %s8766_s16 }
 0x5f2   : > { %v4177_v59 = vpop.permute.xlu1 %4176  ;;  %v4879_v21 = vld [vmem:[#allocation2 + $0x1c8] sm:$0xff] }
 0x5f3   : > { %v3410_v18 = vpop.permute.xlu0 %3409  ;;  %4243 = vst.msk [vmem:[#allocation2 + $0x1d8] sm:$0xff] %vm1256_vm5, %v4177_v59  ;;  %8350 = vmatprep.mubr.msk.f32.mxu0 %vm4917_vm11, %v4879_v21 }
 0x5f4   : > { %3475 = vst.msk [vmem:[#allocation2 + $0x1e8] sm:$0xff] %vm483_vm1, %v3410_v18  ;;  %5768 = vrot.lane.b32.xlu1 %v5960_v20, %s8757_s30 }
 0x5f6   : > { %v2571_v52 = vpop.permute.xlu1 %2570  ;;  %v4878_v55 = vld [vmem:[#allocation2 + $0x1c0] sm:$0xff] }
 0x5f7   : > { %v1800_v50 = vpop.permute.xlu0 %1799  ;;  %2638 = vst.msk [vmem:[#allocation2 + $0x1d0] sm:$0xff] %vm2608_vm12, %v2571_v52  ;;  %v5190_v3 = vpop.f32.mrf.mxu0  ;;  %5219 = vmatmul.mubr.f32.gmra.mxu0 %v4878_v55 }
 0x5f8   : > { %1866 = vst.msk [vmem:[#allocation2 + $0x1e0] sm:$0xff] %vm1835_vm8, %v1800_v50  ;;  %v5191_v41 = vadd.f32 %v11754_v12, %v5190_v3  ;;  %5817 = vrot.lane.b32.xlu1 %v6008_v32, %s8761_s10  ;;  %v5319_v3 = vld [vmem:[#allocation3 + $0xc8] sm:$0xff] }
 0x5f9   : > { %v5192_v1 = vpop.f32.mrf.mxu0 }
 0x5fa   : > { %v5261_v58 = vmax.f32 %v5191_v41, 0.0  ;;  %v4369_v29 = vpop.permute.xlu1 %4368 }
 0x5fb   : > { %v3602_v42 = vpop.permute.xlu0 %3601  ;;  %4435 = vst.msk [vmem:[#allocation2 + $0x1d8] sm:$0xff] %vm1449_vm6, %v4369_v29 }
 0x5fc   : > { %3667 = vst.msk [vmem:[#allocation2 + $0x1e8] sm:$0xff] %vm676_vm2, %v3602_v42  ;;  %5866 = vrot.lane.b32.xlu1 %v5847_v28, %s8766_s16 }
 0x5fd   : > { %5298 = vst.msk [vmem:[#allocation3 + $0xd0] sm:$0xff] %vm13349_vm14, %v5261_v58  ;;  %vm13354_vm14 = vcmask 326912  }
 0x5fe   : > { %v2764_v17 = vpop.permute.xlu1 %2763 }
 0x5ff   : > { %v1993_v60 = vpop.permute.xlu0 %1992  ;;  %2831 = vst.msk [vmem:[#allocation2 + $0x1d0] sm:$0xff] %vm2801_vm13, %v2764_v17  ;;  %v8599_v37 = vpop.f32.mrf.mxu1 }
 0x600   : > { %2059 = vst.msk [vmem:[#allocation2 + $0x1e0] sm:$0xff] %vm2028_vm9, %v1993_v60  ;;  %v5591_v9 = vadd.f32 1.0, %v8599_v37 }
 0x601   : > { %v5585_v51 = vpop.f32.mrf.mxu1 }
 0x602   : > { %8679 = vrsqrt.f32 %v5591_v9  ;;  %v5586_v25 = vadd.f32 1.0, %v5585_v51  ;;  %v4561_v8 = vpop.permute.xlu1 %4560 }
 0x603   : > { %v3794_v2 = vpop.permute.xlu0 %3793  ;;  %4627 = vst.msk [vmem:[#allocation2 + $0x1d8] sm:$0xff] %vm13350_vm0, %v4561_v8  ;;  %vm13355_vm0 = vcmask 786112  }
 0x604   : > { %v12098_v57 = vld [vmem:[#allocation3 + $0xd0] sm:$0xff]  ;;  %3859 = vst.msk [vmem:[#allocation2 + $0x1e8] sm:$0xff] %vm869_vm3, %v3794_v2  ;;  %8681 = vrsqrt.f32 %v5586_v25 }
 0x605   : > { %v5351_v6 = vmax.f32 %v5318_v53, %v12098_v57 }
 0x606   : > { %v2957_v40 = vpop.permute.xlu1 %2956 }
 0x607   : > { %v5383_v44 = vmax.f32 %v5351_v6, %v11913_v43  ;;  %v2187_v47 = vpop.permute.xlu0 %2186  ;;  %3024 = vst.msk [vmem:[#allocation2 + $0x1d0] sm:$0xff] %vm13351_vm7, %v2957_v40 }
 0x608   : > { %2253 = vst.msk [vmem:[#allocation2 + $0x1e0] sm:$0xff] %vm13352_vm10, %v2187_v47 }
 0x609   : > { %5408 = vst.msk [vmem:[#allocation4 + $0x79] sm:$0xff] %vm13353_vm4, %v5383_v44 }
 0x60a   : > { %v4753_v4 = vpop.permute.xlu1 %4752 }
 0x60b   : > { %v3987_v49 = vpop.permute.xlu0 %3986  ;;  %4819 = vst.msk [vmem:[#allocation2 + $0x1d8] sm:$0xff] %vm1835_vm8, %v4753_v4 }
 0x60c   : > { %4052 = vst.msk [vmem:[#allocation2 + $0x1e8] sm:$0xff] %vm13354_vm14, %v3987_v49  ;;  %vm13357_vm14 = vcmask 523712  }
 0x60e   : > { %v3151_v24 = vpop.permute.xlu1 %3150 }
 0x60f   : > { %v2380_v54 = vpop.permute.xlu0 %2379  ;;  %v8680_v56 = vpop.eup %8679  ;;  %3218 = vst.msk [vmem:[#allocation2 + $0x1d0] sm:$0xff] %vm3188_vm15, %v3151_v24 }
 0x610   : > { %2446 = vst.msk [vmem:[#allocation2 + $0x1e0] sm:$0xff] %vm13355_vm0, %v2380_v54  ;;  %8683 = vrsqrt.f32 %v8680_v56  ;;  %vm5645_vm7 = vcmp.eq.f32.partialorder %v8680_v56, inf  ;;  %vm5647_vm10 = vcmp.eq.f32.partialorder %v8680_v56, 0.0  ;;  %vm13359_vm0 = vcmask 982912  }
 0x611   : > { %v8682_v43 = vpop.eup %8681 }
 0x612   : > { %v4179_v36 = vpop.permute.xlu1 %4178  ;;  %v4881_v48 = vld [vmem:[#allocation2 + $0x1d8] sm:$0xff]  ;;  %8685 = vrsqrt.f32 %v8682_v43  ;;  %v5641_v59 = vand.u32 2147483648, %v8682_v43 }
 0x613   : > { %v3412_v23 = vpop.permute.xlu0 %3411  ;;  %4244 = vst.msk [vmem:[#allocation2 + $0x1e8] sm:$0xff] %vm1256_vm5, %v4179_v36  ;;  %8351 = vmatprep.mubr.msk.f32.mxu0 %vm4917_vm11, %v4881_v48 }
 0x614   : > { %3476 = vst.msk [vmem:[#allocation2 + $0x1f8] sm:$0xff] %vm483_vm1, %v3412_v23  ;;  %vm13356_vm1 = vmmov %vm13353_vm4  ;;  %vm5638_vm4 = vcmp.eq.f32.partialorder %v8682_v43, inf }
 0x616   : > { %v2573_v38 = vpop.permute.xlu1 %2572  ;;  %v4880_v31 = vld [vmem:[#allocation2 + $0x1d0] sm:$0xff] }
 0x617   : > { %v1802_v0 = vpop.permute.xlu0 %1801  ;;  %2639 = vst.msk [vmem:[#allocation2 + $0x1e0] sm:$0xff] %vm2608_vm12, %v2573_v38  ;;  %5224 = vmatmul.mubr.f32.gmra.mxu0 %v4880_v31 }
 0x618   : > { %1867 = vst.msk [vmem:[#allocation2 + $0x1f0] sm:$0xff] %vm1835_vm8, %v1802_v0 }
 0x619   : > { %v5195_v34 = vpop.f32.mrf.mxu0 }
 0x61a   : > { %v5196_v35 = vadd.f32 %v11754_v12, %v5195_v34  ;;  %v4371_v26 = vpop.permute.xlu1 %4370  ;;  %v5648_v12 = vand.u32 2147483648, %v8680_v56 }
 0x61b   : > { %v5197_v7 = vpop.f32.mrf.mxu0  ;;  %v3604_v62 = vpop.permute.xlu0 %3603  ;;  %4436 = vst.msk [vmem:[#allocation2 + $0x1e8] sm:$0xff] %vm1449_vm6, %v4371_v26 }
 0x61c   : > { %v5262_v22 = vmax.f32 %v5196_v35, 0.0  ;;  %3668 = vst.msk [vmem:[#allocation2 + $0x1f8] sm:$0xff] %vm676_vm2, %v3604_v62  ;;  %vm5640_vm2 = vcmp.eq.f32.partialorder %v8682_v43, 0.0 }
 0x61d   : > { %v8684_v39 = vpop.eup %8683 }
 0x61e   : > { %5299 = vst.msk [vmem:[#allocation3 + $0xd8] sm:$0xff] %vm13356_vm1, %v5262_v22  ;;  %v2766_v63 = vpop.permute.xlu1 %2765  ;;  %v5644_v46 = vmul.f32 %v8684_v39, %v8680_v56 }
 0x61f   : > { %v1995_v20 = vpop.permute.xlu0 %1994  ;;  %v8686_v10 = vpop.eup %8685  ;;  %2832 = vst.msk [vmem:[#allocation2 + $0x1e0] sm:$0xff] %vm2801_vm13, %v2766_v63 }
 0x620   : > { %2060 = vst.msk [vmem:[#allocation2 + $0x1f0] sm:$0xff] %vm2028_vm9, %v1995_v20  ;;  %v5637_v32 = vmul.f32 %v8686_v10, %v8682_v43  ;;  %v5646_v30 = vsel %vm5645_vm7, %v8680_v56, %v5644_v46  ;;  %vm13358_vm9 = vmmov %vm13356_vm1  ;;  %vm13360_vm1 = vcmask 720512   ;;  %v12208_v20 = vld [vmem:[%s13186_s2] ss:$0 sm:$0xff] }
 0x621   : > { %v5649_v18 = vsel %vm5647_vm10, %v5648_v12, %v5646_v30  ;;  %vm13361_vm7 = vmmov %vm13358_vm9  ;;  %vm13363_vm10 = vcmask 326912  }
 0x622   : > { %v4563_v21 = vpop.permute.xlu1 %4562  ;;  %v5639_v50 = vsel %vm5638_vm4, %v8682_v43, %v5637_v32  ;;  %v5681_v55 = vmul.f32 %v8680_v56, %v5649_v18 }
 0x623   : > { %v3796_v52 = vpop.permute.xlu0 %3795  ;;  %4628 = vst.msk [vmem:[#allocation2 + $0x1e8] sm:$0xff] %vm13357_vm14, %v4563_v21  ;;  %v5642_v1 = vsel %vm5640_vm2, %v5641_v59, %v5639_v50  ;;  %vm13365_vm2 = vcmask 786112  }
 0x624   : > { %3860 = vst.msk [vmem:[#allocation2 + $0x1f8] sm:$0xff] %vm869_vm3, %v3796_v52  ;;  %v5680_v29 = vmul.f32 %v8682_v43, %v5642_v1  ;;  %v5689_v42 = vmul.f32 %v5681_v55, %v11724_v61  ;;  %vm13362_vm3 = vmmov %vm13361_vm7 }
 0x625   : > { %v12122_v41 = vld [vmem:[#allocation3 + $0xd8] sm:$0xff]  ;;  %vm13364_vm4 = vmmov %vm13362_vm3 }
 0x626   : > { %v5352_v58 = vmax.f32 %v5319_v3, %v12122_v41  ;;  %v2959_v17 = vpop.permute.xlu1 %2958  ;;  %v5688_v37 = vmul.f32 %v5680_v29, %v11455_v5  ;;  %5725 = vst.msk [vmem:[#allocation5 + $0x52] sm:$0xff] %vm13358_vm9, %v5689_v42  ;;  %vm13366_vm14 = vmmov %vm13362_vm3 }
 0x627   : > { %v2189_v60 = vpop.permute.xlu0 %2188  ;;  %3025 = vst.msk [vmem:[#allocation2 + $0x1e0] sm:$0xff] %vm13359_vm0, %v2959_v17  ;;  %vm13367_vm9 = vmmov %vm13362_vm3 }
 0x628   : > { %v5384_v28 = vmax.f32 %v5352_v58, %v11959_v14  ;;  %2254 = vst.msk [vmem:[#allocation2 + $0x1f0] sm:$0xff] %vm13360_vm1, %v2189_v60  ;;  %vm13368_vm0 = vmmov %vm13362_vm3 }
 0x629   : > { %5724 = vst.msk [vmem:[#allocation5 + $0x42] sm:$0xff] %vm13362_vm3, %v5688_v37  ;;  %vm13369_vm1 = vmmov %vm13368_vm0 }
 0x62a   : > { %5409 = vst.msk [vmem:[#allocation4 + $0x81] sm:$0xff] %vm13361_vm7, %v5384_v28  ;;  %v4755_v9 = vpop.permute.xlu1 %4754  ;;  %vm13370_vm7 = vmmov %vm13368_vm0 }
 0x62b   : > { %v3989_v51 = vpop.permute.xlu0 %3988  ;;  %4820 = vst.msk [vmem:[#allocation2 + $0x1e8] sm:$0xff] %vm1835_vm8, %v4755_v9  ;;  %vm13371_vm3 = vmmov %vm13368_vm0 }
 0x62c   : > { %4053 = vst.msk [vmem:[#allocation2 + $0x1f8] sm:$0xff] %vm13363_vm10, %v3989_v51  ;;  %vm13372_vm10 = vmmov %vm13368_vm0 }
 0x62d   : > { %v12137_v61 = vld [vmem:[#allocation5 + $0x50] sm:$0xff] }
 0x62e   : > { %v3153_v14 = vpop.permute.xlu1 %3152  ;;  %v12139_v25 = vld [vmem:[#allocation5 + $0x53] sm:$0xff]  ;;  %5743 = vst.msk [vmem:[#allocation6 + $0x118] sm:$0xff] %vm13364_vm4, %v12137_v61  ;;  %vm13373_vm4 = vmmov %vm13368_vm0 }
 0x62f   : > { %v2382_v5 = vpop.permute.xlu0 %2381  ;;  %v12143_v8 = vld [vmem:[#allocation5 + $0x54] sm:$0xff]  ;;  %3219 = vst.msk [vmem:[#allocation2 + $0x1e0] sm:$0xff] %vm3188_vm15, %v3153_v14 }
 0x630   : > { %v12145_v2 = vld [vmem:[#allocation5 + $0x50] sm:$0xff]  ;;  %2447 = vst.msk [vmem:[#allocation2 + $0x1f0] sm:$0xff] %vm13365_vm2, %v2382_v5  ;;  %v12149_v53 = vld [vmem:[#allocation5 + $0x40] sm:$0xff]  ;;  %vm13376_vm2 = vmmov %vm13368_vm0 }
 0x631   : > { %v12151_v6 = vld [vmem:[#allocation5 + $0x41] sm:$0xff]  ;;  %5906 = vst.msk [vmem:[#allocation6 + $0x120] sm:$0xff] %vm13366_vm14, %v12143_v8  ;;  %5932 = vrot.lane.b32.xlu0 %v12149_v53, %s8757_s30  ;;  %v12181_v0 = vld [vmem:[#allocation5 + $0x52] sm:$0xff]  ;;  %vm13377_vm14 = vmmov %vm13368_vm0 }
 0x632   : > { %6066 = vst.msk [vmem:[#allocation6 + $0xf0] sm:$0xff] %vm13367_vm9, %v12139_v25  ;;  %5770 = vrot.lane.b32.xlu1 %v12151_v6, %s8757_s30  ;;  %v5424_v44 = vld [vmem:[#allocation4 + $0x78] ss:$2 sm:$0xff]  ;;  %v5440_v40 = vld [vmem:[#allocation4 + $0x79] ss:$2 sm:$0xff]  ;;  %v2575_v54 = vpop.permute.xlu1 %2574  ;;  %v4883_v43 = vld [vmem:[#allocation2 + $0x1e8] sm:$0xff] }
 0x633   : > { %6545 = vst.msk [vmem:[#allocation6 + $0x60] sm:$0xff] %vm13368_vm0, %v12145_v2  ;;  %v5466_v47 = vmax.f32 %v5424_v44, %v5440_v40  ;;  %v5848_v4 = vld [vmem:[#allocation5 + $0x43] sm:$0xff]  ;;  %v4181_v56 = vpop.permute.xlu0 %4180  ;;  %8352 = vmatprep.mubr.msk.f32.mxu0 %vm4917_vm11, %v4883_v43  ;;  %v12190_v34 = vld [vmem:[#allocation5 + $0x51] sm:$0xff]  ;;  %vm13378_vm9 = vmmov %vm13368_vm0 }
 0x634   : > { %5742 = vst.msk [vmem:[#allocation6 + $0xe0] sm:$0xff] %vm13369_vm1, %v12149_v53  ;;  %v12165_v49 = vld [vmem:[#allocation5 + $0x44] sm:$0xff]  ;;  %v6697_v7 = vld [vmem:[#allocation5 + $0x54] sm:$0xff]  ;;  %vm13381_vm1 = vmmov %vm13368_vm0 }
 0x635   : > { %v12167_v24 = vld [vmem:[#allocation5 + $0x40] sm:$0xff]  ;;  %5905 = vst.msk [vmem:[#allocation6 + $0xe8] sm:$0xff] %vm13370_vm7, %v12165_v49  ;;  %5980 = vrot.lane.b32.xlu0 %v12151_v6, %s8761_s10  ;;  %v12215_v59 = vld [vmem:[#allocation5 + $0x51] sm:$0xff]  ;;  %vm5786_vm7 = vcmask 523520  }
 0x636   : > { %v5456_v36 = vld [vmem:[#allocation4 + $0x7a] ss:$2 sm:$0xff]  ;;  %6065 = vst.msk [vmem:[#allocation6 + $0xb8] sm:$0xff] %vm13371_vm3, %v5848_v4  ;;  %v2768_v26 = vpop.permute.xlu1 %2767  ;;  %v5800_v52 = vld [vmem:[#allocation5 + $0x52] sm:$0xff]  ;;  %vm13383_vm3 = vmmov %vm13368_vm0 }
 0x637   : > { %v12172_v23 = vld [vmem:[#allocation5 + $0x42] sm:$0xff]  ;;  %6544 = vst.msk [vmem:[#allocation6 + $0x28] sm:$0xff] %vm13372_vm10, %v12167_v24  ;;  %v12179_v38 = vmax.f32 %v5466_v47, %v5456_v36  ;;  %v4373_v62 = vpop.permute.xlu0 %4372  ;;  %v5200_v63 = vpop.f32.mrf.mxu0  ;;  %vm13384_vm10 = vmmov %vm13368_vm0 }
 0x638   : > { %2640 = vst.msk [vmem:[#allocation2 + $0x1f0] sm:$0xff] %vm2608_vm12, %v2575_v54  ;;  %v5799_v48 = vld [vmem:[#allocation5 + $0x42] sm:$0xff]  ;;  %vm13375_vm12 = vmmov %vm13368_vm0  ;;  %v5201_v46 = vadd.f32 %v12208_v20, %v5200_v63 }
 0x639   : > { %4245 = vst.msk [vmem:[#allocation2 + $0x1f8] sm:$0xff] %vm1256_vm5, %v4181_v56  ;;  %v12183_v31 = vld [vmem:[#allocation5 + $0x41] sm:$0xff]  ;;  %5819 = vrot.lane.b32.xlu1 %v5799_v48, %s8761_s10  ;;  %vm13374_vm5 = vmmov %vm13368_vm0  ;;  %v5482_v22 = vmul.f32 %v12179_v38, %v12179_v38  ;;  %6028 = vrot.lane.b32.xlu0 %v5799_v48, %s8766_s16  ;;  %v5202_v10 = vpop.f32.mrf.mxu0 }
 0x63a   : > { %6224 = vst.msk [vmem:[#allocation6 + $0x88] sm:$0xff] %vm13373_vm4, %v12172_v23  ;;  %v6696_v35 = vld [vmem:[#allocation5 + $0x44] sm:$0xff]  ;;  %v5263_v12 = vmax.f32 %v5201_v46, 0.0  ;;  %v2961_v32 = vpop.permute.xlu1 %2960  ;;  %vm13385_vm4 = vmmov %vm13368_vm0 }
 0x63b   : > { %6384 = vst.msk [vmem:[#allocation6 + $0x58] sm:$0xff] %vm13374_vm5, %v12183_v31  ;;  %v4882_v39 = vld [vmem:[#allocation2 + $0x1e0] sm:$0xff]  ;;  %8601 = vmatmul.mubr.msk.f32.gmra.mxu1 %vm13368_vm0, %v5482_v22  ;;  %v4565_v30 = vpop.permute.xlu0 %4564  ;;  %vm13386_vm5 = vmmov %vm13368_vm0 }
 0x63c   : > { %6225 = vst.msk [vmem:[#allocation6 + $0xc0] sm:$0xff] %vm13375_vm12, %v12181_v0  ;;  %5229 = vmatmul.mubr.f32.gmra.mxu0 %v4882_v39  ;;  %vm13387_vm12 = vmmov %vm13368_vm0 }
 0x63d   : > { %6385 = vst.msk [vmem:[#allocation6 + $0x90] sm:$0xff] %vm13376_vm2, %v12190_v34  ;;  %5868 = vrot.lane.b32.xlu1 %v5848_v4, %s8766_s16  ;;  %5934 = vrot.lane.b32.xlu0 %v12137_v61, %s8757_s30  ;;  %vm13388_vm2 = vmmov %vm13368_vm0 }
 0x63e   : > { %6704 = vst.msk [vmem:[#allocation6 + $0x30] sm:$0xff] %vm13377_vm14, %v6696_v35  ;;  %v3155_v18 = vpop.permute.xlu1 %3154  ;;  %vm13389_vm14 = vmmov %vm13368_vm0 }
 0x63f   : > { %6705 = vst.msk [vmem:[#allocation6 + $0x68] sm:$0xff] %vm13378_vm9, %v6697_v7  ;;  %v4757_v21 = vpop.permute.xlu0 %4756  ;;  %vm13390_vm9 = vmmov %vm13368_vm0 }
 0x640   : > { %2833 = vst.msk [vmem:[#allocation2 + $0x1f0] sm:$0xff] %vm2801_vm13, %v2768_v26  ;;  %vm13380_vm13 = vcmask 523712  }
 0x641   : > { %4437 = vst.msk [vmem:[#allocation2 + $0x1f8] sm:$0xff] %vm1449_vm6, %v4373_v62  ;;  %vm13379_vm6 = vcmask 982912   ;;  %5772 = vrot.lane.b32.xlu1 %v12215_v59, %s8757_s30  ;;  %5982 = vrot.lane.b32.xlu0 %v12215_v59, %s8761_s10 }
 0x642   : > { %3026 = vst.msk [vmem:[#allocation2 + $0x1f0] sm:$0xff] %vm13379_vm6, %v2961_v32  ;;  %v5763_v50 = vpop.permute.xlu1 %5762  ;;  %v6799_v32 = vld [vmem:[%s13187_s3 + $0xf8] sm:$0xff]  ;;  %vm13391_vm6 = vmmov %vm13368_vm0 }
 0x643   : > { %4629 = vst.msk [vmem:[#allocation2 + $0x1f8] sm:$0xff] %vm13380_vm13, %v4565_v30  ;;  %v5927_v55 = vpop.permute.xlu0 %5926  ;;  %8394 = vmatprep.subr.mxu1 %v6799_v32  ;;  %v6783_v30 = vld [vmem:[%s13187_s3 + $0x78] sm:$0xff]  ;;  %v6785_v32 = vld [vmem:[%s13187_s3 + $0x88] sm:$0xff] }
 0x644   : > { %5300 = vst.msk [vmem:[#allocation3 + $0xe0] sm:$0xff] %vm13381_vm1, %v5263_v12  ;;  %8395 = vmatpush3.msra.mxu1 %v6783_v30  ;;  %v6784_v30 = vld [vmem:[%s13187_s3 + $0x80] sm:$0xff] }
 0x645   : > { %3220 = vst.msk [vmem:[#allocation2 + $0x1f0] sm:$0xff] %vm3188_vm15, %v3155_v18  ;;  %5821 = vrot.lane.b32.xlu1 %v5800_v52, %s8761_s10  ;;  %6030 = vrot.lane.b32.xlu0 %v5800_v52, %s8766_s16  ;;  %vm5835_vm15 = vcmask 785920   ;;  %v6798_v18 = vld [vmem:[%s13187_s3 + $0xf0] sm:$0xff]  ;;  %v6781_v52 = vld [vmem:[%s13187_s3 + $0x68] sm:$0xff] }
 0x646   : > { %4821 = vst.msk [vmem:[#allocation2 + $0x1f8] sm:$0xff] %vm1835_vm8, %v4757_v21  ;;  %v5812_v3 = vpop.permute.xlu1 %5811  ;;  %vm5884_vm8 = vcmask 1048320   ;;  %8396 = vmatprep.subr.mxu1 %v6798_v18  ;;  %v6797_v21 = vld [vmem:[%s13187_s3 + $0xe8] sm:$0xff] }
 0x647   : > { %5787 = vst.msk [vmem:[#allocation6] sm:$0xff] %vm5786_vm7, %v5763_v50  ;;  %5950 = vst.msk [vmem:[#allocation6 + $0x8] sm:$0xff] %vm5786_vm7, %v5927_v55  ;;  %v5975_v1 = vpop.permute.xlu0 %5974  ;;  %v6796_v50 = vld [vmem:[%s13187_s3 + $0xe0] sm:$0xff] }
 0x648   : > { %5836 = vst.msk [vmem:[#allocation6] sm:$0xff] %vm5835_vm15, %v5812_v3  ;;  %5998 = vst.msk [vmem:[#allocation6 + $0x8] sm:$0xff] %vm5835_vm15, %v5975_v1  ;;  %v6780_v55 = vld [vmem:[%s13187_s3 + $0x60] sm:$0xff]  ;;  %v6795_v3 = vld [vmem:[%s13187_s3 + $0xd8] sm:$0xff] }
 0x649   : > { %5870 = vrot.lane.b32.xlu1 %v12139_v25, %s8766_s16  ;;  %v6779_v1 = vld [vmem:[%s13187_s3 + $0x58] sm:$0xff] }
 0x64a   : > { %v5861_v42 = vpop.permute.xlu1 %5860 }
 0x64b   : > { %v6023_v28 = vpop.permute.xlu0 %6022  ;;  %5885 = vst.msk [vmem:[#allocation6] sm:$0xff] %vm5884_vm8, %v5861_v42  ;;  %v5320_v63 = vld [vmem:[#allocation3 + $0xe0] sm:$0xff] }
 0x64c   : > { %v4884_v29 = vld [vmem:[#allocation2 + $0x1f0] sm:$0xff]  ;;  %6046 = vst.msk [vmem:[#allocation6 + $0x8] sm:$0xff] %vm5884_vm8, %v6023_v28 }
 0x64d   : > { %v4885_v58 = vld [vmem:[#allocation2 + $0x1f8] sm:$0xff]  ;;  %v6778_v28 = vld [vmem:[%s13187_s3 + $0x50] sm:$0xff] }
 0x64e   : > { %8353 = vmatprep.mubr.msk.f32.mxu0 %vm4917_vm11, %v4885_v58  ;;  %v5765_v17 = vpop.permute.xlu1 %5764  ;;  %vm13382_vm11 = vmmov %vm13368_vm0 }
 0x64f   : > { %5234 = vmatmul.mubr.f32.gmra.mxu0 %v4884_v29  ;;  %v5929_v60 = vpop.permute.xlu0 %5928  ;;  %5788 = vst.msk [vmem:[#allocation6 + $0x38] sm:$0xff] %vm5786_vm7, %v5765_v17  ;;  %v6794_v29 = vld [vmem:[%s13187_s3 + $0xd0] sm:$0xff] }
 0x650   : > { %5951 = vst.msk [vmem:[#allocation6 + $0x40] sm:$0xff] %vm5786_vm7, %v5929_v60  ;;  %v6793_v60 = vld [vmem:[%s13187_s3 + $0xc8] sm:$0xff] }
 0x652   : > { %v5814_v37 = vpop.permute.xlu1 %5813 }
 0x653   : > { %v5977_v9 = vpop.permute.xlu0 %5976  ;;  %5837 = vst.msk [vmem:[#allocation6 + $0x38] sm:$0xff] %vm5835_vm15, %v5814_v37  ;;  %v6777_v37 = vld [vmem:[%s13187_s3 + $0x48] sm:$0xff] }
 0x654   : > { %5999 = vst.msk [vmem:[#allocation6 + $0x40] sm:$0xff] %vm5835_vm15, %v5977_v9  ;;  %v6792_v9 = vld [vmem:[%s13187_s3 + $0xc0] sm:$0xff] }
 0x656   : > { %v5863_v51 = vpop.permute.xlu1 %5862 }
 0x657   : > { %v6025_v14 = vpop.permute.xlu0 %6024  ;;  %5886 = vst.msk [vmem:[#allocation6 + $0x38] sm:$0xff] %vm5884_vm8, %v5863_v51  ;;  %v5205_v5 = vpop.f32.mrf.mxu0 }
 0x658   : > { %6047 = vst.msk [vmem:[#allocation6 + $0x40] sm:$0xff] %vm5884_vm8, %v6025_v14  ;;  %v5206_v25 = vadd.f32 %v12208_v20, %v5205_v5  ;;  %v6776_v14 = vld [vmem:[%s13187_s3 + $0x40] sm:$0xff]  ;;  %v6791_v5 = vld [vmem:[%s13187_s3 + $0xb8] sm:$0xff] }
 0x659   : > { %v5207_v44 = vpop.f32.mrf.mxu0 }
 0x65a   : > { %v5264_v40 = vmax.f32 %v5206_v25, 0.0  ;;  %v5767_v4 = vpop.permute.xlu1 %5766  ;;  %v6775_v25 = vld [vmem:[%s13187_s3 + $0x38] sm:$0xff]  ;;  %v6790_v44 = vld [vmem:[%s13187_s3 + $0xb0] sm:$0xff] }
 0x65b   : > { %v5931_v47 = vpop.permute.xlu0 %5930  ;;  %5789 = vst.msk [vmem:[#allocation6 + $0x70] sm:$0xff] %vm5786_vm7, %v5767_v4  ;;  %v6773_v4 = vld [vmem:[%s13187_s3 + $0x28] sm:$0xff] }
 0x65c   : > { %5952 = vst.msk [vmem:[#allocation6 + $0x78] sm:$0xff] %vm5786_vm7, %v5931_v47  ;;  %v6789_v47 = vld [vmem:[%s13187_s3 + $0xa8] sm:$0xff] }
 0x65d   : > { %5301 = vst.msk [vmem:[#allocation3 + $0xe8] sm:$0xff] %vm13382_vm11, %v5264_v40  ;;  %v6774_v40 = vld [vmem:[%s13187_s3 + $0x30] sm:$0xff]  ;;  %vm13392_vm11 = vmmov %vm13368_vm0 }
 0x65e   : > { %v5816_v56 = vpop.permute.xlu1 %5815 }
 0x65f   : > { %v5979_v54 = vpop.permute.xlu0 %5978  ;;  %5838 = vst.msk [vmem:[#allocation6 + $0x70] sm:$0xff] %vm5835_vm15, %v5816_v56 }
 0x660   : > { %6000 = vst.msk [vmem:[#allocation6 + $0x78] sm:$0xff] %vm5835_vm15, %v5979_v54  ;;  %v6788_v54 = vld [vmem:[%s13187_s3 + $0xa0] sm:$0xff] }
 0x662   : > { %v5865_v36 = vpop.permute.xlu1 %5864 }
 0x663   : > { %v6027_v43 = vpop.permute.xlu0 %6026  ;;  %5887 = vst.msk [vmem:[#allocation6 + $0x70] sm:$0xff] %vm5884_vm8, %v5865_v36  ;;  %v6772_v36 = vld [vmem:[%s13187_s3 + $0x20] sm:$0xff] }
 0x664   : > { %6048 = vst.msk [vmem:[#allocation6 + $0x78] sm:$0xff] %vm5884_vm8, %v6027_v43 }
 0x666   : > { %v5769_v48 = vpop.permute.xlu1 %5768 }
 0x667   : > { %5790 = vst.msk [vmem:[#allocation6 + $0xa8] sm:$0xff] %vm5786_vm7, %v5769_v48  ;;  %v5321_v48 = vld [vmem:[#allocation3 + $0xe8] sm:$0xff] }
 0x66a   : > { %v5818_v35 = vpop.permute.xlu1 %5817 }
 0x66b   : > { %5839 = vst.msk [vmem:[#allocation6 + $0xa8] sm:$0xff] %vm5835_vm15, %v5818_v35 }
 0x66e   : > { %v5867_v7 = vpop.permute.xlu1 %5866 }
 0x66f   : > { %5888 = vst.msk [vmem:[#allocation6 + $0xa8] sm:$0xff] %vm5884_vm8, %v5867_v7  ;;  %v6787_v7 = vld [vmem:[%s13187_s3 + $0x98] sm:$0xff] }
 0x677   : > { %v5210_v22 = vpop.f32.mrf.mxu0 }
 0x678   : > { %v5211_v26 = vadd.f32 %v12208_v20, %v5210_v22 }
 0x679   : > { %v5212_v62 = vpop.f32.mrf.mxu0 }
 0x67a   : > { %v5265_v39 = vmax.f32 %v5211_v26, 0.0  ;;  %v6771_v26 = vld [vmem:[%s13187_s3 + $0x18] sm:$0xff]  ;;  %v6786_v62 = vld [vmem:[%s13187_s3 + $0x90] sm:$0xff] }
 0x67c   : > { %5302 = vst.msk [vmem:[#allocation3 + $0xf0] sm:$0xff] %vm13383_vm3, %v5265_v39 }
 0x683   : > { %v12256_v46 = vld [vmem:[#allocation3 + $0xf0] sm:$0xff] }
 0x684   : > { %v5353_v10 = vmax.f32 %v5320_v63, %v12256_v46 }
 0x686   : > { %v5385_v12 = vmax.f32 %v5353_v10, %v12098_v57  ;;  %v6782_v57 = vld [vmem:[%s13187_s3 + $0x70] sm:$0xff] }
 0x687   : > { %8397 = vmatpush3.msra.mxu1 %v6782_v57 }
 0x688   : > { %5410 = vst.msk [vmem:[#allocation4 + $0x91] sm:$0xff] %vm13384_vm10, %v5385_v12  ;;  %8398 = vmatprep.subr.mxu1 %v6797_v21  ;;  %v6770_v12 = vld [vmem:[%s13187_s3 + $0x10] sm:$0xff]  ;;  %v6768_v21 = vld [vmem:[%s13187_s3] sm:$0xff] }
 0x689   : > { %8399 = vmatpush3.msra.mxu1 %v6781_v52 }
 0x68a   : > { %8400 = vmatprep.subr.mxu1 %v6796_v50 }
 0x68b   : > { %8401 = vmatpush3.msra.mxu1 %v6780_v55 }
 0x68c   : > { %8402 = vmatprep.subr.mxu1 %v6795_v3 }
 0x68d   : > { %8403 = vmatpush3.msra.mxu1 %v6779_v1 }
 0x68e   : > { %8404 = vmatprep.subr.mxu1 %v6794_v29 }
 0x68f   : > { %8405 = vmatpush3.msra.mxu1 %v6778_v28 }
 0x690   : > { %8406 = vmatprep.subr.mxu1 %v6793_v60 }
 0x691   : > { %8407 = vmatpush3.msra.mxu1 %v6777_v37 }
 0x692   : > { %8408 = vmatprep.subr.mxu1 %v6792_v9 }
 0x693   : > { %8409 = vmatpush3.msra.mxu1 %v6776_v14 }
 0x694   : > { %8410 = vmatprep.subr.mxu1 %v6791_v5 }
 0x695   : > { %8411 = vmatpush3.msra.mxu1 %v6775_v25 }
 0x696   : > { %8412 = vmatprep.subr.mxu1 %v6790_v44 }
 0x697   : > { %v5215_v58 = vpop.f32.mrf.mxu0  ;;  %8413 = vmatpush3.msra.mxu1 %v6774_v40 }
 0x698   : > { %v5216_v42 = vadd.f32 %v12208_v20, %v5215_v58  ;;  %8414 = vmatprep.subr.mxu1 %v6789_v47 }
 0x699   : > { %v5217_v17 = vpop.f32.mrf.mxu0  ;;  %8415 = vmatpush3.msra.mxu1 %v6773_v4 }
 0x69a   : > { %v5266_v51 = vmax.f32 %v5216_v42, 0.0  ;;  %8416 = vmatprep.subr.mxu1 %v6788_v54 }
 0x69b   : > { %8417 = vmatpush3.msra.mxu1 %v6772_v36 }
 0x69c   : > { %5303 = vst.msk [vmem:[#allocation3 + $0xf8] sm:$0xff] %vm13385_vm4, %v5266_v51  ;;  %8418 = vmatprep.subr.mxu1 %v6787_v7  ;;  %vm13393_vm4 = vmmov %vm13368_vm0 }
 0x69d   : > { %8419 = vmatpush3.msra.mxu1 %v6771_v26 }
 0x69e   : > { %8420 = vmatprep.subr.mxu1 %v6786_v62 }
 0x69f   : > { %8421 = vmatpush3.msra.mxu1 %v6770_v12 }
 0x6a0   : > { %8422 = vmatprep.subr.mxu1 %v6785_v32 }
 0x6a3   : > { %v5933_v56 = vpop.permute.xlu0 %5932  ;;  %v12335_v35 = vld [vmem:[#allocation3 + $0xf8] sm:$0xff] }
 0x6a4   : > { %v5771_v43 = vpop.permute.xlu1 %5770  ;;  %5953 = vst.msk [vmem:[#allocation6 + $0xb0] sm:$0xff] %vm5786_vm7, %v5933_v56  ;;  %v5354_v22 = vmax.f32 %v5321_v48, %v12335_v35 }
 0x6a5   : > { %5791 = vst.msk [vmem:[#allocation6 + $0xe0] sm:$0xff] %vm5786_vm7, %v5771_v43 }
 0x6a6   : > { %v5386_v39 = vmax.f32 %v5354_v22, %v12122_v41  ;;  %v6769_v41 = vld [vmem:[%s13187_s3 + $0x8] sm:$0xff] }
 0x6a7   : > { %v5981_v63 = vpop.permute.xlu0 %5980  ;;  %8423 = vmatpush3.msra.mxu1 %v6769_v41 }
 0x6a8   : > { %6001 = vst.msk [vmem:[#allocation6 + $0xb0] sm:$0xff] %vm5835_vm15, %v5981_v63  ;;  %8424 = vmatprep.subr.mxu1 %v6784_v30 }
 0x6a9   : > { %5411 = vst.msk [vmem:[#allocation4 + $0x99] sm:$0xff] %vm13386_vm5, %v5386_v39  ;;  %8425 = vmatpush3.msra.mxu1 %v6768_v21  ;;  %vm13394_vm5 = vmmov %vm13368_vm0 }
 0x6ab   : > { %v5820_v10 = vpop.permute.xlu1 %5819  ;;  %v6029_v18 = vpop.permute.xlu0 %6028 }
 0x6ac   : > { %5840 = vst.msk [vmem:[#allocation6 + $0xe0] sm:$0xff] %vm5835_vm15, %v5820_v10 }
 0x6ad   : > { %6049 = vst.msk [vmem:[#allocation6 + $0xb0] sm:$0xff] %vm5884_vm8, %v6029_v18 }
 0x6af   : > { %v5869_v57 = vpop.permute.xlu1 %5868  ;;  %v5935_v52 = vpop.permute.xlu0 %5934 }
 0x6b0   : > { %5889 = vst.msk [vmem:[#allocation6 + $0xe0] sm:$0xff] %vm5884_vm8, %v5869_v57  ;;  %v5426_v55 = vld [vmem:[#allocation4 + $0x90] ss:$2 sm:$0xff]  ;;  %v5442_v3 = vld [vmem:[#allocation4 + $0x91] ss:$2 sm:$0xff] }
 0x6b1   : > { %5954 = vst.msk [vmem:[#allocation6 + $0xe8] sm:$0xff] %vm5786_vm7, %v5935_v52  ;;  %v5467_v1 = vmax.f32 %v5426_v55, %v5442_v3  ;;  %v5458_v58 = vld [vmem:[#allocation4 + $0x92] ss:$2 sm:$0xff] }
 0x6b3   : > { %v5773_v50 = vpop.permute.xlu1 %5772  ;;  %v5983_v29 = vpop.permute.xlu0 %5982  ;;  %v12372_v28 = vmax.f32 %v5467_v1, %v5458_v58 }
 0x6b4   : > { %5792 = vst.msk [vmem:[#allocation6 + $0x118] sm:$0xff] %vm5786_vm7, %v5773_v50 }
 0x6b5   : > { %6002 = vst.msk [vmem:[#allocation6 + $0xe8] sm:$0xff] %vm5835_vm15, %v5983_v29  ;;  %v5483_v17 = vmul.f32 %v12372_v28, %v12372_v28 }
 0x6b7   : > { %v5822_v42 = vpop.permute.xlu1 %5821  ;;  %v6031_v60 = vpop.permute.xlu0 %6030  ;;  %8603 = vmatprep.mubr.msk.f32.mxu1 %vm13387_vm12, %v5483_v17  ;;  %vm13395_vm12 = vmmov %vm13368_vm0 }
 0x6b8   : > { %5841 = vst.msk [vmem:[#allocation6 + $0x118] sm:$0xff] %vm5835_vm15, %v5822_v42  ;;  %v5220_v9 = vpop.f32.mrf.mxu0 }
 0x6b9   : > { %6050 = vst.msk [vmem:[#allocation6 + $0xe8] sm:$0xff] %vm5884_vm8, %v6031_v60  ;;  %v5221_v51 = vadd.f32 %v12208_v20, %v5220_v9 }
 0x6ba   : > { %v5222_v14 = vpop.f32.mrf.mxu0 }
 0x6bb   : > { %v5871_v37 = vpop.permute.xlu1 %5870  ;;  %v5267_v5 = vmax.f32 %v5221_v51, 0.0 }
 0x6bc   : > { %5890 = vst.msk [vmem:[#allocation6 + $0x118] sm:$0xff] %vm5884_vm8, %v5871_v37 }
 0x6bd   : > { %5304 = vst.msk [vmem:[#allocation3 + $0x100] sm:$0xff] %vm13388_vm2, %v5267_v5  ;;  %vm13396_vm2 = vmmov %vm13368_vm0 }
 0x6c4   : > { %v5322_v26 = vld [vmem:[#allocation3 + $0x100] sm:$0xff] }
 0x6d7   : > { %v5225_v25 = vpop.f32.mrf.mxu0 }
 0x6d8   : > { %v5226_v44 = vadd.f32 %v12208_v20, %v5225_v25 }
 0x6d9   : > { %v5227_v40 = vpop.f32.mrf.mxu0 }
 0x6da   : > { %v5268_v47 = vmax.f32 %v5226_v44, 0.0 }
 0x6dc   : > { %5305 = vst.msk [vmem:[#allocation3 + $0x108] sm:$0xff] %vm13389_vm14, %v5268_v47  ;;  %vm13397_vm14 = vmmov %vm13368_vm0 }
 0x6e3   : > { %v5323_v57 = vld [vmem:[#allocation3 + $0x108] sm:$0xff] }
 0x6fb   : > { %v8602_v4 = vpop.f32.mrf.mxu1 }
 0x6fc   : > { %v5230_v54 = vpop.f32.mrf.mxu0  ;;  %v5601_v56 = vadd.f32 1.0, %v8602_v4  ;;  %v6713_v4 = vld [vmem:[#allocation6 + $0x8] sm:$0xff] }
 0x6fd   : > { %v5231_v43 = vadd.f32 %v12208_v20, %v5230_v54  ;;  %v5595_v36 = vpop.f32.mrf.mxu1 }
 0x6fe   : > { %v5232_v48 = vpop.f32.mrf.mxu0  ;;  %8687 = vrsqrt.f32 %v5601_v56  ;;  %v5596_v22 = vadd.f32 1.0, %v5595_v36 }
 0x6ff   : > { %v5269_v7 = vmax.f32 %v5231_v43, 0.0  ;;  %v6712_v48 = vld [vmem:[#allocation6] sm:$0xff] }
 0x700   : > { %8689 = vrsqrt.f32 %v5596_v22 }
 0x701   : > { %5306 = vst.msk [vmem:[#allocation3 + $0x110] sm:$0xff] %vm13390_vm9, %v5269_v7  ;;  %vm13398_vm9 = vmmov %vm13368_vm0 }
 0x708   : > { %v5339_v62 = vld [vmem:[#allocation3 + $0x110] sm:$0xff] }
 0x709   : > { %v5355_v39 = vmax.f32 %v5322_v26, %v5339_v62 }
 0x70b   : > { %v5387_v63 = vmax.f32 %v5355_v39, %v12256_v46  ;;  %v8688_v10 = vpop.eup %8687 }
 0x70c   : > { %8691 = vrsqrt.f32 %v8688_v10  ;;  %vm5659_vm13 = vcmp.eq.f32.partialorder %v8688_v10, inf  ;;  %v5662_v1 = vand.u32 2147483648, %v8688_v10  ;;  %vm5661_vm1 = vcmp.eq.f32.partialorder %v8688_v10, 0.0 }
 0x70d   : > { %5412 = vst.msk [vmem:[#allocation4 + $0xa9] sm:$0xff] %vm13368_vm0, %v5387_v63  ;;  %v8690_v32 = vpop.eup %8689 }
 0x70e   : > { %8693 = vrsqrt.f32 %v8690_v32  ;;  %vm5652_vm3 = vcmp.eq.f32.partialorder %v8690_v32, inf  ;;  %vm5654_vm10 = vcmp.eq.f32.partialorder %v8690_v32, 0.0 }
 0x70f   : > { %v5235_v12 = vpop.f32.mrf.mxu0 }
 0x710   : > { %v5236_v41 = vadd.f32 %v12208_v20, %v5235_v12  ;;  %v5655_v20 = vand.u32 2147483648, %v8690_v32 }
 0x711   : > { %v5237_v30 = vpop.f32.mrf.mxu0 }
 0x712   : > { %v5270_v18 = vmax.f32 %v5236_v41, 0.0  ;;  %v6720_v30 = vld [vmem:[#allocation6 + $0x40] sm:$0xff] }
 0x714   : > { %5307 = vst.msk [vmem:[#allocation3 + $0x118] sm:$0xff] %vm13391_vm6, %v5270_v18  ;;  %vm13399_vm6 = vmmov %vm13368_vm0  ;;  %v6719_v18 = vld [vmem:[#allocation6 + $0x38] sm:$0xff] }
 0x719   : > { %v8692_v52 = vpop.eup %8691 }
 0x71a   : > { %v5658_v55 = vmul.f32 %v8692_v52, %v8688_v10  ;;  %v6726_v52 = vld [vmem:[#allocation6 + $0x70] sm:$0xff] }
 0x71b   : > { %v5340_v21 = vld [vmem:[#allocation3 + $0x118] sm:$0xff]  ;;  %v8694_v3 = vpop.eup %8693 }
 0x71c   : > { %v5356_v50 = vmax.f32 %v5323_v57, %v5340_v21  ;;  %v5651_v58 = vmul.f32 %v8694_v3, %v8690_v32  ;;  %v5660_v29 = vsel %vm5659_vm13, %v8688_v10, %v5658_v55  ;;  %vm13400_vm13 = vmmov %vm13368_vm0  ;;  %v6054_v57 = vld [vmem:[#allocation5 + $0x13] sm:$0xff]  ;;  %v6733_v3 = vld [vmem:[#allocation6 + $0xa8] sm:$0xff] }
 0x71d   : > { %v5663_v42 = vsel %vm5661_vm1, %v5662_v1, %v5660_v29  ;;  %vm13401_vm1 = vmmov %vm13368_vm0  ;;  %v6727_v21 = vld [vmem:[#allocation6 + $0x78] sm:$0xff]  ;;  %v6734_v55 = vld [vmem:[#allocation6 + $0xb0] sm:$0xff] }
 0x71e   : > { %v5388_v46 = vmax.f32 %v5356_v50, %v12335_v35  ;;  %v5653_v17 = vsel %vm5652_vm3, %v8690_v32, %v5651_v58  ;;  %v5683_v60 = vmul.f32 %v8688_v10, %v5663_v42  ;;  %vm13403_vm3 = vmmov %vm13368_vm0  ;;  %v6741_v1 = vld [vmem:[#allocation6 + $0xe8] sm:$0xff]  ;;  %v6740_v58 = vld [vmem:[#allocation6 + $0xe0] sm:$0xff] }
 0x71f   : > { %v5656_v37 = vsel %vm5654_vm10, %v5655_v20, %v5653_v17  ;;  %vm13404_vm10 = vmmov %vm13368_vm0  ;;  %v6118_v29 = vld [vmem:[#allocation5 + $0x20] sm:$0xff]  ;;  %v8741_v42 = vld [vmem:[#allocation5 + $0x31] sm:$0xff] }
 0x720   : > { %5413 = vst.msk [vmem:[#allocation4 + $0xb1] sm:$0xff] %vm13392_vm11, %v5388_v46  ;;  %v5682_v9 = vmul.f32 %v8690_v32, %v5656_v37  ;;  %v5691_v51 = vmul.f32 %v5683_v60, %v12179_v38  ;;  %vm13402_vm11 = vmmov %vm13368_vm0  ;;  %v6166_v20 = vld [vmem:[#allocation5 + $0x21] sm:$0xff] }
 0x722   : > { %v5690_v14 = vmul.f32 %v5682_v9, %v11986_v11  ;;  %5727 = vst.msk [vmem:[#allocation5 + $0x72] sm:$0xff] %vm13393_vm4, %v5691_v51  ;;  %vm13405_vm4 = vmmov %vm13368_vm0 }
 0x724   : > { %5726 = vst.msk [vmem:[#allocation5 + $0x62] sm:$0xff] %vm13394_vm5, %v5690_v14  ;;  %vm13406_vm5 = vmmov %vm13368_vm0  ;;  %v6747_v14 = vld [vmem:[#allocation6 + $0x118] sm:$0xff] }
 0x727   : > { %v5428_v35 = vld [vmem:[#allocation4 + $0xa8] ss:$2 sm:$0xff]  ;;  %v5444_v5 = vld [vmem:[#allocation4 + $0xa9] ss:$2 sm:$0xff] }
 0x728   : > { %v5468_v25 = vmax.f32 %v5428_v35, %v5444_v5  ;;  %v5460_v44 = vld [vmem:[#allocation4 + $0xaa] ss:$2 sm:$0xff] }
 0x729   : > { %v12401_v54 = vld [vmem:[#allocation5 + $0x70] sm:$0xff] }
 0x72a   : > { %v12397_v40 = vmax.f32 %v5468_v25, %v5460_v44  ;;  %v12403_v56 = vld [vmem:[#allocation5 + $0x73] sm:$0xff]  ;;  %5745 = vst.msk [vmem:[#allocation6 + $0x188] sm:$0xff] %vm13395_vm12, %v12401_v54  ;;  %vm13407_vm12 = vmmov %vm13368_vm0 }
 0x72b   : > { %v12405_v38 = vld [vmem:[#allocation5 + $0x74] sm:$0xff]  ;;  %v12410_v43 = vld [vmem:[#allocation5 + $0x60] sm:$0xff]  ;;  %6068 = vst.msk [vmem:[#allocation6 + $0x160] sm:$0xff] %vm13397_vm14, %v12403_v56  ;;  %vm13409_vm14 = vmmov %vm13368_vm0 }
 0x72c   : > { %v5484_v47 = vmul.f32 %v12397_v40, %v12397_v40  ;;  %v6379_v11 = vld [vmem:[#allocation5 + $0x71] sm:$0xff]  ;;  %v12412_v36 = vld [vmem:[#allocation5 + $0x61] sm:$0xff]  ;;  %5908 = vst.msk [vmem:[#allocation6 + $0x190] sm:$0xff] %vm13398_vm9, %v12405_v38  ;;  %5936 = vrot.lane.b32.xlu0 %v12410_v43, %s8757_s30  ;;  %vm13410_vm9 = vmmov %vm13368_vm0 }
 0x72d   : > { %6387 = vst.msk [vmem:[#allocation6 + $0x100] sm:$0xff] %vm13368_vm0, %v6379_v11  ;;  %5774 = vrot.lane.b32.xlu1 %v12412_v36, %s8757_s30  ;;  %v12423_v7 = vld [vmem:[#allocation5 + $0x63] sm:$0xff]  ;;  %v6219_v39 = vld [vmem:[#allocation5 + $0x72] sm:$0xff] }
 0x72e   : > { %8604 = vmatmul.mubr.msk.f32.gmra.mxu1 %vm13396_vm2, %v5484_v47  ;;  %v12425_v22 = vld [vmem:[#allocation5 + $0x64] sm:$0xff]  ;;  %5744 = vst.msk [vmem:[#allocation6 + $0x150] sm:$0xff] %vm13399_vm6, %v12410_v43  ;;  %v6539_v10 = vld [vmem:[#allocation5 + $0x70] sm:$0xff]  ;;  %vm13408_vm2 = vmmov %vm13368_vm0 }
 0x72f   : > { %v6378_v26 = vld [vmem:[#allocation5 + $0x61] sm:$0xff]  ;;  %6962 = vmatprep.mubr.f32.mxu1 %v6713_v4  ;;  %5907 = vst.msk [vmem:[#allocation6 + $0x158] sm:$0xff] %vm13400_vm13, %v12425_v22  ;;  %v6699_v32 = vld [vmem:[#allocation5 + $0x74] sm:$0xff] }
 0x730   : > { %6067 = vst.msk [vmem:[#allocation6 + $0x128] sm:$0xff] %vm13401_vm1, %v12423_v7  ;;  %v6218_v62 = vld [vmem:[#allocation5 + $0x62] sm:$0xff]  ;;  %5984 = vrot.lane.b32.xlu0 %v12412_v36, %s8761_s10  ;;  %v12451_v50 = vld [vmem:[#allocation5 + $0x71] sm:$0xff] }
 0x731   : > { %6386 = vst.msk [vmem:[#allocation6 + $0xc8] sm:$0xff] %vm13402_vm11, %v6378_v26  ;;  %v6538_v63 = vld [vmem:[#allocation5 + $0x60] sm:$0xff]  ;;  %v12457_v46 = vld [vmem:[#allocation5 + $0x72] sm:$0xff]  ;;  %vm13411_vm11 = vmmov %vm13408_vm2 }
 0x732   : > { %6226 = vst.msk [vmem:[#allocation6 + $0xf8] sm:$0xff] %vm13403_vm3, %v6218_v62  ;;  %v6698_v12 = vld [vmem:[#allocation5 + $0x64] sm:$0xff]  ;;  %6963 = vmatmul.mubr.f32.vlgmr.msra.gmra.mxu1 %v6712_v48  ;;  %vm13412_vm3 = vmmov %vm13408_vm2 }
 0x733   : > { %6227 = vst.msk [vmem:[#allocation6 + $0x130] sm:$0xff] %vm13404_vm10, %v6219_v39  ;;  %v12437_v41 = vld [vmem:[#allocation5 + $0x62] sm:$0xff]  ;;  %6967 = vmatprep.mubr.f32.mxu1 %v6720_v30  ;;  %vm13413_vm10 = vmmov %vm13408_vm2 }
 0x734   : > { %6546 = vst.msk [vmem:[#allocation6 + $0x98] sm:$0xff] %vm13405_vm4, %v6538_v63  ;;  %5823 = vrot.lane.b32.xlu1 %v12437_v41, %s8761_s10  ;;  %6032 = vrot.lane.b32.xlu0 %v12437_v41, %s8766_s16  ;;  %vm13414_vm4 = vmmov %vm13408_vm2 }
 0x735   : > { %6547 = vst.msk [vmem:[#allocation6 + $0xd0] sm:$0xff] %vm13406_vm5, %v6539_v10  ;;  %vm13415_vm5 = vmmov %vm13408_vm2 }
 0x736   : > { %6706 = vst.msk [vmem:[#allocation6 + $0xa0] sm:$0xff] %vm13407_vm12, %v6698_v12  ;;  %6968 = vmatmul.mubr.f32.gmra.mxu1 %v6719_v18  ;;  %vm13416_vm12 = vmmov %vm13408_vm2 }
 0x737   : > { %6707 = vst.msk [vmem:[#allocation6 + $0xd8] sm:$0xff] %vm13408_vm2, %v6699_v32  ;;  %6972 = vmatprep.mubr.f32.mxu1 %v6727_v21 }
 0x738   : > { %5872 = vrot.lane.b32.xlu1 %v12423_v7, %s8766_s16  ;;  %6062 = vst.msk [vmem:[#allocation6 + $0x10] sm:$0xff] %vm13409_vm14, %v6054_v57  ;;  %5938 = vrot.lane.b32.xlu0 %v12401_v54, %s8757_s30  ;;  %vm13417_vm14 = vmmov %vm13408_vm2 }
 0x73a   : > { %6973 = vmatmul.mubr.f32.gmra.mxu1 %v6726_v52 }
 0x73b   : > { %6977 = vmatprep.mubr.f32.mxu1 %v6734_v55 }
 0x73c   : > { %5776 = vrot.lane.b32.xlu1 %v12451_v50, %s8757_s30  ;;  %5986 = vrot.lane.b32.xlu0 %v12451_v50, %s8761_s10 }
 0x73e   : > { %6978 = vmatmul.mubr.f32.gmra.mxu1 %v6733_v3 }
 0x73f   : > { %6982 = vmatprep.mubr.f32.mxu1 %v6741_v1 }
 0x740   : > { %5825 = vrot.lane.b32.xlu1 %v12457_v46, %s8761_s10  ;;  %6034 = vrot.lane.b32.xlu0 %v12457_v46, %s8766_s16 }
 0x742   : > { %6983 = vmatmul.mubr.f32.gmra.mxu1 %v6740_v58 }
 0x744   : > { %5874 = vrot.lane.b32.xlu1 %v12403_v56, %s8766_s16 }
 0x748   : > { %6086 = vrot.lane.b32.xlu1 %v12040_v33, %s8757_s30 }
 0x74c   : > { %6134 = vrot.lane.b32.xlu1 %v6118_v29, %s8761_s10 }
 0x750   : > { %6182 = vrot.lane.b32.xlu1 %v6166_v20, %s8766_s16 }
 0x754   : > { %6088 = vrot.lane.b32.xlu1 %v11761_v27, %s8757_s30 }
 0x758   : > { %6136 = vrot.lane.b32.xlu1 %v11734_v15, %s8761_s10 }
 0x75c   : > { %6184 = vrot.lane.b32.xlu1 %v8741_v42, %s8766_s16 }
 0x760   : > { %6090 = vrot.lane.b32.xlu1 %v11739_v19, %s8757_s30 }
 0x764   : > { %6138 = vrot.lane.b32.xlu1 %v12149_v53, %s8761_s10 }
 0x768   : > { %6186 = vrot.lane.b32.xlu1 %v12151_v6, %s8766_s16 }
 0x76c   : > { %6092 = vrot.lane.b32.xlu1 %v12165_v49, %s8757_s30 }
 0x770   : > { %6140 = vrot.lane.b32.xlu1 %v12137_v61, %s8761_s10 }
 0x774   : > { %6188 = vrot.lane.b32.xlu1 %v12215_v59, %s8766_s16 }
 0x778   : > { %6094 = vrot.lane.b32.xlu1 %v12143_v8, %s8757_s30 }
 0x77c   : > { %6142 = vrot.lane.b32.xlu1 %v12410_v43, %s8761_s10 }
 0x780   : > { %6190 = vrot.lane.b32.xlu1 %v12412_v36, %s8766_s16 }
 0x784   : > { %6096 = vrot.lane.b32.xlu1 %v12425_v22, %s8757_s30 }
 0x788   : > { %6144 = vrot.lane.b32.xlu1 %v12401_v54, %s8761_s10 }
 0x78c   : > { %6192 = vrot.lane.b32.xlu1 %v12451_v50, %s8766_s16 }
 0x790   : > { %6098 = vrot.lane.b32.xlu1 %v12405_v38, %s8757_s30 }
 0x79e   : > { %v5937_v15 = vpop.permute.xlu0 %5936 }
 0x79f   : > { %v5775_v33 = vpop.permute.xlu1 %5774  ;;  %5955 = vst.msk [vmem:[#allocation6 + $0x120] sm:$0xff] %vm5786_vm7, %v5937_v15 }
 0x7a0   : > { %5793 = vst.msk [vmem:[#allocation6 + $0x150] sm:$0xff] %vm5786_vm7, %v5775_v33 }
 0x7a2   : > { %v5985_v61 = vpop.permute.xlu0 %5984 }
 0x7a3   : > { %6003 = vst.msk [vmem:[#allocation6 + $0x120] sm:$0xff] %vm5835_vm15, %v5985_v61 }
 0x7a6   : > { %v5824_v53 = vpop.permute.xlu1 %5823  ;;  %v6033_v6 = vpop.permute.xlu0 %6032 }
 0x7a7   : > { %5842 = vst.msk [vmem:[#allocation6 + $0x150] sm:$0xff] %vm5835_vm15, %v5824_v53 }
 0x7a8   : > { %6051 = vst.msk [vmem:[#allocation6 + $0x120] sm:$0xff] %vm5884_vm8, %v6033_v6 }
 0x7aa   : > { %v5873_v59 = vpop.permute.xlu1 %5872  ;;  %v5939_v17 = vpop.permute.xlu0 %5938 }
 0x7ab   : > { %5891 = vst.msk [vmem:[#allocation6 + $0x150] sm:$0xff] %vm5884_vm8, %v5873_v59 }
 0x7ac   : > { %5956 = vst.msk [vmem:[#allocation6 + $0x158] sm:$0xff] %vm5786_vm7, %v5939_v17 }
 0x7ae   : > { %v5777_v60 = vpop.permute.xlu1 %5776  ;;  %v5987_v37 = vpop.permute.xlu0 %5986 }
 0x7af   : > { %5794 = vst.msk [vmem:[#allocation6 + $0x188] sm:$0xff] %vm5786_vm7, %v5777_v60  ;;  %v6748_v51 = vld [vmem:[#allocation6 + $0x120] sm:$0xff] }
 0x7b0   : > { %6004 = vst.msk [vmem:[#allocation6 + $0x158] sm:$0xff] %vm5835_vm15, %v5987_v37  ;;  %6987 = vmatprep.mubr.f32.mxu1 %v6748_v51 }
 0x7b1   : > { %6988 = vmatmul.mubr.f32.gmra.mxu1 %v6747_v14 }
 0x7b2   : > { %v5826_v9 = vpop.permute.xlu1 %5825  ;;  %v6035_v35 = vpop.permute.xlu0 %6034  ;;  %v6754_v4 = vld [vmem:[#allocation6 + $0x150] sm:$0xff] }
 0x7b3   : > { %5843 = vst.msk [vmem:[#allocation6 + $0x188] sm:$0xff] %vm5835_vm15, %v5826_v9 }
 0x7b4   : > { %6052 = vst.msk [vmem:[#allocation6 + $0x158] sm:$0xff] %vm5884_vm8, %v6035_v35 }
 0x7b6   : > { %v5875_v5 = vpop.permute.xlu1 %5874 }
 0x7b7   : > { %5892 = vst.msk [vmem:[#allocation6 + $0x188] sm:$0xff] %vm5884_vm8, %v5875_v5 }
 0x7ba   : > { %v6087_v25 = vpop.permute.xlu1 %6086 }
 0x7bb   : > { %6110 = vst.msk [vmem:[#allocation6 + $0x10] sm:$0xff] %vm5786_vm7, %v6087_v25  ;;  %v6755_v47 = vld [vmem:[#allocation6 + $0x158] sm:$0xff]  ;;  %v12541_v25 = vld [vmem:[#allocation5 + $0xa0] sm:$0xff] }
 0x7bc   : > { %6992 = vmatprep.mubr.f32.mxu1 %v6755_v47  ;;  %6550 = vst.msk [vmem:[#allocation6 + $0x178] sm:$0xff] %vm13410_vm9, %v12541_v25  ;;  %vm13418_vm9 = vmmov %vm13408_vm2 }
 0x7bd   : > { %6993 = vmatmul.mubr.f32.gmra.mxu1 %v6754_v4 }
 0x7be   : > { %v6135_v44 = vpop.permute.xlu1 %6134 }
 0x7bf   : > { %6158 = vst.msk [vmem:[#allocation6 + $0x10] sm:$0xff] %vm5835_vm15, %v6135_v44  ;;  %v6831_v44 = vld [vmem:[%s13187_s3 + $0x1f8] sm:$0xff] }
 0x7c0   : > { %8450 = vmatprep.subr.mxu1 %v6831_v44 }
 0x7c2   : > { %v6183_v11 = vpop.permute.xlu1 %6182 }
 0x7c3   : > { %6206 = vst.msk [vmem:[#allocation6 + $0x10] sm:$0xff] %vm5884_vm8, %v6183_v11 }
 0x7c6   : > { %v6089_v48 = vpop.permute.xlu1 %6088 }
 0x7c7   : > { %6111 = vst.msk [vmem:[#allocation6 + $0x48] sm:$0xff] %vm5786_vm7, %v6089_v48 }
 0x7ca   : > { %v6137_v26 = vpop.permute.xlu1 %6136 }
 0x7cb   : > { %6159 = vst.msk [vmem:[#allocation6 + $0x48] sm:$0xff] %vm5835_vm15, %v6137_v26 }
 0x7ce   : > { %v6185_v62 = vpop.permute.xlu1 %6184 }
 0x7cf   : > { %6207 = vst.msk [vmem:[#allocation6 + $0x48] sm:$0xff] %vm5884_vm8, %v6185_v62 }
 0x7d2   : > { %v6091_v39 = vpop.permute.xlu1 %6090 }
 0x7d3   : > { %6112 = vst.msk [vmem:[#allocation6 + $0x80] sm:$0xff] %vm5786_vm7, %v6091_v39  ;;  %v6815_v39 = vld [vmem:[%s13187_s3 + $0x178] sm:$0xff] }
 0x7d4   : > { %8451 = vmatpush3.msra.mxu1 %v6815_v39  ;;  %v6806_v39 = vld [vmem:[%s13187_s3 + $0x130] sm:$0xff] }
 0x7d6   : > { %v6139_v63 = vpop.permute.xlu1 %6138 }
 0x7d7   : > { %6160 = vst.msk [vmem:[#allocation6 + $0x80] sm:$0xff] %vm5835_vm15, %v6139_v63  ;;  %v6830_v63 = vld [vmem:[%s13187_s3 + $0x1f0] sm:$0xff] }
 0x7d8   : > { %8452 = vmatprep.subr.mxu1 %v6830_v63  ;;  %v6821_v63 = vld [vmem:[%s13187_s3 + $0x1a8] sm:$0xff] }
 0x7da   : > { %v6187_v10 = vpop.permute.xlu1 %6186 }
 0x7db   : > { %6208 = vst.msk [vmem:[#allocation6 + $0x80] sm:$0xff] %vm5884_vm8, %v6187_v10 }
 0x7de   : > { %v6093_v12 = vpop.permute.xlu1 %6092 }
 0x7df   : > { %6113 = vst.msk [vmem:[#allocation6 + $0xb8] sm:$0xff] %vm5786_vm7, %v6093_v12 }
 0x7e2   : > { %v6141_v32 = vpop.permute.xlu1 %6140 }
 0x7e3   : > { %6161 = vst.msk [vmem:[#allocation6 + $0xb8] sm:$0xff] %vm5835_vm15, %v6141_v32 }
 0x7e6   : > { %v6189_v30 = vpop.permute.xlu1 %6188 }
 0x7e7   : > { %6209 = vst.msk [vmem:[#allocation6 + $0xb8] sm:$0xff] %vm5884_vm8, %v6189_v30 }
 0x7ea   : > { %v6095_v18 = vpop.permute.xlu1 %6094 }
 0x7eb   : > { %6114 = vst.msk [vmem:[#allocation6 + $0xf0] sm:$0xff] %vm5786_vm7, %v6095_v18 }
 0x7ee   : > { %v6143_v57 = vpop.permute.xlu1 %6142  ;;  %v8605_v21 = vpop.f32.mrf.mxu1 }
 0x7ef   : > { %6162 = vst.msk [vmem:[#allocation6 + $0xf0] sm:$0xff] %vm5835_vm15, %v6143_v57  ;;  %v5611_v52 = vadd.f32 1.0, %v8605_v21  ;;  %v6814_v57 = vld [vmem:[%s13187_s3 + $0x170] sm:$0xff]  ;;  %v6829_v21 = vld [vmem:[%s13187_s3 + $0x1e8] sm:$0xff] }
 0x7f0   : > { %v5605_v55 = vpop.f32.mrf.mxu1  ;;  %8453 = vmatpush3.msra.mxu1 %v6814_v57 }
 0x7f1   : > { %8695 = vrsqrt.f32 %v5611_v52  ;;  %v5606_v3 = vadd.f32 1.0, %v5605_v55  ;;  %8454 = vmatprep.subr.mxu1 %v6829_v21  ;;  %v6803_v21 = vld [vmem:[%s13187_s3 + $0x118] sm:$0xff] }
 0x7f2   : > { %v6191_v1 = vpop.permute.xlu1 %6190  ;;  %v8426_v58 = vpop.f32.mrf.mxu1 }
 0x7f3   : > { %6210 = vst.msk [vmem:[#allocation6 + $0xf0] sm:$0xff] %vm5884_vm8, %v6191_v1  ;;  %8697 = vrsqrt.f32 %v5606_v3  ;;  %v6813_v3 = vld [vmem:[%s13187_s3 + $0x168] sm:$0xff]  ;;  %v6828_v1 = vld [vmem:[%s13187_s3 + $0x1e0] sm:$0xff] }
 0x7f4   : > { %v8427_v29 = vpop.f32.mrf.mxu1  ;;  %8455 = vmatpush3.msra.mxu1 %v6813_v3  ;;  %v6817_v3 = vld [vmem:[%s13187_s3 + $0x188] sm:$0xff] }
 0x7f5   : > { %v12529_v20 = vadd.f32 %v8427_v29, %v8426_v58  ;;  %8456 = vmatprep.subr.mxu1 %v6828_v1  ;;  %v6827_v29 = vld [vmem:[%s13187_s3 + $0x1d8] sm:$0xff]  ;;  %v6816_v1 = vld [vmem:[%s13187_s3 + $0x180] sm:$0xff] }
 0x7f6   : > { %v6097_v42 = vpop.permute.xlu1 %6096  ;;  %v8429_v15 = vpop.f32.mrf.mxu1 }
 0x7f7   : > { %6115 = vst.msk [vmem:[#allocation6 + $0x128] sm:$0xff] %vm5786_vm7, %v6097_v42  ;;  %v6811_v42 = vld [vmem:[%s13187_s3 + $0x158] sm:$0xff] }
 0x7f8   : > { %v8430_v33 = vpop.f32.mrf.mxu1 }
 0x7f9   : > { %v12532_v61 = vadd.f32 %v8430_v33, %v8429_v15  ;;  %v6810_v15 = vld [vmem:[%s13187_s3 + $0x150] sm:$0xff]  ;;  %v6825_v33 = vld [vmem:[%s13187_s3 + $0x1c8] sm:$0xff] }
 0x7fa   : > { %v6145_v53 = vpop.permute.xlu1 %6144  ;;  %v8432_v6 = vpop.f32.mrf.mxu1 }
 0x7fb   : > { %6163 = vst.msk [vmem:[#allocation6 + $0x128] sm:$0xff] %vm5835_vm15, %v6145_v53  ;;  %v6809_v53 = vld [vmem:[%s13187_s3 + $0x148] sm:$0xff] }
 0x7fc   : > { %v8433_v59 = vpop.f32.mrf.mxu1 }
 0x7fd   : > { %v12535_v60 = vadd.f32 %v8433_v59, %v8432_v6  ;;  %v6824_v6 = vld [vmem:[%s13187_s3 + $0x1c0] sm:$0xff] }
 0x7fe   : > { %v6193_v17 = vpop.permute.xlu1 %6192  ;;  %v8696_v37 = vpop.eup %8695 }
 0x7ff   : > { %6211 = vst.msk [vmem:[#allocation6 + $0x128] sm:$0xff] %vm5884_vm8, %v6193_v17  ;;  %v8435_v9 = vpop.f32.mrf.mxu1  ;;  %8699 = vrsqrt.f32 %v8696_v37  ;;  %vm5673_vm0 = vcmp.eq.f32.partialorder %v8696_v37, inf  ;;  %v5676_v48 = vand.u32 2147483648, %v8696_v37  ;;  %vm5675_vm6 = vcmp.eq.f32.partialorder %v8696_v37, 0.0 }
 0x800   : > { %v8698_v51 = vpop.eup %8697 }
 0x801   : > { %v8436_v14 = vpop.f32.mrf.mxu1  ;;  %8701 = vrsqrt.f32 %v8698_v51  ;;  %vm5666_vm13 = vcmp.eq.f32.partialorder %v8698_v51, inf  ;;  %v5669_v10 = vand.u32 2147483648, %v8698_v51  ;;  %vm5668_vm1 = vcmp.eq.f32.partialorder %v8698_v51, 0.0 }
 0x802   : > { %v6099_v35 = vpop.permute.xlu1 %6098  ;;  %v12538_v5 = vadd.f32 %v8436_v14, %v8435_v9 }
 0x803   : > { %6116 = vst.msk [vmem:[#allocation6 + $0x160] sm:$0xff] %vm5786_vm7, %v6099_v35 }
 0x80c   : > { %v8700_v47 = vpop.eup %8699 }
 0x80d   : > { %v5672_v4 = vmul.f32 %v8700_v47, %v8696_v37  ;;  %v6808_v47 = vld [vmem:[%s13187_s3 + $0x140] sm:$0xff] }
 0x80e   : > { %v8702_v11 = vpop.eup %8701 }
 0x80f   : > { %v5665_v26 = vmul.f32 %v8702_v11, %v8698_v51  ;;  %v5674_v62 = vsel %vm5673_vm0, %v8696_v37, %v5672_v4  ;;  %v6823_v4 = vld [vmem:[%s13187_s3 + $0x1b8] sm:$0xff]  ;;  %vm13419_vm0 = vmmov %vm13408_vm2 }
 0x810   : > { %v5677_v12 = vsel %vm5675_vm6, %v5676_v48, %v5674_v62  ;;  %v6807_v11 = vld [vmem:[%s13187_s3 + $0x138] sm:$0xff]  ;;  %v6822_v48 = vld [vmem:[%s13187_s3 + $0x1b0] sm:$0xff]  ;;  %vm13420_vm6 = vmmov %vm13419_vm0 }
 0x811   : > { %v5667_v32 = vsel %vm5666_vm13, %v8698_v51, %v5665_v26  ;;  %v5685_v30 = vmul.f32 %v8696_v37, %v5677_v12  ;;  %vm13421_vm13 = vmmov %vm13419_vm0 }
 0x812   : > { %v5670_v18 = vsel %vm5668_vm1, %v5669_v10, %v5667_v32  ;;  %v6805_v10 = vld [vmem:[%s13187_s3 + $0x128] sm:$0xff]  ;;  %v6820_v32 = vld [vmem:[%s13187_s3 + $0x1a0] sm:$0xff]  ;;  %vm13422_vm1 = vmmov %vm13419_vm0 }
 0x813   : > { %v5684_v52 = vmul.f32 %v8698_v51, %v5670_v18  ;;  %v5693_v55 = vmul.f32 %v5685_v30, %v12397_v40  ;;  %v6812_v40 = vld [vmem:[%s13187_s3 + $0x160] sm:$0xff]  ;;  %v6819_v18 = vld [vmem:[%s13187_s3 + $0x198] sm:$0xff] }
 0x814   : > { %8457 = vmatpush3.msra.mxu1 %v6812_v40  ;;  %v6804_v30 = vld [vmem:[%s13187_s3 + $0x120] sm:$0xff] }
 0x815   : > { %v5692_v58 = vmul.f32 %v5684_v52, %v12372_v28  ;;  %5729 = vst.msk [vmem:[#allocation5 + $0x92] sm:$0xff] %vm13411_vm11, %v5693_v55  ;;  %v6826_v28 = vld [vmem:[%s13187_s3 + $0x1d0] sm:$0xff]  ;;  %8458 = vmatprep.subr.mxu1 %v6827_v29  ;;  %v6800_v40 = vld [vmem:[%s13187_s3 + $0x100] sm:$0xff]  ;;  %vm13423_vm11 = vmmov %vm13419_vm0 }
 0x816   : > { %8459 = vmatpush3.msra.mxu1 %v6811_v42  ;;  %v6818_v52 = vld [vmem:[%s13187_s3 + $0x190] sm:$0xff]  ;;  %v12803_v29 = vld [vmem:[#allocation5 + $0xa3] sm:$0xff] }
 0x817   : > { %5728 = vst.msk [vmem:[#allocation5 + $0x82] sm:$0xff] %vm13412_vm3, %v5692_v58  ;;  %8460 = vmatprep.subr.mxu1 %v6826_v28  ;;  %v6802_v55 = vld [vmem:[%s13187_s3 + $0x110] sm:$0xff]  ;;  %vm13424_vm3 = vmmov %vm13419_vm0 }
 0x818   : > { %8461 = vmatpush3.msra.mxu1 %v6810_v15  ;;  %v6327_v58 = vld [vmem:[#allocation5 + $0x30] sm:$0xff] }
 0x819   : > { %8462 = vmatprep.subr.mxu1 %v6825_v33 }
 0x81a   : > { %8463 = vmatpush3.msra.mxu1 %v6809_v53 }
 0x81b   : > { %8464 = vmatprep.subr.mxu1 %v6824_v6 }
 0x81c   : > { %v12594_v59 = vld [vmem:[#allocation5 + $0x91] sm:$0xff]  ;;  %8465 = vmatpush3.msra.mxu1 %v6808_v47 }
 0x81d   : > { %v12596_v17 = vld [vmem:[#allocation5 + $0x92] sm:$0xff]  ;;  %6389 = vst.msk [vmem:[#allocation6 + $0x170] sm:$0xff] %vm13413_vm10, %v12594_v59  ;;  %8466 = vmatprep.subr.mxu1 %v6823_v4  ;;  %vm13428_vm10 = vmmov %vm13419_vm0 }
 0x81e   : > { %v12598_v37 = vld [vmem:[#allocation5 + $0x94] sm:$0xff]  ;;  %6229 = vst.msk [vmem:[#allocation6 + $0x1a0] sm:$0xff] %vm13414_vm4, %v12596_v17  ;;  %v12604_v51 = vld [vmem:[#allocation5 + $0x80] sm:$0xff]  ;;  %8467 = vmatpush3.msra.mxu1 %v6807_v11  ;;  %vm13429_vm4 = vmmov %vm13419_vm0 }
 0x81f   : > { %v6541_v9 = vld [vmem:[#allocation5 + $0x90] sm:$0xff]  ;;  %v12606_v14 = vld [vmem:[#allocation5 + $0x81] sm:$0xff]  ;;  %6709 = vst.msk [vmem:[#allocation6 + $0x148] sm:$0xff] %vm13416_vm12, %v12598_v37  ;;  %5940 = vrot.lane.b32.xlu0 %v12604_v51, %s8757_s30  ;;  %6146 = vrot.lane.b32.xlu1 %v12604_v51, %s8761_s10  ;;  %vm13431_vm12 = vmmov %vm13419_vm0 }
 0x820   : > { %v12608_v35 = vld [vmem:[#allocation5 + $0x82] sm:$0xff]  ;;  %6549 = vst.msk [vmem:[#allocation6 + $0x140] sm:$0xff] %vm13415_vm5, %v6541_v9  ;;  %8468 = vmatprep.subr.mxu1 %v6822_v48  ;;  %v12667_v57 = vld [vmem:[#allocation5 + $0x90] sm:$0xff]  ;;  %vm13430_vm5 = vmmov %vm13419_vm0 }
 0x821   : > { %v12617_v44 = vld [vmem:[#allocation5 + $0x83] sm:$0xff]  ;;  %6388 = vst.msk [vmem:[#allocation6 + $0x138] sm:$0xff] %vm13408_vm2, %v12606_v14  ;;  %8469 = vmatpush3.msra.mxu1 %v6806_v39  ;;  %vm13432_vm2 = vmmov %vm13419_vm0 }
 0x822   : > { %6228 = vst.msk [vmem:[#allocation6 + $0x168] sm:$0xff] %vm13417_vm14, %v12608_v35  ;;  %v6540_v26 = vld [vmem:[#allocation5 + $0x80] sm:$0xff]  ;;  %8470 = vmatprep.subr.mxu1 %v6821_v63  ;;  %v6761_v9 = vld [vmem:[#allocation6 + $0x188] sm:$0xff]  ;;  %vm13433_vm14 = vmmov %vm13419_vm0 }
 0x823   : > { %6069 = vst.msk [vmem:[#allocation6 + $0x198] sm:$0xff] %vm13418_vm9, %v12617_v44  ;;  %v6700_v62 = vld [vmem:[#allocation5 + $0x84] sm:$0xff]  ;;  %5988 = vrot.lane.b32.xlu0 %v12606_v14, %s8761_s10  ;;  %6194 = vrot.lane.b32.xlu1 %v12606_v14, %s8766_s16  ;;  %vm13434_vm9 = vmmov %vm13419_vm0 }
 0x824   : > { %6548 = vst.msk [vmem:[#allocation6 + $0x108] sm:$0xff] %vm13419_vm0, %v6540_v26  ;;  %v12652_v12 = vld [vmem:[#allocation5 + $0x84] sm:$0xff]  ;;  %8471 = vmatpush3.msra.mxu1 %v6805_v10  ;;  %v6847_v26 = vld [vmem:[%s13187_s3 + $0x278] sm:$0xff] }
 0x825   : > { %6708 = vst.msk [vmem:[#allocation6 + $0x110] sm:$0xff] %vm13420_vm6, %v6700_v62  ;;  %8472 = vmatprep.subr.mxu1 %v6820_v32  ;;  %v6862_v62 = vld [vmem:[%s13187_s3 + $0x2f0] sm:$0xff]  ;;  %v6861_v39 = vld [vmem:[%s13187_s3 + $0x2e8] sm:$0xff]  ;;  %v6844_v32 = vld [vmem:[%s13187_s3 + $0x260] sm:$0xff] }
 0x826   : > { %8473 = vmatpush3.msra.mxu1 %v6804_v30  ;;  %v6859_v30 = vld [vmem:[%s13187_s3 + $0x2d8] sm:$0xff]  ;;  %vm13435_vm6 = vmmov %vm13419_vm0 }
 0x827   : > { %6036 = vrot.lane.b32.xlu0 %v12608_v35, %s8766_s16  ;;  %6100 = vrot.lane.b32.xlu1 %v12652_v12, %s8757_s30 }
 0x828   : > { %8474 = vmatprep.subr.mxu1 %v6819_v18 }
 0x829   : > { %8475 = vmatpush3.msra.mxu1 %v6803_v21  ;;  %v6843_v21 = vld [vmem:[%s13187_s3 + $0x258] sm:$0xff] }
 0x82a   : > { %8476 = vmatprep.subr.mxu1 %v6818_v52  ;;  %v6842_v52 = vld [vmem:[%s13187_s3 + $0x250] sm:$0xff] }
 0x82b   : > { %6246 = vrot.lane.b32.xlu0 %v11767_v16, %s8757_s30  ;;  %6148 = vrot.lane.b32.xlu1 %v12667_v57, %s8761_s10  ;;  %v6801_v16 = vld [vmem:[%s13187_s3 + $0x108] sm:$0xff] }
 0x82c   : > { %8477 = vmatpush3.msra.mxu1 %v6802_v55 }
 0x82d   : > { %8478 = vmatprep.subr.mxu1 %v6817_v3 }
 0x82e   : > { %8479 = vmatpush3.msra.mxu1 %v6801_v16 }
 0x82f   : > { %6294 = vrot.lane.b32.xlu0 %v11761_v27, %s8761_s10  ;;  %6196 = vrot.lane.b32.xlu1 %v12594_v59, %s8766_s16  ;;  %v6232_v27 = vld [vmem:[#allocation5 + $0x43] sm:$0xff] }
 0x830   : > { %8480 = vmatprep.subr.mxu1 %v6816_v1  ;;  %v6857_v1 = vld [vmem:[%s13187_s3 + $0x2c8] sm:$0xff] }
 0x831   : > { %8481 = vmatpush3.msra.mxu1 %v6800_v40  ;;  %v6856_v40 = vld [vmem:[%s13187_s3 + $0x2c0] sm:$0xff] }
 0x833   : > { %6343 = vrot.lane.b32.xlu0 %v6327_v58, %s8766_s16  ;;  %6407 = vrot.lane.b32.xlu1 %v11771_v45, %s8757_s30  ;;  %v6494_v45 = vld [vmem:[#allocation5 + $0xa4] sm:$0xff] }
 0x834   : > { %6710 = vst.msk [vmem:[#allocation6 + $0x180] sm:$0xff] %vm13422_vm1, %v6494_v45  ;;  %v6841_v58 = vld [vmem:[%s13187_s3 + $0x248] sm:$0xff]  ;;  %vm13437_vm1 = vmmov %vm13419_vm0 }
 0x837   : > { %6248 = vrot.lane.b32.xlu0 %v11741_v13, %s8757_s30  ;;  %6455 = vrot.lane.b32.xlu1 %v11741_v13, %s8761_s10  ;;  %v12729_v13 = vld [vmem:[#allocation5 + $0xa1] sm:$0xff] }
 0x838   : > { %6390 = vst.msk [vmem:[#allocation6 + $0x1a8] sm:$0xff] %vm13421_vm13, %v12729_v13  ;;  %vm13436_vm13 = vmmov %vm13419_vm0 }
 0x83b   : > { %6296 = vrot.lane.b32.xlu0 %v11739_v19, %s8761_s10  ;;  %6503 = vrot.lane.b32.xlu1 %v11739_v19, %s8766_s16  ;;  %v12723_v19 = vld [vmem:[#allocation5 + $0x53] sm:$0xff] }
 0x83f   : > { %6345 = vrot.lane.b32.xlu0 %v12167_v24, %s8766_s16  ;;  %6409 = vrot.lane.b32.xlu1 %v12172_v23, %s8757_s30 }
 0x843   : > { %6250 = vrot.lane.b32.xlu0 %v6232_v27, %s8757_s30  ;;  %6457 = vrot.lane.b32.xlu1 %v6232_v27, %s8761_s10 }
 0x847   : > { %6298 = vrot.lane.b32.xlu0 %v12165_v49, %s8761_s10  ;;  %6505 = vrot.lane.b32.xlu1 %v12165_v49, %s8766_s16 }
 0x84b   : > { %6347 = vrot.lane.b32.xlu0 %v12145_v2, %s8766_s16  ;;  %6411 = vrot.lane.b32.xlu1 %v12181_v0, %s8757_s30  ;;  %v6863_v2 = vld [vmem:[%s13187_s3 + $0x2f8] sm:$0xff] }
 0x84c   : > { %8506 = vmatprep.subr.mxu1 %v6863_v2  ;;  %v6855_v2 = vld [vmem:[%s13187_s3 + $0x2b8] sm:$0xff] }
 0x84f   : > { %6252 = vrot.lane.b32.xlu0 %v12723_v19, %s8757_s30  ;;  %6459 = vrot.lane.b32.xlu1 %v12723_v19, %s8761_s10 }
 0x853   : > { %6300 = vrot.lane.b32.xlu0 %v12143_v8, %s8761_s10  ;;  %6507 = vrot.lane.b32.xlu1 %v12143_v8, %s8766_s16  ;;  %v12762_v8 = vpop.f32.mrf.mxu1 }
 0x855   : > { %v12771_v49 = vpop.f32.mrf.mxu1 }
 0x857   : > { %6349 = vrot.lane.b32.xlu0 %v12410_v43, %s8766_s16  ;;  %6413 = vrot.lane.b32.xlu1 %v12437_v41, %s8757_s30  ;;  %v12787_v43 = vld [vmem:[#allocation5 + $0x93] sm:$0xff] }
 0x85b   : > { %6254 = vrot.lane.b32.xlu0 %v12423_v7, %s8757_s30  ;;  %6461 = vrot.lane.b32.xlu1 %v12423_v7, %s8761_s10 }
 0x85f   : > { %6302 = vrot.lane.b32.xlu0 %v12425_v22, %s8761_s10  ;;  %6509 = vrot.lane.b32.xlu1 %v12425_v22, %s8766_s16  ;;  %v12797_v22 = vld [vmem:[#allocation5 + $0xa2] sm:$0xff] }
 0x863   : > { %6351 = vrot.lane.b32.xlu0 %v12401_v54, %s8766_s16  ;;  %6415 = vrot.lane.b32.xlu1 %v12457_v46, %s8757_s30 }
 0x867   : > { %6256 = vrot.lane.b32.xlu0 %v12403_v56, %s8757_s30  ;;  %6463 = vrot.lane.b32.xlu1 %v12403_v56, %s8761_s10 }
 0x86b   : > { %6304 = vrot.lane.b32.xlu0 %v12405_v38, %s8761_s10  ;;  %6511 = vrot.lane.b32.xlu1 %v12405_v38, %s8766_s16 }
 0x86f   : > { %6353 = vrot.lane.b32.xlu0 %v12604_v51, %s8766_s16  ;;  %6417 = vrot.lane.b32.xlu1 %v12608_v35, %s8757_s30 }
 0x871   : > { %v8441_v24 = vpop.f32.mrf.mxu1 }
 0x873   : > { %6258 = vrot.lane.b32.xlu0 %v12617_v44, %s8757_s30  ;;  %6465 = vrot.lane.b32.xlu1 %v12617_v44, %s8761_s10  ;;  %v8442_v54 = vpop.f32.mrf.mxu1 }
 0x874   : > { %v12777_v38 = vadd.f32 %v8442_v54, %v8441_v24  ;;  %v6854_v24 = vld [vmem:[%s13187_s3 + $0x2b0] sm:$0xff] }
 0x875   : > { %v6838_v54 = vld [vmem:[%s13187_s3 + $0x230] sm:$0xff] }
 0x877   : > { %6306 = vrot.lane.b32.xlu0 %v12652_v12, %s8761_s10  ;;  %6513 = vrot.lane.b32.xlu1 %v12652_v12, %s8766_s16  ;;  %v6845_v12 = vld [vmem:[%s13187_s3 + $0x268] sm:$0xff] }
 0x87b   : > { %6355 = vrot.lane.b32.xlu0 %v12667_v57, %s8766_s16  ;;  %6419 = vrot.lane.b32.xlu1 %v12596_v17, %s8757_s30 }
 0x87f   : > { %6260 = vrot.lane.b32.xlu0 %v12787_v43, %s8757_s30  ;;  %6467 = vrot.lane.b32.xlu1 %v12787_v43, %s8761_s10 }
 0x883   : > { %6308 = vrot.lane.b32.xlu0 %v12598_v37, %s8761_s10  ;;  %6515 = vrot.lane.b32.xlu1 %v12598_v37, %s8766_s16 }
 0x887   : > { %6357 = vrot.lane.b32.xlu0 %v12541_v25, %s8766_s16  ;;  %6421 = vrot.lane.b32.xlu1 %v12797_v22, %s8757_s30 }
 0x88b   : > { %6568 = vrot.lane.b32.xlu0 %v12183_v31, %s8757_s30  ;;  %6469 = vrot.lane.b32.xlu1 %v12803_v29, %s8761_s10 }
 0x88f   : > { %6616 = vrot.lane.b32.xlu0 %v12172_v23, %s8761_s10  ;;  %6517 = vrot.lane.b32.xlu1 %v6494_v45, %s8766_s16 }
 0x891   : > { %v5941_v42 = vpop.permute.xlu0 %5940  ;;  %v6147_v28 = vpop.permute.xlu1 %6146 }
 0x892   : > { %5957 = vst.msk [vmem:[#allocation6 + $0x190] sm:$0xff] %vm5786_vm7, %v5941_v42 }
 0x893   : > { %6164 = vst.msk [vmem:[#allocation6 + $0x160] sm:$0xff] %vm5835_vm15, %v6147_v28  ;;  %6664 = vrot.lane.b32.xlu0 %v6232_v27, %s8766_s16  ;;  %v6840_v27 = vld [vmem:[%s13187_s3 + $0x240] sm:$0xff] }
 0x895   : > { %v5989_v25 = vpop.permute.xlu0 %5988  ;;  %v6195_v15 = vpop.permute.xlu1 %6194 }
 0x896   : > { %6005 = vst.msk [vmem:[#allocation6 + $0x190] sm:$0xff] %vm5835_vm15, %v5989_v25  ;;  %v6853_v25 = vld [vmem:[%s13187_s3 + $0x2a8] sm:$0xff] }
 0x897   : > { %6212 = vst.msk [vmem:[#allocation6 + $0x160] sm:$0xff] %vm5884_vm8, %v6195_v15  ;;  %6570 = vrot.lane.b32.xlu0 %v12190_v34, %s8757_s30  ;;  %v6852_v15 = vld [vmem:[%s13187_s3 + $0x2a0] sm:$0xff] }
 0x899   : > { %v6037_v23 = vpop.permute.xlu0 %6036  ;;  %v6101_v31 = vpop.permute.xlu1 %6100 }
 0x89a   : > { %6053 = vst.msk [vmem:[#allocation6 + $0x190] sm:$0xff] %vm5884_vm8, %v6037_v23 }
 0x89b   : > { %6117 = vst.msk [vmem:[#allocation6 + $0x198] sm:$0xff] %vm5786_vm7, %v6101_v31  ;;  %6618 = vrot.lane.b32.xlu0 %v12181_v0, %s8761_s10 }
 0x89d   : > { %v6247_v33 = vpop.permute.xlu0 %6246  ;;  %v6149_v53 = vpop.permute.xlu1 %6148 }
 0x89e   : > { %6270 = vst.msk [vmem:[#allocation6 + $0x18] sm:$0xff] %vm5786_vm7, %v6247_v33 }
 0x89f   : > { %6165 = vst.msk [vmem:[#allocation6 + $0x198] sm:$0xff] %vm5835_vm15, %v6149_v53  ;;  %6666 = vrot.lane.b32.xlu0 %v12723_v19, %s8766_s16  ;;  %v6836_v53 = vld [vmem:[%s13187_s3 + $0x220] sm:$0xff] }
 0x8a1   : > { %v6295_v6 = vpop.permute.xlu0 %6294  ;;  %v6197_v34 = vpop.permute.xlu1 %6196  ;;  %v6762_v37 = vld [vmem:[#allocation6 + $0x190] sm:$0xff] }
 0x8a2   : > { %6318 = vst.msk [vmem:[#allocation6 + $0x18] sm:$0xff] %vm5835_vm15, %v6295_v6  ;;  %6997 = vmatprep.mubr.f32.mxu1 %v6762_v37  ;;  %v6851_v6 = vld [vmem:[%s13187_s3 + $0x298] sm:$0xff]  ;;  %v6850_v37 = vld [vmem:[%s13187_s3 + $0x290] sm:$0xff] }
 0x8a3   : > { %6213 = vst.msk [vmem:[#allocation6 + $0x198] sm:$0xff] %vm5884_vm8, %v6197_v34  ;;  %6572 = vrot.lane.b32.xlu0 %v12412_v36, %s8757_s30  ;;  %6998 = vmatmul.mubr.f32.gmra.mxu1 %v6761_v9  ;;  %v6835_v34 = vld [vmem:[%s13187_s3 + $0x218] sm:$0xff] }
 0x8a5   : > { %v6344_v0 = vpop.permute.xlu0 %6343  ;;  %v6408_v51 = vpop.permute.xlu1 %6407 }
 0x8a6   : > { %6367 = vst.msk [vmem:[#allocation6 + $0x18] sm:$0xff] %vm5884_vm8, %v6344_v0 }
 0x8a7   : > { %6431 = vst.msk [vmem:[#allocation6 + $0x20] sm:$0xff] %vm5786_vm7, %v6408_v51  ;;  %6620 = vrot.lane.b32.xlu0 %v12437_v41, %s8761_s10  ;;  %v6714_v41 = vld [vmem:[#allocation6 + $0x10] sm:$0xff] }
 0x8a8   : > { %v6834_v51 = vld [vmem:[%s13187_s3 + $0x210] sm:$0xff] }
 0x8a9   : > { %v6249_v47 = vpop.permute.xlu0 %6248  ;;  %v6456_v4 = vpop.permute.xlu1 %6455 }
 0x8aa   : > { %6271 = vst.msk [vmem:[#allocation6 + $0x50] sm:$0xff] %vm5786_vm7, %v6249_v47  ;;  %v6833_v47 = vld [vmem:[%s13187_s3 + $0x208] sm:$0xff] }
 0x8ab   : > { %6479 = vst.msk [vmem:[#allocation6 + $0x20] sm:$0xff] %vm5835_vm15, %v6456_v4  ;;  %6668 = vrot.lane.b32.xlu0 %v12423_v7, %s8766_s16  ;;  %v6846_v7 = vld [vmem:[%s13187_s3 + $0x270] sm:$0xff]  ;;  %v6848_v4 = vld [vmem:[%s13187_s3 + $0x280] sm:$0xff] }
 0x8ad   : > { %v6297_v36 = vpop.permute.xlu0 %6296  ;;  %v6504_v11 = vpop.permute.xlu1 %6503  ;;  %v6715_v48 = vld [vmem:[#allocation6 + $0x18] sm:$0xff] }
 0x8ae   : > { %6319 = vst.msk [vmem:[#allocation6 + $0x50] sm:$0xff] %vm5835_vm15, %v6297_v36  ;;  %7067 = vmatprep.mubr.f32.mxu1 %v6715_v48  ;;  %v6832_v48 = vld [vmem:[%s13187_s3 + $0x200] sm:$0xff] }
 0x8af   : > { %6527 = vst.msk [vmem:[#allocation6 + $0x20] sm:$0xff] %vm5884_vm8, %v6504_v11  ;;  %6574 = vrot.lane.b32.xlu0 %v12451_v50, %s8757_s30  ;;  %7068 = vmatmul.mubr.f32.vlgmr.msra.gmra.mxu1 %v6714_v41  ;;  %v6860_v50 = vld [vmem:[%s13187_s3 + $0x2e0] sm:$0xff] }
 0x8b0   : > { %8507 = vmatpush3.msra.mxu1 %v6847_v26  ;;  %v6543_v26 = vld [vmem:[#allocation5 + $0xb0] sm:$0xff] }
 0x8b1   : > { %v6346_v63 = vpop.permute.xlu0 %6345  ;;  %v6410_v10 = vpop.permute.xlu1 %6409  ;;  %8508 = vmatprep.subr.mxu1 %v6862_v62  ;;  %6551 = vst.msk [vmem:[#allocation6 + $0x1b0] sm:$0xff] %vm13423_vm11, %v6543_v26  ;;  %vm13438_vm11 = vmmov %vm13419_vm0 }
 0x8b2   : > { %6368 = vst.msk [vmem:[#allocation6 + $0x50] sm:$0xff] %vm5884_vm8, %v6346_v63  ;;  %8509 = vmatpush3.msra.mxu1 %v6846_v7 }
 0x8b3   : > { %6432 = vst.msk [vmem:[#allocation6 + $0x58] sm:$0xff] %vm5786_vm7, %v6410_v10  ;;  %6622 = vrot.lane.b32.xlu0 %v12457_v46, %s8761_s10  ;;  %8510 = vmatprep.subr.mxu1 %v6861_v39  ;;  %v6858_v46 = vld [vmem:[%s13187_s3 + $0x2d0] sm:$0xff]  ;;  %v6735_v39 = vld [vmem:[#allocation6 + $0xb8] sm:$0xff] }
 0x8b4   : > { %8511 = vmatpush3.msra.mxu1 %v6845_v12 }
 0x8b5   : > { %v6251_v18 = vpop.permute.xlu0 %6250  ;;  %v6458_v57 = vpop.permute.xlu1 %6457  ;;  %8512 = vmatprep.subr.mxu1 %v6860_v50 }
 0x8b6   : > { %6272 = vst.msk [vmem:[#allocation6 + $0x88] sm:$0xff] %vm5786_vm7, %v6251_v18  ;;  %8513 = vmatpush3.msra.mxu1 %v6844_v32  ;;  %v6742_v18 = vld [vmem:[#allocation6 + $0xf0] sm:$0xff] }
 0x8b7   : > { %6480 = vst.msk [vmem:[#allocation6 + $0x58] sm:$0xff] %vm5835_vm15, %v6458_v57  ;;  %6670 = vrot.lane.b32.xlu0 %v12403_v56, %s8766_s16  ;;  %8514 = vmatprep.subr.mxu1 %v6859_v30  ;;  %v6721_v56 = vld [vmem:[#allocation6 + $0x48] sm:$0xff] }
 0x8b8   : > { %8515 = vmatpush3.msra.mxu1 %v6843_v21 }
 0x8b9   : > { %v6299_v55 = vpop.permute.xlu0 %6298  ;;  %v6506_v3 = vpop.permute.xlu1 %6505  ;;  %v6722_v16 = vld [vmem:[#allocation6 + $0x50] sm:$0xff]  ;;  %8516 = vmatprep.subr.mxu1 %v6858_v46 }
 0x8ba   : > { %6320 = vst.msk [vmem:[#allocation6 + $0x88] sm:$0xff] %vm5835_vm15, %v6299_v55  ;;  %7072 = vmatprep.mubr.f32.mxu1 %v6722_v16  ;;  %8517 = vmatpush3.msra.mxu1 %v6842_v52 }
 0x8bb   : > { %6528 = vst.msk [vmem:[#allocation6 + $0x58] sm:$0xff] %vm5884_vm8, %v6506_v3  ;;  %6576 = vrot.lane.b32.xlu0 %v12606_v14, %s8757_s30  ;;  %7073 = vmatmul.mubr.f32.gmra.mxu1 %v6721_v56  ;;  %v6839_v14 = vld [vmem:[%s13187_s3 + $0x238] sm:$0xff] }
 0x8bc   : > { %8518 = vmatprep.subr.mxu1 %v6857_v1  ;;  %v6749_v1 = vld [vmem:[#allocation6 + $0x128] sm:$0xff] }
 0x8bd   : > { %v6348_v19 = vpop.permute.xlu0 %6347  ;;  %v6412_v45 = vpop.permute.xlu1 %6411  ;;  %8519 = vmatpush3.msra.mxu1 %v6841_v58 }
 0x8be   : > { %6369 = vst.msk [vmem:[#allocation6 + $0x88] sm:$0xff] %vm5884_vm8, %v6348_v19  ;;  %8520 = vmatprep.subr.mxu1 %v6856_v40  ;;  %v6703_v19 = vld [vmem:[#allocation5 + $0xb4] sm:$0xff] }
 0x8bf   : > { %6433 = vst.msk [vmem:[#allocation6 + $0x90] sm:$0xff] %vm5786_vm7, %v6412_v45  ;;  %6624 = vrot.lane.b32.xlu0 %v12608_v35, %s8761_s10  ;;  %8521 = vmatpush3.msra.mxu1 %v6840_v27  ;;  %v6837_v35 = vld [vmem:[%s13187_s3 + $0x228] sm:$0xff] }
 0x8c0   : > { %8522 = vmatprep.subr.mxu1 %v6855_v2  ;;  %6711 = vst.msk [vmem:[#allocation6 + $0x1b8] sm:$0xff] %vm13424_vm3, %v6703_v19  ;;  %vm13439_vm3 = vmmov %vm13419_vm0 }
 0x8c1   : > { %v6253_v42 = vpop.permute.xlu0 %6252  ;;  %v6460_v28 = vpop.permute.xlu1 %6459  ;;  %8523 = vmatpush3.msra.mxu1 %v6839_v14 }
 0x8c2   : > { %6273 = vst.msk [vmem:[#allocation6 + $0xc0] sm:$0xff] %vm5786_vm7, %v6253_v42  ;;  %8524 = vmatprep.subr.mxu1 %v6854_v24  ;;  %v6756_v24 = vld [vmem:[#allocation6 + $0x160] sm:$0xff] }
 0x8c3   : > { %6481 = vst.msk [vmem:[#allocation6 + $0x90] sm:$0xff] %vm5835_vm15, %v6460_v28  ;;  %6672 = vrot.lane.b32.xlu0 %v12617_v44, %s8766_s16  ;;  %8525 = vmatpush3.msra.mxu1 %v6838_v54  ;;  %v6728_v44 = vld [vmem:[#allocation6 + $0x80] sm:$0xff] }
 0x8c4   : > { %8526 = vmatprep.subr.mxu1 %v6853_v25 }
 0x8c5   : > { %v6301_v23 = vpop.permute.xlu0 %6300  ;;  %v6508_v31 = vpop.permute.xlu1 %6507  ;;  %v6729_v33 = vld [vmem:[#allocation6 + $0x88] sm:$0xff]  ;;  %8527 = vmatpush3.msra.mxu1 %v6837_v35 }
 0x8c6   : > { %6321 = vst.msk [vmem:[#allocation6 + $0xc0] sm:$0xff] %vm5835_vm15, %v6301_v23  ;;  %7077 = vmatprep.mubr.f32.mxu1 %v6729_v33  ;;  %8528 = vmatprep.subr.mxu1 %v6852_v15 }
 0x8c7   : > { %6529 = vst.msk [vmem:[#allocation6 + $0x90] sm:$0xff] %vm5884_vm8, %v6508_v31  ;;  %6578 = vrot.lane.b32.xlu0 %v12594_v59, %s8757_s30  ;;  %7078 = vmatmul.mubr.f32.gmra.mxu1 %v6728_v44  ;;  %v6849_v59 = vld [vmem:[%s13187_s3 + $0x288] sm:$0xff]  ;;  %v6763_v31 = vld [vmem:[#allocation6 + $0x198] sm:$0xff] }
 0x8c8   : > { %8529 = vmatpush3.msra.mxu1 %v6836_v53 }
 0x8c9   : > { %v6350_v9 = vpop.permute.xlu0 %6349  ;;  %v6414_v0 = vpop.permute.xlu1 %6413  ;;  %8530 = vmatprep.subr.mxu1 %v6851_v6 }
 0x8ca   : > { %6370 = vst.msk [vmem:[#allocation6 + $0xc0] sm:$0xff] %vm5884_vm8, %v6350_v9  ;;  %8531 = vmatpush3.msra.mxu1 %v6835_v34  ;;  %v6716_v34 = vld [vmem:[#allocation6 + $0x20] sm:$0xff]  ;;  %v6865_v9 = vld [vmem:[%s13187_s3 + $0x308] sm:$0xff] }
 0x8cb   : > { %6434 = vst.msk [vmem:[#allocation6 + $0xc8] sm:$0xff] %vm5786_vm7, %v6414_v0  ;;  %6626 = vrot.lane.b32.xlu0 %v12596_v17, %s8761_s10  ;;  %8532 = vmatprep.subr.mxu1 %v6850_v37  ;;  %v12969_v17 = vld [vmem:[%s13187_s3 + $0x318] sm:$0xff]  ;;  %v6866_v37 = vld [vmem:[%s13187_s3 + $0x310] sm:$0xff] }
 0x8cc   : > { %8533 = vmatpush3.msra.mxu1 %v6834_v51  ;;  %v6864_v51 = vld [vmem:[%s13187_s3 + $0x300] sm:$0xff] }
 0x8cd   : > { %v6255_v36 = vpop.permute.xlu0 %6254  ;;  %v6462_v11 = vpop.permute.xlu1 %6461  ;;  %8534 = vmatprep.subr.mxu1 %v6849_v59 }
 0x8ce   : > { %6274 = vst.msk [vmem:[#allocation6 + $0xf8] sm:$0xff] %vm5786_vm7, %v6255_v36  ;;  %8535 = vmatpush3.msra.mxu1 %v6833_v47  ;;  %v13029_v47 = vld [vmem:[%s13189_s5 + $0x18] sm:$0xff] }
 0x8cf   : > { %6482 = vst.msk [vmem:[#allocation6 + $0xc8] sm:$0xff] %vm5835_vm15, %v6462_v11  ;;  %6674 = vrot.lane.b32.xlu0 %v12787_v43, %s8766_s16  ;;  %8536 = vmatprep.subr.mxu1 %v6848_v4  ;;  %v6723_v11 = vld [vmem:[#allocation6 + $0x58] sm:$0xff] }
 0x8d0   : > { %8537 = vmatpush3.msra.mxu1 %v6832_v48 }
 0x8d1   : > { %v6303_v41 = vpop.permute.xlu0 %6302  ;;  %v6510_v62 = vpop.permute.xlu1 %6509  ;;  %v6736_v7 = vld [vmem:[#allocation6 + $0xc0] sm:$0xff]  ;;  %8606 = vmatprep.subr.mxu1 %v12969_v17 }
 0x8d2   : > { %6322 = vst.msk [vmem:[#allocation6 + $0xf8] sm:$0xff] %vm5835_vm15, %v6303_v41  ;;  %7082 = vmatprep.mubr.f32.mxu1 %v6736_v7 }
 0x8d3   : > { %6530 = vst.msk [vmem:[#allocation6 + $0xc8] sm:$0xff] %vm5884_vm8, %v6510_v62  ;;  %6580 = vrot.lane.b32.xlu0 %v12729_v13, %s8757_s30  ;;  %7083 = vmatmul.mubr.f32.gmra.mxu1 %v6735_v39  ;;  %v6559_v13 = vld [vmem:[#allocation5 + $0xb1] sm:$0xff] }
 0x8d4   : > { %v6730_v62 = vld [vmem:[#allocation6 + $0x90] sm:$0xff] }
 0x8d5   : > { %v6352_v43 = vpop.permute.xlu0 %6351  ;;  %v6416_v63 = vpop.permute.xlu1 %6415 }
 0x8d6   : > { %6371 = vst.msk [vmem:[#allocation6 + $0xf8] sm:$0xff] %vm5884_vm8, %v6352_v43 }
 0x8d7   : > { %6435 = vst.msk [vmem:[#allocation6 + $0x100] sm:$0xff] %vm5786_vm7, %v6416_v63  ;;  %6628 = vrot.lane.b32.xlu0 %v12797_v22, %s8761_s10  ;;  %v6607_v22 = vld [vmem:[#allocation5 + $0xb2] sm:$0xff] }
 0x8d9   : > { %v6257_v10 = vpop.permute.xlu0 %6256  ;;  %v6464_v12 = vpop.permute.xlu1 %6463 }
 0x8da   : > { %6275 = vst.msk [vmem:[#allocation6 + $0x130] sm:$0xff] %vm5786_vm7, %v6257_v10  ;;  %v6737_v10 = vld [vmem:[#allocation6 + $0xc8] sm:$0xff] }
 0x8db   : > { %6483 = vst.msk [vmem:[#allocation6 + $0x100] sm:$0xff] %vm5835_vm15, %v6464_v12  ;;  %6676 = vrot.lane.b32.xlu0 %v12803_v29, %s8766_s16  ;;  %v6655_v29 = vld [vmem:[#allocation5 + $0xb3] sm:$0xff] }
 0x8dd   : > { %v6305_v50 = vpop.permute.xlu0 %6304  ;;  %v6512_v32 = vpop.permute.xlu1 %6511  ;;  %v6743_v30 = vld [vmem:[#allocation6 + $0xf8] sm:$0xff] }
 0x8de   : > { %6323 = vst.msk [vmem:[#allocation6 + $0x130] sm:$0xff] %vm5835_vm15, %v6305_v50  ;;  %7087 = vmatprep.mubr.f32.mxu1 %v6743_v30 }
 0x8df   : > { %6531 = vst.msk [vmem:[#allocation6 + $0x100] sm:$0xff] %vm5884_vm8, %v6512_v32  ;;  %6582 = vrot.lane.b32.xlu0 %v6559_v13, %s8757_s30  ;;  %7088 = vmatmul.mubr.f32.gmra.mxu1 %v6742_v18 }
 0x8e1   : > { %v6354_v57 = vpop.permute.xlu0 %6353  ;;  %v6418_v21 = vpop.permute.xlu1 %6417 }
 0x8e2   : > { %6372 = vst.msk [vmem:[#allocation6 + $0x130] sm:$0xff] %vm5884_vm8, %v6354_v57 }
 0x8e3   : > { %6436 = vst.msk [vmem:[#allocation6 + $0x138] sm:$0xff] %vm5786_vm7, %v6418_v21  ;;  %6630 = vrot.lane.b32.xlu0 %v6607_v22, %s8761_s10 }
 0x8e5   : > { %v6259_v46 = vpop.permute.xlu0 %6258  ;;  %v6466_v52 = vpop.permute.xlu1 %6465 }
 0x8e6   : > { %6276 = vst.msk [vmem:[#allocation6 + $0x168] sm:$0xff] %vm5786_vm7, %v6259_v46  ;;  %v6744_v30 = vld [vmem:[#allocation6 + $0x100] sm:$0xff] }
 0x8e7   : > { %6484 = vst.msk [vmem:[#allocation6 + $0x138] sm:$0xff] %vm5835_vm15, %v6466_v52  ;;  %6678 = vrot.lane.b32.xlu0 %v6655_v29, %s8766_s16 }
 0x8e9   : > { %v6307_v55 = vpop.permute.xlu0 %6306  ;;  %v6514_v3 = vpop.permute.xlu1 %6513  ;;  %v6750_v16 = vld [vmem:[#allocation6 + $0x130] sm:$0xff] }
 0x8ea   : > { %6324 = vst.msk [vmem:[#allocation6 + $0x168] sm:$0xff] %vm5835_vm15, %v6307_v55  ;;  %7092 = vmatprep.mubr.f32.mxu1 %v6750_v16 }
 0x8eb   : > { %6532 = vst.msk [vmem:[#allocation6 + $0x138] sm:$0xff] %vm5884_vm8, %v6514_v3  ;;  %7093 = vmatmul.mubr.f32.gmra.mxu1 %v6749_v1 }
 0x8ed   : > { %v6356_v56 = vpop.permute.xlu0 %6355  ;;  %v6420_v58 = vpop.permute.xlu1 %6419 }
 0x8ee   : > { %6373 = vst.msk [vmem:[#allocation6 + $0x168] sm:$0xff] %vm5884_vm8, %v6356_v56  ;;  %v13049_v56 = vpop.f32.mrf.mxu1 }
 0x8ef   : > { %6437 = vst.msk [vmem:[#allocation6 + $0x170] sm:$0xff] %vm5786_vm7, %v6420_v58 }
 0x8f1   : > { %v6261_v40 = vpop.permute.xlu0 %6260  ;;  %v6468_v27 = vpop.permute.xlu1 %6467 }
 0x8f2   : > { %6277 = vst.msk [vmem:[#allocation6 + $0x1a0] sm:$0xff] %vm5786_vm7, %v6261_v40  ;;  %v6751_v29 = vld [vmem:[#allocation6 + $0x138] sm:$0xff]  ;;  %v13051_v40 = vpop.f32.mrf.mxu1 }
 0x8f3   : > { %6485 = vst.msk [vmem:[#allocation6 + $0x170] sm:$0xff] %vm5835_vm15, %v6468_v27 }
 0x8f5   : > { %v6309_v45 = vpop.permute.xlu0 %6308  ;;  %v6516_v2 = vpop.permute.xlu1 %6515  ;;  %v6757_v14 = vld [vmem:[#allocation6 + $0x168] sm:$0xff] }
 0x8f6   : > { %6325 = vst.msk [vmem:[#allocation6 + $0x1a0] sm:$0xff] %vm5835_vm15, %v6309_v45  ;;  %7097 = vmatprep.mubr.f32.mxu1 %v6757_v14  ;;  %v6718_v45 = vld [vmem:[#allocation6 + $0x30] sm:$0xff] }
 0x8f7   : > { %6533 = vst.msk [vmem:[#allocation6 + $0x170] sm:$0xff] %vm5884_vm8, %v6516_v2  ;;  %7098 = vmatmul.mubr.f32.gmra.mxu1 %v6756_v24  ;;  %v6725_v24 = vld [vmem:[#allocation6 + $0x68] sm:$0xff] }
 0x8f9   : > { %v6358_v54 = vpop.permute.xlu0 %6357  ;;  %v6422_v42 = vpop.permute.xlu1 %6421 }
 0x8fa   : > { %6374 = vst.msk [vmem:[#allocation6 + $0x1a0] sm:$0xff] %vm5884_vm8, %v6358_v54  ;;  %v6732_v54 = vld [vmem:[#allocation6 + $0xa0] sm:$0xff] }
 0x8fb   : > { %6438 = vst.msk [vmem:[#allocation6 + $0x1a8] sm:$0xff] %vm5786_vm7, %v6422_v42  ;;  %v8743_v42 = vld [vmem:[%s13189_s5 + $0x10] sm:$0xff] }
 0x8fd   : > { %v6569_v28 = vpop.permute.xlu0 %6568  ;;  %v6470_v25 = vpop.permute.xlu1 %6469 }
 0x8fe   : > { %6592 = vst.msk [vmem:[#allocation6 + $0x28] sm:$0xff] %vm5786_vm7, %v6569_v28  ;;  %v6758_v16 = vld [vmem:[#allocation6 + $0x170] sm:$0xff]  ;;  %v6739_v28 = vld [vmem:[#allocation6 + $0xd8] sm:$0xff] }
 0x8ff   : > { %6486 = vst.msk [vmem:[#allocation6 + $0x1a8] sm:$0xff] %vm5835_vm15, %v6470_v25  ;;  %v6746_v25 = vld [vmem:[#allocation6 + $0x110] sm:$0xff] }
 0x901   : > { %v6617_v35 = vpop.permute.xlu0 %6616  ;;  %v6764_v15 = vld [vmem:[#allocation6 + $0x1a0] sm:$0xff]  ;;  %v6518_v23 = vpop.permute.xlu1 %6517 }
 0x902   : > { %6640 = vst.msk [vmem:[#allocation6 + $0x28] sm:$0xff] %vm5835_vm15, %v6617_v35  ;;  %7102 = vmatprep.mubr.f32.mxu1 %v6764_v15  ;;  %v8744_v35 = vld [vmem:[%s13189_s5 + $0x8] sm:$0xff]  ;;  %v6760_v15 = vld [vmem:[#allocation6 + $0x180] sm:$0xff] }
 0x903   : > { %6534 = vst.msk [vmem:[#allocation6 + $0x1a8] sm:$0xff] %vm5884_vm8, %v6518_v23  ;;  %7103 = vmatmul.mubr.f32.gmra.mxu1 %v6763_v31  ;;  %v8745_v23 = vld [vmem:[%s13189_s5] sm:$0xff]  ;;  %v6753_v31 = vld [vmem:[#allocation6 + $0x148] sm:$0xff] }
 0x905   : > { %v6665_v33 = vpop.permute.xlu0 %6664 }
 0x906   : > { %6688 = vst.msk [vmem:[#allocation6 + $0x28] sm:$0xff] %vm5884_vm8, %v6665_v33  ;;  %v6767_v33 = vld [vmem:[#allocation6 + $0x1b8] sm:$0xff] }
 0x909   : > { %v6571_v53 = vpop.permute.xlu0 %6570 }
 0x90a   : > { %6593 = vst.msk [vmem:[#allocation6 + $0x60] sm:$0xff] %vm5786_vm7, %v6571_v53  ;;  %v6765_v58 = vld [vmem:[#allocation6 + $0x1a8] sm:$0xff] }
 0x90d   : > { %v6619_v44 = vpop.permute.xlu0 %6618  ;;  %v6717_v6 = vld [vmem:[#allocation6 + $0x28] sm:$0xff] }
 0x90e   : > { %6641 = vst.msk [vmem:[#allocation6 + $0x60] sm:$0xff] %vm5835_vm15, %v6619_v44  ;;  %7172 = vmatprep.mubr.f32.mxu1 %v6717_v6 }
 0x90f   : > { %7173 = vmatmul.mubr.f32.vlgmr.msra.gmra.mxu1 %v6716_v34 }
 0x910   : > { %8607 = vmatpush3.msra.mxu1 %v12969_v17 }
 0x911   : > { %v6667_v0 = vpop.permute.xlu0 %6666  ;;  %8608 = vmatprep.subr.mxu1 %v6866_v37 }
 0x912   : > { %6689 = vst.msk [vmem:[#allocation6 + $0x60] sm:$0xff] %vm5884_vm8, %v6667_v0  ;;  %8609 = vmatpush3.msra.mxu1 %v6866_v37 }
 0x913   : > { %8610 = vmatprep.subr.mxu1 %v6865_v9 }
 0x914   : > { %8611 = vmatpush3.msra.mxu1 %v6865_v9 }
 0x915   : > { %v6573_v59 = vpop.permute.xlu0 %6572  ;;  %8612 = vmatprep.subr.mxu1 %v6864_v51 }
 0x916   : > { %6594 = vst.msk [vmem:[#allocation6 + $0x98] sm:$0xff] %vm5786_vm7, %v6573_v59  ;;  %8613 = vmatpush3.msra.mxu1 %v6864_v51 }
 0x917   : > { %8626 = vmatprep.subr.mxu1 %v13029_v47 }
 0x919   : > { %v6621_v4 = vpop.permute.xlu0 %6620  ;;  %v6724_v36 = vld [vmem:[#allocation6 + $0x60] sm:$0xff] }
 0x91a   : > { %6642 = vst.msk [vmem:[#allocation6 + $0x98] sm:$0xff] %vm5835_vm15, %v6621_v4  ;;  %7177 = vmatprep.mubr.f32.mxu1 %v6724_v36 }
 0x91b   : > { %7178 = vmatmul.mubr.f32.gmra.mxu1 %v6723_v11 }
 0x91d   : > { %v6669_v48 = vpop.permute.xlu0 %6668 }
 0x91e   : > { %6690 = vst.msk [vmem:[#allocation6 + $0x98] sm:$0xff] %vm5884_vm8, %v6669_v48 }
 0x921   : > { %v6575_v17 = vpop.permute.xlu0 %6574 }
 0x922   : > { %6595 = vst.msk [vmem:[#allocation6 + $0xd0] sm:$0xff] %vm5786_vm7, %v6575_v17 }
 0x925   : > { %v6623_v26 = vpop.permute.xlu0 %6622  ;;  %v6731_v41 = vld [vmem:[#allocation6 + $0x98] sm:$0xff] }
 0x926   : > { %6643 = vst.msk [vmem:[#allocation6 + $0xd0] sm:$0xff] %vm5835_vm15, %v6623_v26  ;;  %7182 = vmatprep.mubr.f32.mxu1 %v6731_v41 }
 0x927   : > { %7183 = vmatmul.mubr.f32.gmra.mxu1 %v6730_v62 }
 0x929   : > { %v6671_v7 = vpop.permute.xlu0 %6670 }
 0x92a   : > { %6691 = vst.msk [vmem:[#allocation6 + $0xd0] sm:$0xff] %vm5884_vm8, %v6671_v7 }
 0x92d   : > { %v6577_v39 = vpop.permute.xlu0 %6576 }
 0x92e   : > { %6596 = vst.msk [vmem:[#allocation6 + $0x108] sm:$0xff] %vm5786_vm7, %v6577_v39 }
 0x931   : > { %v6625_v43 = vpop.permute.xlu0 %6624  ;;  %v6738_v63 = vld [vmem:[#allocation6 + $0xd0] sm:$0xff] }
 0x932   : > { %6644 = vst.msk [vmem:[#allocation6 + $0x108] sm:$0xff] %vm5835_vm15, %v6625_v43  ;;  %7187 = vmatprep.mubr.f32.mxu1 %v6738_v63 }
 0x933   : > { %7188 = vmatmul.mubr.f32.gmra.mxu1 %v6737_v10 }
 0x935   : > { %v6673_v12 = vpop.permute.xlu0 %6672 }
 0x936   : > { %6692 = vst.msk [vmem:[#allocation6 + $0x108] sm:$0xff] %vm5884_vm8, %v6673_v12 }
 0x939   : > { %v6579_v13 = vpop.permute.xlu0 %6578 }
 0x93a   : > { %6597 = vst.msk [vmem:[#allocation6 + $0x140] sm:$0xff] %vm5786_vm7, %v6579_v13 }
 0x93d   : > { %v6627_v50 = vpop.permute.xlu0 %6626  ;;  %v6745_v32 = vld [vmem:[#allocation6 + $0x108] sm:$0xff] }
 0x93e   : > { %6645 = vst.msk [vmem:[#allocation6 + $0x140] sm:$0xff] %vm5835_vm15, %v6627_v50  ;;  %7192 = vmatprep.mubr.f32.mxu1 %v6745_v32 }
 0x93f   : > { %7193 = vmatmul.mubr.f32.gmra.mxu1 %v6744_v30 }
 0x941   : > { %v6675_v18 = vpop.permute.xlu0 %6674 }
 0x942   : > { %6693 = vst.msk [vmem:[#allocation6 + $0x140] sm:$0xff] %vm5884_vm8, %v6675_v18 }
 0x945   : > { %v6581_v22 = vpop.permute.xlu0 %6580 }
 0x946   : > { %6598 = vst.msk [vmem:[#allocation6 + $0x178] sm:$0xff] %vm5786_vm7, %v6581_v22 }
 0x949   : > { %v6629_v57 = vpop.permute.xlu0 %6628  ;;  %v6752_v21 = vld [vmem:[#allocation6 + $0x140] sm:$0xff] }
 0x94a   : > { %6646 = vst.msk [vmem:[#allocation6 + $0x178] sm:$0xff] %vm5835_vm15, %v6629_v57  ;;  %7197 = vmatprep.mubr.f32.mxu1 %v6752_v21  ;;  %v8362_v57 = vld [vmem:[%s13188_s4] ss:$0 sm:$0xff] }
 0x94b   : > { %7198 = vmatmul.mubr.f32.gmra.mxu1 %v6751_v29  ;;  %v6970_v29 = vadd.f32 %v12532_v61, %v8362_v57  ;;  %v6975_v61 = vadd.f32 %v12535_v60, %v8362_v57 }
 0x94d   : > { %v6677_v46 = vpop.permute.xlu0 %6676 }
 0x94e   : > { %6694 = vst.msk [vmem:[#allocation6 + $0x178] sm:$0xff] %vm5884_vm8, %v6677_v46 }
 0x951   : > { %v6583_v52 = vpop.permute.xlu0 %6582 }
 0x952   : > { %6599 = vst.msk [vmem:[#allocation6 + $0x1b0] sm:$0xff] %vm5786_vm7, %v6583_v52  ;;  %vm13425_vm7 = vmmov %vm13419_vm0 }
 0x955   : > { %v6631_v55 = vpop.permute.xlu0 %6630  ;;  %v6759_v3 = vld [vmem:[#allocation6 + $0x178] sm:$0xff] }
 0x956   : > { %6647 = vst.msk [vmem:[#allocation6 + $0x1b0] sm:$0xff] %vm5835_vm15, %v6631_v55  ;;  %7202 = vmatprep.mubr.f32.mxu1 %v6759_v3  ;;  %vm13426_vm15 = vmmov %vm13419_vm0  ;;  %v6965_v3 = vadd.f32 %v12529_v20, %v8362_v57 }
 0x957   : > { %7203 = vmatmul.mubr.f32.gmra.mxu1 %v6758_v16 }
 0x959   : > { %v6679_v1 = vpop.permute.xlu0 %6678 }
 0x95a   : > { %6695 = vst.msk [vmem:[#allocation6 + $0x1b0] sm:$0xff] %vm5884_vm8, %v6679_v1  ;;  %vm13427_vm8 = vmmov %vm13419_vm0 }
 0x961   : > { %v6766_v27 = vld [vmem:[#allocation6 + $0x1b0] sm:$0xff] }
 0x962   : > { %7207 = vmatprep.mubr.f32.mxu1 %v6766_v27  ;;  %v6980_v27 = vadd.f32 %v12538_v5, %v8362_v57 }
 0x963   : > { %v8447_v19 = vpop.f32.mrf.mxu1  ;;  %7208 = vmatmul.mubr.f32.gmra.mxu1 %v6765_v58 }
 0x964   : > { %8614 = vmatprep.mubr.msk.f32.mxu1 %vm13425_vm7, %v6718_v45 }
 0x965   : > { %v8448_v2 = vpop.f32.mrf.mxu1 }
 0x966   : > { %v13054_v14 = vadd.f32 %v8448_v2, %v8447_v19  ;;  %v8440_v19 = vadd.f32 %v12771_v49, %v12762_v8 }
 0x967   : > { %8615 = vmatmul.mubr.msk.f32.vlgmr.msra.gmra.mxu1 %vm13426_vm15, %v6725_v24 }
 0x968   : > { %8617 = vmatprep.mubr.msk.f32.mxu1 %vm13427_vm8, %v6732_v54  ;;  %8627 = vmatpush3.msra.mxu1 %v13029_v47 }
 0x969   : > { %8628 = vmatprep.subr.mxu1 %v8743_v42 }
 0x96a   : > { %8629 = vmatpush3.msra.mxu1 %v8743_v42 }
 0x96b   : > { %8618 = vmatmul.mubr.msk.f32.gmra.mxu1 %vm13428_vm10, %v6739_v28  ;;  %8630 = vmatprep.subr.mxu1 %v8744_v35 }
 0x96c   : > { %8620 = vmatprep.mubr.msk.f32.mxu1 %vm13429_vm4, %v6746_v25  ;;  %8631 = vmatpush3.msra.mxu1 %v8744_v35 }
 0x96d   : > { %8632 = vmatprep.subr.mxu1 %v8745_v23 }
 0x96e   : > { %8633 = vmatpush3.msra.mxu1 %v8745_v23 }
 0x96f   : > { %8621 = vmatmul.mubr.msk.f32.gmra.mxu1 %vm13430_vm5, %v6753_v31  ;;  %v8482_v53 = vpop.f32.mrf.mxu1  ;;  %v6985_v31 = vadd.f32 %v8440_v19, %v8362_v57 }
 0x970   : > { %8623 = vmatprep.mubr.msk.f32.mxu1 %vm13431_vm12, %v6760_v15 }
 0x971   : > { %v8483_v44 = vpop.f32.mrf.mxu1 }
 0x972   : > { %v8484_v46 = vadd.f32 %v8483_v44, %v8482_v53 }
 0x973   : > { %8624 = vmatmul.mubr.msk.f32.gmra.mxu1 %vm13432_vm2, %v6767_v33  ;;  %v6990_v33 = vadd.f32 %v12777_v38, %v8362_v57  ;;  %v7000_v38 = vadd.f32 %v13054_v14, %v8362_v57 }
 0x974   : > { %v7070_v2 = vadd.f32 %v8484_v46, %v6965_v3 }
 0x97b   : > { %v8485_v6 = vpop.f32.mrf.mxu1 }
 0x97d   : > { %v8486_v34 = vpop.f32.mrf.mxu1 }
 0x97e   : > { %v8487_v22 = vadd.f32 %v8486_v34, %v8485_v6  ;;  %v8446_v34 = vadd.f32 %v13051_v40, %v13049_v56 }
 0x980   : > { %v7075_v16 = vadd.f32 %v8487_v22, %v6970_v29 }
 0x987   : > { %v8488_v37 = vpop.f32.mrf.mxu1 }
 0x989   : > { %v8489_v9 = vpop.f32.mrf.mxu1 }
 0x98a   : > { %v8490_v24 = vadd.f32 %v8489_v9, %v8488_v37 }
 0x98c   : > { %v7080_v44 = vadd.f32 %v8490_v24, %v6975_v61 }
 0x993   : > { %v8491_v0 = vpop.f32.mrf.mxu1 }
 0x995   : > { %v8492_v51 = vpop.f32.mrf.mxu1 }
 0x996   : > { %v8493_v1 = vadd.f32 %v8492_v51, %v8491_v0 }
 0x998   : > { %v7085_v35 = vadd.f32 %v8493_v1, %v6980_v27 }
 0x99f   : > { %v8494_v59 = vpop.f32.mrf.mxu1 }
 0x9a1   : > { %v8495_v47 = vpop.f32.mrf.mxu1 }
 0x9a2   : > { %v8496_v5 = vadd.f32 %v8495_v47, %v8494_v59 }
 0x9a4   : > { %v7090_v59 = vadd.f32 %v8496_v5, %v6985_v31 }
 0x9ab   : > { %v8497_v4 = vpop.f32.mrf.mxu1 }
 0x9ad   : > { %v8498_v36 = vpop.f32.mrf.mxu1 }
 0x9ae   : > { %v8499_v28 = vadd.f32 %v8498_v36, %v8497_v4 }
 0x9b0   : > { %v7095_v37 = vadd.f32 %v8499_v28, %v6990_v33 }
 0x9b7   : > { %v8500_v11 = vpop.f32.mrf.mxu1 }
 0x9b9   : > { %v8501_v48 = vpop.f32.mrf.mxu1 }
 0x9ba   : > { %v8502_v47 = vadd.f32 %v8501_v48, %v8500_v11 }
 0x9c3   : > { %v8503_v17 = vpop.f32.mrf.mxu1 }
 0x9c5   : > { %v8504_v26 = vpop.f32.mrf.mxu1 }
 0x9c6   : > { %v8505_v60 = vadd.f32 %v8504_v26, %v8503_v17  ;;  %v6995_v17 = vadd.f32 %v8446_v34, %v8362_v57 }
 0x9c8   : > { %v7105_v26 = vadd.f32 %v8505_v60, %v7000_v38 }
 0x9cf   : > { %v8538_v41 = vpop.f32.mrf.mxu1 }
 0x9d1   : > { %v8539_v62 = vpop.f32.mrf.mxu1 }
 0x9d2   : > { %v8540_v58 = vadd.f32 %v8539_v62, %v8538_v41 }
 0x9d4   : > { %v7175_v23 = vadd.f32 %v8540_v58, %v7070_v2 }
 0x9db   : > { %v8541_v7 = vpop.f32.mrf.mxu1 }
 0x9dd   : > { %v8542_v39 = vpop.f32.mrf.mxu1 }
 0x9de   : > { %v8543_v52 = vadd.f32 %v8542_v39, %v8541_v7 }
 0x9e0   : > { %v7180_v42 = vadd.f32 %v8543_v52, %v7075_v16 }
 0x9e7   : > { %v8544_v43 = vpop.f32.mrf.mxu1 }
 0x9e9   : > { %v8545_v63 = vpop.f32.mrf.mxu1 }
 0x9ea   : > { %v8546_v15 = vadd.f32 %v8545_v63, %v8544_v43 }
 0x9ec   : > { %v7185_v41 = vadd.f32 %v8546_v15, %v7080_v44 }
 0x9f3   : > { %v8547_v10 = vpop.f32.mrf.mxu1 }
 0x9f5   : > { %v8548_v12 = vpop.f32.mrf.mxu1 }
 0x9f6   : > { %v8549_v54 = vadd.f32 %v8548_v12, %v8547_v10 }
 0x9f8   : > { %v7190_v6 = vadd.f32 %v8549_v54, %v7085_v35 }
 0x9ff   : > { %v8550_v13 = vpop.f32.mrf.mxu1 }
 0xa01   : > { %v8551_v50 = vpop.f32.mrf.mxu1 }
 0xa02   : > { %v8552_v51 = vadd.f32 %v8551_v50, %v8550_v13  ;;  %v7100_v50 = vadd.f32 %v8502_v47, %v6995_v17 }
 0xa04   : > { %v7195_v11 = vadd.f32 %v8552_v51, %v7090_v59 }
 0xa0b   : > { %v8553_v32 = vpop.f32.mrf.mxu1 }
 0xa0d   : > { %v8554_v30 = vpop.f32.mrf.mxu1 }
 0xa0e   : > { %v8555_v8 = vadd.f32 %v8554_v30, %v8553_v32 }
 0xa10   : > { %v7200_v40 = vadd.f32 %v8555_v8, %v7095_v37 }
 0xa17   : > { %v8556_v18 = vpop.f32.mrf.mxu1 }
 0xa19   : > { %v8557_v21 = vpop.f32.mrf.mxu1 }
 0xa1a   : > { %v8558_v12 = vadd.f32 %v8557_v21, %v8556_v18 }
 0xa1c   : > { %v7205_v52 = vadd.f32 %v8558_v12, %v7100_v50 }
 0xa23   : > { %v8559_v55 = vpop.f32.mrf.mxu1 }
 0xa25   : > { %v8560_v45 = vpop.f32.mrf.mxu1 }
 0xa26   : > { %v8561_v7 = vadd.f32 %v8560_v45, %v8559_v55 }
 0xa27   : > { %v8616_v25 = vpop.f32.mrf.mxu1 }
 0xa28   : > { %v7285_v20 = vadd.f32 %v8616_v25, %v7180_v42  ;;  %v7210_v22 = vadd.f32 %v8561_v7, %v7105_v26 }
 0xa29   : > { %v7279_v53 = vpop.f32.mrf.mxu1 }
 0xa2a   : > { %v7280_v49 = vadd.f32 %v7279_v53, %v7175_v23  ;;  %v13085_v9 = vmax.f32 %v7285_v20, 0.0 }
 0xa2b   : > { %v8619_v0 = vpop.f32.mrf.mxu1 }
 0xa2c   : > { %v13087_v4 = vmax.f32 %v7280_v49, 0.0  ;;  %v7295_v36 = vadd.f32 %v8619_v0, %v7190_v6  ;;  %v7327_v43 = vmul.f32 %v13085_v9, %v13085_v9 }
 0xa2d   : > { %v7289_v62 = vpop.f32.mrf.mxu1 }
 0xa2e   : > { %v7326_v39 = vmul.f32 %v13087_v4, %v13087_v4  ;;  %v7290_v56 = vadd.f32 %v7289_v62, %v7185_v41  ;;  %v13094_v63 = vmax.f32 %v7295_v36, 0.0 }
 0xa2f   : > { %v8622_v10 = vpop.f32.mrf.mxu1 }
 0xa30   : > { %v13096_v13 = vmax.f32 %v7290_v56, 0.0  ;;  %v7305_v14 = vadd.f32 %v8622_v10, %v7200_v40  ;;  %8634 = vmatprep.mubr.msk.f32.mxu1 %vm13433_vm14, %v7326_v39  ;;  %v7329_v57 = vmul.f32 %v13094_v63, %v13094_v63  ;;  %vm13440_vm14 = vmmov %vm13419_vm0 }
 0xa31   : > { %v7299_v48 = vpop.f32.mrf.mxu1  ;;  %8635 = vmatmul.mubr.msk.f32.vlgmr.msra.gmra.mxu1 %vm13434_vm9, %v7327_v43 }
 0xa32   : > { %v7328_v32 = vmul.f32 %v13096_v13, %v13096_v13  ;;  %v7300_v30 = vadd.f32 %v7299_v48, %v7195_v11  ;;  %v13104_v29 = vmax.f32 %v7305_v14, 0.0 }
 0xa33   : > { %v8625_v18 = vpop.f32.mrf.mxu1 }
 0xa34   : > { %v13106_v21 = vmax.f32 %v7300_v30, 0.0  ;;  %v7315_v46 = vadd.f32 %v8625_v18, %v7210_v22  ;;  %8637 = vmatprep.mubr.msk.f32.mxu1 %vm13419_vm0, %v7328_v32  ;;  %v7331_v1 = vmul.f32 %v13104_v29, %v13104_v29 }
 0xa35   : > { %v7309_v55 = vpop.f32.mrf.mxu1  ;;  %8638 = vmatmul.mubr.msk.f32.gmra.mxu1 %vm13435_vm6, %v7329_v57  ;;  %vm13441_vm6 = vmmov %vm13437_vm1 }
 0xa36   : > { %v7330_v3 = vmul.f32 %v13106_v21, %v13106_v21  ;;  %v7310_v16 = vadd.f32 %v7309_v55, %v7205_v52  ;;  %v13114_v58 = vmax.f32 %v7315_v46, 0.0 }
 0xa38   : > { %v13116_v27 = vmax.f32 %v7310_v16, 0.0  ;;  %8640 = vmatprep.mubr.msk.f32.mxu1 %vm13436_vm13, %v7330_v3  ;;  %v7333_v45 = vmul.f32 %v13114_v58, %v13114_v58 }
 0xa39   : > { %8641 = vmatmul.mubr.msk.f32.gmra.mxu1 %vm13437_vm1, %v7331_v1 }
 0xa3a   : > { %v7332_v19 = vmul.f32 %v13116_v27, %v13116_v27 }
 0xa3c   : > { %8643 = vmatprep.mubr.msk.f32.mxu1 %vm13438_vm11, %v7332_v19  ;;  %vm13442_vm11 = vmmov %vm13439_vm3 }
 0xa3d   : > { %8644 = vmatmul.mubr.msk.f32.gmra.mxu1 %vm13439_vm3, %v7333_v45 }
 0xaf1   : > { %v8636_v2 = vpop.f32.mrf.mxu1 }
 0xaf2   : > { %v7430_v24 = vadd.f32 1.0, %v8636_v2 }
 0xaf3   : > { %v7424_v54 = vpop.f32.mrf.mxu1 }
 0xaf4   : > { %8703 = vrsqrt.f32 %v7430_v24  ;;  %v7425_v42 = vadd.f32 1.0, %v7424_v54 }
 0xaf5   : > { %v8639_v61 = vpop.f32.mrf.mxu1 }
 0xaf6   : > { %8705 = vrsqrt.f32 %v7425_v42  ;;  %v7440_v28 = vadd.f32 1.0, %v8639_v61 }
 0xaf7   : > { %v7434_v25 = vpop.f32.mrf.mxu1 }
 0xaf8   : > { %8707 = vrsqrt.f32 %v7440_v28  ;;  %v7435_v35 = vadd.f32 1.0, %v7434_v25 }
 0xaf9   : > { %v8642_v15 = vpop.f32.mrf.mxu1 }
 0xafa   : > { %8709 = vrsqrt.f32 %v7435_v35  ;;  %v7450_v20 = vadd.f32 1.0, %v8642_v15 }
 0xafb   : > { %v7444_v23 = vpop.f32.mrf.mxu1 }
 0xafc   : > { %8711 = vrsqrt.f32 %v7450_v20  ;;  %v7445_v31 = vadd.f32 1.0, %v7444_v23 }
 0xafd   : > { %v8645_v33 = vpop.f32.mrf.mxu1 }
 0xafe   : > { %8713 = vrsqrt.f32 %v7445_v31  ;;  %v7460_v5 = vadd.f32 1.0, %v8645_v33 }
 0xaff   : > { %v7454_v53 = vpop.f32.mrf.mxu1 }
 0xb00   : > { %8715 = vrsqrt.f32 %v7460_v5  ;;  %v7455_v44 = vadd.f32 1.0, %v7454_v53 }
 0xb01   : > { %v8704_v8 = vpop.eup %8703 }
 0xb02   : > { %8717 = vrsqrt.f32 %v8704_v8  ;;  %vm7480_vm7 = vcmp.eq.f32.partialorder %v8704_v8, inf  ;;  %v7483_v59 = vand.u32 2147483648, %v8704_v8  ;;  %vm7482_vm15 = vcmp.eq.f32.partialorder %v8704_v8, 0.0 }
 0xb03   : > { %v8706_v49 = vpop.eup %8705  ;;  %8719 = vrsqrt.f32 %v7455_v44 }
 0xb04   : > { %8721 = vrsqrt.f32 %v8706_v49  ;;  %vm7473_vm8 = vcmp.eq.f32.partialorder %v8706_v49, inf  ;;  %v7476_v56 = vand.u32 2147483648, %v8706_v49  ;;  %vm7475_vm10 = vcmp.eq.f32.partialorder %v8706_v49, 0.0 }
 0xb05   : > { %v8708_v6 = vpop.eup %8707 }
 0xb06   : > { %8723 = vrsqrt.f32 %v8708_v6  ;;  %vm7494_vm4 = vcmp.eq.f32.partialorder %v8708_v6, inf  ;;  %vm7496_vm5 = vcmp.eq.f32.partialorder %v8708_v6, 0.0  ;;  %v7497_v12 = vand.u32 2147483648, %v8708_v6 }
 0xb07   : > { %v8710_v34 = vpop.eup %8709 }
 0xb08   : > { %8725 = vrsqrt.f32 %v8710_v34  ;;  %vm7487_vm12 = vcmp.eq.f32.partialorder %v8710_v34, inf  ;;  %vm7489_vm2 = vcmp.eq.f32.partialorder %v8710_v34, 0.0  ;;  %v7490_v22 = vand.u32 2147483648, %v8710_v34 }
 0xb09   : > { %v8712_v37 = vpop.eup %8711 }
 0xb0a   : > { %8727 = vrsqrt.f32 %v8712_v37  ;;  %vm7508_vm9 = vcmp.eq.f32.partialorder %v8712_v37, inf  ;;  %vm7510_vm0 = vcmp.eq.f32.partialorder %v8712_v37, 0.0 }
 0xb0b   : > { %v13126_v60 = vpop.eup %8713 }
 0xb0c   : > { %8729 = vrsqrt.f32 %v13126_v60  ;;  %vm7501_vm13 = vcmp.eq.f32.partialorder %v13126_v60, inf  ;;  %vm7503_vm1 = vcmp.eq.f32.partialorder %v13126_v60, 0.0 }
 0xb0d   : > { %v13129_v0 = vpop.eup %8715 }
 0xb0e   : > { %8731 = vrsqrt.f32 %v13129_v0  ;;  %vm7522_vm3 = vcmp.eq.f32.partialorder %v13129_v0, inf  ;;  %v7525_v25 = vand.u32 2147483648, %v13129_v0 }
 0xb0f   : > { %v8718_v51 = vpop.eup %8717 }
 0xb10   : > { %v13132_v36 = vpop.eup %8719  ;;  %v7479_v41 = vmul.f32 %v8718_v51, %v8704_v8 }
 0xb11   : > { %v8722_v38 = vpop.eup %8721  ;;  %8733 = vrsqrt.f32 %v13132_v36  ;;  %v7518_v53 = vand.u32 2147483648, %v13132_v36 }
 0xb12   : > { %v7481_v47 = vsel %vm7480_vm7, %v8704_v8, %v7479_v41  ;;  %v7472_v62 = vmul.f32 %v8722_v38, %v8706_v49  ;;  %vm13443_vm7 = vmmov %vm13441_vm6 }
 0xb13   : > { %v8724_v7 = vpop.eup %8723  ;;  %v7484_v39 = vsel %vm7482_vm15, %v7483_v59, %v7481_v47  ;;  %vm7524_vm15 = vcmp.eq.f32.partialorder %v13129_v0, 0.0 }
 0xb14   : > { %v7528_v40 = vmul.f32 %v8704_v8, %v7484_v39  ;;  %v7474_v17 = vsel %vm7473_vm8, %v8706_v49, %v7472_v62  ;;  %v7493_v26 = vmul.f32 %v8724_v7, %v8708_v6  ;;  %vm13444_vm8 = vmmov %vm13441_vm6  ;;  %v7567_v8 = vld [vmem:[#allocation7 + $0x8] sm:$0xff] }
 0xb15   : > { %v8726_v43 = vpop.eup %8725  ;;  %v7477_v10 = vsel %vm7475_vm10, %v7476_v56, %v7474_v17  ;;  %vm7515_vm10 = vcmp.eq.f32.partialorder %v13132_v36, inf }
 0xb16   : > { %v7536_v14 = vmul.f32 %v7528_v40, %v13085_v9  ;;  %v7527_v11 = vmul.f32 %v8706_v49, %v7477_v10  ;;  %v7495_v48 = vsel %vm7494_vm4, %v8708_v6, %v7493_v26  ;;  %v7486_v50 = vmul.f32 %v8726_v43, %v8710_v34 }
 0xb17   : > { %v8728_v32 = vpop.eup %8727  ;;  %v7498_v30 = vsel %vm7496_vm5, %v7497_v12, %v7495_v48  ;;  %v7511_v9 = vand.u32 2147483648, %v8712_v37  ;;  %vm7517_vm4 = vcmp.eq.f32.partialorder %v13132_v36, 0.0  ;;  %vm13445_vm5 = vmmov %vm13441_vm6 }
 0xb18   : > { %7547 = vst.msk [vmem:[#allocation7 + $0x18] sm:$0xff] %vm13440_vm14, %v7536_v14  ;;  %v7535_v57 = vmul.f32 %v7527_v11, %v13087_v4  ;;  %v7530_v18 = vmul.f32 %v8708_v6, %v7498_v30  ;;  %v7488_v46 = vsel %vm7487_vm12, %v8710_v34, %v7486_v50  ;;  %v7507_v52 = vmul.f32 %v8728_v32, %v8712_v37  ;;  %vm13446_vm12 = vmmov %vm13445_vm5 }
 0xb19   : > { %v8730_v55 = vpop.eup %8729  ;;  %v7491_v3 = vsel %vm7489_vm2, %v7490_v22, %v7488_v46  ;;  %v7504_v4 = vand.u32 2147483648, %v13126_v60  ;;  %vm13447_vm2 = vmmov %vm13445_vm5 }
 0xb1a   : > { %7546 = vst.msk [vmem:[#allocation7 + $0x10] sm:$0xff] %vm13441_vm6, %v7535_v57  ;;  %v7538_v16 = vmul.f32 %v7530_v18, %v13094_v63  ;;  %v7529_v1 = vmul.f32 %v8710_v34, %v7491_v3  ;;  %v7509_v19 = vsel %vm7508_vm9, %v8712_v37, %v7507_v52  ;;  %v7500_v45 = vmul.f32 %v8730_v55, %v13126_v60  ;;  %vm13448_vm14 = vmmov %vm13447_vm2 }
 0xb1b   : > { %v8732_v2 = vpop.eup %8731  ;;  %v7512_v24 = vsel %vm7510_vm0, %v7511_v9, %v7509_v19  ;;  %vm13449_vm9 = vmmov %vm13447_vm2  ;;  %vm13451_vm6 = vcmask 257024  }
 0xb1c   : > { %7549 = vst.msk [vmem:[#allocation7 + $0x28] sm:$0xff] %vm13442_vm11, %v7538_v16  ;;  %v7537_v54 = vmul.f32 %v7529_v1, %v13096_v13  ;;  %v7532_v42 = vmul.f32 %v8712_v37, %v7512_v24  ;;  %v7502_v61 = vsel %vm7501_vm13, %v13126_v60, %v7500_v45  ;;  %v7521_v63 = vmul.f32 %v8732_v2, %v13129_v0  ;;  %vm13450_vm0 = vmmov %vm13447_vm2 }
 0xb1d   : > { %v7505_v28 = vsel %vm7503_vm1, %v7504_v4, %v7502_v61  ;;  %vm13452_vm13 = vmmov %vm13450_vm0 }
 0xb1e   : > { %v8734_v35 = vpop.eup %8733  ;;  %7548 = vst.msk [vmem:[#allocation7 + $0x20] sm:$0xff] %vm13443_vm7, %v7537_v54  ;;  %v7540_v15 = vmul.f32 %v7532_v42, %v13104_v29  ;;  %v7531_v20 = vmul.f32 %v13126_v60, %v7505_v28  ;;  %v7523_v23 = vsel %vm7522_vm3, %v13129_v0, %v7521_v63  ;;  %vm13453_vm1 = vmmov %vm13451_vm6 }
 0xb1f   : > { %v7526_v13 = vsel %vm7524_vm15, %v7525_v25, %v7523_v23  ;;  %v7514_v31 = vmul.f32 %v8734_v35, %v13132_v36  ;;  %v7559_v29 = vld [vmem:[#allocation7 + $0x18] sm:$0xff]  ;;  %vm13454_vm11 = vmmov %vm13453_vm1 }
 0xb20   : > { %7551 = vst.msk [vmem:[#allocation7 + $0x38] sm:$0xff] %vm13444_vm8, %v7540_v15  ;;  %v7539_v33 = vmul.f32 %v7531_v20, %v13106_v21  ;;  %v7534_v5 = vmul.f32 %v13129_v0, %v7526_v13  ;;  %vm13455_vm3 = vmmov %vm13453_vm1 }
 0xb21   : > { %v7554_v44 = vld [vmem:[#allocation7 + $0x10] sm:$0xff]  ;;  %v7516_v49 = vsel %vm7515_vm10, %v13132_v36, %v7514_v31 }
 0xb22   : > { %v7563_v6 = vmax.f32 %v7554_v44, %v7559_v29  ;;  %7550 = vst.msk [vmem:[#allocation7 + $0x30] sm:$0xff] %vm13445_vm5, %v7539_v33  ;;  %v7542_v34 = vmul.f32 %v7534_v5, %v13114_v58  ;;  %v7519_v21 = vsel %vm7517_vm4, %v7518_v53, %v7516_v49 }
 0xb23   : > { %v7533_v37 = vmul.f32 %v13132_v36, %v7519_v21  ;;  %v7560_v0 = vld [vmem:[#allocation7 + $0x28] sm:$0xff] }
 0xb24   : > { %v7571_v60 = vmax.f32 %v7563_v6, %v7567_v8  ;;  %7553 = vst.msk [vmem:[#allocation7 + $0x48] sm:$0xff] %vm13446_vm12, %v7542_v34 }
 0xb25   : > { %v7555_v51 = vld [vmem:[#allocation7 + $0x20] sm:$0xff]  ;;  %v7541_v41 = vmul.f32 %v7533_v37, %v13116_v27 }
 0xb26   : > { %7579 = vst.msk [vmem:[#allocation8 + $0x1] sm:$0xff] %vm13447_vm2, %v7571_v60  ;;  %v7564_v38 = vmax.f32 %v7555_v51, %v7560_v0 }
 0xb27   : > { %7552 = vst.msk [vmem:[#allocation7 + $0x40] sm:$0xff] %vm13448_vm14, %v7541_v41  ;;  %v7561_v47 = vld [vmem:[#allocation7 + $0x38] sm:$0xff] }
 0xb28   : > { %v7572_v59 = vmax.f32 %v7564_v38, %v7559_v29 }
 0xb29   : > { %v7556_v62 = vld [vmem:[#allocation7 + $0x30] sm:$0xff] }
 0xb2a   : > { %7580 = vst.msk [vmem:[#allocation8 + $0x11] sm:$0xff] %vm13449_vm9, %v7572_v59  ;;  %v7565_v58 = vmax.f32 %v7556_v62, %v7561_v47 }
 0xb2b   : > { %v7562_v40 = vld [vmem:[#allocation7 + $0x48] sm:$0xff] }
 0xb2c   : > { %v7573_v36 = vmax.f32 %v7565_v58, %v7560_v0 }
 0xb2d   : > { %v7583_v7 = vld [vmem:[#allocation8] ss:$2 sm:$0xf]  ;;  %v7591_v39 = vld [vmem:[#allocation8 + $0x1] ss:$2 sm:$0xf] }
 0xb2e   : > { %v7606_v56 = vmax.f32 %v7583_v7, %v7591_v39  ;;  %7581 = vst.msk [vmem:[#allocation8 + $0x21] sm:$0xff] %vm13450_vm0, %v7573_v36  ;;  %v7557_v27 = vld [vmem:[#allocation7 + $0x40] sm:$0xff]  ;;  %v7599_v17 = vld [vmem:[#allocation8 + $0x2] ss:$2 sm:$0xf] }
 0xb2f   : > { %v7566_v26 = vmax.f32 %v7557_v27, %v7562_v40 }
 0xb30   : > { %v7610_v43 = vmax.f32 %v7606_v56, %v7599_v17 }
 0xb31   : > { %v7585_v10 = vld [vmem:[#allocation8 + $0x10] ss:$2 sm:$0xf]  ;;  %v7593_v12 = vld [vmem:[#allocation8 + $0x11] ss:$2 sm:$0xf]  ;;  %v7574_v14 = vmax.f32 %v7566_v26, %v7561_v47 }
 0xb32   : > { %7614 = vst.msk [vmem:[%s251_s29] sm:$0xf] %vm13451_vm6, %v7610_v43  ;;  %v7607_v11 = vmax.f32 %v7585_v10, %v7593_v12  ;;  %v7601_v48 = vld [vmem:[#allocation8 + $0x12] ss:$2 sm:$0xf] }
 0xb33   : > { %7582 = vst.msk [vmem:[#allocation8 + $0x31] sm:$0xff] %vm13452_vm13, %v7574_v14 }
 0xb34   : > { %v7611_v50 = vmax.f32 %v7607_v11, %v7601_v48 }
 0xb35   : > { %v7587_v32 = vld [vmem:[#allocation8 + $0x20] ss:$2 sm:$0xf]  ;;  %v7595_v30 = vld [vmem:[#allocation8 + $0x21] ss:$2 sm:$0xf] }
 0xb36   : > { %7615 = vst.msk [vmem:[%s251_s29 + $0x4] sm:$0xf] %vm13453_vm1, %v7611_v50  ;;  %v7608_v22 = vmax.f32 %v7587_v32, %v7595_v30  ;;  %v7603_v57 = vld [vmem:[#allocation8 + $0x22] ss:$2 sm:$0xf] }
 0xb38   : > { %v7612_v18 = vmax.f32 %v7608_v22, %v7603_v57 }
 0xb3a   : > { %7616 = vst.msk [vmem:[%s251_s29 + $0x8] sm:$0xf] %vm13454_vm11, %v7612_v18  ;;  %v7589_v46 = vld [vmem:[#allocation8 + $0x30] ss:$2 sm:$0xf] }
 0xb3b   : > { %v7597_v52 = vld [vmem:[#allocation8 + $0x31] ss:$2 sm:$0xf]  ;;  %v7605_v3 = vld [vmem:[#allocation8 + $0x32] ss:$2 sm:$0xf] }
 0xb3c   : > { %v7609_v55 = vmax.f32 %v7589_v46, %v7597_v52 }
 0xb3e   : > { %v7613_v9 = vmax.f32 %v7609_v55, %v7605_v3 }
 0xb40   : > { %7617 = vst.msk [vmem:[%s251_s29 + $0xc] sm:$0xf] %vm13455_vm3, %v7613_v9 }
 0xb41 PF: > { %s16_s21 = sadd.s32 1, %s8752_s21  }
 0xb42   : > { %p13_p4 = scmp.ge.s32.totalorder %s16_s21, 4  }
 0xb44   :  { %15 = sbr.rel (!%p13_p4) target bundleno = 1 (0x1), region = 123 }

</bundles_post_ra>
